<compile_context>
chip_gen: v7x
topology: tpu7x:2x2x1
jax: 0.10.0
libtpu: 0.0.40
codegen_flags: <defaults>
</compile_context>

<pallas_src>
import jax
import jax.numpy as jnp
from jax.experimental import pallas as pl
from jax.experimental.pallas import tpu as pltpu

# bf16 MXU operands: ~2x MXU rate on v6e/v7x, even larger relative win on v5e,
# and half the weight VMEM/DMA. Accumulation and all VPU/EUP math stay f32.
# Set to jnp.float32 for closest-parity numerics.
MXU_DTYPE = jnp.bfloat16


def _round_up(x, m):
    return (x + m - 1) // m * m


def _nbytes(*arrs):
    return sum(int(a.size) * a.dtype.itemsize for a in arrs)


def _vmem_budget_bytes():
    try:
        return int(pltpu.get_tpu_info().vmem_capacity_bytes * 0.85)
    except Exception:
        return 50 * 1024 * 1024   # conservative fallback (v7x has 64 MiB physical)


def _vmem_limit(resident_bytes):
    want = int(resident_bytes * 1.4) + (8 << 20)   # headroom for Mosaic internals
    return max(16 << 20, min(want, _vmem_budget_bytes()))


# ----------------------------------------------------------------------------
# core kernel: attention + context + batched gate precompute + LSTM recurrence
# ----------------------------------------------------------------------------
def decoder_core_kernel(emb_ref, enc_ref, prev_ref,
                        w_attin_ref, b_attin_ref,
                        w_attout_s_ref, w_attout_p_ref, b_attout_ref,
                        w_ih_ctx_hbm, w_ih_emb_hbm, w_hh_hbm, b_lstm_ref,
                        hs_ref, new_prev_ref,
                        w_ih_ctx_vmem, w_ih_emb_vmem, w_hh_vmem, dma_sem, xg_ref):
    T, B, E = emb_ref.shape
    H = prev_ref.shape[1]
    cdt = w_attin_ref.dtype          # MXU operand dtype (bf16 by default)

    # ---- start the big LSTM-weight DMAs; they overlap the attention prologue
    cp_ctx = pltpu.make_async_copy(w_ih_ctx_hbm, w_ih_ctx_vmem, dma_sem.at[0])
    cp_emb = pltpu.make_async_copy(w_ih_emb_hbm, w_ih_emb_vmem, dma_sem.at[1])
    cp_hh = pltpu.make_async_copy(w_hh_hbm, w_hh_vmem, dma_sem.at[2])
    cp_ctx.start()
    cp_emb.start()
    cp_hh.start()

    enc = enc_ref[...]               # (S, B, H)  f32
    prev = prev_ref[...]             # (B, H)     f32

    # ---- general attention score:  sc[s, b] = <attin(prev)[b], enc[s, b]>
    h_t = (jnp.dot(prev.astype(cdt), w_attin_ref[...],
                   preferred_element_type=jnp.float32) + b_attin_ref[...])    # (B, H)
    sc = jnp.sum(enc * h_t[None, :, :], axis=-1)                              # (S, B)

    # ---- nn.LogSoftmax() legacy default on 2-D input => dim=1 (batch dim), f32 math
    m = jnp.max(sc, axis=1, keepdims=True)
    z = sc - m
    a = z - jnp.log(jnp.sum(jnp.exp(z), axis=1, keepdims=True))               # (S, B)

    # ---- s = sum_s enc[s] * a[s]   (log-probabilities as weights, as in the module)
    s = jnp.sum(enc * a[:, :, None], axis=0)                                  # (B, H)

    # ---- context = tanh(attout(cat([s, prev], 1)))  -- attout pre-split / transposed
    ctx = jnp.tanh(
        jnp.dot(s.astype(cdt), w_attout_s_ref[...],
                preferred_element_type=jnp.float32)
        + jnp.dot(prev.astype(cdt), w_attout_p_ref[...],
                  preferred_element_type=jnp.float32)
        + b_attout_ref[...])                                                  # (B, H)

    # ---- non-recurrent gate terms, batched over T (one M = T*B MXU matmul)
    cp_emb.wait()
    emb_flat = emb_ref[...].reshape(T * B, E)                                 # already cdt
    xg = jnp.dot(emb_flat, w_ih_emb_vmem[...],
                 preferred_element_type=jnp.float32).reshape(T, B, 4 * H)
    cp_ctx.wait()
    ctx_g = (jnp.dot(ctx.astype(cdt), w_ih_ctx_vmem[...],
                     preferred_element_type=jnp.float32)
             + b_lstm_ref[...])                                               # (B, 4H)
    xg_ref[...] = (xg + ctx_g[None, :, :]).astype(xg_ref.dtype)

    # ---- LSTM recurrence: only h @ W_hh + gate nonlinearities per step
    cp_hh.wait()
    w_hh = w_hh_vmem[...]                                                     # (H, 4H)

    def step(t, carry):
        h, c = carry
        gates = (xg_ref[t].astype(jnp.float32)
                 + jnp.dot(h.astype(cdt), w_hh,
                           preferred_element_type=jnp.float32))               # (B, 4H)
        i_g = jax.nn.sigmoid(gates[:, 0 * H:1 * H])
        f_g = jax.nn.sigmoid(gates[:, 1 * H:2 * H])
        g_g = jnp.tanh(gates[:, 2 * H:3 * H])
        o_g = jax.nn.sigmoid(gates[:, 3 * H:4 * H])
        c = f_g * c + i_g * g_g
        h = o_g * jnp.tanh(c)
        hs_ref[t] = h.astype(hs_ref.dtype)                                    # lane-dense slab
        return h, c

    h0 = jnp.zeros((B, H), jnp.float32)
    c0 = jnp.zeros((B, H), jnp.float32)
    h_last, _ = jax.lax.fori_loop(0, T, step, (h0, c0),
                                  unroll=True if T <= 16 else 4)
    new_prev_ref[...] = h_last           # the module's self.prev = lstm_out[-1]


# ----------------------------------------------------------------------------
# vocab projection kernel: one (tm, H) x (H, tv) MXU tile per grid step
# ----------------------------------------------------------------------------
def gen_kernel(hs_ref, w_gen_ref, b_gen_ref, out_ref):
    out_ref[...] = (jnp.dot(hs_ref[...], w_gen_ref[...],
                            preferred_element_type=jnp.float32)
                    + b_gen_ref[...])


# ----------------------------------------------------------------------------
# one-time parameter preparation (hoisted out of the per-call forward)
# ----------------------------------------------------------------------------
def prepare_params(params, dtype=MXU_DTYPE):
    H = params["w_attin"].shape[0]
    E = params["embedding"].shape[1]
    V = params["w_gen"].shape[0]
    E_pad = _round_up(E, 128)
    V_pad = _round_up(V, 128)

    emb_tab = params["embedding"].astype(dtype)
    if E_pad != E:                                   # pad contraction dim with zeros
        emb_tab = jnp.pad(emb_tab, ((0, 0), (0, E_pad - E)))

    # LSTM input is cat([context(H), embedded(E)]) -> split weight_ih accordingly.
    w_ih_ctx = params["w_ih"][:, :H].T.astype(dtype)             # (H, 4H)
    w_ih_emb = params["w_ih"][:, H:].T.astype(dtype)             # (E, 4H)
    if E_pad != E:
        w_ih_emb = jnp.pad(w_ih_emb, ((0, E_pad - E), (0, 0)))

    w_gen = params["w_gen"].T.astype(dtype)                      # (H, V)
    b_gen = params["b_gen"].reshape(1, V).astype(jnp.float32)
    if V_pad != V:                                   # lane-dense vocab tiles
        w_gen = jnp.pad(w_gen, ((0, 0), (0, V_pad - V)))
        b_gen = jnp.pad(b_gen, ((0, 0), (0, V_pad - V)))

    return {
        "embedding":  emb_tab,                                   # (V, E_pad)
        "w_attin":    params["w_attin"].T.astype(dtype),         # (H, H)
        "b_attin":    params["b_attin"].reshape(1, H).astype(jnp.float32),
        "w_attout_s": params["w_attout"][:, :H].T.astype(dtype), # acts on s
        "w_attout_p": params["w_attout"][:, H:].T.astype(dtype), # acts on prev
        "b_attout":   params["b_attout"].reshape(1, H).astype(jnp.float32),
        "w_ih_ctx":   w_ih_ctx,
        "w_ih_emb":   w_ih_emb,                                  # (E_pad, 4H)
        "w_hh":       params["w_hh"].T.astype(dtype),            # (H, 4H)
        "b_lstm":     (params["b_ih"] + params["b_hh"]).reshape(1, 4 * H)
                      .astype(jnp.float32),
        "w_gen":      w_gen,                                     # (H, V_pad)
        "b_gen":      b_gen,                                     # (1, V_pad)
    }


# ----------------------------------------------------------------------------
# forward
# ----------------------------------------------------------------------------
def decoder_forward(targ, encoder_out, prev, prep, *, vocab_size=None):
    emb = prep["embedding"][targ]                    # (T, B, E_pad) gather, MXU dtype
    T, B, E = emb.shape
    S = encoder_out.shape[0]
    H = prev.shape[1]
    V_pad = prep["w_gen"].shape[1]
    V = V_pad if vocab_size is None else vocab_size
    wdt = prep["w_hh"].dtype
    wsz = jnp.dtype(wdt).itemsize

    enc = encoder_out.astype(jnp.float32)
    prev = prev.astype(jnp.float32)

    core_inputs = (emb, enc, prev,
                   prep["w_attin"], prep["b_attin"],
                   prep["w_attout_s"], prep["w_attout_p"], prep["b_attout"],
                   prep["w_ih_ctx"], prep["w_ih_emb"], prep["w_hh"], prep["b_lstm"])
    vmem = pl.BlockSpec(memory_space=pltpu.MemorySpace.VMEM)
    hbm = pl.BlockSpec(memory_space=pl.ANY)          # LSTM weights: manual DMA overlap
    core_in_specs = [vmem, vmem, vmem,
                     vmem, vmem, vmem, vmem, vmem,
                     hbm, hbm, hbm, vmem]

    scratch_shapes = [pltpu.VMEM((H, 4 * H), wdt),        # w_ih_ctx copy
                      pltpu.VMEM((E, 4 * H), wdt),        # w_ih_emb copy
                      pltpu.VMEM((H, 4 * H), wdt),        # w_hh copy
                      pltpu.SemaphoreType.DMA((3,)),
                      pltpu.VMEM((T, B, 4 * H), wdt)]     # xg slab (bf16)

    core_resident = (_nbytes(emb, enc, prev,
                             prep["w_attin"], prep["b_attin"],
                             prep["w_attout_s"], prep["w_attout_p"],
                             prep["b_attout"], prep["b_lstm"])
                     + (2 * H * 4 * H + E * 4 * H + T * B * 4 * H) * wsz
                     + T * B * H * wsz + B * H * 4)
    core_flops = 2 * (B * H * H + 2 * S * B * H + 2 * B * H * H
                      + T * B * E * 4 * H + B * H * 4 * H + T * B * H * 4 * H)
    core_trans = S * B + B * H + T * B * 5 * H
    core_bytes = _nbytes(*core_inputs) + T * B * H * wsz + B * H * 4

    hs, new_prev = pl.pallas_call(
        decoder_core_kernel,
        out_shape=(jax.ShapeDtypeStruct((T, B, H), wdt),        # bf16 slab for gen matmul
                   jax.ShapeDtypeStruct((B, H), jnp.float32)),  # module's new self.prev
        in_specs=core_in_specs,
        out_specs=(vmem, vmem),
        scratch_shapes=scratch_shapes,
        compiler_params=pltpu.CompilerParams(
            vmem_limit_bytes=_vmem_limit(core_resident)),
        cost_estimate=pl.CostEstimate(flops=core_flops,
                                      transcendentals=core_trans,
                                      bytes_accessed=core_bytes),
    )(*core_inputs)

    # ---- deferred vocab projection: (T*B, H) x (H, V_pad), 2-D parallel grid
    M = T * B
    hs_flat = hs.reshape(M, H)
    if M >= 1024:
        n_m = 4
    elif M >= 256:
        n_m = 2
    else:
        n_m = 1
    tm = _round_up(pl.cdiv(M, n_m), 8)
    M_pad = tm * n_m
    if M_pad != M:
        hs_flat = jnp.pad(hs_flat, ((0, M_pad - M), (0, 0)))

    if V_pad % 512 == 0:            # fat, lane-dense vocab tiles
        tv = 512
    elif V_pad % 256 == 0:
        tv = 256
    else:
        tv = 128
    n_v = V_pad // tv

    gen_resident = 2 * (tm * H + H * tv) * wsz + 2 * (tv + tm * tv) * 4
    gen_flops = 2 * M_pad * H * V_pad
    gen_bytes = (M_pad * H + H * V_pad) * wsz + V_pad * 4 + M_pad * V_pad * 4

    gen_flat = pl.pallas_call(
        gen_kernel,
        out_shape=jax.ShapeDtypeStruct((M_pad, V_pad), jnp.float32),
        grid=(n_m, n_v),
        in_specs=[pl.BlockSpec((tm, H), lambda i, j: (i, 0)),
                  pl.BlockSpec((H, tv), lambda i, j: (0, j)),
                  pl.BlockSpec((1, tv), lambda i, j: (0, j))],
        out_specs=pl.BlockSpec((tm, tv), lambda i, j: (i, j)),
        compiler_params=pltpu.CompilerParams(
            dimension_semantics=("parallel", "parallel"),   # v7x: both TCs get work
            vmem_limit_bytes=_vmem_limit(gen_resident)),
        cost_estimate=pl.CostEstimate(flops=gen_flops, transcendentals=0,
                                      bytes_accessed=gen_bytes),
    )(hs_flat, prep["w_gen"], prep["b_gen"])

    generated = gen_flat[:M, :V].reshape(T, B, V)
    return generated, new_prev


def init_params(key, trg_vocab_size, H, E):
    def uniform(k, shape, fan_in):
        lim = 1.0 / jnp.sqrt(jnp.float32(fan_in))
        return jax.random.uniform(k, shape, jnp.float32, -lim, lim)

    ks = jax.random.split(key, 12)
    return {
        "embedding": jax.random.normal(ks[0], (trg_vocab_size, E), jnp.float32),
        "w_attin":  uniform(ks[1], (H, H), H),
        "b_attin":  uniform(ks[2], (H,), H),
        "w_attout": uniform(ks[3], (H, 2 * H), 2 * H),
        "b_attout": uniform(ks[4], (H,), 2 * H),
        "w_ih":     uniform(ks[5], (4 * H, H + E), H),
        "w_hh":     uniform(ks[6], (4 * H, H), H),
        "b_ih":     uniform(ks[7], (4 * H,), H),
        "b_hh":     uniform(ks[8], (4 * H,), H),
        "w_gen":    uniform(ks[9], (trg_vocab_size, H), H),
        "b_gen":    uniform(ks[10], (trg_vocab_size,), H),
    }


if __name__ == "__main__":
    # small shapes (scaled-down stand-ins for B=48, H=1024, E=300, V~trg_vocab)
    T, S, B = 8, 8, 8
    H, E, V_TRG = 256, 128, 512

    key = jax.random.PRNGKey(0)
    k_par, k_targ, k_enc, k_prev = jax.random.split(key, 4)

    params = init_params(k_par, V_TRG, H, E)
    prep = prepare_params(params)                 # one-time weight prep (hoisted)

    targ = jax.random.randint(k_targ, (T, B), 0, V_TRG, dtype=jnp.int32)
    encoder_out = jax.random.normal(k_enc, (S, B, H), jnp.float32)
    prev = jax.random.normal(k_prev, (B, H), jnp.float32)   # self.prev = randn

    fwd = jax.jit(decoder_forward, static_argnames=("vocab_size",))
    generated, new_prev = fwd(targ, encoder_out, prev, prep, vocab_size=V_TRG)
    jax.block_until_ready((generated, new_prev))

    assert generated.shape == (T, B, V_TRG)
    assert new_prev.shape == (B, H)
    print("KERNEL_OK")
</pallas_src>

<mosaic_0001>
module attributes {stable_mosaic.version = 11 : i64} {
  func.func @gen_kernel(%arg0: i32, %arg1: i32, %arg2: memref<64x256xbf16, #tpu.memory_space<vmem>>, %arg3: memref<256x512xbf16, #tpu.memory_space<vmem>>, %arg4: memref<1x512xf32, #tpu.memory_space<vmem>>, %arg5: memref<64x512xf32, #tpu.memory_space<vmem>>) attributes {dimension_semantics = [#tpu.dimension_semantics<parallel>, #tpu.dimension_semantics<parallel>], iteration_bounds = array<i64: 1, 1>, scalar_prefetch = 0 : i64, scratch_operands = 0 : i64, tpu.core_type = #tpu.core_type<tc>, window_params = [{transform_indices = @transform_0, window_bounds = array<i64: 64, 256>}, {transform_indices = @transform_1, window_bounds = array<i64: 256, 512>}, {transform_indices = @transform_2, window_bounds = array<i64: 1, 512>}, {transform_indices = @transform_3, window_bounds = array<i64: 64, 512>}]} {
    %c0 = arith.constant 0 : index
    %c0_0 = arith.constant 0 : index
    %0 = vector.load %arg2[%c0, %c0_0] : memref<64x256xbf16, #tpu.memory_space<vmem>>, vector<64x256xbf16>
    %c0_1 = arith.constant 0 : index
    %c0_2 = arith.constant 0 : index
    %1 = vector.load %arg3[%c0_1, %c0_2] : memref<256x512xbf16, #tpu.memory_space<vmem>>, vector<256x512xbf16>
    %cst = arith.constant dense<0.000000e+00> : vector<64x512xf32>
    %2 = tpu.matmul %0, %1, %cst {dimension_numbers = #tpu.dot_dimension_numbers<[1], [0], [0], [1], [0, 0, 1, 1], [], []>} : vector<64x256xbf16>, vector<256x512xbf16>, vector<64x512xf32> -> vector<64x512xf32>
    %c0_3 = arith.constant 0 : index
    %c0_4 = arith.constant 0 : index
    %3 = vector.load %arg4[%c0_3, %c0_4] : memref<1x512xf32, #tpu.memory_space<vmem>>, vector<1x512xf32>
    %4 = vector.broadcast %3 : vector<1x512xf32> to vector<64x512xf32>
    %5 = arith.addf %2, %4 : vector<64x512xf32>
    %c0_5 = arith.constant 0 : index
    %c0_6 = arith.constant 0 : index
    %6 = vector.load %arg5[%c0_5, %c0_6] : memref<64x512xf32, #tpu.memory_space<vmem>>, vector<64x512xf32>
    tpu.vector_store %arg5[%c0_5, %c0_6], %5 {strides = array<i32>} : memref<64x512xf32, #tpu.memory_space<vmem>>, vector<64x512xf32>,
    return
  }
  func.func @transform_0(%arg0: i32, %arg1: i32) -> (i32, i32) {
    %c0_i32 = arith.constant 0 : i32
    %c0_i32_0 = arith.constant 0 : i32
    return %arg0, %c0_i32 : i32, i32
  }
  func.func @transform_1(%arg0: i32, %arg1: i32) -> (i32, i32) {
    %c0_i32 = arith.constant 0 : i32
    %c0_i32_0 = arith.constant 0 : i32
    return %c0_i32, %arg1 : i32, i32
  }
  func.func @transform_2(%arg0: i32, %arg1: i32) -> (i32, i32) {
    %c0_i32 = arith.constant 0 : i32
    %c0_i32_0 = arith.constant 0 : i32
    return %c0_i32, %arg1 : i32, i32
  }
  func.func @transform_3(%arg0: i32, %arg1: i32) -> (i32, i32) {
    %c0_i32 = arith.constant 0 : i32
    return %arg0, %arg1 : i32, i32
  }
}

module attributes {stable_mosaic.version = 11 : i64} {
  func.func @decoder_core_kernel(%arg0: memref<8x8x128xbf16, #tpu.memory_space<vmem>>, %arg1: memref<8x8x256xf32, #tpu.memory_space<vmem>>, %arg2: memref<8x256xf32, #tpu.memory_space<vmem>>, %arg3: memref<256x256xbf16, #tpu.memory_space<vmem>>, %arg4: memref<1x256xf32, #tpu.memory_space<vmem>>, %arg5: memref<256x256xbf16, #tpu.memory_space<vmem>>, %arg6: memref<256x256xbf16, #tpu.memory_space<vmem>>, %arg7: memref<1x256xf32, #tpu.memory_space<vmem>>, %arg8: memref<256x1024xbf16, #tpu.memory_space<any>>, %arg9: memref<128x1024xbf16, #tpu.memory_space<any>>, %arg10: memref<256x1024xbf16, #tpu.memory_space<any>>, %arg11: memref<1x1024xf32, #tpu.memory_space<vmem>>, %arg12: memref<8x8x256xbf16, #tpu.memory_space<vmem>>, %arg13: memref<8x256xf32, #tpu.memory_space<vmem>>, %arg14: memref<256x1024xbf16, #tpu.memory_space<vmem>>, %arg15: memref<128x1024xbf16, #tpu.memory_space<vmem>>, %arg16: memref<256x1024xbf16, #tpu.memory_space<vmem>>, %arg17: memref<3x!tpu.dma_semaphore, #tpu.memory_space<semaphore_mem>>, %arg18: memref<8x8x1024xbf16, #tpu.memory_space<vmem>>) attributes {dimension_semantics = [], scalar_prefetch = 0 : i64, scratch_operands = 5 : i64, tpu.core_type = #tpu.core_type<tc>} {
    %c0_i32 = arith.constant 0 : i32
    %0 = tpu.memref_slice %arg17[%c0_i32] : memref<3x!tpu.dma_semaphore, #tpu.memory_space<semaphore_mem>> -> memref<1x!tpu.dma_semaphore, #tpu.memory_space<semaphore_mem>>
    %1 = tpu.memref_squeeze %0 : memref<1x!tpu.dma_semaphore, #tpu.memory_space<semaphore_mem>> -> memref<!tpu.dma_semaphore, #tpu.memory_space<semaphore_mem>>
    tpu.enqueue_dma source(%arg8 : memref<256x1024xbf16, #tpu.memory_space<any>>) target(%arg14 : memref<256x1024xbf16, #tpu.memory_space<vmem>>) target_semaphore(%1 : memref<!tpu.dma_semaphore, #tpu.memory_space<semaphore_mem>>)
    %c1_i32 = arith.constant 1 : i32
    %2 = tpu.memref_slice %arg17[%c1_i32] : memref<3x!tpu.dma_semaphore, #tpu.memory_space<semaphore_mem>> -> memref<1x!tpu.dma_semaphore, #tpu.memory_space<semaphore_mem>>
    %3 = tpu.memref_squeeze %2 : memref<1x!tpu.dma_semaphore, #tpu.memory_space<semaphore_mem>> -> memref<!tpu.dma_semaphore, #tpu.memory_space<semaphore_mem>>
    tpu.enqueue_dma source(%arg9 : memref<128x1024xbf16, #tpu.memory_space<any>>) target(%arg15 : memref<128x1024xbf16, #tpu.memory_space<vmem>>) target_semaphore(%3 : memref<!tpu.dma_semaphore, #tpu.memory_space<semaphore_mem>>)
    %c2_i32 = arith.constant 2 : i32
    %4 = tpu.memref_slice %arg17[%c2_i32] : memref<3x!tpu.dma_semaphore, #tpu.memory_space<semaphore_mem>> -> memref<1x!tpu.dma_semaphore, #tpu.memory_space<semaphore_mem>>
    %5 = tpu.memref_squeeze %4 : memref<1x!tpu.dma_semaphore, #tpu.memory_space<semaphore_mem>> -> memref<!tpu.dma_semaphore, #tpu.memory_space<semaphore_mem>>
    tpu.enqueue_dma source(%arg10 : memref<256x1024xbf16, #tpu.memory_space<any>>) target(%arg16 : memref<256x1024xbf16, #tpu.memory_space<vmem>>) target_semaphore(%5 : memref<!tpu.dma_semaphore, #tpu.memory_space<semaphore_mem>>)
    %c0 = arith.constant 0 : index
    %c0_0 = arith.constant 0 : index
    %c0_1 = arith.constant 0 : index
    %6 = vector.load %arg1[%c0, %c0_0, %c0_1] : memref<8x8x256xf32, #tpu.memory_space<vmem>>, vector<8x8x256xf32>
    %c0_2 = arith.constant 0 : index
    %c0_3 = arith.constant 0 : index
    %7 = vector.load %arg2[%c0_2, %c0_3] : memref<8x256xf32, #tpu.memory_space<vmem>>, vector<8x256xf32>
    %8 = arith.truncf %7 : vector<8x256xf32> to vector<8x256xbf16>
    %c0_4 = arith.constant 0 : index
    %c0_5 = arith.constant 0 : index
    %9 = vector.load %arg3[%c0_4, %c0_5] : memref<256x256xbf16, #tpu.memory_space<vmem>>, vector<256x256xbf16>
    %cst = arith.constant dense<0.000000e+00> : vector<8x256xf32>
    %10 = tpu.matmul %8, %9, %cst {dimension_numbers = #tpu.dot_dimension_numbers<[1], [0], [0], [1], [0, 0, 1, 1], [], []>} : vector<8x256xbf16>, vector<256x256xbf16>, vector<8x256xf32> -> vector<8x256xf32>
    %c0_6 = arith.constant 0 : index
    %c0_7 = arith.constant 0 : index
    %11 = vector.load %arg4[%c0_6, %c0_7] : memref<1x256xf32, #tpu.memory_space<vmem>>, vector<1x256xf32>
    %12 = vector.broadcast %11 : vector<1x256xf32> to vector<8x256xf32>
    %13 = arith.addf %10, %12 : vector<8x256xf32>
    %14 = vector.shape_cast %13 : vector<8x256xf32> to vector<1x8x256xf32>
    %15 = vector.broadcast %14 : vector<1x8x256xf32> to vector<8x8x256xf32>
    %16 = arith.mulf %6, %15 : vector<8x8x256xf32>
    %cst_8 = arith.constant dense<0.000000e+00> : vector<8x8xf32>
    %17 = vector.multi_reduction <add>, %16, %cst_8 [2] : vector<8x8x256xf32> to vector<8x8xf32>
    %cst_9 = arith.constant dense<0xFF800000> : vector<8xf32>
    %18 = vector.multi_reduction <maximumf>, %17, %cst_9 [1] : vector<8x8xf32> to vector<8xf32>
    %19 = vector.shape_cast %18 : vector<8xf32> to vector<8x1xf32>
    %20 = vector.broadcast %19 : vector<8x1xf32> to vector<8x8xf32>
    %21 = arith.subf %17, %20 : vector<8x8xf32>
    %22 = math.exp %21 : vector<8x8xf32>
    %cst_10 = arith.constant dense<0.000000e+00> : vector<8xf32>
    %23 = vector.multi_reduction <add>, %22, %cst_10 [1] : vector<8x8xf32> to vector<8xf32>
    %24 = vector.shape_cast %23 : vector<8xf32> to vector<8x1xf32>
    %25 = math.log %24 : vector<8x1xf32>
    %26 = vector.broadcast %25 : vector<8x1xf32> to vector<8x8xf32>
    %27 = arith.subf %21, %26 : vector<8x8xf32>
    %28 = vector.shape_cast %27 : vector<8x8xf32> to vector<8x8x1xf32>
    %29 = vector.broadcast %28 : vector<8x8x1xf32> to vector<8x8x256xf32>
    %30 = arith.mulf %6, %29 : vector<8x8x256xf32>
    %cst_11 = arith.constant dense<0.000000e+00> : vector<8x256xf32>
    %31 = vector.multi_reduction <add>, %30, %cst_11 [0] : vector<8x8x256xf32> to vector<8x256xf32>
    %32 = arith.truncf %31 : vector<8x256xf32> to vector<8x256xbf16>
    %c0_12 = arith.constant 0 : index
    %c0_13 = arith.constant 0 : index
    %33 = vector.load %arg5[%c0_12, %c0_13] : memref<256x256xbf16, #tpu.memory_space<vmem>>, vector<256x256xbf16>
    %cst_14 = arith.constant dense<0.000000e+00> : vector<8x256xf32>
    %34 = tpu.matmul %32, %33, %cst_14 {dimension_numbers = #tpu.dot_dimension_numbers<[1], [0], [0], [1], [0, 0, 1, 1], [], []>} : vector<8x256xbf16>, vector<256x256xbf16>, vector<8x256xf32> -> vector<8x256xf32>
    %35 = arith.truncf %7 : vector<8x256xf32> to vector<8x256xbf16>
    %c0_15 = arith.constant 0 : index
    %c0_16 = arith.constant 0 : index
    %36 = vector.load %arg6[%c0_15, %c0_16] : memref<256x256xbf16, #tpu.memory_space<vmem>>, vector<256x256xbf16>
    %cst_17 = arith.constant dense<0.000000e+00> : vector<8x256xf32>
    %37 = tpu.matmul %35, %36, %cst_17 {dimension_numbers = #tpu.dot_dimension_numbers<[1], [0], [0], [1], [0, 0, 1, 1], [], []>} : vector<8x256xbf16>, vector<256x256xbf16>, vector<8x256xf32> -> vector<8x256xf32>
    %38 = arith.addf %34, %37 : vector<8x256xf32>
    %c0_18 = arith.constant 0 : index
    %c0_19 = arith.constant 0 : index
    %39 = vector.load %arg7[%c0_18, %c0_19] : memref<1x256xf32, #tpu.memory_space<vmem>>, vector<1x256xf32>
    %40 = vector.broadcast %39 : vector<1x256xf32> to vector<8x256xf32>
    %41 = arith.addf %38, %40 : vector<8x256xf32>
    %42 = math.tanh %41 : vector<8x256xf32>
    %c1_i32_20 = arith.constant 1 : i32
    %43 = tpu.memref_slice %arg17[%c1_i32_20] : memref<3x!tpu.dma_semaphore, #tpu.memory_space<semaphore_mem>> -> memref<1x!tpu.dma_semaphore, #tpu.memory_space<semaphore_mem>>
    %44 = tpu.memref_squeeze %43 : memref<1x!tpu.dma_semaphore, #tpu.memory_space<semaphore_mem>> -> memref<!tpu.dma_semaphore, #tpu.memory_space<semaphore_mem>>
    tpu.wait_dma2 semaphore(%44 : memref<!tpu.dma_semaphore, #tpu.memory_space<semaphore_mem>>) src(%arg9 : memref<128x1024xbf16, #tpu.memory_space<any>>) dst(%arg15 : memref<128x1024xbf16, #tpu.memory_space<vmem>>)
    %c0_21 = arith.constant 0 : index
    %c0_22 = arith.constant 0 : index
    %c0_23 = arith.constant 0 : index
    %45 = vector.load %arg0[%c0_21, %c0_22, %c0_23] : memref<8x8x128xbf16, #tpu.memory_space<vmem>>, vector<8x8x128xbf16>
    %46 = vector.shape_cast %45 : vector<8x8x128xbf16> to vector<64x128xbf16>
    %c0_24 = arith.constant 0 : index
    %c0_25 = arith.constant 0 : index
    %47 = vector.load %arg15[%c0_24, %c0_25] : memref<128x1024xbf16, #tpu.memory_space<vmem>>, vector<128x1024xbf16>
    %cst_26 = arith.constant dense<0.000000e+00> : vector<64x1024xf32>
    %48 = tpu.matmul %46, %47, %cst_26 {dimension_numbers = #tpu.dot_dimension_numbers<[1], [0], [0], [1], [0, 0, 1, 1], [], []>} : vector<64x128xbf16>, vector<128x1024xbf16>, vector<64x1024xf32> -> vector<64x1024xf32>
    %49 = vector.shape_cast %48 : vector<64x1024xf32> to vector<8x8x1024xf32>
    %c0_i32_27 = arith.constant 0 : i32
    %50 = tpu.memref_slice %arg17[%c0_i32_27] : memref<3x!tpu.dma_semaphore, #tpu.memory_space<semaphore_mem>> -> memref<1x!tpu.dma_semaphore, #tpu.memory_space<semaphore_mem>>
    %51 = tpu.memref_squeeze %50 : memref<1x!tpu.dma_semaphore, #tpu.memory_space<semaphore_mem>> -> memref<!tpu.dma_semaphore, #tpu.memory_space<semaphore_mem>>
    tpu.wait_dma2 semaphore(%51 : memref<!tpu.dma_semaphore, #tpu.memory_space<semaphore_mem>>) src(%arg8 : memref<256x1024xbf16, #tpu.memory_space<any>>) dst(%arg14 : memref<256x1024xbf16, #tpu.memory_space<vmem>>)
    %52 = arith.truncf %42 : vector<8x256xf32> to vector<8x256xbf16>
    %c0_28 = arith.constant 0 : index
    %c0_29 = arith.constant 0 : index
    %53 = vector.load %arg14[%c0_28, %c0_29] : memref<256x1024xbf16, #tpu.memory_space<vmem>>, vector<256x1024xbf16>
    %cst_30 = arith.constant dense<0.000000e+00> : vector<8x1024xf32>
    %54 = tpu.matmul %52, %53, %cst_30 {dimension_numbers = #tpu.dot_dimension_numbers<[1], [0], [0], [1], [0, 0, 1, 1], [], []>} : vector<8x256xbf16>, vector<256x1024xbf16>, vector<8x1024xf32> -> vector<8x1024xf32>
    %c0_31 = arith.constant 0 : index
    %c0_32 = arith.constant 0 : index
    %55 = vector.load %arg11[%c0_31, %c0_32] : memref<1x1024xf32, #tpu.memory_space<vmem>>, vector<1x1024xf32>
    %56 = vector.broadcast %55 : vector<1x1024xf32> to vector<8x1024xf32>
    %57 = arith.addf %54, %56 : vector<8x1024xf32>
    %58 = vector.shape_cast %57 : vector<8x1024xf32> to vector<1x8x1024xf32>
    %59 = vector.broadcast %58 : vector<1x8x1024xf32> to vector<8x8x1024xf32>
    %60 = arith.addf %49, %59 : vector<8x8x1024xf32>
    %61 = arith.truncf %60 : vector<8x8x1024xf32> to vector<8x8x1024xbf16>
    %c0_33 = arith.constant 0 : index
    %c0_34 = arith.constant 0 : index
    %c0_35 = arith.constant 0 : index
    %62 = vector.load %arg18[%c0_33, %c0_34, %c0_35] : memref<8x8x1024xbf16, #tpu.memory_space<vmem>>, vector<8x8x1024xbf16>
    tpu.vector_store %arg18[%c0_33, %c0_34, %c0_35], %61 {strides = array<i32>} : memref<8x8x1024xbf16, #tpu.memory_space<vmem>>, vector<8x8x1024xbf16>,
    %c2_i32_36 = arith.constant 2 : i32
    %63 = tpu.memref_slice %arg17[%c2_i32_36] : memref<3x!tpu.dma_semaphore, #tpu.memory_space<semaphore_mem>> -> memref<1x!tpu.dma_semaphore, #tpu.memory_space<semaphore_mem>>
    %64 = tpu.memref_squeeze %63 : memref<1x!tpu.dma_semaphore, #tpu.memory_space<semaphore_mem>> -> memref<!tpu.dma_semaphore, #tpu.memory_space<semaphore_mem>>
    tpu.wait_dma2 semaphore(%64 : memref<!tpu.dma_semaphore, #tpu.memory_space<semaphore_mem>>) src(%arg10 : memref<256x1024xbf16, #tpu.memory_space<any>>) dst(%arg16 : memref<256x1024xbf16, #tpu.memory_space<vmem>>)
    %c0_37 = arith.constant 0 : index
    %c0_38 = arith.constant 0 : index
    %65 = vector.load %arg16[%c0_37, %c0_38] : memref<256x1024xbf16, #tpu.memory_space<vmem>>, vector<256x1024xbf16>
    %cst_39 = arith.constant 0.000000e+00 : f32
    %66 = vector.broadcast %cst_39 : f32 to vector<8x256xf32>
    %cst_40 = arith.constant 0.000000e+00 : f32
    %67 = vector.broadcast %cst_40 : f32 to vector<8x256xf32>
    %c0_i32_41 = arith.constant 0 : i32
    %68 = arith.index_cast %c0_i32_41 : i32 to index
    %c0_42 = arith.constant 0 : index
    %c0_43 = arith.constant 0 : index
    %69 = vector.load %arg18[%68, %c0_42, %c0_43] : memref<8x8x1024xbf16, #tpu.memory_space<vmem>>, vector<1x8x1024xbf16>
    %70 = vector.shape_cast %69 : vector<1x8x1024xbf16> to vector<8x1024xbf16>
    %71 = arith.extf %70 : vector<8x1024xbf16> to vector<8x1024xf32>
    %72 = arith.truncf %66 : vector<8x256xf32> to vector<8x256xbf16>
    %cst_44 = arith.constant dense<0.000000e+00> : vector<8x1024xf32>
    %73 = tpu.matmul %72, %65, %cst_44 {dimension_numbers = #tpu.dot_dimension_numbers<[1], [0], [0], [1], [0, 0, 1, 1], [], []>} : vector<8x256xbf16>, vector<256x1024xbf16>, vector<8x1024xf32> -> vector<8x1024xf32>
    %74 = arith.addf %71, %73 : vector<8x1024xf32>
    %75 = vector.extract_strided_slice %74 {offsets = [0, 0], sizes = [8, 256], strides = [1, 1]} : vector<8x1024xf32> to vector<8x256xf32>
    %76 = arith.negf %75 : vector<8x256xf32>
    %77 = math.exp %76 : vector<8x256xf32>
    %cst_45 = arith.constant 1.000000e+00 : f32
    %78 = vector.broadcast %cst_45 : f32 to vector<8x256xf32>
    %79 = arith.addf %78, %77 : vector<8x256xf32>
    %80 = arith.divf %78, %79 : vector<8x256xf32>
    %81 = vector.extract_strided_slice %74 {offsets = [0, 256], sizes = [8, 256], strides = [1, 1]} : vector<8x1024xf32> to vector<8x256xf32>
    %82 = arith.negf %81 : vector<8x256xf32>
    %83 = math.exp %82 : vector<8x256xf32>
    %cst_46 = arith.constant 1.000000e+00 : f32
    %84 = vector.broadcast %cst_46 : f32 to vector<8x256xf32>
    %85 = arith.addf %84, %83 : vector<8x256xf32>
    %86 = arith.divf %84, %85 : vector<8x256xf32>
    %87 = vector.extract_strided_slice %74 {offsets = [0, 512], sizes = [8, 256], strides = [1, 1]} : vector<8x1024xf32> to vector<8x256xf32>
    %88 = math.tanh %87 : vector<8x256xf32>
    %89 = vector.extract_strided_slice %74 {offsets = [0, 768], sizes = [8, 256], strides = [1, 1]} : vector<8x1024xf32> to vector<8x256xf32>
    %90 = arith.negf %89 : vector<8x256xf32>
    %91 = math.exp %90 : vector<8x256xf32>
    %cst_47 = arith.constant 1.000000e+00 : f32
    %92 = vector.broadcast %cst_47 : f32 to vector<8x256xf32>
    %93 = arith.addf %92, %91 : vector<8x256xf32>
    %94 = arith.divf %92, %93 : vector<8x256xf32>
    %95 = arith.mulf %86, %67 : vector<8x256xf32>
    %96 = arith.mulf %80, %88 : vector<8x256xf32>
    %97 = arith.addf %95, %96 : vector<8x256xf32>
    %98 = math.tanh %97 : vector<8x256xf32>
    %99 = arith.mulf %94, %98 : vector<8x256xf32>
    %100 = arith.truncf %99 : vector<8x256xf32> to vector<8x256xbf16>
    %101 = arith.index_cast %c0_i32_41 : i32 to index
    %c0_48 = arith.constant 0 : index
    %c0_49 = arith.constant 0 : index
    %102 = vector.load %arg12[%101, %c0_48, %c0_49] : memref<8x8x256xbf16, #tpu.memory_space<vmem>>, vector<1x8x256xbf16>
    %103 = vector.shape_cast %102 : vector<1x8x256xbf16> to vector<8x256xbf16>
    %104 = vector.shape_cast %100 : vector<8x256xbf16> to vector<1x8x256xbf16>
    tpu.vector_store %arg12[%101, %c0_48, %c0_49], %104 {strides = array<i32>} : memref<8x8x256xbf16, #tpu.memory_space<vmem>>, vector<1x8x256xbf16>,
    %c1_i32_50 = arith.constant 1 : i32
    %105 = arith.index_cast %c1_i32_50 : i32 to index
    %c0_51 = arith.constant 0 : index
    %c0_52 = arith.constant 0 : index
    %106 = vector.load %arg18[%105, %c0_51, %c0_52] : memref<8x8x1024xbf16, #tpu.memory_space<vmem>>, vector<1x8x1024xbf16>
    %107 = vector.shape_cast %106 : vector<1x8x1024xbf16> to vector<8x1024xbf16>
    %108 = arith.extf %107 : vector<8x1024xbf16> to vector<8x1024xf32>
    %109 = arith.truncf %99 : vector<8x256xf32> to vector<8x256xbf16>
    %cst_53 = arith.constant dense<0.000000e+00> : vector<8x1024xf32>
    %110 = tpu.matmul %109, %65, %cst_53 {dimension_numbers = #tpu.dot_dimension_numbers<[1], [0], [0], [1], [0, 0, 1, 1], [], []>} : vector<8x256xbf16>, vector<256x1024xbf16>, vector<8x1024xf32> -> vector<8x1024xf32>
    %111 = arith.addf %108, %110 : vector<8x1024xf32>
    %112 = vector.extract_strided_slice %111 {offsets = [0, 0], sizes = [8, 256], strides = [1, 1]} : vector<8x1024xf32> to vector<8x256xf32>
    %113 = arith.negf %112 : vector<8x256xf32>
    %114 = math.exp %113 : vector<8x256xf32>
    %cst_54 = arith.constant 1.000000e+00 : f32
    %115 = vector.broadcast %cst_54 : f32 to vector<8x256xf32>
    %116 = arith.addf %115, %114 : vector<8x256xf32>
    %117 = arith.divf %115, %116 : vector<8x256xf32>
    %118 = vector.extract_strided_slice %111 {offsets = [0, 256], sizes = [8, 256], strides = [1, 1]} : vector<8x1024xf32> to vector<8x256xf32>
    %119 = arith.negf %118 : vector<8x256xf32>
    %120 = math.exp %119 : vector<8x256xf32>
    %cst_55 = arith.constant 1.000000e+00 : f32
    %121 = vector.broadcast %cst_55 : f32 to vector<8x256xf32>
    %122 = arith.addf %121, %120 : vector<8x256xf32>
    %123 = arith.divf %121, %122 : vector<8x256xf32>
    %124 = vector.extract_strided_slice %111 {offsets = [0, 512], sizes = [8, 256], strides = [1, 1]} : vector<8x1024xf32> to vector<8x256xf32>
    %125 = math.tanh %124 : vector<8x256xf32>
    %126 = vector.extract_strided_slice %111 {offsets = [0, 768], sizes = [8, 256], strides = [1, 1]} : vector<8x1024xf32> to vector<8x256xf32>
    %127 = arith.negf %126 : vector<8x256xf32>
    %128 = math.exp %127 : vector<8x256xf32>
    %cst_56 = arith.constant 1.000000e+00 : f32
    %129 = vector.broadcast %cst_56 : f32 to vector<8x256xf32>
    %130 = arith.addf %129, %128 : vector<8x256xf32>
    %131 = arith.divf %129, %130 : vector<8x256xf32>
    %132 = arith.mulf %123, %97 : vector<8x256xf32>
    %133 = arith.mulf %117, %125 : vector<8x256xf32>
    %134 = arith.addf %132, %133 : vector<8x256xf32>
    %135 = math.tanh %134 : vector<8x256xf32>
    %136 = arith.mulf %131, %135 : vector<8x256xf32>
    %137 = arith.truncf %136 : vector<8x256xf32> to vector<8x256xbf16>
    %138 = arith.index_cast %c1_i32_50 : i32 to index
    %c0_57 = arith.constant 0 : index
    %c0_58 = arith.constant 0 : index
    %139 = vector.load %arg12[%138, %c0_57, %c0_58] : memref<8x8x256xbf16, #tpu.memory_space<vmem>>, vector<1x8x256xbf16>
    %140 = vector.shape_cast %139 : vector<1x8x256xbf16> to vector<8x256xbf16>
    %141 = vector.shape_cast %137 : vector<8x256xbf16> to vector<1x8x256xbf16>
    tpu.vector_store %arg12[%138, %c0_57, %c0_58], %141 {strides = array<i32>} : memref<8x8x256xbf16, #tpu.memory_space<vmem>>, vector<1x8x256xbf16>,
    %c2_i32_59 = arith.constant 2 : i32
    %142 = arith.index_cast %c2_i32_59 : i32 to index
    %c0_60 = arith.constant 0 : index
    %c0_61 = arith.constant 0 : index
    %143 = vector.load %arg18[%142, %c0_60, %c0_61] : memref<8x8x1024xbf16, #tpu.memory_space<vmem>>, vector<1x8x1024xbf16>
    %144 = vector.shape_cast %143 : vector<1x8x1024xbf16> to vector<8x1024xbf16>
    %145 = arith.extf %144 : vector<8x1024xbf16> to vector<8x1024xf32>
    %146 = arith.truncf %136 : vector<8x256xf32> to vector<8x256xbf16>
    %cst_62 = arith.constant dense<0.000000e+00> : vector<8x1024xf32>
    %147 = tpu.matmul %146, %65, %cst_62 {dimension_numbers = #tpu.dot_dimension_numbers<[1], [0], [0], [1], [0, 0, 1, 1], [], []>} : vector<8x256xbf16>, vector<256x1024xbf16>, vector<8x1024xf32> -> vector<8x1024xf32>
    %148 = arith.addf %145, %147 : vector<8x1024xf32>
    %149 = vector.extract_strided_slice %148 {offsets = [0, 0], sizes = [8, 256], strides = [1, 1]} : vector<8x1024xf32> to vector<8x256xf32>
    %150 = arith.negf %149 : vector<8x256xf32>
    %151 = math.exp %150 : vector<8x256xf32>
    %cst_63 = arith.constant 1.000000e+00 : f32
    %152 = vector.broadcast %cst_63 : f32 to vector<8x256xf32>
    %153 = arith.addf %152, %151 : vector<8x256xf32>
    %154 = arith.divf %152, %153 : vector<8x256xf32>
    %155 = vector.extract_strided_slice %148 {offsets = [0, 256], sizes = [8, 256], strides = [1, 1]} : vector<8x1024xf32> to vector<8x256xf32>
    %156 = arith.negf %155 : vector<8x256xf32>
    %157 = math.exp %156 : vector<8x256xf32>
    %cst_64 = arith.constant 1.000000e+00 : f32
    %158 = vector.broadcast %cst_64 : f32 to vector<8x256xf32>
    %159 = arith.addf %158, %157 : vector<8x256xf32>
    %160 = arith.divf %158, %159 : vector<8x256xf32>
    %161 = vector.extract_strided_slice %148 {offsets = [0, 512], sizes = [8, 256], strides = [1, 1]} : vector<8x1024xf32> to vector<8x256xf32>
    %162 = math.tanh %161 : vector<8x256xf32>
    %163 = vector.extract_strided_slice %148 {offsets = [0, 768], sizes = [8, 256], strides = [1, 1]} : vector<8x1024xf32> to vector<8x256xf32>
    %164 = arith.negf %163 : vector<8x256xf32>
    %165 = math.exp %164 : vector<8x256xf32>
    %cst_65 = arith.constant 1.000000e+00 : f32
    %166 = vector.broadcast %cst_65 : f32 to vector<8x256xf32>
    %167 = arith.addf %166, %165 : vector<8x256xf32>
    %168 = arith.divf %166, %167 : vector<8x256xf32>
    %169 = arith.mulf %160, %134 : vector<8x256xf32>
    %170 = arith.mulf %154, %162 : vector<8x256xf32>
    %171 = arith.addf %169, %170 : vector<8x256xf32>
    %172 = math.tanh %171 : vector<8x256xf32>
    %173 = arith.mulf %168, %172 : vector<8x256xf32>
    %174 = arith.truncf %173 : vector<8x256xf32> to vector<8x256xbf16>
    %175 = arith.index_cast %c2_i32_59 : i32 to index
    %c0_66 = arith.constant 0 : index
    %c0_67 = arith.constant 0 : index
    %176 = vector.load %arg12[%175, %c0_66, %c0_67] : memref<8x8x256xbf16, #tpu.memory_space<vmem>>, vector<1x8x256xbf16>
    %177 = vector.shape_cast %176 : vector<1x8x256xbf16> to vector<8x256xbf16>
    %178 = vector.shape_cast %174 : vector<8x256xbf16> to vector<1x8x256xbf16>
    tpu.vector_store %arg12[%175, %c0_66, %c0_67], %178 {strides = array<i32>} : memref<8x8x256xbf16, #tpu.memory_space<vmem>>, vector<1x8x256xbf16>,
    %c3_i32 = arith.constant 3 : i32
    %179 = arith.index_cast %c3_i32 : i32 to index
    %c0_68 = arith.constant 0 : index
    %c0_69 = arith.constant 0 : index
    %180 = vector.load %arg18[%179, %c0_68, %c0_69] : memref<8x8x1024xbf16, #tpu.memory_space<vmem>>, vector<1x8x1024xbf16>
    %181 = vector.shape_cast %180 : vector<1x8x1024xbf16> to vector<8x1024xbf16>
    %182 = arith.extf %181 : vector<8x1024xbf16> to vector<8x1024xf32>
    %183 = arith.truncf %173 : vector<8x256xf32> to vector<8x256xbf16>
    %cst_70 = arith.constant dense<0.000000e+00> : vector<8x1024xf32>
    %184 = tpu.matmul %183, %65, %cst_70 {dimension_numbers = #tpu.dot_dimension_numbers<[1], [0], [0], [1], [0, 0, 1, 1], [], []>} : vector<8x256xbf16>, vector<256x1024xbf16>, vector<8x1024xf32> -> vector<8x1024xf32>
    %185 = arith.addf %182, %184 : vector<8x1024xf32>
    %186 = vector.extract_strided_slice %185 {offsets = [0, 0], sizes = [8, 256], strides = [1, 1]} : vector<8x1024xf32> to vector<8x256xf32>
    %187 = arith.negf %186 : vector<8x256xf32>
    %188 = math.exp %187 : vector<8x256xf32>
    %cst_71 = arith.constant 1.000000e+00 : f32
    %189 = vector.broadcast %cst_71 : f32 to vector<8x256xf32>
    %190 = arith.addf %189, %188 : vector<8x256xf32>
    %191 = arith.divf %189, %190 : vector<8x256xf32>
    %192 = vector.extract_strided_slice %185 {offsets = [0, 256], sizes = [8, 256], strides = [1, 1]} : vector<8x1024xf32> to vector<8x256xf32>
    %193 = arith.negf %192 : vector<8x256xf32>
    %194 = math.exp %193 : vector<8x256xf32>
    %cst_72 = arith.constant 1.000000e+00 : f32
    %195 = vector.broadcast %cst_72 : f32 to vector<8x256xf32>
    %196 = arith.addf %195, %194 : vector<8x256xf32>
    %197 = arith.divf %195, %196 : vector<8x256xf32>
    %198 = vector.extract_strided_slice %185 {offsets = [0, 512], sizes = [8, 256], strides = [1, 1]} : vector<8x1024xf32> to vector<8x256xf32>
    %199 = math.tanh %198 : vector<8x256xf32>
    %200 = vector.extract_strided_slice %185 {offsets = [0, 768], sizes = [8, 256], strides = [1, 1]} : vector<8x1024xf32> to vector<8x256xf32>
    %201 = arith.negf %200 : vector<8x256xf32>
    %202 = math.exp %201 : vector<8x256xf32>
    %cst_73 = arith.constant 1.000000e+00 : f32
    %203 = vector.broadcast %cst_73 : f32 to vector<8x256xf32>
    %204 = arith.addf %203, %202 : vector<8x256xf32>
    %205 = arith.divf %203, %204 : vector<8x256xf32>
    %206 = arith.mulf %197, %171 : vector<8x256xf32>
    %207 = arith.mulf %191, %199 : vector<8x256xf32>
    %208 = arith.addf %206, %207 : vector<8x256xf32>
    %209 = math.tanh %208 : vector<8x256xf32>
    %210 = arith.mulf %205, %209 : vector<8x256xf32>
    %211 = arith.truncf %210 : vector<8x256xf32> to vector<8x256xbf16>
    %212 = arith.index_cast %c3_i32 : i32 to index
    %c0_74 = arith.constant 0 : index
    %c0_75 = arith.constant 0 : index
    %213 = vector.load %arg12[%212, %c0_74, %c0_75] : memref<8x8x256xbf16, #tpu.memory_space<vmem>>, vector<1x8x256xbf16>
    %214 = vector.shape_cast %213 : vector<1x8x256xbf16> to vector<8x256xbf16>
    %215 = vector.shape_cast %211 : vector<8x256xbf16> to vector<1x8x256xbf16>
    tpu.vector_store %arg12[%212, %c0_74, %c0_75], %215 {strides = array<i32>} : memref<8x8x256xbf16, #tpu.memory_space<vmem>>, vector<1x8x256xbf16>,
    %c4_i32 = arith.constant 4 : i32
    %216 = arith.index_cast %c4_i32 : i32 to index
    %c0_76 = arith.constant 0 : index
    %c0_77 = arith.constant 0 : index
    %217 = vector.load %arg18[%216, %c0_76, %c0_77] : memref<8x8x1024xbf16, #tpu.memory_space<vmem>>, vector<1x8x1024xbf16>
    %218 = vector.shape_cast %217 : vector<1x8x1024xbf16> to vector<8x1024xbf16>
    %219 = arith.extf %218 : vector<8x1024xbf16> to vector<8x1024xf32>
    %220 = arith.truncf %210 : vector<8x256xf32> to vector<8x256xbf16>
    %cst_78 = arith.constant dense<0.000000e+00> : vector<8x1024xf32>
    %221 = tpu.matmul %220, %65, %cst_78 {dimension_numbers = #tpu.dot_dimension_numbers<[1], [0], [0], [1], [0, 0, 1, 1], [], []>} : vector<8x256xbf16>, vector<256x1024xbf16>, vector<8x1024xf32> -> vector<8x1024xf32>
    %222 = arith.addf %219, %221 : vector<8x1024xf32>
    %223 = vector.extract_strided_slice %222 {offsets = [0, 0], sizes = [8, 256], strides = [1, 1]} : vector<8x1024xf32> to vector<8x256xf32>
    %224 = arith.negf %223 : vector<8x256xf32>
    %225 = math.exp %224 : vector<8x256xf32>
    %cst_79 = arith.constant 1.000000e+00 : f32
    %226 = vector.broadcast %cst_79 : f32 to vector<8x256xf32>
    %227 = arith.addf %226, %225 : vector<8x256xf32>
    %228 = arith.divf %226, %227 : vector<8x256xf32>
    %229 = vector.extract_strided_slice %222 {offsets = [0, 256], sizes = [8, 256], strides = [1, 1]} : vector<8x1024xf32> to vector<8x256xf32>
    %230 = arith.negf %229 : vector<8x256xf32>
    %231 = math.exp %230 : vector<8x256xf32>
    %cst_80 = arith.constant 1.000000e+00 : f32
    %232 = vector.broadcast %cst_80 : f32 to vector<8x256xf32>
    %233 = arith.addf %232, %231 : vector<8x256xf32>
    %234 = arith.divf %232, %233 : vector<8x256xf32>
    %235 = vector.extract_strided_slice %222 {offsets = [0, 512], sizes = [8, 256], strides = [1, 1]} : vector<8x1024xf32> to vector<8x256xf32>
    %236 = math.tanh %235 : vector<8x256xf32>
    %237 = vector.extract_strided_slice %222 {offsets = [0, 768], sizes = [8, 256], strides = [1, 1]} : vector<8x1024xf32> to vector<8x256xf32>
    %238 = arith.negf %237 : vector<8x256xf32>
    %239 = math.exp %238 : vector<8x256xf32>
    %cst_81 = arith.constant 1.000000e+00 : f32
    %240 = vector.broadcast %cst_81 : f32 to vector<8x256xf32>
    %241 = arith.addf %240, %239 : vector<8x256xf32>
    %242 = arith.divf %240, %241 : vector<8x256xf32>
    %243 = arith.mulf %234, %208 : vector<8x256xf32>
    %244 = arith.mulf %228, %236 : vector<8x256xf32>
    %245 = arith.addf %243, %244 : vector<8x256xf32>
    %246 = math.tanh %245 : vector<8x256xf32>
    %247 = arith.mulf %242, %246 : vector<8x256xf32>
    %248 = arith.truncf %247 : vector<8x256xf32> to vector<8x256xbf16>
    %249 = arith.index_cast %c4_i32 : i32 to index
    %c0_82 = arith.constant 0 : index
    %c0_83 = arith.constant 0 : index
    %250 = vector.load %arg12[%249, %c0_82, %c0_83] : memref<8x8x256xbf16, #tpu.memory_space<vmem>>, vector<1x8x256xbf16>
    %251 = vector.shape_cast %250 : vector<1x8x256xbf16> to vector<8x256xbf16>
    %252 = vector.shape_cast %248 : vector<8x256xbf16> to vector<1x8x256xbf16>
    tpu.vector_store %arg12[%249, %c0_82, %c0_83], %252 {strides = array<i32>} : memref<8x8x256xbf16, #tpu.memory_space<vmem>>, vector<1x8x256xbf16>,
    %c5_i32 = arith.constant 5 : i32
    %253 = arith.index_cast %c5_i32 : i32 to index
    %c0_84 = arith.constant 0 : index
    %c0_85 = arith.constant 0 : index
    %254 = vector.load %arg18[%253, %c0_84, %c0_85] : memref<8x8x1024xbf16, #tpu.memory_space<vmem>>, vector<1x8x1024xbf16>
    %255 = vector.shape_cast %254 : vector<1x8x1024xbf16> to vector<8x1024xbf16>
    %256 = arith.extf %255 : vector<8x1024xbf16> to vector<8x1024xf32>
    %257 = arith.truncf %247 : vector<8x256xf32> to vector<8x256xbf16>
    %cst_86 = arith.constant dense<0.000000e+00> : vector<8x1024xf32>
    %258 = tpu.matmul %257, %65, %cst_86 {dimension_numbers = #tpu.dot_dimension_numbers<[1], [0], [0], [1], [0, 0, 1, 1], [], []>} : vector<8x256xbf16>, vector<256x1024xbf16>, vector<8x1024xf32> -> vector<8x1024xf32>
    %259 = arith.addf %256, %258 : vector<8x1024xf32>
    %260 = vector.extract_strided_slice %259 {offsets = [0, 0], sizes = [8, 256], strides = [1, 1]} : vector<8x1024xf32> to vector<8x256xf32>
    %261 = arith.negf %260 : vector<8x256xf32>
    %262 = math.exp %261 : vector<8x256xf32>
    %cst_87 = arith.constant 1.000000e+00 : f32
    %263 = vector.broadcast %cst_87 : f32 to vector<8x256xf32>
    %264 = arith.addf %263, %262 : vector<8x256xf32>
    %265 = arith.divf %263, %264 : vector<8x256xf32>
    %266 = vector.extract_strided_slice %259 {offsets = [0, 256], sizes = [8, 256], strides = [1, 1]} : vector<8x1024xf32> to vector<8x256xf32>
    %267 = arith.negf %266 : vector<8x256xf32>
    %268 = math.exp %267 : vector<8x256xf32>
    %cst_88 = arith.constant 1.000000e+00 : f32
    %269 = vector.broadcast %cst_88 : f32 to vector<8x256xf32>
    %270 = arith.addf %269, %268 : vector<8x256xf32>
    %271 = arith.divf %269, %270 : vector<8x256xf32>
    %272 = vector.extract_strided_slice %259 {offsets = [0, 512], sizes = [8, 256], strides = [1, 1]} : vector<8x1024xf32> to vector<8x256xf32>
    %273 = math.tanh %272 : vector<8x256xf32>
    %274 = vector.extract_strided_slice %259 {offsets = [0, 768], sizes = [8, 256], strides = [1, 1]} : vector<8x1024xf32> to vector<8x256xf32>
    %275 = arith.negf %274 : vector<8x256xf32>
    %276 = math.exp %275 : vector<8x256xf32>
    %cst_89 = arith.constant 1.000000e+00 : f32
    %277 = vector.broadcast %cst_89 : f32 to vector<8x256xf32>
    %278 = arith.addf %277, %276 : vector<8x256xf32>
    %279 = arith.divf %277, %278 : vector<8x256xf32>
    %280 = arith.mulf %271, %245 : vector<8x256xf32>
    %281 = arith.mulf %265, %273 : vector<8x256xf32>
    %282 = arith.addf %280, %281 : vector<8x256xf32>
    %283 = math.tanh %282 : vector<8x256xf32>
    %284 = arith.mulf %279, %283 : vector<8x256xf32>
    %285 = arith.truncf %284 : vector<8x256xf32> to vector<8x256xbf16>
    %286 = arith.index_cast %c5_i32 : i32 to index
    %c0_90 = arith.constant 0 : index
    %c0_91 = arith.constant 0 : index
    %287 = vector.load %arg12[%286, %c0_90, %c0_91] : memref<8x8x256xbf16, #tpu.memory_space<vmem>>, vector<1x8x256xbf16>
    %288 = vector.shape_cast %287 : vector<1x8x256xbf16> to vector<8x256xbf16>
    %289 = vector.shape_cast %285 : vector<8x256xbf16> to vector<1x8x256xbf16>
    tpu.vector_store %arg12[%286, %c0_90, %c0_91], %289 {strides = array<i32>} : memref<8x8x256xbf16, #tpu.memory_space<vmem>>, vector<1x8x256xbf16>,
    %c6_i32 = arith.constant 6 : i32
    %290 = arith.index_cast %c6_i32 : i32 to index
    %c0_92 = arith.constant 0 : index
    %c0_93 = arith.constant 0 : index
    %291 = vector.load %arg18[%290, %c0_92, %c0_93] : memref<8x8x1024xbf16, #tpu.memory_space<vmem>>, vector<1x8x1024xbf16>
    %292 = vector.shape_cast %291 : vector<1x8x1024xbf16> to vector<8x1024xbf16>
    %293 = arith.extf %292 : vector<8x1024xbf16> to vector<8x1024xf32>
    %294 = arith.truncf %284 : vector<8x256xf32> to vector<8x256xbf16>
    %cst_94 = arith.constant dense<0.000000e+00> : vector<8x1024xf32>
    %295 = tpu.matmul %294, %65, %cst_94 {dimension_numbers = #tpu.dot_dimension_numbers<[1], [0], [0], [1], [0, 0, 1, 1], [], []>} : vector<8x256xbf16>, vector<256x1024xbf16>, vector<8x1024xf32> -> vector<8x1024xf32>
    %296 = arith.addf %293, %295 : vector<8x1024xf32>
    %297 = vector.extract_strided_slice %296 {offsets = [0, 0], sizes = [8, 256], strides = [1, 1]} : vector<8x1024xf32> to vector<8x256xf32>
    %298 = arith.negf %297 : vector<8x256xf32>
    %299 = math.exp %298 : vector<8x256xf32>
    %cst_95 = arith.constant 1.000000e+00 : f32
    %300 = vector.broadcast %cst_95 : f32 to vector<8x256xf32>
    %301 = arith.addf %300, %299 : vector<8x256xf32>
    %302 = arith.divf %300, %301 : vector<8x256xf32>
    %303 = vector.extract_strided_slice %296 {offsets = [0, 256], sizes = [8, 256], strides = [1, 1]} : vector<8x1024xf32> to vector<8x256xf32>
    %304 = arith.negf %303 : vector<8x256xf32>
    %305 = math.exp %304 : vector<8x256xf32>
    %cst_96 = arith.constant 1.000000e+00 : f32
    %306 = vector.broadcast %cst_96 : f32 to vector<8x256xf32>
    %307 = arith.addf %306, %305 : vector<8x256xf32>
    %308 = arith.divf %306, %307 : vector<8x256xf32>
    %309 = vector.extract_strided_slice %296 {offsets = [0, 512], sizes = [8, 256], strides = [1, 1]} : vector<8x1024xf32> to vector<8x256xf32>
    %310 = math.tanh %309 : vector<8x256xf32>
    %311 = vector.extract_strided_slice %296 {offsets = [0, 768], sizes = [8, 256], strides = [1, 1]} : vector<8x1024xf32> to vector<8x256xf32>
    %312 = arith.negf %311 : vector<8x256xf32>
    %313 = math.exp %312 : vector<8x256xf32>
    %cst_97 = arith.constant 1.000000e+00 : f32
    %314 = vector.broadcast %cst_97 : f32 to vector<8x256xf32>
    %315 = arith.addf %314, %313 : vector<8x256xf32>
    %316 = arith.divf %314, %315 : vector<8x256xf32>
    %317 = arith.mulf %308, %282 : vector<8x256xf32>
    %318 = arith.mulf %302, %310 : vector<8x256xf32>
    %319 = arith.addf %317, %318 : vector<8x256xf32>
    %320 = math.tanh %319 : vector<8x256xf32>
    %321 = arith.mulf %316, %320 : vector<8x256xf32>
    %322 = arith.truncf %321 : vector<8x256xf32> to vector<8x256xbf16>
    %323 = arith.index_cast %c6_i32 : i32 to index
    %c0_98 = arith.constant 0 : index
    %c0_99 = arith.constant 0 : index
    %324 = vector.load %arg12[%323, %c0_98, %c0_99] : memref<8x8x256xbf16, #tpu.memory_space<vmem>>, vector<1x8x256xbf16>
    %325 = vector.shape_cast %324 : vector<1x8x256xbf16> to vector<8x256xbf16>
    %326 = vector.shape_cast %322 : vector<8x256xbf16> to vector<1x8x256xbf16>
    tpu.vector_store %arg12[%323, %c0_98, %c0_99], %326 {strides = array<i32>} : memref<8x8x256xbf16, #tpu.memory_space<vmem>>, vector<1x8x256xbf16>,
    %c7_i32 = arith.constant 7 : i32
    %327 = arith.index_cast %c7_i32 : i32 to index
    %c0_100 = arith.constant 0 : index
    %c0_101 = arith.constant 0 : index
    %328 = vector.load %arg18[%327, %c0_100, %c0_101] : memref<8x8x1024xbf16, #tpu.memory_space<vmem>>, vector<1x8x1024xbf16>
    %329 = vector.shape_cast %328 : vector<1x8x1024xbf16> to vector<8x1024xbf16>
    %330 = arith.extf %329 : vector<8x1024xbf16> to vector<8x1024xf32>
    %331 = arith.truncf %321 : vector<8x256xf32> to vector<8x256xbf16>
    %cst_102 = arith.constant dense<0.000000e+00> : vector<8x1024xf32>
    %332 = tpu.matmul %331, %65, %cst_102 {dimension_numbers = #tpu.dot_dimension_numbers<[1], [0], [0], [1], [0, 0, 1, 1], [], []>} : vector<8x256xbf16>, vector<256x1024xbf16>, vector<8x1024xf32> -> vector<8x1024xf32>
    %333 = arith.addf %330, %332 : vector<8x1024xf32>
    %334 = vector.extract_strided_slice %333 {offsets = [0, 0], sizes = [8, 256], strides = [1, 1]} : vector<8x1024xf32> to vector<8x256xf32>
    %335 = arith.negf %334 : vector<8x256xf32>
    %336 = math.exp %335 : vector<8x256xf32>
    %cst_103 = arith.constant 1.000000e+00 : f32
    %337 = vector.broadcast %cst_103 : f32 to vector<8x256xf32>
    %338 = arith.addf %337, %336 : vector<8x256xf32>
    %339 = arith.divf %337, %338 : vector<8x256xf32>
    %340 = vector.extract_strided_slice %333 {offsets = [0, 256], sizes = [8, 256], strides = [1, 1]} : vector<8x1024xf32> to vector<8x256xf32>
    %341 = arith.negf %340 : vector<8x256xf32>
    %342 = math.exp %341 : vector<8x256xf32>
    %cst_104 = arith.constant 1.000000e+00 : f32
    %343 = vector.broadcast %cst_104 : f32 to vector<8x256xf32>
    %344 = arith.addf %343, %342 : vector<8x256xf32>
    %345 = arith.divf %343, %344 : vector<8x256xf32>
    %346 = vector.extract_strided_slice %333 {offsets = [0, 512], sizes = [8, 256], strides = [1, 1]} : vector<8x1024xf32> to vector<8x256xf32>
    %347 = math.tanh %346 : vector<8x256xf32>
    %348 = vector.extract_strided_slice %333 {offsets = [0, 768], sizes = [8, 256], strides = [1, 1]} : vector<8x1024xf32> to vector<8x256xf32>
    %349 = arith.negf %348 : vector<8x256xf32>
    %350 = math.exp %349 : vector<8x256xf32>
    %cst_105 = arith.constant 1.000000e+00 : f32
    %351 = vector.broadcast %cst_105 : f32 to vector<8x256xf32>
    %352 = arith.addf %351, %350 : vector<8x256xf32>
    %353 = arith.divf %351, %352 : vector<8x256xf32>
    %354 = arith.mulf %345, %319 : vector<8x256xf32>
    %355 = arith.mulf %339, %347 : vector<8x256xf32>
    %356 = arith.addf %354, %355 : vector<8x256xf32>
    %357 = math.tanh %356 : vector<8x256xf32>
    %358 = arith.mulf %353, %357 : vector<8x256xf32>
    %359 = arith.truncf %358 : vector<8x256xf32> to vector<8x256xbf16>
    %360 = arith.index_cast %c7_i32 : i32 to index
    %c0_106 = arith.constant 0 : index
    %c0_107 = arith.constant 0 : index
    %361 = vector.load %arg12[%360, %c0_106, %c0_107] : memref<8x8x256xbf16, #tpu.memory_space<vmem>>, vector<1x8x256xbf16>
    %362 = vector.shape_cast %361 : vector<1x8x256xbf16> to vector<8x256xbf16>
    %363 = vector.shape_cast %359 : vector<8x256xbf16> to vector<1x8x256xbf16>
    tpu.vector_store %arg12[%360, %c0_106, %c0_107], %363 {strides = array<i32>} : memref<8x8x256xbf16, #tpu.memory_space<vmem>>, vector<1x8x256xbf16>,
    %c8_i32 = arith.constant 8 : i32
    %c0_108 = arith.constant 0 : index
    %c0_109 = arith.constant 0 : index
    %364 = vector.load %arg13[%c0_108, %c0_109] : memref<8x256xf32, #tpu.memory_space<vmem>>, vector<8x256xf32>
    tpu.vector_store %arg13[%c0_108, %c0_109], %358 {strides = array<i32>} : memref<8x256xf32, #tpu.memory_space<vmem>>, vector<8x256xf32>,
    return
  }
}

</mosaic_0001>

<bundles_post_ra>
// kernel: decoder_forward.3
= control target key start
LH: loop header
LB: loop body
LE: loop exit
PB: predicated region body
PF: predicated region fallthrough
CT: control target
= control target key end

     0   :  { %s1164_s0 = inlined_call_operand.vmem [shape: bf16[64,256], index: 0, kind: input, shape index: {}]   ;;  %s1165_s1 = inlined_call_operand.vmem [shape: bf16[256,512], index: 1, kind: input, shape index: {}]   ;;  %s1166_s2 = inlined_call_operand.vmem [shape: f32[1,512], index: 2, kind: input, shape index: {}]   ;;  %s1167_s3 = inlined_call_operand.hbm [shape: f32[64,512], index: 3, kind: output, shape index: {}]  }
   0x1   :  { %v738_v0 = vld [vmem:[%s1165_s1 + $0x4] ss:$16 sps:$4 sm:$0xff]   ;;  %v740_v1 = vld [vmem:[%s1165_s1 + $0xc] ss:$16 sps:$4 sm:$0xff]   ;;  %v742_v2 = vld [vmem:[%s1165_s1] ss:$16 sps:$4 sm:$0xff]  }
   0x2   :  { %469 = vmatprep.subr.bf16.mxu0 %v738_v0  ;;  %v743_v3 = vld [vmem:[%s1165_s1 + $0x8] ss:$16 sps:$4 sm:$0xff]   ;;  %542 = vmatprep.subr.bf16.mxu1 %v740_v1  ;;  %v744_v4 = vld [vmem:[%s1165_s1 + $0x24] ss:$16 sps:$4 sm:$0xff]   ;;  %v746_v5 = vld [vmem:[%s1165_s1 + $0x2c] ss:$16 sps:$4 sm:$0xff]  }
   0x3   :  { %470 = vmatpush1.bf16.msra.mxu0 %v742_v2  ;;  %543 = vmatpush1.bf16.msra.mxu1 %v743_v3  ;;  %v748_v6 = vld [vmem:[%s1165_s1 + $0x20] ss:$16 sps:$4 sm:$0xff]   ;;  %v749_v7 = vld [vmem:[%s1165_s1 + $0x28] ss:$16 sps:$4 sm:$0xff]   ;;  %v750_v8 = vld [vmem:[%s1165_s1 + $0x44] ss:$16 sps:$4 sm:$0xff]  }
   0x4   :  { %471 = vmatprep.subr.bf16.mxu0 %v744_v4  ;;  %544 = vmatprep.subr.bf16.mxu1 %v746_v5  ;;  %v752_v9 = vld [vmem:[%s1165_s1 + $0x4c] ss:$16 sps:$4 sm:$0xff]   ;;  %v754_v10 = vld [vmem:[%s1165_s1 + $0x40] ss:$16 sps:$4 sm:$0xff]   ;;  %v755_v11 = vld [vmem:[%s1165_s1 + $0x48] ss:$16 sps:$4 sm:$0xff]  }
   0x5   :  { %v756_v12 = vld [vmem:[%s1165_s1 + $0x64] ss:$16 sps:$4 sm:$0xff]   ;;  %v758_v13 = vld [vmem:[%s1165_s1 + $0x6c] ss:$16 sps:$4 sm:$0xff]   ;;  %v760_v14 = vld [vmem:[%s1165_s1 + $0x60] ss:$16 sps:$4 sm:$0xff]  }
   0x6   :  { %v761_v15 = vld [vmem:[%s1165_s1 + $0x68] ss:$16 sps:$4 sm:$0xff]   ;;  %v762_v16 = vld [vmem:[%s1165_s1 + $0x84] ss:$16 sps:$4 sm:$0xff]   ;;  %v764_v17 = vld [vmem:[%s1165_s1 + $0x8c] ss:$16 sps:$4 sm:$0xff]  }
   0x7   :  { %472 = vmatpush1.bf16.msra.mxu0 %v748_v6  ;;  %545 = vmatpush1.bf16.msra.mxu1 %v749_v7  ;;  %v766_v18 = vld [vmem:[%s1165_s1 + $0x80] ss:$16 sps:$4 sm:$0xff]   ;;  %v767_v19 = vld [vmem:[%s1165_s1 + $0x88] ss:$16 sps:$4 sm:$0xff]   ;;  %v768_v20 = vld [vmem:[%s1165_s1 + $0xa4] ss:$16 sps:$4 sm:$0xff]  }
   0x8   :  { %473 = vmatprep.subr.bf16.mxu0 %v750_v8  ;;  %546 = vmatprep.subr.bf16.mxu1 %v752_v9  ;;  %v770_v21 = vld [vmem:[%s1165_s1 + $0xac] ss:$16 sps:$4 sm:$0xff]   ;;  %v772_v22 = vld [vmem:[%s1165_s1 + $0xa0] ss:$16 sps:$4 sm:$0xff]   ;;  %v773_v23 = vld [vmem:[%s1165_s1 + $0xa8] ss:$16 sps:$4 sm:$0xff]  }
   0x9   :  { %v774_v24 = vld [vmem:[%s1165_s1 + $0xc4] ss:$16 sps:$4 sm:$0xff]   ;;  %v776_v25 = vld [vmem:[%s1165_s1 + $0xcc] ss:$16 sps:$4 sm:$0xff]   ;;  %v778_v26 = vld [vmem:[%s1165_s1 + $0xc0] ss:$16 sps:$4 sm:$0xff]  }
   0xa   :  { %v779_v27 = vld [vmem:[%s1165_s1 + $0xc8] ss:$16 sps:$4 sm:$0xff]   ;;  %v780_v28 = vld [vmem:[%s1165_s1 + $0xe4] ss:$16 sps:$4 sm:$0xff]   ;;  %v782_v29 = vld [vmem:[%s1165_s1 + $0xec] ss:$16 sps:$4 sm:$0xff]  }
   0xb   :  { %474 = vmatpush1.bf16.msra.mxu0 %v754_v10  ;;  %547 = vmatpush1.bf16.msra.mxu1 %v755_v11  ;;  %v784_v30 = vld [vmem:[%s1165_s1 + $0xe0] ss:$16 sps:$4 sm:$0xff]   ;;  %v785_v31 = vld [vmem:[%s1165_s1 + $0xe8] ss:$16 sps:$4 sm:$0xff]   ;;  %v786_v32 = vld [vmem:[%s1165_s1 + $0x104] ss:$16 sps:$4 sm:$0xff]  }
   0xc   :  { %475 = vmatprep.subr.bf16.mxu0 %v756_v12  ;;  %548 = vmatprep.subr.bf16.mxu1 %v758_v13  ;;  %v788_v33 = vld [vmem:[%s1165_s1 + $0x10c] ss:$16 sps:$4 sm:$0xff]   ;;  %v790_v34 = vld [vmem:[%s1165_s1 + $0x100] ss:$16 sps:$4 sm:$0xff]   ;;  %v791_v35 = vld [vmem:[%s1165_s1 + $0x108] ss:$16 sps:$4 sm:$0xff]  }
   0xd   :  { %v792_v36 = vld [vmem:[%s1165_s1 + $0x124] ss:$16 sps:$4 sm:$0xff]   ;;  %v794_v37 = vld [vmem:[%s1165_s1 + $0x12c] ss:$16 sps:$4 sm:$0xff]   ;;  %v796_v38 = vld [vmem:[%s1165_s1 + $0x120] ss:$16 sps:$4 sm:$0xff]  }
   0xe   :  { %v797_v39 = vld [vmem:[%s1165_s1 + $0x128] ss:$16 sps:$4 sm:$0xff]   ;;  %v798_v40 = vld [vmem:[%s1165_s1 + $0x144] ss:$16 sps:$4 sm:$0xff]   ;;  %v800_v41 = vld [vmem:[%s1165_s1 + $0x14c] ss:$16 sps:$4 sm:$0xff]  }
   0xf   :  { %476 = vmatpush1.bf16.msra.mxu0 %v760_v14  ;;  %549 = vmatpush1.bf16.msra.mxu1 %v761_v15  ;;  %v802_v42 = vld [vmem:[%s1165_s1 + $0x140] ss:$16 sps:$4 sm:$0xff]   ;;  %v803_v43 = vld [vmem:[%s1165_s1 + $0x148] ss:$16 sps:$4 sm:$0xff]   ;;  %v804_v44 = vld [vmem:[%s1165_s1 + $0x164] ss:$16 sps:$4 sm:$0xff]  }
  0x10   :  { %477 = vmatprep.subr.bf16.mxu0 %v762_v16  ;;  %550 = vmatprep.subr.bf16.mxu1 %v764_v17  ;;  %v806_v45 = vld [vmem:[%s1165_s1 + $0x16c] ss:$16 sps:$4 sm:$0xff]   ;;  %v808_v46 = vld [vmem:[%s1165_s1 + $0x160] ss:$16 sps:$4 sm:$0xff]   ;;  %v809_v47 = vld [vmem:[%s1165_s1 + $0x168] ss:$16 sps:$4 sm:$0xff]  }
  0x11   :  { %v836_v48 = vld [vmem:[%s1164_s0 + $0x4] ss:$8 sps:$4 sm:$0xff]   ;;  %v814_v51 = vld [vmem:[%s1165_s1 + $0x180] ss:$16 sps:$4 sm:$0xff]   ;;  %v815_v52 = vld [vmem:[%s1165_s1 + $0x188] ss:$16 sps:$4 sm:$0xff]  }
  0x12   :  { %v810_v49 = vld [vmem:[%s1165_s1 + $0x184] ss:$16 sps:$4 sm:$0xff]   ;;  %v812_v50 = vld [vmem:[%s1165_s1 + $0x18c] ss:$16 sps:$4 sm:$0xff]   ;;  %501 = vmatprep.mubr.bf16.mxu0 %v836_v48  ;;  %574 = vmatprep.mubr.bf16.mxu1 %v836_v48 }
  0x13   :  { %478 = vmatpush1.bf16.msra.mxu0 %v766_v18  ;;  %551 = vmatpush1.bf16.msra.mxu1 %v767_v19 }
  0x14   :  { %479 = vmatprep.subr.bf16.mxu0 %v768_v20  ;;  %552 = vmatprep.subr.bf16.mxu1 %v770_v21 }
  0x17   :  { %480 = vmatpush1.bf16.msra.mxu0 %v772_v22  ;;  %553 = vmatpush1.bf16.msra.mxu1 %v773_v23 }
  0x18   :  { %481 = vmatprep.subr.bf16.mxu0 %v774_v24  ;;  %554 = vmatprep.subr.bf16.mxu1 %v776_v25 }
  0x1b   :  { %482 = vmatpush1.bf16.msra.mxu0 %v778_v26  ;;  %555 = vmatpush1.bf16.msra.mxu1 %v779_v27 }
  0x1c   :  { %483 = vmatprep.subr.bf16.mxu0 %v780_v28  ;;  %556 = vmatprep.subr.bf16.mxu1 %v782_v29 }
  0x1f   :  { %484 = vmatpush1.bf16.msra.mxu0 %v784_v30  ;;  %557 = vmatpush1.bf16.msra.mxu1 %v785_v31 }
  0x20   :  { %485 = vmatprep.subr.bf16.mxu0 %v786_v32  ;;  %558 = vmatprep.subr.bf16.mxu1 %v788_v33 }
  0x23   :  { %486 = vmatpush1.bf16.msra.mxu0 %v790_v34  ;;  %559 = vmatpush1.bf16.msra.mxu1 %v791_v35 }
  0x24   :  { %487 = vmatprep.subr.bf16.mxu0 %v792_v36  ;;  %560 = vmatprep.subr.bf16.mxu1 %v794_v37 }
  0x27   :  { %488 = vmatpush1.bf16.msra.mxu0 %v796_v38  ;;  %561 = vmatpush1.bf16.msra.mxu1 %v797_v39 }
  0x28   :  { %489 = vmatprep.subr.bf16.mxu0 %v798_v40  ;;  %562 = vmatprep.subr.bf16.mxu1 %v800_v41 }
  0x2b   :  { %490 = vmatpush1.bf16.msra.mxu0 %v802_v42  ;;  %563 = vmatpush1.bf16.msra.mxu1 %v803_v43 }
  0x2c   :  { %491 = vmatprep.subr.bf16.mxu0 %v804_v44  ;;  %564 = vmatprep.subr.bf16.mxu1 %v806_v45 }
  0x2f   :  { %492 = vmatpush1.bf16.msra.mxu0 %v808_v46  ;;  %565 = vmatpush1.bf16.msra.mxu1 %v809_v47 }
  0x30   :  { %8 = vsyncpa [#allocation3], 0  ;;  %493 = vmatprep.subr.bf16.mxu0 %v810_v49  ;;  %566 = vmatprep.subr.bf16.mxu1 %v812_v50  ;;  %v816_v53 = vld [vmem:[%s1165_s1 + $0x1a4] ss:$16 sps:$4 sm:$0xff]   ;;  %v818_v54 = vld [vmem:[%s1165_s1 + $0x1ac] ss:$16 sps:$4 sm:$0xff]   ;;  %v89_v8 = vlaneseq }
  0x31   :  { %v820_v55 = vld [vmem:[%s1165_s1 + $0x1a0] ss:$16 sps:$4 sm:$0xff]   ;;  %v821_v56 = vld [vmem:[%s1165_s1 + $0x1a8] ss:$16 sps:$4 sm:$0xff]   ;;  %v822_v57 = vld [vmem:[%s1165_s1 + $0x1c4] ss:$16 sps:$4 sm:$0xff]  }
  0x32   :  { %v824_v58 = vld [vmem:[%s1165_s1 + $0x1cc] ss:$16 sps:$4 sm:$0xff]   ;;  %v826_v59 = vld [vmem:[%s1165_s1 + $0x1c0] ss:$16 sps:$4 sm:$0xff]   ;;  %v827_v60 = vld [vmem:[%s1165_s1 + $0x1c8] ss:$16 sps:$4 sm:$0xff]  }
  0x33   :  { %494 = vmatpush1.bf16.msra.mxu0 %v814_v51  ;;  %567 = vmatpush1.bf16.msra.mxu1 %v815_v52  ;;  %v828_v61 = vld [vmem:[%s1165_s1 + $0x1e4] ss:$16 sps:$4 sm:$0xff]   ;;  %v830_v62 = vld [vmem:[%s1165_s1 + $0x1ec] ss:$16 sps:$4 sm:$0xff]   ;;  %v832_v63 = vld [vmem:[%s1165_s1 + $0x1e0] ss:$16 sps:$4 sm:$0xff]  }
  0x34   :  { %495 = vmatprep.subr.bf16.mxu0 %v816_v53  ;;  %568 = vmatprep.subr.bf16.mxu1 %v818_v54  ;;  %v833_v0 = vld [vmem:[%s1165_s1 + $0x1e8] ss:$16 sps:$4 sm:$0xff]   ;;  %v837_v2 = vld [vmem:[%s1164_s0 + $0x14] ss:$8 sps:$4 sm:$0xff]   ;;  %v840_v4 = vld [vmem:[%s1164_s0 + $0x24] ss:$8 sps:$4 sm:$0xff]  }
  0x35   :  { %v834_v1 = vld [vmem:[%s1164_s0] ss:$8 sps:$4 sm:$0xff]   ;;  %v839_v3 = vld [vmem:[%s1164_s0 + $0x10] ss:$8 sps:$4 sm:$0xff]   ;;  %v843_v6 = vld [vmem:[%s1164_s0 + $0x34] ss:$8 sps:$4 sm:$0xff]  }
  0x36   :  { %v842_v5 = vld [vmem:[%s1164_s0 + $0x20] ss:$8 sps:$4 sm:$0xff]   ;;  %v845_v7 = vld [vmem:[%s1164_s0 + $0x30] ss:$8 sps:$4 sm:$0xff]   ;;  %v90_v9 = vshrl.u32 %v89_v8, 7  ;;  %s870_s0 = smov [#allocation2]  }
  0x37   :  { %496 = vmatpush1.bf16.msra.mxu0 %v820_v55  ;;  %569 = vmatpush1.bf16.msra.mxu1 %v821_v56  ;;  %v87_v12 = vld [vmem:[%s1166_s2] sm:$0xf]  ;;  %s652_s2 = sshll.u32 %s870_s0, 4  ;;  %s653_s2 = int_to_ptr.vmem [resolvable:$true] %s652_s2 }
  0x38   :  { %497 = vmatprep.subr.bf16.mxu0 %v822_v57  ;;  %570 = vmatprep.subr.bf16.mxu1 %v824_v58  ;;  %v91_v10 = vsub.s32 0, %v90_v9  ;;  %v99_v11 = vsub.s32 2, %v90_v9  ;;  %v95_v13 = vsub.s32 1, %v90_v9  ;;  %v103_v14 = vsub.s32 3, %v90_v9  ;;  %s846_s22 = scalar_lea.vmem %s653_s2, 4096  ;;  %p851_p1 = scmp.lt.s32.totalorder %s653_s2, %s653_s2 }
  0x39   :  { %p847_p0 = scmp.ne.s32.totalorder %s653_s2, %s846_s22  ;;  %p852_p2 = scmp.lt.s32.totalorder %s846_s22, %s846_s22 }
  0x3a   :  { %v1112_v15 = vrot.slane %v87_v12, %v91_v10  ;;  %v1114_v16 = vrot.slane %v87_v12, %v99_v11  ;;  %v1116_v17 = vrot.slane %v87_v12, %v95_v13  ;;  %v1118_v18 = vrot.slane %v87_v12, %v103_v14 }
  0x3b   :  { %498 = vmatpush1.bf16.msra.mxu0 %v826_v59  ;;  %571 = vmatpush1.bf16.msra.mxu1 %v827_v60  ;;  %p853_p3 = por %p852_p2, %p851_p1 }
  0x3c   :  { %499 = vmatprep.subr.bf16.mxu0 %v828_v61  ;;  %572 = vmatprep.subr.bf16.mxu1 %v830_v62 }
  0x3d   :  { %p854_p4 = pnand %p853_p3, %p847_p0 }
  0x3f   :  { %500 = vmatpush1.bf16.msra.mxu0 %v832_v63  ;;  %573 = vmatpush1.bf16.msra.mxu1 %v833_v0 }
  0x42   :  { %502 = vmatmul.mubr.bf16.vlgmr.msra.gmra.mrb[0].mxu0 %v834_v1  ;;  %575 = vmatmul.mubr.bf16.vlgmr.msra.gmra.mrb[0].mxu1 %v834_v1 }
  0x43   :  { %511 = vmatprep.mubr.bf16.mxu0 %v837_v2  ;;  %584 = vmatprep.mubr.bf16.mxu1 %v837_v2 }
  0x4a   :  { %512 = vmatmul.mubr.bf16.gmra.mrb[4].mxu0 %v839_v3  ;;  %585 = vmatmul.mubr.bf16.gmra.mrb[4].mxu1 %v839_v3 }
  0x4b   :  { %521 = vmatprep.mubr.bf16.mxu0 %v840_v4  ;;  %594 = vmatprep.mubr.bf16.mxu1 %v840_v4 }
  0x52   :  { %522 = vmatmul.mubr.bf16.gmra.mrb[8].mxu0 %v842_v5  ;;  %595 = vmatmul.mubr.bf16.gmra.mrb[8].mxu1 %v842_v5 }
  0x53   :  { %531 = vmatprep.mubr.bf16.mxu0 %v843_v6  ;;  %604 = vmatprep.mubr.bf16.mxu1 %v843_v6 }
  0x5a   :  { %532 = vmatmul.mubr.bf16.gmra.mrb[12].mxu0 %v845_v7  ;;  %605 = vmatmul.mubr.bf16.gmra.mrb[12].mxu1 %v845_v7 }
 0x115   :  { %v503_v19 = vpop.f32.mrb[0].mxu0  ;;  %v576_v20 = vpop.f32.mrb[0].mxu1 }
 0x116   :  { %v504_v21 = vadd.f32 %v503_v19, %v1112_v15  ;;  %v577_v22 = vadd.f32 %v576_v20, %v1114_v16  ;;  %v505_v23 = vpop.f32.mrb[1].mxu0  ;;  %v578_v24 = vpop.f32.mrb[1].mxu1 }
 0x117   :  { %v506_v25 = vadd.f32 %v505_v23, %v1116_v17  ;;  %v579_v26 = vadd.f32 %v578_v24, %v1118_v18  ;;  %v507_v27 = vpop.f32.mrb[2].mxu0  ;;  %v580_v28 = vpop.f32.mrb[2].mxu1 }
 0x118   :  { %615 = vst [vmem:[#allocation2] sm:$0xff] %v504_v21  ;;  %617 = vst [vmem:[#allocation2 + $0x10] sm:$0xff] %v577_v22  ;;  %v508_v29 = vadd.f32 %v507_v27, %v1112_v15  ;;  %v581_v30 = vadd.f32 %v580_v28, %v1114_v16  ;;  %v509_v31 = vpop.f32.mrb[3].mxu0  ;;  %v582_v32 = vpop.f32.mrb[3].mxu1 }
 0x119   :  { %616 = vst [vmem:[#allocation2 + $0x8] sm:$0xff] %v506_v25  ;;  %618 = vst [vmem:[#allocation2 + $0x18] sm:$0xff] %v579_v26  ;;  %v510_v33 = vadd.f32 %v509_v31, %v1116_v17  ;;  %v583_v34 = vadd.f32 %v582_v32, %v1118_v18 }
 0x11a   :  { %619 = vst [vmem:[#allocation2 + $0x20] sm:$0xff] %v508_v29  ;;  %621 = vst [vmem:[#allocation2 + $0x30] sm:$0xff] %v581_v30 }
 0x11b   :  { %620 = vst [vmem:[#allocation2 + $0x28] sm:$0xff] %v510_v33  ;;  %622 = vst [vmem:[#allocation2 + $0x38] sm:$0xff] %v583_v34 }
 0x11d   :  { %v513_v35 = vpop.f32.mrb[4].mxu0  ;;  %v586_v36 = vpop.f32.mrb[4].mxu1 }
 0x11e   :  { %v514_v37 = vadd.f32 %v513_v35, %v1112_v15  ;;  %v587_v38 = vadd.f32 %v586_v36, %v1114_v16  ;;  %v515_v39 = vpop.f32.mrb[5].mxu0  ;;  %v588_v40 = vpop.f32.mrb[5].mxu1 }
 0x11f   :  { %v516_v41 = vadd.f32 %v515_v39, %v1116_v17  ;;  %v589_v42 = vadd.f32 %v588_v40, %v1118_v18  ;;  %v517_v43 = vpop.f32.mrb[6].mxu0  ;;  %v590_v44 = vpop.f32.mrb[6].mxu1 }
 0x120   :  { %623 = vst [vmem:[#allocation2 + $0x40] sm:$0xff] %v514_v37  ;;  %625 = vst [vmem:[#allocation2 + $0x50] sm:$0xff] %v587_v38  ;;  %v518_v45 = vadd.f32 %v517_v43, %v1112_v15  ;;  %v591_v46 = vadd.f32 %v590_v44, %v1114_v16  ;;  %v519_v47 = vpop.f32.mrb[7].mxu0  ;;  %v592_v48 = vpop.f32.mrb[7].mxu1 }
 0x121   :  { %624 = vst [vmem:[#allocation2 + $0x48] sm:$0xff] %v516_v41  ;;  %626 = vst [vmem:[#allocation2 + $0x58] sm:$0xff] %v589_v42  ;;  %v520_v49 = vadd.f32 %v519_v47, %v1116_v17  ;;  %v593_v50 = vadd.f32 %v592_v48, %v1118_v18 }
 0x122   :  { %627 = vst [vmem:[#allocation2 + $0x60] sm:$0xff] %v518_v45  ;;  %629 = vst [vmem:[#allocation2 + $0x70] sm:$0xff] %v591_v46 }
 0x123   :  { %628 = vst [vmem:[#allocation2 + $0x68] sm:$0xff] %v520_v49  ;;  %630 = vst [vmem:[#allocation2 + $0x78] sm:$0xff] %v593_v50 }
 0x125   :  { %v523_v51 = vpop.f32.mrb[8].mxu0  ;;  %v596_v52 = vpop.f32.mrb[8].mxu1 }
 0x126   :  { %v524_v53 = vadd.f32 %v523_v51, %v1112_v15  ;;  %v597_v54 = vadd.f32 %v596_v52, %v1114_v16  ;;  %v525_v55 = vpop.f32.mrb[9].mxu0  ;;  %v598_v56 = vpop.f32.mrb[9].mxu1 }
 0x127   :  { %v526_v57 = vadd.f32 %v525_v55, %v1116_v17  ;;  %v599_v58 = vadd.f32 %v598_v56, %v1118_v18  ;;  %v527_v59 = vpop.f32.mrb[10].mxu0  ;;  %v600_v60 = vpop.f32.mrb[10].mxu1 }
 0x128   :  { %631 = vst [vmem:[#allocation2 + $0x80] sm:$0xff] %v524_v53  ;;  %633 = vst [vmem:[#allocation2 + $0x90] sm:$0xff] %v597_v54  ;;  %v528_v61 = vadd.f32 %v527_v59, %v1112_v15  ;;  %v601_v62 = vadd.f32 %v600_v60, %v1114_v16  ;;  %v529_v63 = vpop.f32.mrb[11].mxu0  ;;  %v602_v0 = vpop.f32.mrb[11].mxu1 }
 0x129   :  { %632 = vst [vmem:[#allocation2 + $0x88] sm:$0xff] %v526_v57  ;;  %634 = vst [vmem:[#allocation2 + $0x98] sm:$0xff] %v599_v58  ;;  %v530_v1 = vadd.f32 %v529_v63, %v1116_v17  ;;  %v603_v2 = vadd.f32 %v602_v0, %v1118_v18 }
 0x12a   :  { %635 = vst [vmem:[#allocation2 + $0xa0] sm:$0xff] %v528_v61  ;;  %637 = vst [vmem:[#allocation2 + $0xb0] sm:$0xff] %v601_v62 }
 0x12b   :  { %636 = vst [vmem:[#allocation2 + $0xa8] sm:$0xff] %v530_v1  ;;  %638 = vst [vmem:[#allocation2 + $0xb8] sm:$0xff] %v603_v2 }
 0x12d   :  { %v533_v3 = vpop.f32.mrb[12].mxu0  ;;  %v606_v4 = vpop.f32.mrb[12].mxu1 }
 0x12e   :  { %v534_v5 = vadd.f32 %v533_v3, %v1112_v15  ;;  %v607_v6 = vadd.f32 %v606_v4, %v1114_v16  ;;  %v535_v7 = vpop.f32.mrb[13].mxu0  ;;  %v608_v8 = vpop.f32.mrb[13].mxu1 }
 0x12f   :  { %v536_v9 = vadd.f32 %v535_v7, %v1116_v17  ;;  %v609_v10 = vadd.f32 %v608_v8, %v1118_v18  ;;  %v537_v11 = vpop.f32.mrb[14].mxu0  ;;  %v610_v12 = vpop.f32.mrb[14].mxu1 }
 0x130   :  { %639 = vst [vmem:[#allocation2 + $0xc0] sm:$0xff] %v534_v5  ;;  %641 = vst [vmem:[#allocation2 + $0xd0] sm:$0xff] %v607_v6  ;;  %v538_v13 = vadd.f32 %v537_v11, %v1112_v15  ;;  %v611_v14 = vadd.f32 %v610_v12, %v1114_v16  ;;  %v539_v19 = vpop.f32.mrb[15].mxu0  ;;  %v612_v20 = vpop.f32.mrb[15].mxu1 }
 0x131   :  { %640 = vst [vmem:[#allocation2 + $0xc8] sm:$0xff] %v536_v9  ;;  %642 = vst [vmem:[#allocation2 + $0xd8] sm:$0xff] %v609_v10  ;;  %v540_v21 = vadd.f32 %v539_v19, %v1116_v17  ;;  %v613_v22 = vadd.f32 %v612_v20, %v1118_v18 }
 0x132   :  { %643 = vst [vmem:[#allocation2 + $0xe0] sm:$0xff] %v538_v13  ;;  %645 = vst [vmem:[#allocation2 + $0xf0] sm:$0xff] %v611_v14 }
 0x133   :  { %644 = vst [vmem:[#allocation2 + $0xe8] sm:$0xff] %v540_v21  ;;  %646 = vst [vmem:[#allocation2 + $0xf8] sm:$0xff] %v613_v22 }
 0x134   :  { %857 = shalt.err (!%p854_p4)
}
 0x135   :  { %s858_s25 = scalar_lea.hbm %s1167_s3, 4096 }
 0x136   :  { %p859_p5 = scmp.ne.s32.totalorder %s1167_s3, %s858_s25  ;;  %p862_p6 = scmp.lt.u32.totalorder %s858_s25, %s1167_s3 }
 0x138   :  { %p864_p7 = pnand %p862_p6, %p859_p5 }
 0x13a   :  { %867 = shalt.err (!%p864_p7)
}
 0x13b   :  { %s871_s30 = smov 512   ;;  %s872_s4 = smov 32  }
 0x13c   :  { %658 = dma.vmem_to_hbm [thread:$0]  %s653_s2, 4096, %s1167_s3, [#allocation3], %s871_s30, %s871_s30, %s872_s4  }
 0x13d   :  { %868 = dma.done.wait [#allocation3], 4096  }
 0x13e   :  { %869 = vsyncadd [#allocation3], 4294963200 }
 0x13f   :  { %662 = vsyncpa [#allocation3], 1 }

// kernel: decoder_forward.2
= control target key start
LH: loop header
LB: loop body
LE: loop exit
PB: predicated region body
PF: predicated region fallthrough
CT: control target
= control target key end

     0   :  { %19 = vsyncpa [#allocation8], 0  ;;  %s8363_s0 = inlined_call_operand.vmem [shape: bf16[8,8,128], index: 0, kind: input, shape index: {}]   ;;  %s8364_s1 = inlined_call_operand.hbm [shape: f32[8,8,256], index: 1, kind: input, shape index: {}]   ;;  %s8365_s2 = inlined_call_operand.vmem [shape: f32[8,256], index: 2, kind: input, shape index: {}]   ;;  %s8366_s3 = inlined_call_operand.vmem [shape: bf16[256,256], index: 3, kind: input, shape index: {}]   ;;  %s8367_s4 = inlined_call_operand.vmem [shape: f32[1,256], index: 4, kind: input, shape index: {}]   ;;  %s8368_s5 = inlined_call_operand.hbm [shape: bf16[256,256], index: 5, kind: input, shape index: {}]   ;;  %s8369_s6 = inlined_call_operand.hbm [shape: bf16[256,256], index: 6, kind: input, shape index: {}]   ;;  %s8370_s7 = inlined_call_operand.vmem [shape: f32[1,256], index: 7, kind: input, shape index: {}]   ;;  %s8371_s8 = inlined_call_operand.hbm [shape: bf16[256,1024], index: 8, kind: input, shape index: {}]   ;;  %s8372_s9 = inlined_call_operand.hbm [shape: bf16[128,1024], index: 9, kind: input, shape index: {}]   ;;  %s8373_s10 = inlined_call_operand.hbm [shape: bf16[256,1024], index: 10, kind: input, shape index: {}]   ;;  %s8374_s11 = inlined_call_operand.vmem [shape: f32[1,1024], index: 11, kind: input, shape index: {}]   ;;  %s8375_s12 = inlined_call_operand.vmem [shape: bf16[8,8,256], index: 12, kind: output, shape index: {0}]   ;;  %s8376_s13 = inlined_call_operand.hbm [shape: f32[8,256], index: 13, kind: output, shape index: {1}]  }
   0x1   :  { %20 = vsyncpa [#allocation11], 0 }
   0x2   :  { %21 = vsyncpa [#allocation9], 0  ;;  %s5545_s25 = smov [#allocation10]   ;;  %s5445_s29 = scalar_lea.hbm %s8368_s5, 4096 }
   0x3   :  { %s47_s26 = sshll.u32 %s5545_s25, 4  ;;  %p5446_p0 = scmp.ne.s32.totalorder %s8368_s5, %s5445_s29  ;;  %s48_s26 = int_to_ptr.vmem [resolvable:$true] %s47_s26 }
   0x4   :  { %p5449_p1 = scmp.lt.u32.totalorder %s5445_s29, %s8368_s5 }
   0x6   :  { %p5451_p2 = pnand %p5449_p1, %p5446_p0 }
   0x8   :  { %5454 = shalt.err (!%p5451_p2)
}
   0x9   :  { %s5455_s17 = scalar_lea.vmem %s48_s26, 4096  ;;  %p5460_p4 = scmp.lt.s32.totalorder %s48_s26, %s48_s26 }
   0xa   :  { %p5456_p3 = scmp.ne.s32.totalorder %s48_s26, %s5455_s17  ;;  %p5461_p5 = scmp.lt.s32.totalorder %s5455_s17, %s5455_s17 }
   0xc   :  { %p5462_p6 = por %p5461_p5, %p5460_p4 }
   0xe   :  { %p5463_p7 = pnand %p5462_p6, %p5456_p3 }
  0x10   :  { %5466 = shalt.err (!%p5463_p7)
}
  0x11   :  { %s5546_s18 = smov 128   ;;  %s5547_s19 = smov 8  }
  0x12   :  { %53 = dma.hbm_to_vmem [thread:$0]  %s8368_s5, 4096, %s48_s26, [#allocation11], %s5546_s18, %s5546_s18, %s5547_s19  }
  0x13   :  { %s5548_s22 = smov [#allocation7]   ;;  %s5467_s27 = scalar_lea.hbm %s8364_s1, 2048 }
  0x14   :  { %s29_s23 = sshll.u32 %s5548_s22, 4  ;;  %p5468_p8 = scmp.ne.s32.totalorder %s8364_s1, %s5467_s27  ;;  %s30_s23 = int_to_ptr.vmem [resolvable:$true] %s29_s23 }
  0x15   :  { %p5471_p9 = scmp.lt.u32.totalorder %s5467_s27, %s8364_s1 }
  0x17   :  { %p5473_p10 = pnand %p5471_p9, %p5468_p8 }
  0x19   :  { %5476 = shalt.err (!%p5473_p10)
}
  0x1a   :  { %s5477_s15 = scalar_lea.vmem %s30_s23, 2048  ;;  %p5482_p12 = scmp.lt.s32.totalorder %s30_s23, %s30_s23 }
  0x1b   :  { %p5478_p11 = scmp.ne.s32.totalorder %s30_s23, %s5477_s15  ;;  %p5483_p13 = scmp.lt.s32.totalorder %s5477_s15, %s5477_s15 }
  0x1d   :  { %p5484_p0 = por %p5483_p13, %p5482_p12 }
  0x1f   :  { %p5485_p1 = pnand %p5484_p0, %p5478_p11 }
  0x21   :  { %5488 = shalt.err (!%p5485_p1)
}
  0x22   :  { %s5549_s5 = smov 256   ;;  %s5550_s26 = smov 16  }
  0x23   :  { %35 = dma.hbm_to_vmem [thread:$0]  %s8364_s1, 2048, %s30_s23, [#allocation8], %s5549_s5, %s5549_s5, %s5550_s26  }
  0x24   :  { %s5551_s20 = smov [#allocation12]   ;;  %s5489_s25 = scalar_lea.hbm %s8369_s6, 4096 }
  0x25   :  { %s59_s21 = sshll.u32 %s5551_s20, 4  ;;  %p5490_p2 = scmp.ne.s32.totalorder %s8369_s6, %s5489_s25  ;;  %s60_s21 = int_to_ptr.vmem [resolvable:$true] %s59_s21 }
  0x26   :  { %p5493_p3 = scmp.lt.u32.totalorder %s5489_s25, %s8369_s6 }
  0x28   :  { %p5495_p4 = pnand %p5493_p3, %p5490_p2 }
  0x2a   :  { %5498 = shalt.err (!%p5495_p4)
}
  0x2b   :  { %s5499_s14 = scalar_lea.vmem %s60_s21, 4096  ;;  %p5504_p6 = scmp.lt.s32.totalorder %s60_s21, %s60_s21 }
  0x2c   :  { %p5500_p5 = scmp.ne.s32.totalorder %s60_s21, %s5499_s14  ;;  %p5505_p7 = scmp.lt.s32.totalorder %s5499_s14, %s5499_s14 }
  0x2e   :  { %p5506_p8 = por %p5505_p7, %p5504_p6 }
  0x30   :  { %p5507_p9 = pnand %p5506_p8, %p5500_p5 }
  0x32   :  { %5510 = shalt.err (!%p5507_p9)
}
  0x33   :  { %65 = dma.hbm_to_vmem [thread:$0]  %s8369_s6, 4096, %s60_s21, [#allocation11], %s5546_s18, %s5546_s18, %s5547_s19  }
  0x34   :  { %5533 = dma.done.wait [#allocation8], 2048  }
  0x35   :  { %5534 = vsyncadd [#allocation8], 4294965248 }
  0x36   :  { %5535 = dma.done.wait [#allocation11], 8192  }
  0x37   :  { %5536 = vsyncadd [#allocation11], 4294959104  ;;  %s84_s15 = sld [smem:[#allocation0]]   ;;  %s5552_s5 = smov 1024   ;;  %v239_v36 = vlaneseq  ;;  %vm532_vm0 = vcmask 1041409   ;;  %vm534_vm1 = vcmask 1042434  }
  0x38   :  { %96 = sst [smem:[#allocation15]] %s5552_s5  ;;  %s5553_s26 = smov [#allocation2]   ;;  %vm536_vm2 = vcmask 1043459   ;;  %vm538_vm3 = vcmask 1044484   ;;  %vm540_vm4 = vcmask 1045509   ;;  %vm542_vm5 = vcmask 1046534  }
  0x39   :  { %98 = sst [smem:[#allocation15 + $0x1]] %s5552_s5  ;;  %s92_s16 = sshll.u32 %s5553_s26, 4  ;;  %v5826_v37 = vshrl.u32 %v239_v36, 7  ;;  %vm544_vm6 = vcmask 1047559   ;;  %vm547_vm7 = vcmask 64512   ;;  %s93_s16 = int_to_ptr.vmem [resolvable:$true] %s92_s16 }
  0x3a   :  { %100 = sst [smem:[#allocation15 + $0x2]] %s5547_s19  ;;  %s5554_s17 = smov 64  }
  0x3b   :  { %102 = sst [smem:[#allocation15 + $0x3]] %s5554_s17  ;;  %s5555_s20 = smov 2   ;;  %v5829_v38 = vsub.s32 0, %v5826_v37  ;;  %v5835_v40 = vsub.s32 1, %v5826_v37 }
  0x3c   :  { %104 = sst [smem:[#allocation15 + $0x4]] %s5546_s18  ;;  %s5556_s22 = smov 512  }
  0x3d   :  { %110 = sst [smem:[#allocation15 + $0x7]] %s5554_s17  ;;  %s4494_s6 = sshll.u32 %s84_s15, 26 }
  0x3e   :  { %106 = sst [smem:[#allocation15 + $0x5]] %s5555_s20  ;;  %s5687_s21 = sadd.s32 134217728, %s4494_s6 }
  0x3f   :  { %108 = sst [smem:[#allocation15 + $0x6]] %s5556_s22  ;;  %s5557_s24 = smov 4  }
  0x40   :  { %112 = sst [smem:[#allocation15 + $0x8]] %s5557_s24  ;;  %s5558_s25 = smov [#allocation5]  }
  0x41   :  { %s5559_s27 = smov [#allocation14]   ;;  %s5560_s30 = smov [#allocation3]  }
  0x42   :  { %114 = dma.general %s8371_s8, 16384, %s93_s16, %s5558_s25, %s5559_s27, [#allocation15], %s5687_s21, 0  }
  0x43   :  { %131 = sst [smem:[#allocation17]] %s5552_s5  ;;  %s127_s14 = sshll.u32 %s5560_s30, 4  ;;  %s128_s14 = int_to_ptr.vmem [resolvable:$true] %s127_s14 }
  0x44   :  { %133 = sst [smem:[#allocation17 + $0x1]] %s5552_s5  ;;  %s5561_s8 = smov [#allocation5 + $0x1]  }
  0x45   :  { %135 = sst [smem:[#allocation17 + $0x2]] %s5547_s19  ;;  %s5562_s1 = smov [#allocation16]  }
  0x46   :  { %137 = sst [smem:[#allocation17 + $0x3]] %s5554_s17  ;;  %s5563_s26 = smov [#allocation4]  }
  0x47   :  { %139 = sst [smem:[#allocation17 + $0x4]] %s5546_s18  ;;  %s162_s16 = sshll.u32 %s5563_s26, 4  ;;  %s163_s16 = int_to_ptr.vmem [resolvable:$true] %s162_s16 }
  0x48   :  { %141 = sst [smem:[#allocation17 + $0x5]] %s5555_s20  ;;  %s5565_s6 = smov [#allocation18]  }
  0x49   :  { %143 = sst [smem:[#allocation17 + $0x6]] %s5556_s22 }
  0x4a   :  { %145 = sst [smem:[#allocation17 + $0x7]] %s5554_s17 }
  0x4b   :  { %147 = sst [smem:[#allocation17 + $0x8]] %s5557_s24 }
  0x4c   :  { %149 = dma.general %s8372_s9, 8192, %s128_s14, %s5561_s8, %s5562_s1, [#allocation17], %s5687_s21, 0  }
  0x4d   :  { %166 = sst [smem:[#allocation19]] %s5552_s5  ;;  %s5564_s9 = smov [#allocation5 + $0x2]  }
  0x4e   :  { %168 = sst [smem:[#allocation19 + $0x1]] %s5552_s5 }
  0x4f   :  { %170 = sst [smem:[#allocation19 + $0x2]] %s5547_s19 }
  0x50   :  { %172 = sst [smem:[#allocation19 + $0x3]] %s5554_s17 }
  0x51   :  { %174 = sst [smem:[#allocation19 + $0x4]] %s5546_s18 }
  0x52   :  { %176 = sst [smem:[#allocation19 + $0x5]] %s5555_s20 }
  0x53   :  { %178 = sst [smem:[#allocation19 + $0x6]] %s5556_s22 }
  0x54   :  { %180 = sst [smem:[#allocation19 + $0x7]] %s5554_s17 }
  0x55   :  { %182 = sst [smem:[#allocation19 + $0x8]] %s5557_s24 }
  0x56   :  { %184 = dma.general %s8373_s10, 16384, %s163_s16, %s5564_s9, %s5565_s6, [#allocation19], %s5687_s21, 0  }
  0x57   :  { %v4763_v0 = vld [vmem:[%s8366_s3 + $0x4] ss:$8 sps:$4 sm:$0xff]   ;;  %v4765_v1 = vld [vmem:[%s8366_s3] ss:$8 sps:$4 sm:$0xff]   ;;  %v4766_v2 = vld [vmem:[%s8366_s3 + $0x14] ss:$8 sps:$4 sm:$0xff]  }
  0x58   :  { %409 = vmatprep.subr.bf16.mxu0 %v4763_v0  ;;  %v4768_v3 = vld [vmem:[%s8366_s3 + $0x10] ss:$8 sps:$4 sm:$0xff]   ;;  %v4769_v4 = vld [vmem:[%s8366_s3 + $0x24] ss:$8 sps:$4 sm:$0xff]   ;;  %v4771_v5 = vld [vmem:[%s8366_s3 + $0x20] ss:$8 sps:$4 sm:$0xff]  }
  0x59   :  { %410 = vmatpush1.bf16.msra.mxu0 %v4765_v1  ;;  %v4772_v6 = vld [vmem:[%s8366_s3 + $0x34] ss:$8 sps:$4 sm:$0xff]   ;;  %v4774_v7 = vld [vmem:[%s8366_s3 + $0x30] ss:$8 sps:$4 sm:$0xff]   ;;  %v4775_v8 = vld [vmem:[%s8366_s3 + $0x44] ss:$8 sps:$4 sm:$0xff]  }
  0x5a   :  { %411 = vmatprep.subr.bf16.mxu0 %v4766_v2  ;;  %v4777_v9 = vld [vmem:[%s8366_s3 + $0x40] ss:$8 sps:$4 sm:$0xff]   ;;  %v4778_v10 = vld [vmem:[%s8366_s3 + $0x54] ss:$8 sps:$4 sm:$0xff]   ;;  %v4780_v11 = vld [vmem:[%s8366_s3 + $0x50] ss:$8 sps:$4 sm:$0xff]  }
  0x5b   :  { %v4781_v12 = vld [vmem:[%s8366_s3 + $0x64] ss:$8 sps:$4 sm:$0xff]   ;;  %v4783_v13 = vld [vmem:[%s8366_s3 + $0x60] ss:$8 sps:$4 sm:$0xff]   ;;  %v4784_v15 = vld [vmem:[%s8366_s3 + $0x74] ss:$8 sps:$4 sm:$0xff]  }
  0x5c   :  { %v202_v14 = vld [vmem:[%s8365_s2 + $0x8] sm:$0xff]  ;;  %v4786_v17 = vld [vmem:[%s8366_s3 + $0x70] ss:$8 sps:$4 sm:$0xff]   ;;  %v4790_v20 = vld [vmem:[%s8366_s3 + $0x94] ss:$8 sps:$4 sm:$0xff]  }
  0x5d   :  { %412 = vmatpush1.bf16.msra.mxu0 %v4768_v3  ;;  %v204_v16 = vpack.c.bf16 %v202_v14, %v202_v14  ;;  %v4787_v18 = vld [vmem:[%s8366_s3 + $0x84] ss:$8 sps:$4 sm:$0xff]   ;;  %v4789_v19 = vld [vmem:[%s8366_s3 + $0x80] ss:$8 sps:$4 sm:$0xff]   ;;  %v4792_v21 = vld [vmem:[%s8366_s3 + $0x90] ss:$8 sps:$4 sm:$0xff]  }
  0x5e   :  { %413 = vmatprep.subr.bf16.mxu0 %v4769_v4  ;;  %v4793_v22 = vld [vmem:[%s8366_s3 + $0xa4] ss:$8 sps:$4 sm:$0xff]   ;;  %v4795_v23 = vld [vmem:[%s8366_s3 + $0xa0] ss:$8 sps:$4 sm:$0xff]   ;;  %v4796_v24 = vld [vmem:[%s8366_s3 + $0xb4] ss:$8 sps:$4 sm:$0xff]  }
  0x5f   :  { %441 = vmatprep.mubr.bf16.mxu0 %v204_v16  ;;  %1070 = vmatprep.mubr.bf16.mxu1 %v204_v16  ;;  %v4798_v25 = vld [vmem:[%s8366_s3 + $0xb0] ss:$8 sps:$4 sm:$0xff]   ;;  %v4799_v26 = vld [vmem:[%s8366_s3 + $0xc4] ss:$8 sps:$4 sm:$0xff]   ;;  %v4801_v27 = vld [vmem:[%s8366_s3 + $0xc0] ss:$8 sps:$4 sm:$0xff]  }
  0x60   :  { %v4802_v28 = vld [vmem:[%s8366_s3 + $0xd4] ss:$8 sps:$4 sm:$0xff]   ;;  %v4804_v29 = vld [vmem:[%s8366_s3 + $0xd0] ss:$8 sps:$4 sm:$0xff]   ;;  %v4805_v30 = vld [vmem:[%s8366_s3 + $0xe4] ss:$8 sps:$4 sm:$0xff]  }
  0x61   :  { %414 = vmatpush1.bf16.msra.mxu0 %v4771_v5  ;;  %v4807_v31 = vld [vmem:[%s8366_s3 + $0xe0] ss:$8 sps:$4 sm:$0xff]   ;;  %v4808_v32 = vld [vmem:[%s8366_s3 + $0xf4] ss:$8 sps:$4 sm:$0xff]   ;;  %v4810_v33 = vld [vmem:[%s8366_s3 + $0xf0] ss:$8 sps:$4 sm:$0xff]  }
  0x62   :  { %415 = vmatprep.subr.bf16.mxu0 %v4772_v6  ;;  %v201_v34 = vld [vmem:[%s8365_s2] sm:$0xff]  ;;  %v5843_v45 = vld [vmem:[#allocation7 + $0x30] sm:$0xff]  ;;  %v5845_v47 = vld [vmem:[#allocation7 + $0x28] sm:$0xff] }
  0x63   :  { %v5823_v35 = vpack.c.bf16 %v201_v34, %v201_v34  ;;  %v237_v39 = vld [vmem:[%s8367_s4] sm:$0x3]  ;;  %v5847_v48 = vld [vmem:[#allocation7 + $0x8] sm:$0xff]  ;;  %v5849_v49 = vld [vmem:[#allocation7 + $0x10] sm:$0xff] }
  0x64   :  { %v242_v41 = vrot.slane %v237_v39, %v5829_v38  ;;  %v246_v42 = vrot.slane %v237_v39, %v5835_v40  ;;  %v5839_v43 = vld [vmem:[#allocation7 + $0x20] sm:$0xff]  ;;  %v5851_v52 = vld [vmem:[#allocation7 + $0x38] sm:$0xff]  ;;  %v5855_v54 = vld [vmem:[#allocation7 + $0x50] sm:$0xff] }
  0x65   :  { %416 = vmatpush1.bf16.msra.mxu0 %v4774_v7  ;;  %v5841_v44 = vld [vmem:[#allocation7] sm:$0xff]  ;;  %v5853_v53 = vld [vmem:[#allocation7 + $0x18] sm:$0xff]  ;;  %v5861_v59 = vld [vmem:[#allocation7 + $0x48] sm:$0xff] }
  0x66   :  { %417 = vmatprep.subr.bf16.mxu0 %v4775_v8  ;;  %v5857_v57 = vld [vmem:[#allocation7 + $0x58] sm:$0xff]  ;;  %v5859_v58 = vld [vmem:[#allocation7 + $0x40] sm:$0xff]  ;;  %v5871_v5 = vld [vmem:[#allocation7 + $0x70] sm:$0xff] }
  0x67   :  { %v5873_v6 = vld [vmem:[#allocation7 + $0x78] sm:$0xff] }
  0x69   :  { %418 = vmatpush1.bf16.msra.mxu0 %v4777_v9 }
  0x6a   :  { %419 = vmatprep.subr.bf16.mxu0 %v4778_v10 }
  0x6d   :  { %420 = vmatpush1.bf16.msra.mxu0 %v4780_v11  ;;  %v5879_v11 = vld [vmem:[#allocation7 + $0x60] sm:$0xff] }
  0x6e   :  { %421 = vmatprep.subr.bf16.mxu0 %v4781_v12  ;;  %v5881_v12 = vld [vmem:[#allocation7 + $0x68] sm:$0xff] }
  0x71   :  { %422 = vmatpush1.bf16.msra.mxu0 %v4783_v13 }
  0x72   :  { %423 = vmatprep.subr.bf16.mxu0 %v4784_v15 }
  0x75   :  { %424 = vmatpush1.bf16.msra.mxu0 %v4786_v17 }
  0x76   :  { %425 = vmatprep.subr.bf16.mxu0 %v4787_v18 }
  0x79   :  { %426 = vmatpush1.bf16.msra.mxu0 %v4789_v19 }
  0x7a   :  { %427 = vmatprep.subr.bf16.mxu0 %v4790_v20 }
  0x7d   :  { %428 = vmatpush1.bf16.msra.mxu0 %v4792_v21 }
  0x7e   :  { %429 = vmatprep.subr.bf16.mxu0 %v4793_v22 }
  0x81   :  { %430 = vmatpush1.bf16.msra.mxu0 %v4795_v23 }
  0x82   :  { %431 = vmatprep.subr.bf16.mxu0 %v4796_v24 }
  0x85   :  { %432 = vmatpush1.bf16.msra.mxu0 %v4798_v25  ;;  %v499_v25 = vand.u32 127, %v239_v36 }
  0x86   :  { %433 = vmatprep.subr.bf16.mxu0 %v4799_v26 }
  0x89   :  { %434 = vmatpush1.bf16.msra.mxu0 %v4801_v27 }
  0x8a   :  { %435 = vmatprep.subr.bf16.mxu0 %v4802_v28  ;;  %v5888_v28 = vsub.s32 %v499_v25, %v5826_v37  ;;  %v5937_v25 = vsub.s32 6, %v5826_v37 }
  0x8d   :  { %436 = vmatpush1.bf16.msra.mxu0 %v4804_v29 }
  0x8e   :  { %437 = vmatprep.subr.bf16.mxu0 %v4805_v30 }
  0x91   :  { %438 = vmatpush1.bf16.msra.mxu0 %v4807_v31 }
  0x92   :  { %439 = vmatprep.subr.bf16.mxu0 %v4808_v32 }
  0x95   :  { %440 = vmatpush1.bf16.msra.mxu0 %v4810_v33 }
  0x98   :  { %442 = vmatmul.mubr.bf16.vlgmr.msra.gmra.mrb[0].mxu0 %v5823_v35 }
 0x16b   :  { %v443_v46 = vpop.f32.mrb[0].mxu0 }
 0x16c   :  { %v444_v50 = vadd.f32 %v443_v46, %v242_v41  ;;  %v445_v51 = vpop.f32.mrb[1].mxu0 }
 0x16d   :  { %v446_v55 = vadd.f32 %v445_v51, %v246_v42  ;;  %v447_v56 = vpop.f32.mrb[2].mxu0 }
 0x16e   :  { %v448_v60 = vpop.f32.mrb[3].mxu0  ;;  %v454_v61 = vmul.f32 %v444_v50, %v5839_v43  ;;  %v450_v62 = vmul.f32 %v444_v50, %v5841_v44  ;;  %v456_v63 = vmul.f32 %v444_v50, %v5843_v45  ;;  %v452_v0 = vmul.f32 %v444_v50, %v5849_v49 }
 0x16f   :  { %v455_v1 = vmul.f32 %v446_v55, %v5845_v47  ;;  %v451_v2 = vmul.f32 %v446_v55, %v5847_v48  ;;  %v457_v3 = vmul.f32 %v446_v55, %v5851_v52  ;;  %v453_v4 = vmul.f32 %v446_v55, %v5853_v53 }
 0x170   :  { %v460_v7 = vmul.f32 %v444_v50, %v5855_v54  ;;  %v461_v8 = vmul.f32 %v446_v55, %v5857_v57  ;;  %v458_v9 = vmul.f32 %v444_v50, %v5859_v58  ;;  %v459_v10 = vmul.f32 %v446_v55, %v5861_v59 }
 0x171   :  { %v472_v13 = vadd.f32 %v455_v1, %v454_v61  ;;  %v466_v14 = vadd.f32 %v451_v2, %v450_v62  ;;  %v475_v15 = vadd.f32 %v457_v3, %v456_v63  ;;  %v469_v16 = vadd.f32 %v453_v4, %v452_v0 }
 0x172   :  { %v481_v17 = vadd.f32 %v461_v8, %v460_v7  ;;  %v478_v18 = vadd.f32 %v459_v10, %v458_v9  ;;  %v464_v19 = vmul.f32 %v444_v50, %v5871_v5  ;;  %v465_v20 = vmul.f32 %v446_v55, %v5873_v6 }
 0x173   :  { %473 = vadd.xlane.f32.xlu1 %v472_v13  ;;  %467 = vadd.xlane.f32.xlu0 %v466_v14  ;;  %v462_v21 = vmul.f32 %v444_v50, %v5879_v11  ;;  %v463_v22 = vmul.f32 %v446_v55, %v5881_v12  ;;  %v8377_v3 = vmov 0   ;;  %v5909_v4 = vsub.s32 2, %v5826_v37 }
 0x174   :  { %v487_v23 = vadd.f32 %v465_v20, %v464_v19  ;;  %4762 = vset.pattern.permute.xlu0 %v8377_v3  ;;  %4761 = vset.pattern.permute.xlu1 %v8377_v3  ;;  %v5912_v7 = vsub.s32 3, %v5826_v37 }
 0x175   :  { %v484_v24 = vadd.f32 %v463_v22, %v462_v21  ;;  %v5930_v21 = vsub.s32 5, %v5826_v37 }
 0x177   :  { %476 = vadd.xlane.f32.xlu1 %v475_v15  ;;  %470 = vadd.xlane.f32.xlu0 %v469_v16  ;;  %v5922_v16 = vsub.s32 4, %v5826_v37 }
 0x17b   :  { %482 = vadd.xlane.f32.xlu1 %v481_v17  ;;  %479 = vadd.xlane.f32.xlu0 %v478_v18 }
 0x17f   :  { %488 = vadd.xlane.f32.xlu1 %v487_v23  ;;  %485 = vadd.xlane.f32.xlu0 %v484_v24 }
 0x200   :  { %v474_v26 = vpop.xlane.xlu1 %473  ;;  %v468_v27 = vpop.xlane.xlu0 %467 }
 0x201   :  { %v503_v31 = vrot.slane %v468_v27, %v5888_v28  ;;  %v511_v33 = vrot.slane %v474_v26, %v5888_v28 }
 0x204   :  { %v477_v29 = vpop.xlane.xlu1 %476  ;;  %v471_v30 = vpop.xlane.xlu0 %470 }
 0x205   :  { %v507_v32 = vrot.slane %v471_v30, %v5888_v28  ;;  %v515_v34 = vrot.slane %v477_v29, %v5888_v28 }
 0x207   :  { %v533_v36 = vsel %vm532_vm0, %v507_v32, %v503_v31  ;;  %v5944_v31 = vsub.s32 7, %v5826_v37 }
 0x208   :  { %v535_v39 = vsel %vm534_vm1, %v511_v33, %v533_v36  ;;  %v483_v41 = vpop.xlane.xlu1 %482  ;;  %v480_v42 = vpop.xlane.xlu0 %479 }
 0x209   :  { %v537_v46 = vsel %vm536_vm2, %v515_v34, %v535_v39  ;;  %v519_v50 = vrot.slane %v480_v42, %v5888_v28  ;;  %v523_v51 = vrot.slane %v483_v41, %v5888_v28 }
 0x20b   :  { %v539_v55 = vsel %vm538_vm3, %v519_v50, %v537_v46 }
 0x20c   :  { %v489_v56 = vpop.xlane.xlu1 %488  ;;  %v486_v60 = vpop.xlane.xlu0 %485  ;;  %v541_v63 = vsel %vm540_vm4, %v523_v51, %v539_v55 }
 0x20d   :  { %v531_v61 = vrot.slane %v489_v56, %v5888_v28  ;;  %v527_v62 = vrot.slane %v486_v60, %v5888_v28 }
 0x20f   :  { %v543_v0 = vsel %vm542_vm5, %v527_v62, %v541_v63 }
 0x210   :  { %v545_v1 = vsel %vm544_vm6, %v531_v61, %v543_v0 }
 0x211   :  { %v548_v2 = vsel %vm547_vm7, %v545_v1, -inf }
 0x212   :  { %549 = vmax.xlane.f32.xlu0 %v548_v2 }
 0x29f   :  { %v550_v8 = vpop.xlane.xlu0 %549 }
 0x2a0   :  { %v555_v9 = vrot.slane %v550_v8, %v5829_v38  ;;  %v559_v10 = vrot.slane %v550_v8, %v5835_v40  ;;  %v563_v13 = vrot.slane %v550_v8, %v5909_v4  ;;  %v567_v17 = vrot.slane %v550_v8, %v5912_v7 }
 0x2a1   :  { %v571_v22 = vrot.slane %v550_v8, %v5922_v16  ;;  %v579_v32 = vrot.slane %v550_v8, %v5937_v25  ;;  %v583_v39 = vrot.slane %v550_v8, %v5944_v31 }
 0x2a2   :  { %v5917_v14 = vsub.f32 %v468_v27, %v555_v9  ;;  %v5919_v15 = vsub.f32 %v471_v30, %v559_v10  ;;  %v5925_v18 = vsub.f32 %v474_v26, %v563_v13  ;;  %v5933_v23 = vsub.f32 %v477_v29, %v567_v17 }
 0x2a3   :  { %v575_v26 = vrot.slane %v550_v8, %v5930_v21  ;;  %v5940_v27 = vsub.f32 %v480_v42, %v571_v22  ;;  %v5951_v42 = vsub.f32 %v486_v60, %v579_v32  ;;  %v5954_v50 = vsub.f32 %v489_v56, %v583_v39 }
 0x2a4   :  { %v600_v19 = vmul.f32 1.442695, %v5917_v14  ;;  %v602_v20 = vmul.f32 1.442695, %v5919_v15  ;;  %v604_v24 = vmul.f32 1.442695, %v5925_v18 }
 0x2a5   :  { %v606_v30 = vmul.f32 1.442695, %v5933_v23  ;;  %v5947_v29 = vsub.f32 %v483_v41, %v575_v26  ;;  %v608_v33 = vmul.f32 1.442695, %v5940_v27  ;;  %v612_v41 = vmul.f32 1.442695, %v5951_v42 }
 0x2a6   :  { %4907 = vpow2.f32 %v602_v20  ;;  %v614_v55 = vmul.f32 1.442695, %v5954_v50 }
 0x2a7   :  { %4909 = vpow2.f32 %v600_v19  ;;  %v610_v46 = vmul.f32 1.442695, %v5947_v29 }
 0x2a8   :  { %4911 = vpow2.f32 %v604_v24 }
 0x2a9   :  { %4913 = vpow2.f32 %v606_v30 }
 0x2aa   :  { %4915 = vpow2.f32 %v608_v33 }
 0x2ab   :  { %4917 = vpow2.f32 %v610_v46 }
 0x2ac   :  { %4919 = vpow2.f32 %v612_v41 }
 0x2ad   :  { %4921 = vpow2.f32 %v614_v55  ;;  %v4811_v55 = vld [vmem:[#allocation12 + $0x4] ss:$8 sps:$4 sm:$0xff]  }
 0x2ae   :  { %1038 = vmatprep.subr.bf16.mxu1 %v4811_v55  ;;  %v4855_v55 = vld [vmem:[#allocation12 + $0x70] ss:$8 sps:$4 sm:$0xff]  }
 0x2b0   :  { %v4908_v34 = vpop.eup %4907 }
 0x2b1   :  { %v4910_v36 = vpop.eup %4909  ;;  %628 = vperm.xlu0 %4762, %v4908_v34  }
 0x2b2   :  { %625 = vperm.xlu1 %4761, %v4910_v36   ;;  %v4912_v37 = vpop.eup %4911 }
 0x2b3   :  { %v4914_v51 = vpop.eup %4913 }
 0x2b4   :  { %v4916_v61 = vpop.eup %4915 }
 0x2b5   :  { %v4918_v60 = vpop.eup %4917 }
 0x2b6   :  { %631 = vperm.xlu1 %4761, %v4912_v37   ;;  %v4920_v62 = vpop.eup %4919 }
 0x2b7   :  { %v4922_v63 = vpop.eup %4921 }
 0x2ba   :  { %634 = vperm.xlu1 %4761, %v4914_v51  }
 0x2be   :  { %637 = vperm.xlu1 %4761, %v4916_v61   ;;  %v4813_v61 = vld [vmem:[#allocation12] ss:$8 sps:$4 sm:$0xff]  }
 0x2bf   :  { %1039 = vmatpush1.bf16.msra.mxu1 %v4813_v61  ;;  %v4856_v61 = vld [vmem:[#allocation10 + $0x70] ss:$8 sps:$4 sm:$0xff]  }
 0x2c2   :  { %640 = vperm.xlu1 %4761, %v4918_v60   ;;  %v4814_v60 = vld [vmem:[#allocation10] ss:$8 sps:$4 sm:$0xff]  }
 0x2c6   :  { %643 = vperm.xlu1 %4761, %v4920_v62   ;;  %v4816_v62 = vld [vmem:[#allocation10 + $0x4] ss:$8 sps:$4 sm:$0xff]  }
 0x2c7   :  { %1239 = vmatprep.subr.bf16.mxu0 %v4816_v62 }
 0x2c8   :  { %1240 = vmatpush1.bf16.msra.mxu0 %v4814_v60 }
 0x2ca   :  { %646 = vperm.xlu1 %4761, %v4922_v63   ;;  %v4817_v63 = vld [vmem:[#allocation12 + $0x14] ss:$8 sps:$4 sm:$0xff]  }
 0x2cb   :  { %1040 = vmatprep.subr.bf16.mxu1 %v4817_v63 }
 0x330   :  { %v629_v8 = vpop.permute.xlu0 %628 }
 0x331   :  { %v626_v0 = vpop.permute.xlu1 %625  ;;  %v655_v10 = vrot.slane %v629_v8, %v5888_v28  ;;  %v4825_v8 = vld [vmem:[#allocation12 + $0x20] ss:$8 sps:$4 sm:$0xff]  }
 0x332   :  { %v651_v13 = vrot.slane %v626_v0, %v5888_v28  ;;  %v4822_v0 = vld [vmem:[#allocation10 + $0x14] ss:$8 sps:$4 sm:$0xff]  }
 0x333   :  { %1241 = vmatprep.subr.bf16.mxu0 %v4822_v0 }
 0x334   :  { %v680_v24 = vsel %vm532_vm0, %v655_v10, %v651_v13  ;;  %v4829_v10 = vld [vmem:[#allocation12 + $0x34] ss:$8 sps:$4 sm:$0xff]  }
 0x335   :  { %v632_v56 = vpop.permute.xlu1 %631  ;;  %v4834_v13 = vld [vmem:[#allocation10 + $0x34] ss:$8 sps:$4 sm:$0xff]  }
 0x336   :  { %v659_v17 = vrot.slane %v632_v56, %v5888_v28  ;;  %v4819_v56 = vld [vmem:[#allocation12 + $0x10] ss:$8 sps:$4 sm:$0xff]  }
 0x337   :  { %1041 = vmatpush1.bf16.msra.mxu1 %v4819_v56 }
 0x338   :  { %v681_v30 = vsel %vm534_vm1, %v659_v17, %v680_v24  ;;  %v4831_v17 = vld [vmem:[#allocation12 + $0x30] ss:$8 sps:$4 sm:$0xff]   ;;  %v4837_v24 = vld [vmem:[#allocation12 + $0x40] ss:$8 sps:$4 sm:$0xff]  }
 0x339   :  { %v635_v1 = vpop.permute.xlu1 %634 }
 0x33a   :  { %v663_v19 = vrot.slane %v635_v1, %v5888_v28  ;;  %v4823_v1 = vld [vmem:[#allocation12 + $0x24] ss:$8 sps:$4 sm:$0xff]  }
 0x33b   :  { %1042 = vmatprep.subr.bf16.mxu1 %v4823_v1  ;;  %v4859_v1 = vld [vmem:[#allocation12 + $0x84] ss:$8 sps:$4 sm:$0xff]  }
 0x33c   :  { %v682_v33 = vsel %vm536_vm2, %v663_v19, %v681_v30  ;;  %1043 = vmatpush1.bf16.msra.mxu1 %v4825_v8  ;;  %v4832_v19 = vld [vmem:[#allocation10 + $0x30] ss:$8 sps:$4 sm:$0xff]   ;;  %v4841_v30 = vld [vmem:[#allocation12 + $0x54] ss:$8 sps:$4 sm:$0xff]   ;;  %v4862_v8 = vld [vmem:[#allocation10 + $0x80] ss:$8 sps:$4 sm:$0xff]  }
 0x33d   :  { %v638_v2 = vpop.permute.xlu1 %637  ;;  %1044 = vmatprep.subr.bf16.mxu1 %v4829_v10 }
 0x33e   :  { %v667_v20 = vrot.slane %v638_v2, %v5888_v28  ;;  %v4828_v2 = vld [vmem:[#allocation10 + $0x24] ss:$8 sps:$4 sm:$0xff]  }
 0x340   :  { %v683_v34 = vsel %vm538_vm3, %v667_v20, %v682_v33  ;;  %v4835_v20 = vld [vmem:[#allocation12 + $0x44] ss:$8 sps:$4 sm:$0xff]   ;;  %1045 = vmatpush1.bf16.msra.mxu1 %v4831_v17  ;;  %v4843_v33 = vld [vmem:[#allocation12 + $0x50] ss:$8 sps:$4 sm:$0xff]  }
 0x341   :  { %v641_v9 = vpop.permute.xlu1 %640  ;;  %1046 = vmatprep.subr.bf16.mxu1 %v4835_v20  ;;  %v4867_v20 = vld [vmem:[#allocation12 + $0x90] ss:$8 sps:$4 sm:$0xff]  }
 0x342   :  { %v671_v26 = vrot.slane %v641_v9, %v5888_v28  ;;  %v4826_v9 = vld [vmem:[#allocation10 + $0x20] ss:$8 sps:$4 sm:$0xff]  }
 0x344   :  { %v684_v39 = vsel %vm540_vm4, %v671_v26, %v683_v34  ;;  %v4838_v26 = vld [vmem:[#allocation10 + $0x40] ss:$8 sps:$4 sm:$0xff]   ;;  %1047 = vmatpush1.bf16.msra.mxu1 %v4837_v24  ;;  %v4844_v34 = vld [vmem:[#allocation10 + $0x50] ss:$8 sps:$4 sm:$0xff]   ;;  %v4870_v24 = vld [vmem:[#allocation10 + $0x94] ss:$8 sps:$4 sm:$0xff]  }
 0x345   :  { %v644_v22 = vpop.permute.xlu1 %643  ;;  %1048 = vmatprep.subr.bf16.mxu1 %v4841_v30  ;;  %v4871_v30 = vld [vmem:[#allocation12 + $0xa4] ss:$8 sps:$4 sm:$0xff]  }
 0x346   :  { %v675_v32 = vrot.slane %v644_v22, %v5888_v28  ;;  %v4840_v22 = vld [vmem:[#allocation10 + $0x44] ss:$8 sps:$4 sm:$0xff]  }
 0x348   :  { %v685_v37 = vsel %vm542_vm5, %v675_v32, %v684_v39  ;;  %v4846_v32 = vld [vmem:[#allocation10 + $0x54] ss:$8 sps:$4 sm:$0xff]   ;;  %v4852_v39 = vld [vmem:[#allocation10 + $0x64] ss:$8 sps:$4 sm:$0xff]   ;;  %1049 = vmatpush1.bf16.msra.mxu1 %v4843_v33 }
 0x349   :  { %v647_v36 = vpop.permute.xlu1 %646  ;;  %v4876_v33 = vld [vmem:[#allocation10 + $0xa4] ss:$8 sps:$4 sm:$0xff]  }
 0x34a   :  { %v679_v46 = vrot.slane %v647_v36, %v5888_v28  ;;  %v4820_v28 = vld [vmem:[#allocation10 + $0x10] ss:$8 sps:$4 sm:$0xff]   ;;  %v4847_v36 = vld [vmem:[#allocation12 + $0x64] ss:$8 sps:$4 sm:$0xff]  }
 0x34b   :  { %1242 = vmatpush1.bf16.msra.mxu0 %v4820_v28  ;;  %1050 = vmatprep.subr.bf16.mxu1 %v4847_v36 }
 0x34c   :  { %v686_v41 = vsel %vm544_vm6, %v679_v46, %v685_v37  ;;  %1243 = vmatprep.subr.bf16.mxu0 %v4828_v2  ;;  %v4849_v46 = vld [vmem:[#allocation12 + $0x60] ss:$8 sps:$4 sm:$0xff]  }
 0x34d   :  { %v688_v51 = vsel %vm547_vm7, %v686_v41, 0.0  ;;  %v4850_v37 = vld [vmem:[#allocation10 + $0x60] ss:$8 sps:$4 sm:$0xff]   ;;  %v4853_v41 = vld [vmem:[#allocation12 + $0x74] ss:$8 sps:$4 sm:$0xff]   ;;  %1051 = vmatpush1.bf16.msra.mxu1 %v4849_v46 }
 0x34e   :  { %689 = vadd.xlane.f32.xlu1 %v688_v51  ;;  %v4858_v51 = vld [vmem:[#allocation10 + $0x74] ss:$8 sps:$4 sm:$0xff]   ;;  %1052 = vmatprep.subr.bf16.mxu1 %v4853_v41  ;;  %v4861_v2 = vld [vmem:[#allocation12 + $0x80] ss:$8 sps:$4 sm:$0xff]   ;;  %v4880_v46 = vld [vmem:[#allocation10 + $0xb0] ss:$8 sps:$4 sm:$0xff]  }
 0x34f   :  { %1244 = vmatpush1.bf16.msra.mxu0 %v4826_v9  ;;  %v4864_v9 = vld [vmem:[#allocation10 + $0x84] ss:$8 sps:$4 sm:$0xff]  }
 0x350   :  { %1245 = vmatprep.subr.bf16.mxu0 %v4834_v13 }
 0x351   :  { %1053 = vmatpush1.bf16.msra.mxu1 %v4855_v55  ;;  %v4883_v55 = vld [vmem:[#allocation12 + $0xc4] ss:$8 sps:$4 sm:$0xff]  }
 0x352   :  { %1054 = vmatprep.subr.bf16.mxu1 %v4859_v1  ;;  %v4894_v1 = vld [vmem:[#allocation10 + $0xd4] ss:$8 sps:$4 sm:$0xff]  }
 0x353   :  { %1246 = vmatpush1.bf16.msra.mxu0 %v4832_v19  ;;  %v4865_v19 = vld [vmem:[#allocation12 + $0x94] ss:$8 sps:$4 sm:$0xff]  }
 0x354   :  { %1247 = vmatprep.subr.bf16.mxu0 %v4840_v22  ;;  %v4868_v22 = vld [vmem:[#allocation10 + $0x90] ss:$8 sps:$4 sm:$0xff]  }
 0x355   :  { %1055 = vmatpush1.bf16.msra.mxu1 %v4861_v2 }
 0x356   :  { %1056 = vmatprep.subr.bf16.mxu1 %v4865_v19 }
 0x357   :  { %1248 = vmatpush1.bf16.msra.mxu0 %v4838_v26 }
 0x358   :  { %1249 = vmatprep.subr.bf16.mxu0 %v4846_v32  ;;  %v4873_v32 = vld [vmem:[#allocation12 + $0xa0] ss:$8 sps:$4 sm:$0xff]  }
 0x359   :  { %1057 = vmatpush1.bf16.msra.mxu1 %v4867_v20 }
 0x35a   :  { %1058 = vmatprep.subr.bf16.mxu1 %v4871_v30 }
 0x35b   :  { %1250 = vmatpush1.bf16.msra.mxu0 %v4844_v34 }
 0x35c   :  { %1251 = vmatprep.subr.bf16.mxu0 %v4852_v39  ;;  %v4877_v39 = vld [vmem:[#allocation12 + $0xb4] ss:$8 sps:$4 sm:$0xff]  }
 0x35d   :  { %1059 = vmatpush1.bf16.msra.mxu1 %v4873_v32 }
 0x35e   :  { %1060 = vmatprep.subr.bf16.mxu1 %v4877_v39 }
 0x35f   :  { %1252 = vmatpush1.bf16.msra.mxu0 %v4850_v37  ;;  %v4882_v37 = vld [vmem:[#allocation10 + $0xb4] ss:$8 sps:$4 sm:$0xff]  }
 0x360   :  { %1253 = vmatprep.subr.bf16.mxu0 %v4858_v51 }
 0x363   :  { %1254 = vmatpush1.bf16.msra.mxu0 %v4856_v61  ;;  %v4886_v61 = vld [vmem:[#allocation10 + $0xc0] ss:$8 sps:$4 sm:$0xff]  }
 0x364   :  { %1255 = vmatprep.subr.bf16.mxu0 %v4864_v9  ;;  %v4897_v9 = vld [vmem:[#allocation12 + $0xe0] ss:$8 sps:$4 sm:$0xff]  }
 0x367   :  { %1256 = vmatpush1.bf16.msra.mxu0 %v4862_v8  ;;  %v4895_v8 = vld [vmem:[#allocation12 + $0xe4] ss:$8 sps:$4 sm:$0xff]  }
 0x368   :  { %1257 = vmatprep.subr.bf16.mxu0 %v4870_v24 }
 0x36b   :  { %1258 = vmatpush1.bf16.msra.mxu0 %v4868_v22 }
 0x36c   :  { %1259 = vmatprep.subr.bf16.mxu0 %v4876_v33 }
 0x3db   :  { %v690_v60 = vpop.xlane.xlu1 %689 }
 0x3dc   :  { %4923 = vlog2.f32 %v690_v60  ;;  %v4888_v60 = vld [vmem:[#allocation10 + $0xc4] ss:$8 sps:$4 sm:$0xff]  }
 0x3e6   :  { %v4924_v62 = vpop.eup %4923 }
 0x3e7   :  { %v5974_v63 = vmul.f32 0.6931472, %v4924_v62 }
 0x3e9   :  { %v697_v0 = vrot.slane %v5974_v63, %v5829_v38  ;;  %v701_v28 = vrot.slane %v5974_v63, %v5835_v40  ;;  %v705_v13 = vrot.slane %v5974_v63, %v5909_v4  ;;  %v709_v17 = vrot.slane %v5974_v63, %v5912_v7 }
 0x3ea   :  { %v713_v26 = vrot.slane %v5974_v63, %v5922_v16  ;;  %v717_v36 = vrot.slane %v5974_v63, %v5930_v21  ;;  %v721_v51 = vrot.slane %v5974_v63, %v5937_v25 }
 0x3eb   :  { %v734_v56 = vsub.f32 %v5917_v14, %v697_v0  ;;  %v735_v10 = vsub.f32 %v5919_v15, %v701_v28  ;;  %v736_v14 = vsub.f32 %v5925_v18, %v705_v13  ;;  %v737_v15 = vsub.f32 %v5933_v23, %v709_v17  ;;  %v4874_v18 = vld [vmem:[#allocation10 + $0xa0] ss:$8 sps:$4 sm:$0xff]   ;;  %v4879_v23 = vld [vmem:[#allocation12 + $0xb0] ss:$8 sps:$4 sm:$0xff]   ;;  %v4900_v13 = vld [vmem:[#allocation10 + $0xe4] ss:$8 sps:$4 sm:$0xff]  }
 0x3ec   :  { %v738_v34 = vsub.f32 %v5940_v27, %v713_v26  ;;  %1260 = vmatpush1.bf16.msra.mxu0 %v4874_v18  ;;  %1061 = vmatpush1.bf16.msra.mxu1 %v4879_v23  ;;  %v739_v41 = vsub.f32 %v5947_v29, %v717_v36  ;;  %v4885_v27 = vld [vmem:[#allocation12 + $0xc0] ss:$8 sps:$4 sm:$0xff]   ;;  %v740_v62 = vsub.f32 %v5951_v42, %v721_v51  ;;  %v4891_v29 = vld [vmem:[#allocation12 + $0xd0] ss:$8 sps:$4 sm:$0xff]   ;;  %v4901_v42 = vld [vmem:[#allocation12 + $0xf4] ss:$8 sps:$4 sm:$0xff]  }
 0x3ed   :  { %744 = vperm.xlu0 %4762, %v734_v56   ;;  %1261 = vmatprep.subr.bf16.mxu0 %v4882_v37  ;;  %v725_v0 = vrot.slane %v5974_v63, %v5944_v31  ;;  %v4889_v56 = vld [vmem:[#allocation12 + $0xd4] ss:$8 sps:$4 sm:$0xff]   ;;  %v4892_v28 = vld [vmem:[#allocation10 + $0xd0] ss:$8 sps:$4 sm:$0xff]  }
 0x3ee   :  { %1062 = vmatprep.subr.bf16.mxu1 %v4883_v55  ;;  %v4903_v63 = vld [vmem:[#allocation12 + $0xf0] ss:$8 sps:$4 sm:$0xff]   ;;  %v4906_v17 = vld [vmem:[#allocation10 + $0xf4] ss:$8 sps:$4 sm:$0xff]  }
 0x3ef   :  { %v741_v2 = vsub.f32 %v5954_v50, %v725_v0 }
 0x3f0   :  { %1262 = vmatpush1.bf16.msra.mxu0 %v4880_v46  ;;  %1063 = vmatpush1.bf16.msra.mxu1 %v4885_v27 }
 0x3f1   :  { %749 = vperm.xlu0 %4762, %v735_v10   ;;  %1263 = vmatprep.subr.bf16.mxu0 %v4888_v60  ;;  %v4898_v10 = vld [vmem:[#allocation10 + $0xe0] ss:$8 sps:$4 sm:$0xff]  }
 0x3f2   :  { %1064 = vmatprep.subr.bf16.mxu1 %v4889_v56 }
 0x3f4   :  { %1264 = vmatpush1.bf16.msra.mxu0 %v4886_v61  ;;  %1065 = vmatpush1.bf16.msra.mxu1 %v4891_v29 }
 0x3f5   :  { %754 = vperm.xlu0 %4762, %v736_v14   ;;  %1265 = vmatprep.subr.bf16.mxu0 %v4894_v1  ;;  %v4904_v14 = vld [vmem:[#allocation10 + $0xf0] ss:$8 sps:$4 sm:$0xff]  }
 0x3f6   :  { %1066 = vmatprep.subr.bf16.mxu1 %v4895_v8 }
 0x3f8   :  { %1266 = vmatpush1.bf16.msra.mxu0 %v4892_v28  ;;  %1067 = vmatpush1.bf16.msra.mxu1 %v4897_v9 }
 0x3f9   :  { %759 = vperm.xlu0 %4762, %v737_v15   ;;  %1267 = vmatprep.subr.bf16.mxu0 %v4900_v13 }
 0x3fa   :  { %1068 = vmatprep.subr.bf16.mxu1 %v4901_v42 }
 0x3fc   :  { %1268 = vmatpush1.bf16.msra.mxu0 %v4898_v10  ;;  %1069 = vmatpush1.bf16.msra.mxu1 %v4903_v63 }
 0x3fd   :  { %764 = vperm.xlu0 %4762, %v738_v34   ;;  %1269 = vmatprep.subr.bf16.mxu0 %v4906_v17 }
 0x3ff   :  { %1071 = vmatmul.mubr.bf16.vlgmr.msra.gmra.mrb[0].mxu1 %v5823_v35 }
 0x400   :  { %1270 = vmatpush1.bf16.msra.mxu0 %v4904_v14 }
 0x401   :  { %769 = vperm.xlu0 %4762, %v739_v41  }
 0x405   :  { %774 = vperm.xlu0 %4762, %v740_v62  }
 0x409   :  { %779 = vperm.xlu0 %4762, %v741_v2  }
 0x46c   :  { %v745_v50 = vpop.permute.xlu0 %744 }
 0x46d   :  { %v782_v30 = vmul.f32 %v745_v50, %v5841_v44  ;;  %v783_v32 = vmul.f32 %v745_v50, %v5847_v48 }
 0x470   :  { %v750_v19 = vpop.permute.xlu0 %749 }
 0x471   :  { %v784_v24 = vmul.f32 %v750_v19, %v5849_v49  ;;  %v785_v15 = vmul.f32 %v750_v19, %v5853_v53 }
 0x473   :  { %v798_v34 = vadd.f32 %v784_v24, %v782_v30  ;;  %v805_v36 = vadd.f32 %v785_v15, %v783_v32 }
 0x474   :  { %v755_v20 = vpop.permute.xlu0 %754 }
 0x475   :  { %v786_v18 = vmul.f32 %v755_v20, %v5839_v43  ;;  %v787_v33 = vmul.f32 %v755_v20, %v5845_v47 }
 0x477   :  { %v799_v46 = vadd.f32 %v798_v34, %v786_v18  ;;  %v806_v49 = vadd.f32 %v805_v36, %v787_v33 }
 0x478   :  { %v760_v22 = vpop.permute.xlu0 %759 }
 0x479   :  { %v788_v35 = vmul.f32 %v760_v22, %v5843_v45  ;;  %v789_v39 = vmul.f32 %v760_v22, %v5851_v52 }
 0x47b   :  { %v800_v44 = vadd.f32 %v799_v46, %v788_v35  ;;  %v807_v41 = vadd.f32 %v806_v49, %v789_v39 }
 0x47c   :  { %v765_v26 = vpop.permute.xlu0 %764 }
 0x47d   :  { %v790_v53 = vmul.f32 %v765_v26, %v5859_v58  ;;  %v791_v37 = vmul.f32 %v765_v26, %v5861_v59 }
 0x47f   :  { %v801_v51 = vadd.f32 %v800_v44, %v790_v53  ;;  %v808_v55 = vadd.f32 %v807_v41, %v791_v37 }
 0x480   :  { %v770_v23 = vpop.permute.xlu0 %769 }
 0x481   :  { %v792_v48 = vmul.f32 %v770_v23, %v5855_v54  ;;  %v793_v43 = vmul.f32 %v770_v23, %v5857_v57 }
 0x483   :  { %v802_v27 = vadd.f32 %v801_v51, %v792_v48  ;;  %v809_v61 = vadd.f32 %v808_v55, %v793_v43 }
 0x484   :  { %v775_v47 = vpop.permute.xlu0 %774 }
 0x485   :  { %v794_v45 = vmul.f32 %v775_v47, %v5879_v11  ;;  %v795_v52 = vmul.f32 %v775_v47, %v5881_v12  ;;  %v1280_v12 = vld [vmem:[%s8370_s7] sm:$0x3] }
 0x486   :  { %v1285_v8 = vrot.slane %v1280_v12, %v5829_v38 }
 0x487   :  { %v803_v62 = vadd.f32 %v802_v27, %v794_v45  ;;  %v810_v58 = vadd.f32 %v809_v61, %v795_v52 }
 0x488   :  { %v780_v60 = vpop.permute.xlu0 %779 }
 0x489   :  { %v796_v59 = vmul.f32 %v780_v60, %v5871_v5  ;;  %v797_v0 = vmul.f32 %v780_v60, %v5873_v6  ;;  %v1289_v5 = vrot.slane %v1280_v12, %v5835_v40 }
 0x48b   :  { %v804_v56 = vadd.f32 %v803_v62, %v796_v59  ;;  %v811_v54 = vadd.f32 %v810_v58, %v797_v0 }
 0x48d   :  { %v812_v29 = vpack.c.bf16 %v804_v56, %v804_v56  ;;  %v813_v57 = vpack.c.bf16 %v811_v54, %v811_v54 }
 0x48f   :  { %1271 = vmatprep.mubr.bf16.mxu0 %v813_v57 }
 0x490   :  { %1272 = vmatmul.mubr.bf16.vlgmr.msra.gmra.mrb[4].mxu0 %v812_v29 }
 0x4d2   :  { %v1072_v28 = vpop.f32.mrb[0].mxu1 }
 0x4d3   :  { %v1074_v1 = vpop.f32.mrb[1].mxu1 }
 0x4d4   :  { %v1076_v11 = vpop.f32.mrb[2].mxu1 }
 0x4d5   :  { %v1077_v2 = vpop.f32.mrb[3].mxu1 }
 0x563   :  { %v1273_v9 = vpop.f32.mrb[4].mxu0 }
 0x564   :  { %v1274_v6 = vadd.f32 %v1273_v9, %v1072_v28  ;;  %v1275_v10 = vpop.f32.mrb[5].mxu0 }
 0x565   :  { %v1276_v13 = vadd.f32 %v1275_v10, %v1074_v1  ;;  %v1277_v42 = vpop.f32.mrb[6].mxu0 }
 0x566   :  { %v1292_v63 = vadd.f32 %v1285_v8, %v1274_v6  ;;  %v1278_v14 = vpop.f32.mrb[7].mxu0 }
 0x567   :  { %v1293_v17 = vadd.f32 %v1289_v5, %v1276_v13 }
 0x568   :  { %4925 = vtanh.f32 %v1292_v63 }
 0x569   :  { %4927 = vtanh.f32 %v1293_v17 }
 0x572   :  { %v6022_v50 = vpop.eup %4925 }
 0x573   :  { %v6024_v19 = vpop.eup %4927 }
 0x574   :  { %5537 = dma.done.wait [#allocation5 + $0x1], 8192 }
 0x575   :  { %5538 = vsyncadd [#allocation5 + $0x1], 4294959104  ;;  %1428 = vmatprep.mubr.bf16.mxu1 %v8377_v3  ;;  %1574 = vmatprep.mubr.bf16.mxu0 %v8377_v3  ;;  %v1309_v20 = vld [vmem:[#allocation3 + $0x8] sm:$0xff]  ;;  %v1308_v22 = vld [vmem:[#allocation3] sm:$0xff] }
 0x576   :  { %v1317_v24 = vld [vmem:[#allocation3 + $0x48] sm:$0xff]  ;;  %1396 = vmatprep.subr.bf16.mxu1 %v1309_v20  ;;  %v1316_v15 = vld [vmem:[#allocation3 + $0x40] sm:$0xff]  ;;  %v1311_v45 = vld [vmem:[#allocation3 + $0x18] sm:$0xff] }
 0x577   :  { %1397 = vmatpush1.bf16.msra.mxu1 %v1308_v22  ;;  %v1325_v26 = vld [vmem:[#allocation3 + $0x88] sm:$0xff]  ;;  %v1324_v30 = vld [vmem:[#allocation3 + $0x80] sm:$0xff]  ;;  %v1310_v60 = vld [vmem:[#allocation3 + $0x10] sm:$0xff] }
 0x578   :  { %1398 = vmatprep.subr.bf16.mxu1 %v1317_v24  ;;  %v1333_v32 = vld [vmem:[#allocation3 + $0xc8] sm:$0xff]  ;;  %v1332_v18 = vld [vmem:[#allocation3 + $0xc0] sm:$0xff]  ;;  %v1319_v62 = vld [vmem:[#allocation3 + $0x58] sm:$0xff] }
 0x579   :  { %v1341_v33 = vld [vmem:[#allocation3 + $0x108] sm:$0xff]  ;;  %v1340_v36 = vld [vmem:[#allocation3 + $0x100] sm:$0xff]  ;;  %v1318_v0 = vld [vmem:[#allocation3 + $0x50] sm:$0xff] }
 0x57a   :  { %v1313_v34 = vld [vmem:[#allocation3 + $0x28] sm:$0xff]  ;;  %v1312_v35 = vld [vmem:[#allocation3 + $0x20] sm:$0xff]  ;;  %v1327_v56 = vld [vmem:[#allocation3 + $0x98] sm:$0xff] }
 0x57b   :  { %1399 = vmatpush1.bf16.msra.mxu1 %v1316_v15  ;;  %1542 = vmatprep.subr.bf16.mxu0 %v1313_v34  ;;  %v1349_v39 = vld [vmem:[#allocation3 + $0x148] sm:$0xff]  ;;  %v1320_v46 = vld [vmem:[#allocation3 + $0x60] sm:$0xff]  ;;  %v1326_v28 = vld [vmem:[#allocation3 + $0x90] sm:$0xff] }
 0x57c   :  { %1400 = vmatprep.subr.bf16.mxu1 %v1325_v26  ;;  %1543 = vmatpush1.bf16.msra.mxu0 %v1312_v35  ;;  %v1321_v23 = vld [vmem:[#allocation3 + $0x68] sm:$0xff]  ;;  %v1348_v53 = vld [vmem:[#allocation3 + $0x140] sm:$0xff]  ;;  %v1335_v1 = vld [vmem:[#allocation3 + $0xd8] sm:$0xff] }
 0x57d   :  { %1544 = vmatprep.subr.bf16.mxu0 %v1321_v23  ;;  %v1329_v49 = vld [vmem:[#allocation3 + $0xa8] sm:$0xff]  ;;  %v1328_v44 = vld [vmem:[#allocation3 + $0xa0] sm:$0xff]  ;;  %v1334_v2 = vld [vmem:[#allocation3 + $0xd0] sm:$0xff] }
 0x57e   :  { %v1357_v37 = vld [vmem:[#allocation3 + $0x188] sm:$0xff]  ;;  %v1356_v48 = vld [vmem:[#allocation3 + $0x180] sm:$0xff]  ;;  %v1343_v12 = vld [vmem:[#allocation3 + $0x118] sm:$0xff] }
 0x57f   :  { %1401 = vmatpush1.bf16.msra.mxu1 %v1324_v30  ;;  %v1337_v41 = vld [vmem:[#allocation3 + $0xe8] sm:$0xff]  ;;  %v1336_v47 = vld [vmem:[#allocation3 + $0xe0] sm:$0xff]  ;;  %v6045_v8 = vld [vmem:[%s8363_s0 + $0x10] sm:$0xff]  }
 0x580   :  { %1402 = vmatprep.subr.bf16.mxu1 %v1333_v32  ;;  %1545 = vmatpush1.bf16.msra.mxu0 %v1320_v46  ;;  %v1365_v43 = vld [vmem:[#allocation3 + $0x1c8] sm:$0xff]  ;;  %v1364_v55 = vld [vmem:[#allocation3 + $0x1c0] sm:$0xff]  ;;  %v1342_v9 = vld [vmem:[#allocation3 + $0x110] sm:$0xff] }
 0x581   :  { %1546 = vmatprep.subr.bf16.mxu0 %v1329_v49  ;;  %v1345_v51 = vld [vmem:[#allocation3 + $0x128] sm:$0xff]  ;;  %v6031_v52 = vld [vmem:[%s8363_s0] sm:$0xff]   ;;  %v1351_v5 = vld [vmem:[#allocation3 + $0x158] sm:$0xff] }
 0x582   :  { %v1344_v27 = vld [vmem:[#allocation3 + $0x120] sm:$0xff]  ;;  %v1353_v61 = vld [vmem:[#allocation3 + $0x168] sm:$0xff]  ;;  %v1350_v6 = vld [vmem:[#allocation3 + $0x150] sm:$0xff] }
 0x583   :  { %1403 = vmatpush1.bf16.msra.mxu1 %v1332_v18  ;;  %v1352_v58 = vld [vmem:[#allocation3 + $0x160] sm:$0xff]  ;;  %v1361_v59 = vld [vmem:[#allocation3 + $0x1a8] sm:$0xff]  ;;  %v1359_v10 = vld [vmem:[#allocation3 + $0x198] sm:$0xff] }
 0x584   :  { %1404 = vmatprep.subr.bf16.mxu1 %v1341_v33  ;;  %1547 = vmatpush1.bf16.msra.mxu0 %v1328_v44  ;;  %v6038_v54 = vld [vmem:[%s8363_s0 + $0x8] sm:$0xff]   ;;  %v1360_v29 = vld [vmem:[#allocation3 + $0x1a0] sm:$0xff]  ;;  %v4932_v13 = vld [vmem:[%s8363_s0 + $0x18] sm:$0xff]  }
 0x585   :  { %1548 = vmatprep.subr.bf16.mxu0 %v1337_v41  ;;  %v1369_v57 = vld [vmem:[#allocation3 + $0x1e8] sm:$0xff]  ;;  %v1368_v11 = vld [vmem:[#allocation3 + $0x1e0] sm:$0xff]  ;;  %v1358_v42 = vld [vmem:[#allocation3 + $0x190] sm:$0xff] }
 0x586   :  { %v1367_v63 = vld [vmem:[#allocation3 + $0x1d8] sm:$0xff]  ;;  %v1366_v14 = vld [vmem:[#allocation3 + $0x1d0] sm:$0xff] }
 0x587   :  { %1405 = vmatpush1.bf16.msra.mxu1 %v1340_v36  ;;  %v1315_v17 = vld [vmem:[#allocation3 + $0x38] sm:$0xff]  ;;  %v1314_v20 = vld [vmem:[#allocation3 + $0x30] sm:$0xff] }
 0x588   :  { %1406 = vmatprep.subr.bf16.mxu1 %v1349_v39  ;;  %1549 = vmatpush1.bf16.msra.mxu0 %v1336_v47  ;;  %v1323_v22 = vld [vmem:[#allocation3 + $0x78] sm:$0xff]  ;;  %v1322_v24 = vld [vmem:[#allocation3 + $0x70] sm:$0xff] }
 0x589   :  { %1550 = vmatprep.subr.bf16.mxu0 %v1345_v51  ;;  %v1331_v15 = vld [vmem:[#allocation3 + $0xb8] sm:$0xff]  ;;  %v1330_v26 = vld [vmem:[#allocation3 + $0xb0] sm:$0xff] }
 0x58a   :  { %v1339_v30 = vld [vmem:[#allocation3 + $0xf8] sm:$0xff]  ;;  %v1338_v32 = vld [vmem:[#allocation3 + $0xf0] sm:$0xff] }
 0x58b   :  { %1407 = vmatpush1.bf16.msra.mxu1 %v1348_v53  ;;  %v1347_v18 = vld [vmem:[#allocation3 + $0x138] sm:$0xff]  ;;  %v1346_v33 = vld [vmem:[#allocation3 + $0x130] sm:$0xff] }
 0x58c   :  { %1408 = vmatprep.subr.bf16.mxu1 %v1357_v37  ;;  %1551 = vmatpush1.bf16.msra.mxu0 %v1344_v27  ;;  %v1355_v34 = vld [vmem:[#allocation3 + $0x178] sm:$0xff]  ;;  %v1354_v36 = vld [vmem:[#allocation3 + $0x170] sm:$0xff] }
 0x58d   :  { %1552 = vmatprep.subr.bf16.mxu0 %v1353_v61  ;;  %v1363_v35 = vld [vmem:[#allocation3 + $0x1b8] sm:$0xff]  ;;  %v1362_v39 = vld [vmem:[#allocation3 + $0x1b0] sm:$0xff] }
 0x58e   :  { %v1371_v23 = vld [vmem:[#allocation3 + $0x1f8] sm:$0xff]  ;;  %v1370_v46 = vld [vmem:[#allocation3 + $0x1f0] sm:$0xff] }
 0x58f   :  { %1409 = vmatpush1.bf16.msra.mxu1 %v1356_v48 }
 0x590   :  { %1410 = vmatprep.subr.bf16.mxu1 %v1365_v43  ;;  %1553 = vmatpush1.bf16.msra.mxu0 %v1352_v58 }
 0x591   :  { %1554 = vmatprep.subr.bf16.mxu0 %v1361_v59 }
 0x593   :  { %1411 = vmatpush1.bf16.msra.mxu1 %v1364_v55 }
 0x594   :  { %1469 = vmatprep.subr.bf16.mxu1 %v1311_v45  ;;  %1555 = vmatpush1.bf16.msra.mxu0 %v1360_v29 }
 0x595   :  { %1556 = vmatprep.subr.bf16.mxu0 %v1369_v57 }
 0x596   :  { %1429 = vmatmul.mubr.bf16.vlgmr.msra.gmra.mrb[4].mxu1 %v6031_v52 }
 0x597   :  { %1470 = vmatpush1.bf16.msra.mxu1 %v1310_v60  ;;  %1438 = vmatprep.mubr.bf16.mxu1 %v8377_v3 }
 0x598   :  { %1471 = vmatprep.subr.bf16.mxu1 %v1319_v62  ;;  %1557 = vmatpush1.bf16.msra.mxu0 %v1368_v11 }
 0x59b   :  { %1472 = vmatpush1.bf16.msra.mxu1 %v1318_v0  ;;  %1575 = vmatmul.mubr.bf16.vlgmr.msra.gmra.mrb[8].mxu0 %v6031_v52 }
 0x59c   :  { %1473 = vmatprep.subr.bf16.mxu1 %v1327_v56  ;;  %1584 = vmatprep.mubr.bf16.mxu0 %v8377_v3 }
 0x59e   :  { %1439 = vmatmul.mubr.bf16.gmra.mrb[8].mxu1 %v6038_v54 }
 0x59f   :  { %1474 = vmatpush1.bf16.msra.mxu1 %v1326_v28  ;;  %1448 = vmatprep.mubr.bf16.mxu1 %v8377_v3 }
 0x5a0   :  { %1475 = vmatprep.subr.bf16.mxu1 %v1335_v1 }
 0x5a3   :  { %1476 = vmatpush1.bf16.msra.mxu1 %v1334_v2  ;;  %1585 = vmatmul.mubr.bf16.gmra.mrb[12].mxu0 %v6038_v54 }
 0x5a4   :  { %1477 = vmatprep.subr.bf16.mxu1 %v1343_v12  ;;  %1594 = vmatprep.mubr.bf16.mxu0 %v8377_v3 }
 0x5a6   :  { %1449 = vmatmul.mubr.bf16.gmra.mrb[12].mxu1 %v6045_v8 }
 0x5a7   :  { %1478 = vmatpush1.bf16.msra.mxu1 %v1342_v9  ;;  %1458 = vmatprep.mubr.bf16.mxu1 %v8377_v3 }
 0x5a8   :  { %1479 = vmatprep.subr.bf16.mxu1 %v1351_v5 }
 0x5ab   :  { %1480 = vmatpush1.bf16.msra.mxu1 %v1350_v6  ;;  %1595 = vmatmul.mubr.bf16.gmra.mrb[16].mxu0 %v6045_v8 }
 0x5ac   :  { %1481 = vmatprep.subr.bf16.mxu1 %v1359_v10  ;;  %1604 = vmatprep.mubr.bf16.mxu0 %v8377_v3 }
 0x5ae   :  { %1459 = vmatmul.mubr.bf16.gmra.mrb[16].mxu1 %v4932_v13 }
 0x5af   :  { %1482 = vmatpush1.bf16.msra.mxu1 %v1358_v42  ;;  %1501 = vmatprep.mubr.bf16.mxu1 %v8377_v3 }
 0x5b0   :  { %1483 = vmatprep.subr.bf16.mxu1 %v1367_v63 }
 0x5b3   :  { %1484 = vmatpush1.bf16.msra.mxu1 %v1366_v14  ;;  %1605 = vmatmul.mubr.bf16.gmra.mrb[20].mxu0 %v4932_v13 }
 0x5b4   :  { %1615 = vmatprep.subr.bf16.mxu1 %v1315_v17 }
 0x5b6   :  { %1502 = vmatmul.mubr.bf16.vlgmr.msra.gmra.mrb[20].mxu1 %v6031_v52 }
 0x5b7   :  { %1616 = vmatpush1.bf16.msra.mxu1 %v1314_v20  ;;  %1511 = vmatprep.mubr.bf16.mxu1 %v8377_v3 }
 0x5b8   :  { %1617 = vmatprep.subr.bf16.mxu1 %v1323_v22 }
 0x5bb   :  { %1618 = vmatpush1.bf16.msra.mxu1 %v1322_v24 }
 0x5bc   :  { %1619 = vmatprep.subr.bf16.mxu1 %v1331_v15 }
 0x5be   :  { %1512 = vmatmul.mubr.bf16.gmra.mrb[24].mxu1 %v6038_v54 }
 0x5bf   :  { %1620 = vmatpush1.bf16.msra.mxu1 %v1330_v26  ;;  %1521 = vmatprep.mubr.bf16.mxu1 %v8377_v3 }
 0x5c0   :  { %1621 = vmatprep.subr.bf16.mxu1 %v1339_v30 }
 0x5c3   :  { %1622 = vmatpush1.bf16.msra.mxu1 %v1338_v32 }
 0x5c4   :  { %1623 = vmatprep.subr.bf16.mxu1 %v1347_v18 }
 0x5c6   :  { %1522 = vmatmul.mubr.bf16.gmra.mrb[28].mxu1 %v6045_v8 }
 0x5c7   :  { %1624 = vmatpush1.bf16.msra.mxu1 %v1346_v33  ;;  %1531 = vmatprep.mubr.bf16.mxu1 %v8377_v3 }
 0x5c8   :  { %1625 = vmatprep.subr.bf16.mxu1 %v1355_v34 }
 0x5cb   :  { %1626 = vmatpush1.bf16.msra.mxu1 %v1354_v36 }
 0x5cc   :  { %1627 = vmatprep.subr.bf16.mxu1 %v1363_v35 }
 0x5ce   :  { %1532 = vmatmul.mubr.bf16.gmra.mrb[32].mxu1 %v4932_v13 }
 0x5cf   :  { %1628 = vmatpush1.bf16.msra.mxu1 %v1362_v39  ;;  %1647 = vmatprep.mubr.bf16.mxu1 %v8377_v3 }
 0x5d0   :  { %1629 = vmatprep.subr.bf16.mxu1 %v1371_v23 }
 0x5d3   :  { %1630 = vmatpush1.bf16.msra.mxu1 %v1370_v46 }
 0x5d6   :  { %1648 = vmatmul.mubr.bf16.vlgmr.msra.gmra.mrb[36].mxu1 %v6031_v52 }
 0x5d7   :  { %1657 = vmatprep.mubr.bf16.mxu1 %v8377_v3 }
 0x5de   :  { %1658 = vmatmul.mubr.bf16.gmra.mrb[40].mxu1 %v6038_v54 }
 0x5df   :  { %1667 = vmatprep.mubr.bf16.mxu1 %v8377_v3 }
 0x5e6   :  { %1668 = vmatmul.mubr.bf16.gmra.mrb[44].mxu1 %v6045_v8 }
 0x5e7   :  { %1677 = vmatprep.mubr.bf16.mxu1 %v8377_v3 }
 0x5ee   :  { %1678 = vmatmul.mubr.bf16.gmra.mrb[48].mxu1 %v4932_v13 }
 0x669   :  { %v6072_v49 = vpop.f32.mrb[4].mxu1 }
 0x66a   :  { %v6074_v53 = vpop.f32.mrb[5].mxu1 }
 0x66b   :  { %v6076_v37 = vpop.f32.mrb[6].mxu1 }
 0x66c   :  { %v6078_v44 = vpop.f32.mrb[7].mxu1 }
 0x66e   :  { %v6088_v51 = vpop.f32.mrb[8].mxu0 }
 0x66f   :  { %v6090_v55 = vpop.f32.mrb[9].mxu0 }
 0x670   :  { %8790 = vst [vmem:[#allocation26_spill] sm:$0xff] %v6090_v55  ;;  %v6094_v52 = vpop.f32.mrb[10].mxu0 }
 0x671   :  { %v6080_v41 = vpop.f32.mrb[8].mxu1  ;;  %v6098_v61 = vpop.f32.mrb[11].mxu0 }
 0x672   :  { %v6082_v48 = vpop.f32.mrb[9].mxu1  ;;  %8791 = vst [vmem:[#allocation27_spill] sm:$0xff] %v6098_v61 }
 0x673   :  { %v6084_v43 = vpop.f32.mrb[10].mxu1 }
 0x674   :  { %v6086_v47 = vpop.f32.mrb[11].mxu1 }
 0x676   :  { %v6104_v58 = vpop.f32.mrb[12].mxu0 }
 0x677   :  { %v6106_v59 = vpop.f32.mrb[13].mxu0 }
 0x678   :  { %8792 = vst [vmem:[#allocation28_spill] sm:$0xff] %v6106_v59  ;;  %v6110_v56 = vpop.f32.mrb[14].mxu0 }
 0x679   :  { %v6092_v45 = vpop.f32.mrb[12].mxu1  ;;  %v6114_v29 = vpop.f32.mrb[15].mxu0 }
 0x67a   :  { %v6096_v27 = vpop.f32.mrb[13].mxu1  ;;  %8793 = vst [vmem:[#allocation29_spill] sm:$0xff] %v6114_v29 }
 0x67b   :  { %v6100_v60 = vpop.f32.mrb[14].mxu1 }
 0x67c   :  { %v6102_v62 = vpop.f32.mrb[15].mxu1 }
 0x67e   :  { %v6120_v1 = vpop.f32.mrb[16].mxu0 }
 0x67f   :  { %v6122_v11 = vpop.f32.mrb[17].mxu0 }
 0x680   :  { %8794 = vst [vmem:[#allocation30_spill] sm:$0xff] %v6122_v11  ;;  %v6126_v12 = vpop.f32.mrb[18].mxu0 }
 0x681   :  { %v6108_v0 = vpop.f32.mrb[16].mxu1  ;;  %v6130_v9 = vpop.f32.mrb[19].mxu0 }
 0x682   :  { %v6112_v54 = vpop.f32.mrb[17].mxu1  ;;  %8795 = vst [vmem:[#allocation31_spill] sm:$0xff] %v6130_v9 }
 0x683   :  { %v6116_v57 = vpop.f32.mrb[18].mxu1 }
 0x684   :  { %v6118_v28 = vpop.f32.mrb[19].mxu1 }
 0x686   :  { %v6136_v10 = vpop.f32.mrb[20].mxu0 }
 0x687   :  { %8796 = vst [vmem:[#allocation32_spill] sm:$0xff] %v6136_v10  ;;  %v6138_v13 = vpop.f32.mrb[21].mxu0 }
 0x688   :  { %8797 = vst [vmem:[#allocation33_spill] sm:$0xff] %v6138_v13  ;;  %v6142_v63 = vpop.f32.mrb[22].mxu0 }
 0x689   :  { %v6124_v2 = vpop.f32.mrb[20].mxu1  ;;  %8798 = vst [vmem:[#allocation34_spill] sm:$0xff] %v6142_v63  ;;  %v6146_v17 = vpop.f32.mrb[23].mxu0 }
 0x68a   :  { %v6128_v8 = vpop.f32.mrb[21].mxu1  ;;  %8799 = vst [vmem:[#allocation35_spill] sm:$0xff] %v6146_v17 }
 0x68b   :  { %v6132_v5 = vpop.f32.mrb[22].mxu1 }
 0x68c   :  { %v6134_v6 = vpop.f32.mrb[23].mxu1 }
 0x691   :  { %v6140_v42 = vpop.f32.mrb[24].mxu1 }
 0x692   :  { %v6144_v14 = vpop.f32.mrb[25].mxu1 }
 0x693   :  { %v6148_v20 = vpop.f32.mrb[26].mxu1 }
 0x694   :  { %v6150_v22 = vpop.f32.mrb[27].mxu1 }
 0x699   :  { %v6152_v24 = vpop.f32.mrb[28].mxu1 }
 0x69a   :  { %v6154_v15 = vpop.f32.mrb[29].mxu1 }
 0x69b   :  { %v6156_v26 = vpop.f32.mrb[30].mxu1 }
 0x69c   :  { %v6158_v30 = vpop.f32.mrb[31].mxu1 }
 0x6a1   :  { %v6160_v32 = vpop.f32.mrb[32].mxu1 }
 0x6a2   :  { %v6162_v18 = vpop.f32.mrb[33].mxu1 }
 0x6a3   :  { %v6164_v33 = vpop.f32.mrb[34].mxu1 }
 0x6a4   :  { %v6166_v34 = vpop.f32.mrb[35].mxu1 }
 0x6a9   :  { %v6168_v36 = vpop.f32.mrb[36].mxu1 }
 0x6aa   :  { %8800 = vst [vmem:[#allocation36_spill] sm:$0xff] %v6168_v36  ;;  %v6170_v35 = vpop.f32.mrb[37].mxu1 }
 0x6ab   :  { %8801 = vst [vmem:[#allocation37_spill] sm:$0xff] %v6170_v35  ;;  %v6172_v39 = vpop.f32.mrb[38].mxu1 }
 0x6ac   :  { %8802 = vst [vmem:[#allocation38_spill] sm:$0xff] %v6172_v39  ;;  %v6174_v23 = vpop.f32.mrb[39].mxu1 }
 0x6ad   :  { %8803 = vst [vmem:[#allocation39_spill] sm:$0xff] %v6174_v23 }
 0x6b1   :  { %v6176_v46 = vpop.f32.mrb[40].mxu1 }
 0x6b2   :  { %8804 = vst [vmem:[#allocation40_spill] sm:$0xff] %v6176_v46  ;;  %v6178_v3 = vpop.f32.mrb[41].mxu1 }
 0x6b3   :  { %8805 = vst [vmem:[#allocation41_spill] sm:$0xff] %v6178_v3  ;;  %v6180_v17 = vpop.f32.mrb[42].mxu1 }
 0x6b4   :  { %8806 = vst [vmem:[#allocation42_spill] sm:$0xff] %v6180_v17  ;;  %v6182_v13 = vpop.f32.mrb[43].mxu1 }
 0x6b5   :  { %8807 = vst [vmem:[#allocation43_spill] sm:$0xff] %v6182_v13 }
 0x6b9   :  { %v6184_v9 = vpop.f32.mrb[44].mxu1 }
 0x6ba   :  { %8808 = vst [vmem:[#allocation44_spill] sm:$0xff] %v6184_v9  ;;  %v6186_v11 = vpop.f32.mrb[45].mxu1 }
 0x6bb   :  { %8809 = vst [vmem:[#allocation45_spill] sm:$0xff] %v6186_v11  ;;  %v6188_v29 = vpop.f32.mrb[46].mxu1 }
 0x6bc   :  { %8810 = vst [vmem:[#allocation46_spill] sm:$0xff] %v6188_v29  ;;  %v6190_v59 = vpop.f32.mrb[47].mxu1 }
 0x6bd   :  { %8811 = vst [vmem:[#allocation47_spill] sm:$0xff] %v6190_v59 }
 0x6c1   :  { %v6192_v35 = vpop.f32.mrb[48].mxu1 }
 0x6c2   :  { %8812 = vst [vmem:[#allocation48_spill] sm:$0xff] %v6192_v35  ;;  %v6194_v61 = vpop.f32.mrb[49].mxu1 }
 0x6c3   :  { %8813 = vst [vmem:[#allocation49_spill] sm:$0xff] %v6194_v61  ;;  %v6196_v23 = vpop.f32.mrb[50].mxu1 }
 0x6c4   :  { %8814 = vst [vmem:[#allocation50_spill] sm:$0xff] %v6196_v23  ;;  %v6198_v55 = vpop.f32.mrb[51].mxu1 }
 0x6c5   :  { %8815 = vst [vmem:[#allocation51_spill] sm:$0xff] %v6198_v55 }
 0x6c6   :  { %5539 = dma.done.wait [#allocation5], 16384 }
 0x6c7   :  { %5540 = vsyncadd [#allocation5], 4294950912  ;;  %v6202_v13 = vpack.c.bf16 %v6024_v19, %v6024_v19  ;;  %v1695_v11 = vld [vmem:[#allocation2 + $0x8] sm:$0xff]  ;;  %v1697_v59 = vld [vmem:[#allocation2 + $0x18] sm:$0xff] }
 0x6c8   :  { %v1694_v3 = vld [vmem:[#allocation2] sm:$0xff]  ;;  %1864 = vmatprep.subr.bf16.mxu0 %v1695_v11  ;;  %1905 = vmatprep.subr.bf16.mxu1 %v1697_v59  ;;  %v1696_v61 = vld [vmem:[#allocation2 + $0x10] sm:$0xff]  ;;  %v1703_v35 = vld [vmem:[#allocation2 + $0x48] sm:$0xff] }
 0x6c9   :  { %1896 = vmatprep.mubr.bf16.mxu0 %v6202_v13  ;;  %1937 = vmatprep.mubr.bf16.mxu1 %v6202_v13  ;;  %v1705_v23 = vld [vmem:[#allocation2 + $0x58] sm:$0xff]  ;;  %v1702_v55 = vld [vmem:[#allocation2 + $0x40] sm:$0xff]  ;;  %v1704_v29 = vld [vmem:[#allocation2 + $0x50] sm:$0xff] }
 0x6ca   :  { %1865 = vmatpush1.bf16.msra.mxu0 %v1694_v3  ;;  %1906 = vmatpush1.bf16.msra.mxu1 %v1696_v61  ;;  %v1711_v19 = vld [vmem:[#allocation2 + $0x88] sm:$0xff]  ;;  %v1713_v9 = vld [vmem:[#allocation2 + $0x98] sm:$0xff]  ;;  %v1710_v17 = vld [vmem:[#allocation2 + $0x80] sm:$0xff] }
 0x6cb   :  { %1866 = vmatprep.subr.bf16.mxu0 %v1703_v35  ;;  %1907 = vmatprep.subr.bf16.mxu1 %v1705_v23  ;;  %v1712_v46 = vld [vmem:[#allocation2 + $0x90] sm:$0xff]  ;;  %v1719_v39 = vld [vmem:[#allocation2 + $0xc8] sm:$0xff]  ;;  %v1721_v11 = vld [vmem:[#allocation2 + $0xd8] sm:$0xff] }
 0x6cc   :  { %v1718_v3 = vld [vmem:[#allocation2 + $0xc0] sm:$0xff]  ;;  %v1720_v61 = vld [vmem:[#allocation2 + $0xd0] sm:$0xff]  ;;  %v1727_v59 = vld [vmem:[#allocation2 + $0x108] sm:$0xff] }
 0x6cd   :  { %v1729_v35 = vld [vmem:[#allocation2 + $0x118] sm:$0xff]  ;;  %v1735_v23 = vld [vmem:[#allocation2 + $0x148] sm:$0xff] }
 0x6ce   :  { %1867 = vmatpush1.bf16.msra.mxu0 %v1702_v55  ;;  %1908 = vmatpush1.bf16.msra.mxu1 %v1704_v29  ;;  %v1726_v55 = vld [vmem:[#allocation2 + $0x100] sm:$0xff]  ;;  %v1728_v29 = vld [vmem:[#allocation2 + $0x110] sm:$0xff] }
 0x6cf   :  { %1868 = vmatprep.subr.bf16.mxu0 %v1711_v19  ;;  %1909 = vmatprep.subr.bf16.mxu1 %v1713_v9  ;;  %v1737_v9 = vld [vmem:[#allocation2 + $0x158] sm:$0xff] }
 0x6d0   :  { %v1745_v19 = vld [vmem:[#allocation2 + $0x198] sm:$0xff] }
 0x6d2   :  { %1869 = vmatpush1.bf16.msra.mxu0 %v1710_v17  ;;  %1910 = vmatpush1.bf16.msra.mxu1 %v1712_v46  ;;  %v1734_v17 = vld [vmem:[#allocation2 + $0x140] sm:$0xff]  ;;  %v1736_v46 = vld [vmem:[#allocation2 + $0x150] sm:$0xff] }
 0x6d3   :  { %1870 = vmatprep.subr.bf16.mxu0 %v1719_v39  ;;  %1911 = vmatprep.subr.bf16.mxu1 %v1721_v11  ;;  %v1743_v39 = vld [vmem:[#allocation2 + $0x188] sm:$0xff]  ;;  %v1742_v11 = vld [vmem:[#allocation2 + $0x180] sm:$0xff] }
 0x6d6   :  { %1871 = vmatpush1.bf16.msra.mxu0 %v1718_v3  ;;  %1912 = vmatpush1.bf16.msra.mxu1 %v1720_v61  ;;  %v1744_v3 = vld [vmem:[#allocation2 + $0x190] sm:$0xff]  ;;  %v1751_v61 = vld [vmem:[#allocation2 + $0x1c8] sm:$0xff] }
 0x6d7   :  { %1872 = vmatprep.subr.bf16.mxu0 %v1727_v59  ;;  %1913 = vmatprep.subr.bf16.mxu1 %v1729_v35  ;;  %v1753_v59 = vld [vmem:[#allocation2 + $0x1d8] sm:$0xff]  ;;  %v1750_v35 = vld [vmem:[#allocation2 + $0x1c0] sm:$0xff] }
 0x6da   :  { %1873 = vmatpush1.bf16.msra.mxu0 %v1726_v55  ;;  %1914 = vmatpush1.bf16.msra.mxu1 %v1728_v29  ;;  %v1752_v55 = vld [vmem:[#allocation2 + $0x1d0] sm:$0xff]  ;;  %v1759_v29 = vld [vmem:[#allocation2 + $0x208] sm:$0xff] }
 0x6db   :  { %1874 = vmatprep.subr.bf16.mxu0 %v1735_v23  ;;  %1915 = vmatprep.subr.bf16.mxu1 %v1737_v9  ;;  %v1761_v23 = vld [vmem:[#allocation2 + $0x218] sm:$0xff]  ;;  %v1758_v9 = vld [vmem:[#allocation2 + $0x200] sm:$0xff] }
 0x6de   :  { %1875 = vmatpush1.bf16.msra.mxu0 %v1734_v17  ;;  %1916 = vmatpush1.bf16.msra.mxu1 %v1736_v46  ;;  %v1760_v17 = vld [vmem:[#allocation2 + $0x210] sm:$0xff]  ;;  %v1767_v46 = vld [vmem:[#allocation2 + $0x248] sm:$0xff] }
 0x6df   :  { %1876 = vmatprep.subr.bf16.mxu0 %v1743_v39  ;;  %1917 = vmatprep.subr.bf16.mxu1 %v1745_v19  ;;  %v1769_v39 = vld [vmem:[#allocation2 + $0x258] sm:$0xff]  ;;  %v1766_v19 = vld [vmem:[#allocation2 + $0x240] sm:$0xff] }
 0x6e2   :  { %1877 = vmatpush1.bf16.msra.mxu0 %v1742_v11  ;;  %1918 = vmatpush1.bf16.msra.mxu1 %v1744_v3  ;;  %v1768_v11 = vld [vmem:[#allocation2 + $0x250] sm:$0xff]  ;;  %v1775_v3 = vld [vmem:[#allocation2 + $0x288] sm:$0xff] }
 0x6e3   :  { %1878 = vmatprep.subr.bf16.mxu0 %v1751_v61  ;;  %1919 = vmatprep.subr.bf16.mxu1 %v1753_v59  ;;  %v1777_v61 = vld [vmem:[#allocation2 + $0x298] sm:$0xff]  ;;  %v1774_v59 = vld [vmem:[#allocation2 + $0x280] sm:$0xff] }
 0x6e6   :  { %1879 = vmatpush1.bf16.msra.mxu0 %v1750_v35  ;;  %1920 = vmatpush1.bf16.msra.mxu1 %v1752_v55  ;;  %v1776_v35 = vld [vmem:[#allocation2 + $0x290] sm:$0xff]  ;;  %v1783_v55 = vld [vmem:[#allocation2 + $0x2c8] sm:$0xff] }
 0x6e7   :  { %1880 = vmatprep.subr.bf16.mxu0 %v1759_v29  ;;  %1921 = vmatprep.subr.bf16.mxu1 %v1761_v23  ;;  %v1785_v29 = vld [vmem:[#allocation2 + $0x2d8] sm:$0xff]  ;;  %v1782_v23 = vld [vmem:[#allocation2 + $0x2c0] sm:$0xff] }
 0x6ea   :  { %1881 = vmatpush1.bf16.msra.mxu0 %v1758_v9  ;;  %1922 = vmatpush1.bf16.msra.mxu1 %v1760_v17  ;;  %v1784_v9 = vld [vmem:[#allocation2 + $0x2d0] sm:$0xff]  ;;  %v1791_v17 = vld [vmem:[#allocation2 + $0x308] sm:$0xff] }
 0x6eb   :  { %1882 = vmatprep.subr.bf16.mxu0 %v1767_v46  ;;  %1923 = vmatprep.subr.bf16.mxu1 %v1769_v39  ;;  %v1793_v46 = vld [vmem:[#allocation2 + $0x318] sm:$0xff]  ;;  %v1790_v39 = vld [vmem:[#allocation2 + $0x300] sm:$0xff] }
 0x6ee   :  { %1883 = vmatpush1.bf16.msra.mxu0 %v1766_v19  ;;  %1924 = vmatpush1.bf16.msra.mxu1 %v1768_v11  ;;  %v1792_v19 = vld [vmem:[#allocation2 + $0x310] sm:$0xff]  ;;  %v1799_v11 = vld [vmem:[#allocation2 + $0x348] sm:$0xff] }
 0x6ef   :  { %1884 = vmatprep.subr.bf16.mxu0 %v1775_v3  ;;  %1925 = vmatprep.subr.bf16.mxu1 %v1777_v61  ;;  %v1801_v3 = vld [vmem:[#allocation2 + $0x358] sm:$0xff]  ;;  %v1798_v61 = vld [vmem:[#allocation2 + $0x340] sm:$0xff] }
 0x6f2   :  { %1885 = vmatpush1.bf16.msra.mxu0 %v1774_v59  ;;  %1926 = vmatpush1.bf16.msra.mxu1 %v1776_v35  ;;  %v1800_v59 = vld [vmem:[#allocation2 + $0x350] sm:$0xff]  ;;  %v1807_v35 = vld [vmem:[#allocation2 + $0x388] sm:$0xff] }
 0x6f3   :  { %1886 = vmatprep.subr.bf16.mxu0 %v1783_v55  ;;  %1927 = vmatprep.subr.bf16.mxu1 %v1785_v29  ;;  %v1809_v55 = vld [vmem:[#allocation2 + $0x398] sm:$0xff]  ;;  %v1806_v29 = vld [vmem:[#allocation2 + $0x380] sm:$0xff] }
 0x6f6   :  { %1887 = vmatpush1.bf16.msra.mxu0 %v1782_v23  ;;  %1928 = vmatpush1.bf16.msra.mxu1 %v1784_v9  ;;  %v1808_v23 = vld [vmem:[#allocation2 + $0x390] sm:$0xff]  ;;  %v1815_v9 = vld [vmem:[#allocation2 + $0x3c8] sm:$0xff] }
 0x6f7   :  { %1888 = vmatprep.subr.bf16.mxu0 %v1791_v17  ;;  %1929 = vmatprep.subr.bf16.mxu1 %v1793_v46  ;;  %v1817_v17 = vld [vmem:[#allocation2 + $0x3d8] sm:$0xff]  ;;  %v1814_v46 = vld [vmem:[#allocation2 + $0x3c0] sm:$0xff] }
 0x6fa   :  { %1889 = vmatpush1.bf16.msra.mxu0 %v1790_v39  ;;  %1930 = vmatpush1.bf16.msra.mxu1 %v1792_v19  ;;  %v1816_v39 = vld [vmem:[#allocation2 + $0x3d0] sm:$0xff]  ;;  %v1699_v19 = vld [vmem:[#allocation2 + $0x28] sm:$0xff] }
 0x6fb   :  { %1890 = vmatprep.subr.bf16.mxu0 %v1799_v11  ;;  %1931 = vmatprep.subr.bf16.mxu1 %v1801_v3  ;;  %v1701_v11 = vld [vmem:[#allocation2 + $0x38] sm:$0xff]  ;;  %v6208_v3 = vpack.c.bf16 %v6022_v50, %v6022_v50  ;;  %v1715_v50 = vld [vmem:[#allocation2 + $0xa8] sm:$0xff] }
 0x6fe   :  { %1891 = vmatpush1.bf16.msra.mxu0 %v1798_v61  ;;  %1932 = vmatpush1.bf16.msra.mxu1 %v1800_v59  ;;  %v1698_v61 = vld [vmem:[#allocation2 + $0x20] sm:$0xff]  ;;  %v1700_v59 = vld [vmem:[#allocation2 + $0x30] sm:$0xff] }
 0x6ff   :  { %1892 = vmatprep.subr.bf16.mxu0 %v1807_v35  ;;  %1933 = vmatprep.subr.bf16.mxu1 %v1809_v55  ;;  %v1707_v35 = vld [vmem:[#allocation2 + $0x68] sm:$0xff]  ;;  %v1709_v55 = vld [vmem:[#allocation2 + $0x78] sm:$0xff] }
 0x702   :  { %1893 = vmatpush1.bf16.msra.mxu0 %v1806_v29  ;;  %1934 = vmatpush1.bf16.msra.mxu1 %v1808_v23  ;;  %v1706_v29 = vld [vmem:[#allocation2 + $0x60] sm:$0xff]  ;;  %v1708_v23 = vld [vmem:[#allocation2 + $0x70] sm:$0xff] }
 0x703   :  { %1894 = vmatprep.subr.bf16.mxu0 %v1815_v9  ;;  %1935 = vmatprep.subr.bf16.mxu1 %v1817_v17  ;;  %v1717_v9 = vld [vmem:[#allocation2 + $0xb8] sm:$0xff]  ;;  %v1714_v17 = vld [vmem:[#allocation2 + $0xa0] sm:$0xff] }
 0x706   :  { %1895 = vmatpush1.bf16.msra.mxu0 %v1814_v46  ;;  %1936 = vmatpush1.bf16.msra.mxu1 %v1816_v39  ;;  %v1716_v46 = vld [vmem:[#allocation2 + $0xb0] sm:$0xff]  ;;  %v1723_v39 = vld [vmem:[#allocation2 + $0xe8] sm:$0xff] }
 0x707   :  { %1946 = vmatprep.subr.bf16.mxu0 %v1699_v19  ;;  %1987 = vmatprep.subr.bf16.mxu1 %v1701_v11  ;;  %v1725_v19 = vld [vmem:[#allocation2 + $0xf8] sm:$0xff]  ;;  %v1722_v11 = vld [vmem:[#allocation2 + $0xe0] sm:$0xff] }
 0x709   :  { %1897 = vmatmul.mubr.bf16.vlgmr.msra.gmra.mrb[24].mxu0 %v6208_v3  ;;  %1938 = vmatmul.mubr.bf16.vlgmr.msra.gmra.mrb[52].mxu1 %v6208_v3 }
 0x70a   :  { %1947 = vmatpush1.bf16.msra.mxu0 %v1698_v61  ;;  %1988 = vmatpush1.bf16.msra.mxu1 %v1700_v59  ;;  %v1724_v61 = vld [vmem:[#allocation2 + $0xf0] sm:$0xff]  ;;  %v1731_v59 = vld [vmem:[#allocation2 + $0x128] sm:$0xff] }
 0x70b   :  { %1948 = vmatprep.subr.bf16.mxu0 %v1707_v35  ;;  %1989 = vmatprep.subr.bf16.mxu1 %v1709_v55  ;;  %v1733_v35 = vld [vmem:[#allocation2 + $0x138] sm:$0xff]  ;;  %v1732_v55 = vld [vmem:[#allocation2 + $0x130] sm:$0xff] }
 0x70c   :  { %1978 = vmatprep.mubr.bf16.mxu0 %v6202_v13  ;;  %2019 = vmatprep.mubr.bf16.mxu1 %v6202_v13  ;;  %v1730_v13 = vld [vmem:[#allocation2 + $0x120] sm:$0xff] }
 0x70e   :  { %1949 = vmatpush1.bf16.msra.mxu0 %v1706_v29  ;;  %1990 = vmatpush1.bf16.msra.mxu1 %v1708_v23  ;;  %v1739_v29 = vld [vmem:[#allocation2 + $0x168] sm:$0xff]  ;;  %v1741_v23 = vld [vmem:[#allocation2 + $0x178] sm:$0xff] }
 0x70f   :  { %1950 = vmatprep.subr.bf16.mxu0 %v1715_v50  ;;  %1991 = vmatprep.subr.bf16.mxu1 %v1717_v9  ;;  %v1738_v50 = vld [vmem:[#allocation2 + $0x160] sm:$0xff]  ;;  %v1740_v9 = vld [vmem:[#allocation2 + $0x170] sm:$0xff] }
 0x712   :  { %1951 = vmatpush1.bf16.msra.mxu0 %v1714_v17  ;;  %1992 = vmatpush1.bf16.msra.mxu1 %v1716_v46  ;;  %v1747_v17 = vld [vmem:[#allocation2 + $0x1a8] sm:$0xff]  ;;  %v1749_v46 = vld [vmem:[#allocation2 + $0x1b8] sm:$0xff] }
 0x713   :  { %1952 = vmatprep.subr.bf16.mxu0 %v1723_v39  ;;  %1993 = vmatprep.subr.bf16.mxu1 %v1725_v19  ;;  %v1746_v39 = vld [vmem:[#allocation2 + $0x1a0] sm:$0xff]  ;;  %v1748_v19 = vld [vmem:[#allocation2 + $0x1b0] sm:$0xff] }
 0x716   :  { %1953 = vmatpush1.bf16.msra.mxu0 %v1722_v11  ;;  %1994 = vmatpush1.bf16.msra.mxu1 %v1724_v61  ;;  %v1755_v11 = vld [vmem:[#allocation2 + $0x1e8] sm:$0xff]  ;;  %v1757_v61 = vld [vmem:[#allocation2 + $0x1f8] sm:$0xff] }
 0x717   :  { %1954 = vmatprep.subr.bf16.mxu0 %v1731_v59  ;;  %1995 = vmatprep.subr.bf16.mxu1 %v1733_v35  ;;  %v1754_v59 = vld [vmem:[#allocation2 + $0x1e0] sm:$0xff]  ;;  %v1756_v35 = vld [vmem:[#allocation2 + $0x1f0] sm:$0xff] }
 0x71a   :  { %1955 = vmatpush1.bf16.msra.mxu0 %v1730_v13  ;;  %1996 = vmatpush1.bf16.msra.mxu1 %v1732_v55  ;;  %v1763_v13 = vld [vmem:[#allocation2 + $0x228] sm:$0xff]  ;;  %v1765_v55 = vld [vmem:[#allocation2 + $0x238] sm:$0xff] }
 0x71b   :  { %1956 = vmatprep.subr.bf16.mxu0 %v1739_v29  ;;  %1997 = vmatprep.subr.bf16.mxu1 %v1741_v23  ;;  %v1762_v29 = vld [vmem:[#allocation2 + $0x220] sm:$0xff]  ;;  %v1764_v23 = vld [vmem:[#allocation2 + $0x230] sm:$0xff] }
 0x71e   :  { %1957 = vmatpush1.bf16.msra.mxu0 %v1738_v50  ;;  %1998 = vmatpush1.bf16.msra.mxu1 %v1740_v9  ;;  %v1771_v50 = vld [vmem:[#allocation2 + $0x268] sm:$0xff]  ;;  %v1773_v9 = vld [vmem:[#allocation2 + $0x278] sm:$0xff] }
 0x71f   :  { %1958 = vmatprep.subr.bf16.mxu0 %v1747_v17  ;;  %1999 = vmatprep.subr.bf16.mxu1 %v1749_v46  ;;  %v1770_v17 = vld [vmem:[#allocation2 + $0x260] sm:$0xff]  ;;  %v1772_v46 = vld [vmem:[#allocation2 + $0x270] sm:$0xff] }
 0x722   :  { %1959 = vmatpush1.bf16.msra.mxu0 %v1746_v39  ;;  %2000 = vmatpush1.bf16.msra.mxu1 %v1748_v19  ;;  %v1779_v39 = vld [vmem:[#allocation2 + $0x2a8] sm:$0xff]  ;;  %v1781_v19 = vld [vmem:[#allocation2 + $0x2b8] sm:$0xff] }
 0x723   :  { %1960 = vmatprep.subr.bf16.mxu0 %v1755_v11  ;;  %2001 = vmatprep.subr.bf16.mxu1 %v1757_v61  ;;  %v1778_v11 = vld [vmem:[#allocation2 + $0x2a0] sm:$0xff]  ;;  %v1780_v61 = vld [vmem:[#allocation2 + $0x2b0] sm:$0xff] }
 0x726   :  { %1961 = vmatpush1.bf16.msra.mxu0 %v1754_v59  ;;  %2002 = vmatpush1.bf16.msra.mxu1 %v1756_v35  ;;  %v1787_v59 = vld [vmem:[#allocation2 + $0x2e8] sm:$0xff]  ;;  %v1789_v35 = vld [vmem:[#allocation2 + $0x2f8] sm:$0xff] }
 0x727   :  { %1962 = vmatprep.subr.bf16.mxu0 %v1763_v13  ;;  %2003 = vmatprep.subr.bf16.mxu1 %v1765_v55  ;;  %v1786_v13 = vld [vmem:[#allocation2 + $0x2e0] sm:$0xff]  ;;  %v1788_v55 = vld [vmem:[#allocation2 + $0x2f0] sm:$0xff] }
 0x72a   :  { %1963 = vmatpush1.bf16.msra.mxu0 %v1762_v29  ;;  %2004 = vmatpush1.bf16.msra.mxu1 %v1764_v23  ;;  %v1795_v29 = vld [vmem:[#allocation2 + $0x328] sm:$0xff]  ;;  %v1797_v23 = vld [vmem:[#allocation2 + $0x338] sm:$0xff] }
 0x72b   :  { %1964 = vmatprep.subr.bf16.mxu0 %v1771_v50  ;;  %2005 = vmatprep.subr.bf16.mxu1 %v1773_v9  ;;  %v1794_v50 = vld [vmem:[#allocation2 + $0x320] sm:$0xff]  ;;  %v1796_v9 = vld [vmem:[#allocation2 + $0x330] sm:$0xff] }
 0x72e   :  { %1965 = vmatpush1.bf16.msra.mxu0 %v1770_v17  ;;  %2006 = vmatpush1.bf16.msra.mxu1 %v1772_v46  ;;  %v1803_v17 = vld [vmem:[#allocation2 + $0x368] sm:$0xff]  ;;  %v1805_v46 = vld [vmem:[#allocation2 + $0x378] sm:$0xff] }
 0x72f   :  { %1966 = vmatprep.subr.bf16.mxu0 %v1779_v39  ;;  %2007 = vmatprep.subr.bf16.mxu1 %v1781_v19  ;;  %v1802_v39 = vld [vmem:[#allocation2 + $0x360] sm:$0xff]  ;;  %v1804_v19 = vld [vmem:[#allocation2 + $0x370] sm:$0xff] }
 0x732   :  { %1967 = vmatpush1.bf16.msra.mxu0 %v1778_v11  ;;  %2008 = vmatpush1.bf16.msra.mxu1 %v1780_v61  ;;  %v1811_v11 = vld [vmem:[#allocation2 + $0x3a8] sm:$0xff]  ;;  %v1813_v61 = vld [vmem:[#allocation2 + $0x3b8] sm:$0xff] }
 0x733   :  { %1968 = vmatprep.subr.bf16.mxu0 %v1787_v59  ;;  %2009 = vmatprep.subr.bf16.mxu1 %v1789_v35  ;;  %v1810_v59 = vld [vmem:[#allocation2 + $0x3a0] sm:$0xff]  ;;  %v1812_v35 = vld [vmem:[#allocation2 + $0x3b0] sm:$0xff] }
 0x736   :  { %1969 = vmatpush1.bf16.msra.mxu0 %v1786_v13  ;;  %2010 = vmatpush1.bf16.msra.mxu1 %v1788_v55  ;;  %v1819_v13 = vld [vmem:[#allocation2 + $0x3e8] sm:$0xff]  ;;  %v1821_v55 = vld [vmem:[#allocation2 + $0x3f8] sm:$0xff] }
 0x737   :  { %1970 = vmatprep.subr.bf16.mxu0 %v1795_v29  ;;  %2011 = vmatprep.subr.bf16.mxu1 %v1797_v23  ;;  %v1818_v29 = vld [vmem:[#allocation2 + $0x3e0] sm:$0xff]  ;;  %v1820_v23 = vld [vmem:[#allocation2 + $0x3f0] sm:$0xff] }
 0x73a   :  { %1971 = vmatpush1.bf16.msra.mxu0 %v1794_v50  ;;  %2012 = vmatpush1.bf16.msra.mxu1 %v1796_v9  ;;  %v6219_v50 = vld [vmem:[%s8374_s11] sm:$0xff] }
 0x73b   :  { %1972 = vmatprep.subr.bf16.mxu0 %v1803_v17  ;;  %2013 = vmatprep.subr.bf16.mxu1 %v1805_v46  ;;  %v1827_v9 = vrot.slane %v6219_v50, %v5829_v38  ;;  %v1835_v17 = vrot.slane %v6219_v50, %v5909_v4  ;;  %v1831_v46 = vrot.slane %v6219_v50, %v5835_v40 }
 0x73e   :  { %1973 = vmatpush1.bf16.msra.mxu0 %v1802_v39  ;;  %2014 = vmatpush1.bf16.msra.mxu1 %v1804_v19  ;;  %v1839_v39 = vrot.slane %v6219_v50, %v5912_v7 }
 0x73f   :  { %1974 = vmatprep.subr.bf16.mxu0 %v1811_v11  ;;  %2015 = vmatprep.subr.bf16.mxu1 %v1813_v61 }
 0x742   :  { %1975 = vmatpush1.bf16.msra.mxu0 %v1810_v59  ;;  %2016 = vmatpush1.bf16.msra.mxu1 %v1812_v35 }
 0x743   :  { %1976 = vmatprep.subr.bf16.mxu0 %v1819_v13  ;;  %2017 = vmatprep.subr.bf16.mxu1 %v1821_v55 }
 0x746   :  { %1977 = vmatpush1.bf16.msra.mxu0 %v1818_v29  ;;  %2018 = vmatpush1.bf16.msra.mxu1 %v1820_v23 }
 0x749   :  { %1979 = vmatmul.mubr.bf16.vlgmr.msra.gmra.mrb[28].mxu0 %v6208_v3  ;;  %2020 = vmatmul.mubr.bf16.vlgmr.msra.gmra.mrb[56].mxu1 %v6208_v3 }
 0x7dc   :  { %v1898_v19 = vpop.f32.mrb[24].mxu0  ;;  %v1939_v11 = vpop.f32.mrb[52].mxu1 }
 0x7dd   :  { %v1899_v3 = vadd.f32 %v1898_v19, %v1827_v9  ;;  %v1940_v61 = vadd.f32 %v1939_v11, %v1835_v17  ;;  %v1900_v59 = vpop.f32.mrb[25].mxu0  ;;  %v1941_v35 = vpop.f32.mrb[53].mxu1 }
 0x7de   :  { %v1901_v13 = vadd.f32 %v1900_v59, %v1831_v46  ;;  %v1942_v55 = vadd.f32 %v1941_v35, %v1839_v39  ;;  %v1902_v29 = vpop.f32.mrb[26].mxu0  ;;  %v1943_v23 = vpop.f32.mrb[54].mxu1 }
 0x7df   :  { %v2028_v38 = vadd.f32 %v1899_v3, %v6072_v49  ;;  %v2036_v4 = vadd.f32 %v1899_v3, %v6076_v37  ;;  %v2044_v36 = vadd.f32 %v1899_v3, %v6080_v41  ;;  %v2052_v40 = vadd.f32 %v1899_v3, %v6084_v43  ;;  %v1903_v63 = vpop.f32.mrb[27].mxu0  ;;  %v1944_v7 = vpop.f32.mrb[55].mxu1 }
 0x7e0   :  { %v2060_v10 = vadd.f32 %v1899_v3, %v6092_v45  ;;  %v2068_v9 = vadd.f32 %v1899_v3, %v6100_v60  ;;  %v2076_v17 = vadd.f32 %v1899_v3, %v6108_v0  ;;  %v2084_v46 = vadd.f32 %v1899_v3, %v6116_v57 }
 0x7e1   :  { %v2030_v39 = vadd.f32 %v1940_v61, %v6124_v2  ;;  %v2038_v49 = vadd.f32 %v1940_v61, %v6132_v5  ;;  %v2046_v37 = vadd.f32 %v1940_v61, %v6140_v42  ;;  %v2054_v41 = vadd.f32 %v1940_v61, %v6148_v20 }
 0x7e2   :  { %v2062_v43 = vadd.f32 %v1940_v61, %v6152_v24  ;;  %v2070_v63 = vadd.f32 %v1940_v61, %v6156_v26  ;;  %v2078_v45 = vadd.f32 %v1940_v61, %v6160_v32  ;;  %v2086_v60 = vadd.f32 %v1940_v61, %v6164_v33 }
 0x7e3   :  { %v2029_v0 = vadd.f32 %v1901_v13, %v6074_v53  ;;  %v2037_v57 = vadd.f32 %v1901_v13, %v6078_v44  ;;  %v2045_v2 = vadd.f32 %v1901_v13, %v6082_v48  ;;  %v2053_v5 = vadd.f32 %v1901_v13, %v6086_v47 }
 0x7e4   :  { %v2061_v42 = vadd.f32 %v1901_v13, %v6096_v27  ;;  %v2069_v20 = vadd.f32 %v1901_v13, %v6102_v62  ;;  %v2077_v24 = vadd.f32 %v1901_v13, %v6112_v54  ;;  %v2085_v26 = vadd.f32 %v1901_v13, %v6118_v28 }
 0x7e5   :  { %v6253_v19 = vpack.c.bf16 %v2029_v0, %v2028_v38  ;;  %v6255_v32 = vpack.c.bf16 %v2037_v57, %v2036_v4  ;;  %v6257_v33 = vpack.c.bf16 %v2045_v2, %v2044_v36  ;;  %v6259_v53 = vpack.c.bf16 %v2053_v5, %v2052_v40  ;;  %v8834_v0 = vld [vmem:[#allocation36_spill] sm:$0xff]  ;;  %v8835_v2 = vld [vmem:[#allocation38_spill] sm:$0xff] }
 0x7e6   :  { %v6261_v44 = vpack.c.bf16 %v2061_v42, %v2060_v10  ;;  %v6263_v48 = vpack.c.bf16 %v2069_v20, %v2068_v9  ;;  %v6265_v47 = vpack.c.bf16 %v2077_v24, %v2076_v17  ;;  %v6267_v27 = vpack.c.bf16 %v2085_v26, %v2084_v46  ;;  %v8836_v5 = vld [vmem:[#allocation40_spill] sm:$0xff]  ;;  %v8837_v42 = vld [vmem:[#allocation42_spill] sm:$0xff] }
 0x7e7   :  { %8816 = vst [vmem:[#allocation52_spill] sm:$0xff] %v6253_v19  ;;  %8817 = vst [vmem:[#allocation53_spill] sm:$0xff] %v6255_v32  ;;  %v2031_v62 = vadd.f32 %v1942_v55, %v6128_v8  ;;  %v2039_v54 = vadd.f32 %v1942_v55, %v6134_v6  ;;  %v2047_v28 = vadd.f32 %v1942_v55, %v6144_v14  ;;  %v8838_v20 = vld [vmem:[#allocation44_spill] sm:$0xff]  ;;  %v8839_v24 = vld [vmem:[#allocation46_spill] sm:$0xff] }
 0x7e8   :  { %8818 = vst [vmem:[#allocation54_spill] sm:$0xff] %v6257_v33  ;;  %8819 = vst [vmem:[#allocation55_spill] sm:$0xff] %v6259_v53  ;;  %v2055_v11 = vadd.f32 %v1942_v55, %v6150_v22  ;;  %v2063_v36 = vadd.f32 %v1942_v55, %v6154_v15  ;;  %v2071_v3 = vadd.f32 %v1942_v55, %v6158_v30 }
 0x7e9   :  { %8820 = vst [vmem:[#allocation56_spill] sm:$0xff] %v6261_v44  ;;  %8821 = vst [vmem:[#allocation57_spill] sm:$0xff] %v6263_v48  ;;  %v2079_v10 = vadd.f32 %v1942_v55, %v6162_v18  ;;  %v2087_v61 = vadd.f32 %v1942_v55, %v6166_v34  ;;  %v6277_v59 = vpack.c.bf16 %v2031_v62, %v2030_v39  ;;  %v8840_v62 = vld [vmem:[#allocation48_spill] sm:$0xff] }
 0x7ea   :  { %8822 = vst [vmem:[#allocation58_spill] sm:$0xff] %v6265_v47  ;;  %8823 = vst [vmem:[#allocation59_spill] sm:$0xff] %v6267_v27  ;;  %v6279_v35 = vpack.c.bf16 %v2039_v54, %v2038_v49  ;;  %v6281_v13 = vpack.c.bf16 %v2047_v28, %v2046_v37  ;;  %v6283_v8 = vpack.c.bf16 %v2055_v11, %v2054_v41  ;;  %v8841_v54 = vld [vmem:[#allocation50_spill] sm:$0xff] }
 0x7eb   :  { %8824 = vst [vmem:[#allocation60_spill] sm:$0xff] %v6277_v59  ;;  %v6285_v6 = vpack.c.bf16 %v2063_v36, %v2062_v43  ;;  %v6287_v14 = vpack.c.bf16 %v2071_v3, %v2070_v63  ;;  %v6289_v22 = vpack.c.bf16 %v2079_v10, %v2078_v45  ;;  %v6291_v15 = vpack.c.bf16 %v2087_v61, %v2086_v60  ;;  %v8832_v43 = vld [vmem:[#allocation32_spill] sm:$0xff]  ;;  %v8833_v45 = vld [vmem:[#allocation34_spill] sm:$0xff]  ;;  %v8843_v36 = vld [vmem:[#allocation27_spill] sm:$0xff] }
 0x7ec   :  { %8825 = vst [vmem:[#allocation61_spill] sm:$0xff] %v6279_v35  ;;  %8826 = vst [vmem:[#allocation62_spill] sm:$0xff] %v6281_v13  ;;  %v1843_v30 = vrot.slane %v6219_v50, %v5922_v16  ;;  %v1851_v18 = vrot.slane %v6219_v50, %v5937_v25  ;;  %v1847_v34 = vrot.slane %v6219_v50, %v5930_v21  ;;  %v8842_v28 = vld [vmem:[#allocation26_spill] sm:$0xff]  ;;  %v8844_v10 = vld [vmem:[#allocation28_spill] sm:$0xff] }
 0x7ed   :  { %8827 = vst [vmem:[#allocation63_spill] sm:$0xff] %v6283_v8  ;;  %8828 = vst [vmem:[#allocation64_spill] sm:$0xff] %v6285_v6  ;;  %v1855_v55 = vrot.slane %v6219_v50, %v5944_v31 }
 0x7ee   :  { %8829 = vst [vmem:[#allocation65_spill] sm:$0xff] %v6287_v14  ;;  %8830 = vst [vmem:[#allocation66_spill] sm:$0xff] %v6289_v22 }
 0x7ef   :  { %8831 = vst [vmem:[#allocation67_spill] sm:$0xff] %v6291_v15 }
 0x81c   :  { %v1980_v29 = vpop.f32.mrb[28].mxu0  ;;  %v2021_v23 = vpop.f32.mrb[56].mxu1 }
 0x81d   :  { %v1981_v38 = vadd.f32 %v1980_v29, %v1843_v30  ;;  %v2022_v4 = vadd.f32 %v2021_v23, %v1851_v18  ;;  %v1982_v40 = vpop.f32.mrb[29].mxu0  ;;  %v2023_v7 = vpop.f32.mrb[57].mxu1  ;;  %v8845_v30 = vld [vmem:[#allocation29_spill] sm:$0xff]  ;;  %v8847_v29 = vld [vmem:[#allocation31_spill] sm:$0xff] }
 0x81e   :  { %v1983_v9 = vadd.f32 %v1982_v40, %v1847_v34  ;;  %v2024_v17 = vadd.f32 %v2023_v7, %v1855_v55  ;;  %v1984_v46 = vpop.f32.mrb[30].mxu0  ;;  %v2025_v39 = vpop.f32.mrb[58].mxu1  ;;  %v8846_v34 = vld [vmem:[#allocation30_spill] sm:$0xff]  ;;  %v8849_v7 = vld [vmem:[#allocation35_spill] sm:$0xff] }
 0x81f   :  { %v2032_v16 = vadd.f32 %v1981_v38, %v6088_v51  ;;  %v2040_v25 = vadd.f32 %v1981_v38, %v6094_v52  ;;  %v2048_v49 = vadd.f32 %v1981_v38, %v6104_v58  ;;  %v2056_v21 = vadd.f32 %v1981_v38, %v6110_v56  ;;  %v1985_v37 = vpop.f32.mrb[31].mxu0  ;;  %v2026_v31 = vpop.f32.mrb[59].mxu1 }
 0x820   :  { %v2064_v50 = vadd.f32 %v1981_v38, %v6120_v1  ;;  %v2072_v41 = vadd.f32 %v1981_v38, %v6126_v12  ;;  %v2080_v63 = vadd.f32 %v1981_v38, %v8832_v43  ;;  %v2088_v60 = vadd.f32 %v1981_v38, %v8833_v45  ;;  %v8848_v38 = vld [vmem:[#allocation33_spill] sm:$0xff] }
 0x821   :  { %v2034_v57 = vadd.f32 %v2022_v4, %v8834_v0  ;;  %v2042_v51 = vadd.f32 %v2022_v4, %v8835_v2  ;;  %v2050_v52 = vadd.f32 %v2022_v4, %v8836_v5  ;;  %v2058_v58 = vadd.f32 %v2022_v4, %v8837_v42  ;;  %v8858_v5 = vld [vmem:[#allocation37_spill] sm:$0xff] }
 0x822   :  { %v2066_v56 = vadd.f32 %v2022_v4, %v8838_v20  ;;  %v2074_v26 = vadd.f32 %v2022_v4, %v8839_v24  ;;  %v2082_v1 = vadd.f32 %v2022_v4, %v8840_v62  ;;  %v2090_v12 = vadd.f32 %v2022_v4, %v8841_v54  ;;  %v8859_v20 = vld [vmem:[#allocation39_spill] sm:$0xff] }
 0x823   :  { %v2033_v11 = vadd.f32 %v1983_v9, %v8842_v28  ;;  %v2041_v3 = vadd.f32 %v1983_v9, %v8843_v36  ;;  %v2049_v61 = vadd.f32 %v1983_v9, %v8844_v10  ;;  %v2057_v18 = vadd.f32 %v1983_v9, %v8845_v30 }
 0x824   :  { %v2065_v55 = vadd.f32 %v1983_v9, %v8846_v34  ;;  %v2073_v23 = vadd.f32 %v1983_v9, %v8847_v29  ;;  %v2081_v40 = vadd.f32 %v1983_v9, %v8848_v38  ;;  %v2089_v46 = vadd.f32 %v1983_v9, %v8849_v7 }
 0x825   :  { %v6325_v39 = vpack.c.bf16 %v2033_v11, %v2032_v16  ;;  %v6327_v37 = vpack.c.bf16 %v2041_v3, %v2040_v25  ;;  %v6329_v4 = vpack.c.bf16 %v2049_v61, %v2048_v49  ;;  %v6331_v31 = vpack.c.bf16 %v2057_v18, %v2056_v21  ;;  %v8860_v16 = vld [vmem:[#allocation41_spill] sm:$0xff]  ;;  %v8861_v25 = vld [vmem:[#allocation43_spill] sm:$0xff] }
 0x826   :  { %v6333_v43 = vpack.c.bf16 %v2065_v55, %v2064_v50  ;;  %v6335_v45 = vpack.c.bf16 %v2073_v23, %v2072_v41  ;;  %v6337_v0 = vpack.c.bf16 %v2081_v40, %v2080_v63  ;;  %v6339_v2 = vpack.c.bf16 %v2089_v46, %v2088_v60  ;;  %v8862_v49 = vld [vmem:[#allocation45_spill] sm:$0xff]  ;;  %v8863_v21 = vld [vmem:[#allocation47_spill] sm:$0xff] }
 0x827   :  { %8850 = vst [vmem:[#allocation32_spill] sm:$0xff] %v6325_v39  ;;  %8851 = vst [vmem:[#allocation34_spill] sm:$0xff] %v6327_v37  ;;  %v2035_v42 = vadd.f32 %v2024_v17, %v8858_v5  ;;  %v2043_v9 = vadd.f32 %v2024_v17, %v8859_v20  ;;  %v2051_v24 = vadd.f32 %v2024_v17, %v8860_v16  ;;  %v8864_v50 = vld [vmem:[#allocation49_spill] sm:$0xff]  ;;  %v8865_v41 = vld [vmem:[#allocation51_spill] sm:$0xff] }
 0x828   :  { %8852 = vst [vmem:[#allocation36_spill] sm:$0xff] %v6329_v4  ;;  %8853 = vst [vmem:[#allocation38_spill] sm:$0xff] %v6331_v31  ;;  %v2059_v62 = vadd.f32 %v2024_v17, %v8861_v25  ;;  %v2067_v54 = vadd.f32 %v2024_v17, %v8862_v49  ;;  %v2075_v28 = vadd.f32 %v2024_v17, %v8863_v21 }
 0x829   :  { %8854 = vst [vmem:[#allocation40_spill] sm:$0xff] %v6333_v43  ;;  %8855 = vst [vmem:[#allocation42_spill] sm:$0xff] %v6335_v45  ;;  %v2083_v11 = vadd.f32 %v2024_v17, %v8864_v50  ;;  %v2091_v36 = vadd.f32 %v2024_v17, %v8865_v41  ;;  %v6349_v63 = vpack.c.bf16 %v2035_v42, %v2034_v57 }
 0x82a   :  { %8856 = vst [vmem:[#allocation44_spill] sm:$0xff] %v6337_v0  ;;  %8857 = vst [vmem:[#allocation46_spill] sm:$0xff] %v6339_v2  ;;  %v6351_v60 = vpack.c.bf16 %v2043_v9, %v2042_v51  ;;  %v6353_v3 = vpack.c.bf16 %v2051_v24, %v2050_v52  ;;  %v6355_v10 = vpack.c.bf16 %v2059_v62, %v2058_v58 }
 0x82b   :  { %8866 = vst [vmem:[#allocation48_spill] sm:$0xff] %v6349_v63  ;;  %v6357_v61 = vpack.c.bf16 %v2067_v54, %v2066_v56  ;;  %v6359_v30 = vpack.c.bf16 %v2075_v28, %v2074_v26  ;;  %v6361_v18 = vpack.c.bf16 %v2083_v11, %v2082_v1  ;;  %v6363_v34 = vpack.c.bf16 %v2091_v36, %v2090_v12 }
 0x82c   :  { %8867 = vst [vmem:[#allocation50_spill] sm:$0xff] %v6351_v60  ;;  %8868 = vst [vmem:[#allocation26_spill] sm:$0xff] %v6353_v3 }
 0x82d   :  { %8869 = vst [vmem:[#allocation27_spill] sm:$0xff] %v6355_v10  ;;  %8870 = vst [vmem:[#allocation28_spill] sm:$0xff] %v6357_v61 }
 0x82e   :  { %8871 = vst [vmem:[#allocation29_spill] sm:$0xff] %v6359_v30  ;;  %8872 = vst [vmem:[#allocation30_spill] sm:$0xff] %v6361_v18 }
 0x82f   :  { %8873 = vst [vmem:[#allocation31_spill] sm:$0xff] %v6363_v34 }
 0x830   :  { %5541 = dma.done.wait [#allocation5 + $0x2], 16384 }
 0x831   :  { %5542 = vsyncadd [#allocation5 + $0x2], 4294950912  ;;  %v8874_v55 = vmov 0   ;;  %v6367_v17 = vld [vmem:[#allocation4 + $0x8] sm:$0xff]  ;;  %v6369_v57 = vld [vmem:[#allocation4 + $0x18] sm:$0xff]  ;;  %s5567_s5 = smov [#allocation13]  }
 0x832   :  { %2554 = vmatprep.mubr.bf16.mxu0 %v8874_v55  ;;  %2595 = vmatprep.mubr.bf16.mxu1 %v8874_v55  ;;  %v6371_v51 = vld [vmem:[#allocation4] sm:$0xff]  ;;  %v6375_v52 = vld [vmem:[#allocation4 + $0x10] sm:$0xff]  ;;  %v6377_v58 = vld [vmem:[#allocation4 + $0x48] sm:$0xff]  ;;  %s4462_s25 = sshll.u32 %s5567_s5, 4  ;;  %s4463_s25 = int_to_ptr.vmem [resolvable:$true] %s4462_s25 }
 0x833   :  { %2522 = vmatprep.subr.bf16.mxu0 %v6367_v17  ;;  %2563 = vmatprep.subr.bf16.mxu1 %v6369_v57  ;;  %v6379_v56 = vld [vmem:[#allocation4 + $0x58] sm:$0xff]  ;;  %v6385_v26 = vld [vmem:[#allocation4 + $0x40] sm:$0xff]  ;;  %v6387_v1 = vld [vmem:[#allocation4 + $0x50] sm:$0xff]  ;;  %s5511_s19 = scalar_lea.vmem %s4463_s25, 256  ;;  %p5516_p11 = scmp.lt.s32.totalorder %s4463_s25, %s4463_s25 }
 0x834   :  { %2523 = vmatpush1.bf16.msra.mxu0 %v6371_v51  ;;  %2564 = vmatpush1.bf16.msra.mxu1 %v6375_v52  ;;  %v6389_v12 = vld [vmem:[#allocation4 + $0x88] sm:$0xff]  ;;  %v6391_v29 = vld [vmem:[#allocation4 + $0x98] sm:$0xff]  ;;  %v6397_v23 = vld [vmem:[#allocation4 + $0x80] sm:$0xff]  ;;  %p5512_p10 = scmp.ne.s32.totalorder %s4463_s25, %s5511_s19  ;;  %p5517_p12 = scmp.lt.s32.totalorder %s5511_s19, %s5511_s19 }
 0x835   :  { %2524 = vmatprep.subr.bf16.mxu0 %v6377_v58  ;;  %2565 = vmatprep.subr.bf16.mxu1 %v6379_v56  ;;  %v6399_v38 = vld [vmem:[#allocation4 + $0x90] sm:$0xff]  ;;  %v6401_v40 = vld [vmem:[#allocation4 + $0xc8] sm:$0xff]  ;;  %v6403_v7 = vld [vmem:[#allocation4 + $0xd8] sm:$0xff] }
 0x836   :  { %v6409_v46 = vld [vmem:[#allocation4 + $0xc0] sm:$0xff]  ;;  %v6411_v5 = vld [vmem:[#allocation4 + $0xd0] sm:$0xff]  ;;  %v6413_v42 = vld [vmem:[#allocation4 + $0x108] sm:$0xff]  ;;  %p5518_p13 = por %p5517_p12, %p5516_p11 }
 0x837   :  { %v6415_v20 = vld [vmem:[#allocation4 + $0x118] sm:$0xff]  ;;  %v6421_v9 = vld [vmem:[#allocation4 + $0x100] sm:$0xff]  ;;  %v6423_v16 = vld [vmem:[#allocation4 + $0x110] sm:$0xff] }
 0x838   :  { %2525 = vmatpush1.bf16.msra.mxu0 %v6385_v26  ;;  %2566 = vmatpush1.bf16.msra.mxu1 %v6387_v1  ;;  %v6425_v24 = vld [vmem:[#allocation4 + $0x148] sm:$0xff]  ;;  %v6427_v25 = vld [vmem:[#allocation4 + $0x158] sm:$0xff]  ;;  %v6433_v62 = vld [vmem:[#allocation4 + $0x140] sm:$0xff]  ;;  %p5519_p0 = pnand %p5518_p13, %p5512_p10 }
 0x839   :  { %2526 = vmatprep.subr.bf16.mxu0 %v6389_v12  ;;  %2567 = vmatprep.subr.bf16.mxu1 %v6391_v29  ;;  %v6435_v49 = vld [vmem:[#allocation4 + $0x150] sm:$0xff]  ;;  %v6437_v54 = vld [vmem:[#allocation4 + $0x188] sm:$0xff]  ;;  %v6439_v21 = vld [vmem:[#allocation4 + $0x198] sm:$0xff] }
 0x83a   :  { %v6445_v28 = vld [vmem:[#allocation4 + $0x180] sm:$0xff]  ;;  %v6447_v50 = vld [vmem:[#allocation4 + $0x190] sm:$0xff]  ;;  %v6449_v11 = vld [vmem:[#allocation4 + $0x1c8] sm:$0xff] }
 0x83b   :  { %v6451_v41 = vld [vmem:[#allocation4 + $0x1d8] sm:$0xff]  ;;  %v6457_v36 = vld [vmem:[#allocation4 + $0x1c0] sm:$0xff]  ;;  %v6459_v34 = vld [vmem:[#allocation4 + $0x1d0] sm:$0xff] }
 0x83c   :  { %2527 = vmatpush1.bf16.msra.mxu0 %v6397_v23  ;;  %2568 = vmatpush1.bf16.msra.mxu1 %v6399_v38  ;;  %v6461_v2 = vld [vmem:[#allocation4 + $0x208] sm:$0xff]  ;;  %v6463_v15 = vld [vmem:[#allocation4 + $0x218] sm:$0xff]  ;;  %v6469_v27 = vld [vmem:[#allocation4 + $0x200] sm:$0xff] }
 0x83d   :  { %2528 = vmatprep.subr.bf16.mxu0 %v6401_v40  ;;  %2569 = vmatprep.subr.bf16.mxu1 %v6403_v7  ;;  %8875 = vst [vmem:[#allocation33_spill] sm:$0xff] %v6461_v2  ;;  %8876 = vst [vmem:[#allocation35_spill] sm:$0xff] %v6463_v15  ;;  %v6471_v18 = vld [vmem:[#allocation4 + $0x210] sm:$0xff]  ;;  %v6473_v0 = vld [vmem:[#allocation4 + $0x248] sm:$0xff] }
 0x83e   :  { %8877 = vst [vmem:[#allocation37_spill] sm:$0xff] %v6469_v27  ;;  %8878 = vst [vmem:[#allocation39_spill] sm:$0xff] %v6471_v18  ;;  %v6475_v22 = vld [vmem:[#allocation4 + $0x258] sm:$0xff]  ;;  %v6481_v47 = vld [vmem:[#allocation4 + $0x240] sm:$0xff] }
 0x83f   :  { %8879 = vst [vmem:[#allocation41_spill] sm:$0xff] %v6473_v0  ;;  %8880 = vst [vmem:[#allocation43_spill] sm:$0xff] %v6475_v22  ;;  %v6483_v30 = vld [vmem:[#allocation4 + $0x250] sm:$0xff]  ;;  %v6485_v45 = vld [vmem:[#allocation4 + $0x288] sm:$0xff] }
 0x840   :  { %2529 = vmatpush1.bf16.msra.mxu0 %v6409_v46  ;;  %2570 = vmatpush1.bf16.msra.mxu1 %v6411_v5  ;;  %8881 = vst [vmem:[#allocation45_spill] sm:$0xff] %v6481_v47  ;;  %8882 = vst [vmem:[#allocation47_spill] sm:$0xff] %v6483_v30  ;;  %v6487_v14 = vld [vmem:[#allocation4 + $0x298] sm:$0xff]  ;;  %v6493_v48 = vld [vmem:[#allocation4 + $0x280] sm:$0xff] }
 0x841   :  { %2530 = vmatprep.subr.bf16.mxu0 %v6413_v42  ;;  %2571 = vmatprep.subr.bf16.mxu1 %v6415_v20  ;;  %8883 = vst [vmem:[#allocation49_spill] sm:$0xff] %v6485_v45  ;;  %8884 = vst [vmem:[#allocation51_spill] sm:$0xff] %v6487_v14  ;;  %v6495_v61 = vld [vmem:[#allocation4 + $0x290] sm:$0xff]  ;;  %v6497_v43 = vld [vmem:[#allocation4 + $0x2c8] sm:$0xff] }
 0x842   :  { %8885 = vst [vmem:[#allocation68_spill] sm:$0xff] %v6493_v48  ;;  %8886 = vst [vmem:[#allocation69_spill] sm:$0xff] %v6495_v61  ;;  %v6499_v6 = vld [vmem:[#allocation4 + $0x2d8] sm:$0xff]  ;;  %v6505_v44 = vld [vmem:[#allocation4 + $0x2c0] sm:$0xff] }
 0x843   :  { %8887 = vst [vmem:[#allocation70_spill] sm:$0xff] %v6497_v43  ;;  %8888 = vst [vmem:[#allocation71_spill] sm:$0xff] %v6499_v6  ;;  %v6507_v10 = vld [vmem:[#allocation4 + $0x2d0] sm:$0xff]  ;;  %v6509_v31 = vld [vmem:[#allocation4 + $0x308] sm:$0xff] }
 0x844   :  { %2531 = vmatpush1.bf16.msra.mxu0 %v6421_v9  ;;  %2572 = vmatpush1.bf16.msra.mxu1 %v6423_v16  ;;  %8889 = vst [vmem:[#allocation72_spill] sm:$0xff] %v6505_v44  ;;  %8890 = vst [vmem:[#allocation73_spill] sm:$0xff] %v6507_v10  ;;  %v6511_v8 = vld [vmem:[#allocation4 + $0x318] sm:$0xff]  ;;  %v6517_v53 = vld [vmem:[#allocation4 + $0x300] sm:$0xff] }
 0x845   :  { %2532 = vmatprep.subr.bf16.mxu0 %v6425_v24  ;;  %2573 = vmatprep.subr.bf16.mxu1 %v6427_v25  ;;  %8891 = vst [vmem:[#allocation74_spill] sm:$0xff] %v6509_v31  ;;  %8892 = vst [vmem:[#allocation75_spill] sm:$0xff] %v6511_v8  ;;  %v6519_v3 = vld [vmem:[#allocation4 + $0x310] sm:$0xff]  ;;  %v6521_v4 = vld [vmem:[#allocation4 + $0x348] sm:$0xff] }
 0x846   :  { %8893 = vst [vmem:[#allocation76_spill] sm:$0xff] %v6517_v53  ;;  %8894 = vst [vmem:[#allocation77_spill] sm:$0xff] %v6519_v3  ;;  %v6523_v13 = vld [vmem:[#allocation4 + $0x358] sm:$0xff]  ;;  %v6529_v33 = vld [vmem:[#allocation4 + $0x340] sm:$0xff] }
 0x847   :  { %8895 = vst [vmem:[#allocation78_spill] sm:$0xff] %v6521_v4  ;;  %8896 = vst [vmem:[#allocation79_spill] sm:$0xff] %v6523_v13  ;;  %v6531_v60 = vld [vmem:[#allocation4 + $0x350] sm:$0xff]  ;;  %v6533_v37 = vld [vmem:[#allocation4 + $0x388] sm:$0xff] }
 0x848   :  { %2533 = vmatpush1.bf16.msra.mxu0 %v6433_v62  ;;  %2574 = vmatpush1.bf16.msra.mxu1 %v6435_v49  ;;  %8897 = vst [vmem:[#allocation80_spill] sm:$0xff] %v6529_v33  ;;  %8898 = vst [vmem:[#allocation81_spill] sm:$0xff] %v6531_v60  ;;  %v6535_v35 = vld [vmem:[#allocation4 + $0x398] sm:$0xff]  ;;  %v6541_v32 = vld [vmem:[#allocation4 + $0x380] sm:$0xff] }
 0x849   :  { %2534 = vmatprep.subr.bf16.mxu0 %v6437_v54  ;;  %2575 = vmatprep.subr.bf16.mxu1 %v6439_v21  ;;  %8899 = vst [vmem:[#allocation82_spill] sm:$0xff] %v6533_v37  ;;  %8900 = vst [vmem:[#allocation83_spill] sm:$0xff] %v6535_v35  ;;  %v6543_v63 = vld [vmem:[#allocation4 + $0x390] sm:$0xff]  ;;  %v6545_v39 = vld [vmem:[#allocation4 + $0x3c8] sm:$0xff] }
 0x84a   :  { %8901 = vst [vmem:[#allocation84_spill] sm:$0xff] %v6541_v32  ;;  %8902 = vst [vmem:[#allocation85_spill] sm:$0xff] %v6543_v63  ;;  %v6547_v59 = vld [vmem:[#allocation4 + $0x3d8] sm:$0xff]  ;;  %v6553_v19 = vld [vmem:[#allocation4 + $0x3c0] sm:$0xff] }
 0x84b   :  { %8903 = vst [vmem:[#allocation86_spill] sm:$0xff] %v6545_v39  ;;  %8904 = vst [vmem:[#allocation87_spill] sm:$0xff] %v6547_v59 }
 0x84c   :  { %2535 = vmatpush1.bf16.msra.mxu0 %v6445_v28  ;;  %2576 = vmatpush1.bf16.msra.mxu1 %v6447_v50  ;;  %8905 = vst [vmem:[#allocation88_spill] sm:$0xff] %v6553_v19 }
 0x84d   :  { %2536 = vmatprep.subr.bf16.mxu0 %v6449_v11  ;;  %2577 = vmatprep.subr.bf16.mxu1 %v6451_v41 }
 0x850   :  { %2537 = vmatpush1.bf16.msra.mxu0 %v6457_v36  ;;  %2578 = vmatpush1.bf16.msra.mxu1 %v6459_v34 }
 0x851   :  { %2538 = vmatprep.subr.bf16.mxu0 %v6461_v2  ;;  %2579 = vmatprep.subr.bf16.mxu1 %v6463_v15 }
 0x854   :  { %2539 = vmatpush1.bf16.msra.mxu0 %v6469_v27  ;;  %2580 = vmatpush1.bf16.msra.mxu1 %v6471_v18 }
 0x855   :  { %2540 = vmatprep.subr.bf16.mxu0 %v6473_v0  ;;  %2581 = vmatprep.subr.bf16.mxu1 %v6475_v22 }
 0x858   :  { %2541 = vmatpush1.bf16.msra.mxu0 %v6481_v47  ;;  %2582 = vmatpush1.bf16.msra.mxu1 %v6483_v30 }
 0x859   :  { %2542 = vmatprep.subr.bf16.mxu0 %v6485_v45  ;;  %2583 = vmatprep.subr.bf16.mxu1 %v6487_v14 }
 0x85c   :  { %2543 = vmatpush1.bf16.msra.mxu0 %v6493_v48  ;;  %2584 = vmatpush1.bf16.msra.mxu1 %v6495_v61 }
 0x85d   :  { %2544 = vmatprep.subr.bf16.mxu0 %v6497_v43  ;;  %2585 = vmatprep.subr.bf16.mxu1 %v6499_v6 }
 0x860   :  { %2545 = vmatpush1.bf16.msra.mxu0 %v6505_v44  ;;  %2586 = vmatpush1.bf16.msra.mxu1 %v6507_v10 }
 0x861   :  { %2546 = vmatprep.subr.bf16.mxu0 %v6509_v31  ;;  %2587 = vmatprep.subr.bf16.mxu1 %v6511_v8 }
 0x864   :  { %2547 = vmatpush1.bf16.msra.mxu0 %v6517_v53  ;;  %2588 = vmatpush1.bf16.msra.mxu1 %v6519_v3 }
 0x865   :  { %2548 = vmatprep.subr.bf16.mxu0 %v6521_v4  ;;  %2589 = vmatprep.subr.bf16.mxu1 %v6523_v13 }
 0x868   :  { %2549 = vmatpush1.bf16.msra.mxu0 %v6529_v33  ;;  %2590 = vmatpush1.bf16.msra.mxu1 %v6531_v60  ;;  %v6559_v60 = vld [vmem:[#allocation4 + $0x38] sm:$0xff] }
 0x869   :  { %2550 = vmatprep.subr.bf16.mxu0 %v6533_v37  ;;  %2591 = vmatprep.subr.bf16.mxu1 %v6535_v35  ;;  %v6555_v37 = vld [vmem:[#allocation4 + $0x3d0] sm:$0xff]  ;;  %v6557_v35 = vld [vmem:[#allocation4 + $0x28] sm:$0xff]  ;;  %8908 = vst [vmem:[#allocation91_spill] sm:$0xff] %v6559_v60 }
 0x86a   :  { %8906 = vst [vmem:[#allocation89_spill] sm:$0xff] %v6555_v37  ;;  %8907 = vst [vmem:[#allocation90_spill] sm:$0xff] %v6557_v35 }
 0x86c   :  { %2551 = vmatpush1.bf16.msra.mxu0 %v6541_v32  ;;  %2592 = vmatpush1.bf16.msra.mxu1 %v6543_v63  ;;  %v6565_v63 = vld [vmem:[#allocation4 + $0x20] sm:$0xff]  ;;  %v6571_v32 = vld [vmem:[#allocation4 + $0x78] sm:$0xff] }
 0x86d   :  { %2552 = vmatprep.subr.bf16.mxu0 %v6545_v39  ;;  %2593 = vmatprep.subr.bf16.mxu1 %v6547_v59  ;;  %8909 = vst [vmem:[#allocation92_spill] sm:$0xff] %v6565_v63  ;;  %v6567_v39 = vld [vmem:[#allocation4 + $0x30] sm:$0xff]  ;;  %v6569_v59 = vld [vmem:[#allocation4 + $0x68] sm:$0xff]  ;;  %8912 = vst [vmem:[#allocation95_spill] sm:$0xff] %v6571_v32 }
 0x86e   :  { %8910 = vst [vmem:[#allocation93_spill] sm:$0xff] %v6567_v39  ;;  %8911 = vst [vmem:[#allocation94_spill] sm:$0xff] %v6569_v59 }
 0x870   :  { %2553 = vmatpush1.bf16.msra.mxu0 %v6553_v19  ;;  %2594 = vmatpush1.bf16.msra.mxu1 %v6555_v37  ;;  %v6583_v37 = vld [vmem:[#allocation4 + $0xa8] sm:$0xff]  ;;  %v6585_v19 = vld [vmem:[#allocation4 + $0xb8] sm:$0xff] }
 0x871   :  { %2604 = vmatprep.subr.bf16.mxu0 %v6557_v35  ;;  %2645 = vmatprep.subr.bf16.mxu1 %v6559_v60  ;;  %v6579_v60 = vld [vmem:[#allocation4 + $0x60] sm:$0xff]  ;;  %v6581_v35 = vld [vmem:[#allocation4 + $0x70] sm:$0xff]  ;;  %8915 = vst [vmem:[#allocation98_spill] sm:$0xff] %v6583_v37  ;;  %8916 = vst [vmem:[#allocation99_spill] sm:$0xff] %v6585_v19 }
 0x872   :  { %8913 = vst [vmem:[#allocation96_spill] sm:$0xff] %v6579_v60  ;;  %8914 = vst [vmem:[#allocation97_spill] sm:$0xff] %v6581_v35 }
 0x873   :  { %2555 = vmatmul.mubr.bf16.vlgmr.msra.gmra.mrb[32].mxu0 %v8874_v55  ;;  %2596 = vmatmul.mubr.bf16.vlgmr.msra.gmra.mrb[60].mxu1 %v8874_v55 }
 0x874   :  { %2605 = vmatpush1.bf16.msra.mxu0 %v6565_v63  ;;  %2646 = vmatpush1.bf16.msra.mxu1 %v6567_v39  ;;  %v6597_v39 = vld [vmem:[#allocation4 + $0xe8] sm:$0xff]  ;;  %v6599_v63 = vld [vmem:[#allocation4 + $0xf8] sm:$0xff] }
 0x875   :  { %2606 = vmatprep.subr.bf16.mxu0 %v6569_v59  ;;  %2647 = vmatprep.subr.bf16.mxu1 %v6571_v32  ;;  %v6593_v32 = vld [vmem:[#allocation4 + $0xa0] sm:$0xff]  ;;  %v6595_v59 = vld [vmem:[#allocation4 + $0xb0] sm:$0xff]  ;;  %8919 = vst [vmem:[#allocation102_spill] sm:$0xff] %v6597_v39  ;;  %8920 = vst [vmem:[#allocation103_spill] sm:$0xff] %v6599_v63 }
 0x876   :  { %2636 = vmatprep.mubr.bf16.mxu0 %v8874_v55  ;;  %2677 = vmatprep.mubr.bf16.mxu1 %v8874_v55  ;;  %8917 = vst [vmem:[#allocation100_spill] sm:$0xff] %v6593_v32  ;;  %8918 = vst [vmem:[#allocation101_spill] sm:$0xff] %v6595_v59 }
 0x878   :  { %2607 = vmatpush1.bf16.msra.mxu0 %v6579_v60  ;;  %2648 = vmatpush1.bf16.msra.mxu1 %v6581_v35  ;;  %v6605_v35 = vld [vmem:[#allocation4 + $0xe0] sm:$0xff]  ;;  %v6611_v60 = vld [vmem:[#allocation4 + $0x138] sm:$0xff] }
 0x879   :  { %2608 = vmatprep.subr.bf16.mxu0 %v6583_v37  ;;  %2649 = vmatprep.subr.bf16.mxu1 %v6585_v19  ;;  %8921 = vst [vmem:[#allocation104_spill] sm:$0xff] %v6605_v35  ;;  %v6607_v37 = vld [vmem:[#allocation4 + $0xf0] sm:$0xff]  ;;  %v6609_v19 = vld [vmem:[#allocation4 + $0x128] sm:$0xff]  ;;  %8924 = vst [vmem:[#allocation107_spill] sm:$0xff] %v6611_v60 }
 0x87a   :  { %8922 = vst [vmem:[#allocation105_spill] sm:$0xff] %v6607_v37  ;;  %8923 = vst [vmem:[#allocation106_spill] sm:$0xff] %v6609_v19 }
 0x87c   :  { %2609 = vmatpush1.bf16.msra.mxu0 %v6593_v32  ;;  %2650 = vmatpush1.bf16.msra.mxu1 %v6595_v59  ;;  %v6617_v59 = vld [vmem:[#allocation4 + $0x120] sm:$0xff]  ;;  %v6623_v32 = vld [vmem:[#allocation4 + $0x178] sm:$0xff] }
 0x87d   :  { %2610 = vmatprep.subr.bf16.mxu0 %v6597_v39  ;;  %2651 = vmatprep.subr.bf16.mxu1 %v6599_v63  ;;  %8925 = vst [vmem:[#allocation108_spill] sm:$0xff] %v6617_v59  ;;  %v6619_v39 = vld [vmem:[#allocation4 + $0x130] sm:$0xff]  ;;  %v6621_v63 = vld [vmem:[#allocation4 + $0x168] sm:$0xff]  ;;  %8928 = vst [vmem:[#allocation111_spill] sm:$0xff] %v6623_v32 }
 0x87e   :  { %8926 = vst [vmem:[#allocation109_spill] sm:$0xff] %v6619_v39  ;;  %8927 = vst [vmem:[#allocation110_spill] sm:$0xff] %v6621_v63 }
 0x880   :  { %2611 = vmatpush1.bf16.msra.mxu0 %v6605_v35  ;;  %2652 = vmatpush1.bf16.msra.mxu1 %v6607_v37  ;;  %v6629_v37 = vld [vmem:[#allocation4 + $0x160] sm:$0xff]  ;;  %v6635_v35 = vld [vmem:[#allocation4 + $0x1b8] sm:$0xff] }
 0x881   :  { %2612 = vmatprep.subr.bf16.mxu0 %v6609_v19  ;;  %2653 = vmatprep.subr.bf16.mxu1 %v6611_v60  ;;  %8929 = vst [vmem:[#allocation112_spill] sm:$0xff] %v6629_v37  ;;  %v6631_v19 = vld [vmem:[#allocation4 + $0x170] sm:$0xff]  ;;  %v6633_v60 = vld [vmem:[#allocation4 + $0x1a8] sm:$0xff]  ;;  %8932 = vst [vmem:[#allocation115_spill] sm:$0xff] %v6635_v35 }
 0x882   :  { %8930 = vst [vmem:[#allocation113_spill] sm:$0xff] %v6631_v19  ;;  %8931 = vst [vmem:[#allocation114_spill] sm:$0xff] %v6633_v60 }
 0x884   :  { %2613 = vmatpush1.bf16.msra.mxu0 %v6617_v59  ;;  %2654 = vmatpush1.bf16.msra.mxu1 %v6619_v39  ;;  %v6641_v39 = vld [vmem:[#allocation4 + $0x1a0] sm:$0xff]  ;;  %v6647_v59 = vld [vmem:[#allocation4 + $0x1f8] sm:$0xff] }
 0x885   :  { %2614 = vmatprep.subr.bf16.mxu0 %v6621_v63  ;;  %2655 = vmatprep.subr.bf16.mxu1 %v6623_v32  ;;  %8933 = vst [vmem:[#allocation116_spill] sm:$0xff] %v6641_v39  ;;  %v6643_v63 = vld [vmem:[#allocation4 + $0x1b0] sm:$0xff]  ;;  %v6645_v32 = vld [vmem:[#allocation4 + $0x1e8] sm:$0xff]  ;;  %8936 = vst [vmem:[#allocation119_spill] sm:$0xff] %v6647_v59 }
 0x886   :  { %8934 = vst [vmem:[#allocation117_spill] sm:$0xff] %v6643_v63  ;;  %8935 = vst [vmem:[#allocation118_spill] sm:$0xff] %v6645_v32 }
 0x888   :  { %2615 = vmatpush1.bf16.msra.mxu0 %v6629_v37  ;;  %2656 = vmatpush1.bf16.msra.mxu1 %v6631_v19  ;;  %v6653_v19 = vld [vmem:[#allocation4 + $0x1e0] sm:$0xff]  ;;  %v6659_v37 = vld [vmem:[#allocation4 + $0x238] sm:$0xff] }
 0x889   :  { %2616 = vmatprep.subr.bf16.mxu0 %v6633_v60  ;;  %2657 = vmatprep.subr.bf16.mxu1 %v6635_v35  ;;  %8937 = vst [vmem:[#allocation120_spill] sm:$0xff] %v6653_v19  ;;  %v6655_v60 = vld [vmem:[#allocation4 + $0x1f0] sm:$0xff]  ;;  %v6657_v35 = vld [vmem:[#allocation4 + $0x228] sm:$0xff]  ;;  %8940 = vst [vmem:[#allocation123_spill] sm:$0xff] %v6659_v37 }
 0x88a   :  { %8938 = vst [vmem:[#allocation121_spill] sm:$0xff] %v6655_v60  ;;  %8939 = vst [vmem:[#allocation122_spill] sm:$0xff] %v6657_v35 }
 0x88c   :  { %2617 = vmatpush1.bf16.msra.mxu0 %v6641_v39  ;;  %2658 = vmatpush1.bf16.msra.mxu1 %v6643_v63  ;;  %v6665_v63 = vld [vmem:[#allocation4 + $0x220] sm:$0xff]  ;;  %v6671_v39 = vld [vmem:[#allocation4 + $0x278] sm:$0xff] }
 0x88d   :  { %2618 = vmatprep.subr.bf16.mxu0 %v6645_v32  ;;  %2659 = vmatprep.subr.bf16.mxu1 %v6647_v59  ;;  %8941 = vst [vmem:[#allocation124_spill] sm:$0xff] %v6665_v63  ;;  %v6667_v32 = vld [vmem:[#allocation4 + $0x230] sm:$0xff]  ;;  %v6669_v59 = vld [vmem:[#allocation4 + $0x268] sm:$0xff]  ;;  %8944 = vst [vmem:[#allocation127_spill] sm:$0xff] %v6671_v39 }
 0x88e   :  { %8942 = vst [vmem:[#allocation125_spill] sm:$0xff] %v6667_v32  ;;  %8943 = vst [vmem:[#allocation126_spill] sm:$0xff] %v6669_v59 }
 0x890   :  { %2619 = vmatpush1.bf16.msra.mxu0 %v6653_v19  ;;  %2660 = vmatpush1.bf16.msra.mxu1 %v6655_v60  ;;  %v6677_v60 = vld [vmem:[#allocation4 + $0x260] sm:$0xff]  ;;  %v6683_v19 = vld [vmem:[#allocation4 + $0x2b8] sm:$0xff] }
 0x891   :  { %2620 = vmatprep.subr.bf16.mxu0 %v6657_v35  ;;  %2661 = vmatprep.subr.bf16.mxu1 %v6659_v37  ;;  %8945 = vst [vmem:[#allocation128_spill] sm:$0xff] %v6677_v60  ;;  %v6679_v35 = vld [vmem:[#allocation4 + $0x270] sm:$0xff]  ;;  %v6681_v37 = vld [vmem:[#allocation4 + $0x2a8] sm:$0xff]  ;;  %8948 = vst [vmem:[#allocation131_spill] sm:$0xff] %v6683_v19 }
 0x892   :  { %8946 = vst [vmem:[#allocation129_spill] sm:$0xff] %v6679_v35  ;;  %8947 = vst [vmem:[#allocation130_spill] sm:$0xff] %v6681_v37 }
 0x894   :  { %2621 = vmatpush1.bf16.msra.mxu0 %v6665_v63  ;;  %2662 = vmatpush1.bf16.msra.mxu1 %v6667_v32  ;;  %v6689_v32 = vld [vmem:[#allocation4 + $0x2a0] sm:$0xff]  ;;  %v6695_v63 = vld [vmem:[#allocation4 + $0x2f8] sm:$0xff] }
 0x895   :  { %2622 = vmatprep.subr.bf16.mxu0 %v6669_v59  ;;  %2663 = vmatprep.subr.bf16.mxu1 %v6671_v39  ;;  %8949 = vst [vmem:[#allocation132_spill] sm:$0xff] %v6689_v32  ;;  %v6691_v59 = vld [vmem:[#allocation4 + $0x2b0] sm:$0xff]  ;;  %v6693_v39 = vld [vmem:[#allocation4 + $0x2e8] sm:$0xff]  ;;  %8952 = vst [vmem:[#allocation135_spill] sm:$0xff] %v6695_v63 }
 0x896   :  { %8950 = vst [vmem:[#allocation133_spill] sm:$0xff] %v6691_v59  ;;  %8951 = vst [vmem:[#allocation134_spill] sm:$0xff] %v6693_v39 }
 0x898   :  { %2623 = vmatpush1.bf16.msra.mxu0 %v6677_v60  ;;  %2664 = vmatpush1.bf16.msra.mxu1 %v6679_v35  ;;  %v6701_v35 = vld [vmem:[#allocation4 + $0x2e0] sm:$0xff]  ;;  %v6707_v60 = vld [vmem:[#allocation4 + $0x338] sm:$0xff] }
 0x899   :  { %2624 = vmatprep.subr.bf16.mxu0 %v6681_v37  ;;  %2665 = vmatprep.subr.bf16.mxu1 %v6683_v19  ;;  %8953 = vst [vmem:[#allocation136_spill] sm:$0xff] %v6701_v35  ;;  %v6703_v37 = vld [vmem:[#allocation4 + $0x2f0] sm:$0xff]  ;;  %v6705_v19 = vld [vmem:[#allocation4 + $0x328] sm:$0xff]  ;;  %8956 = vst [vmem:[#allocation139_spill] sm:$0xff] %v6707_v60 }
 0x89a   :  { %8954 = vst [vmem:[#allocation137_spill] sm:$0xff] %v6703_v37  ;;  %8955 = vst [vmem:[#allocation138_spill] sm:$0xff] %v6705_v19 }
 0x89c   :  { %2625 = vmatpush1.bf16.msra.mxu0 %v6689_v32  ;;  %2666 = vmatpush1.bf16.msra.mxu1 %v6691_v59  ;;  %v6713_v59 = vld [vmem:[#allocation4 + $0x320] sm:$0xff]  ;;  %v6719_v32 = vld [vmem:[#allocation4 + $0x378] sm:$0xff] }
 0x89d   :  { %2626 = vmatprep.subr.bf16.mxu0 %v6693_v39  ;;  %2667 = vmatprep.subr.bf16.mxu1 %v6695_v63  ;;  %8957 = vst [vmem:[#allocation140_spill] sm:$0xff] %v6713_v59  ;;  %v6715_v39 = vld [vmem:[#allocation4 + $0x330] sm:$0xff]  ;;  %v6717_v63 = vld [vmem:[#allocation4 + $0x368] sm:$0xff]  ;;  %8960 = vst [vmem:[#allocation143_spill] sm:$0xff] %v6719_v32 }
 0x89e   :  { %8958 = vst [vmem:[#allocation141_spill] sm:$0xff] %v6715_v39  ;;  %8959 = vst [vmem:[#allocation142_spill] sm:$0xff] %v6717_v63 }
 0x8a0   :  { %2627 = vmatpush1.bf16.msra.mxu0 %v6701_v35  ;;  %2668 = vmatpush1.bf16.msra.mxu1 %v6703_v37  ;;  %v6725_v37 = vld [vmem:[#allocation4 + $0x360] sm:$0xff]  ;;  %v6731_v35 = vld [vmem:[#allocation4 + $0x3b8] sm:$0xff] }
 0x8a1   :  { %2628 = vmatprep.subr.bf16.mxu0 %v6705_v19  ;;  %2669 = vmatprep.subr.bf16.mxu1 %v6707_v60  ;;  %v6727_v19 = vld [vmem:[#allocation4 + $0x370] sm:$0xff]  ;;  %v6729_v60 = vld [vmem:[#allocation4 + $0x3a8] sm:$0xff] }
 0x8a2   :  { %8961 = vst [vmem:[#allocation144_spill] sm:$0xff] %v6727_v19  ;;  %8962 = vst [vmem:[#allocation145_spill] sm:$0xff] %v6729_v60 }
 0x8a4   :  { %2629 = vmatpush1.bf16.msra.mxu0 %v6713_v59  ;;  %2670 = vmatpush1.bf16.msra.mxu1 %v6715_v39  ;;  %v6737_v39 = vld [vmem:[#allocation4 + $0x3a0] sm:$0xff]  ;;  %v6743_v59 = vld [vmem:[#allocation4 + $0x3f8] sm:$0xff] }
 0x8a5   :  { %2630 = vmatprep.subr.bf16.mxu0 %v6717_v63  ;;  %2671 = vmatprep.subr.bf16.mxu1 %v6719_v32  ;;  %v6739_v63 = vld [vmem:[#allocation4 + $0x3b0] sm:$0xff]  ;;  %v6741_v32 = vld [vmem:[#allocation4 + $0x3e8] sm:$0xff] }
 0x8a8   :  { %2631 = vmatpush1.bf16.msra.mxu0 %v6725_v37  ;;  %2672 = vmatpush1.bf16.msra.mxu1 %v6727_v19  ;;  %v6749_v19 = vld [vmem:[#allocation4 + $0x3e0] sm:$0xff] }
 0x8a9   :  { %2632 = vmatprep.subr.bf16.mxu0 %v6729_v60  ;;  %2673 = vmatprep.subr.bf16.mxu1 %v6731_v35  ;;  %v6751_v60 = vld [vmem:[#allocation4 + $0x3f0] sm:$0xff] }
 0x8ac   :  { %2633 = vmatpush1.bf16.msra.mxu0 %v6737_v39  ;;  %2674 = vmatpush1.bf16.msra.mxu1 %v6739_v63 }
 0x8ad   :  { %2634 = vmatprep.subr.bf16.mxu0 %v6741_v32  ;;  %2675 = vmatprep.subr.bf16.mxu1 %v6743_v59 }
 0x8b0   :  { %2635 = vmatpush1.bf16.msra.mxu0 %v6749_v19  ;;  %2676 = vmatpush1.bf16.msra.mxu1 %v6751_v60 }
 0x8b1   :  { %2764 = vmatprep.subr.bf16.mxu0 %v6367_v17  ;;  %2805 = vmatprep.subr.bf16.mxu1 %v6369_v57 }
 0x8b3   :  { %2637 = vmatmul.mubr.bf16.vlgmr.msra.gmra.mrb[36].mxu0 %v8874_v55  ;;  %2678 = vmatmul.mubr.bf16.vlgmr.msra.gmra.mrb[64].mxu1 %v8874_v55  ;;  %v8963_v55 = vld [vmem:[#allocation81_spill] sm:$0xff] }
 0x8b4   :  { %2765 = vmatpush1.bf16.msra.mxu0 %v6371_v51  ;;  %2806 = vmatpush1.bf16.msra.mxu1 %v6375_v52 }
 0x8b5   :  { %2766 = vmatprep.subr.bf16.mxu0 %v6377_v58  ;;  %2807 = vmatprep.subr.bf16.mxu1 %v6379_v56 }
 0x8b8   :  { %2767 = vmatpush1.bf16.msra.mxu0 %v6385_v26  ;;  %2808 = vmatpush1.bf16.msra.mxu1 %v6387_v1 }
 0x8b9   :  { %2768 = vmatprep.subr.bf16.mxu0 %v6389_v12  ;;  %2809 = vmatprep.subr.bf16.mxu1 %v6391_v29 }
 0x8bc   :  { %2769 = vmatpush1.bf16.msra.mxu0 %v6397_v23  ;;  %2810 = vmatpush1.bf16.msra.mxu1 %v6399_v38 }
 0x8bd   :  { %2770 = vmatprep.subr.bf16.mxu0 %v6401_v40  ;;  %2811 = vmatprep.subr.bf16.mxu1 %v6403_v7 }
 0x8c0   :  { %2771 = vmatpush1.bf16.msra.mxu0 %v6409_v46  ;;  %2812 = vmatpush1.bf16.msra.mxu1 %v6411_v5 }
 0x8c1   :  { %2772 = vmatprep.subr.bf16.mxu0 %v6413_v42  ;;  %2813 = vmatprep.subr.bf16.mxu1 %v6415_v20 }
 0x8c4   :  { %2773 = vmatpush1.bf16.msra.mxu0 %v6421_v9  ;;  %2814 = vmatpush1.bf16.msra.mxu1 %v6423_v16 }
 0x8c5   :  { %2774 = vmatprep.subr.bf16.mxu0 %v6425_v24  ;;  %2815 = vmatprep.subr.bf16.mxu1 %v6427_v25 }
 0x8c8   :  { %2775 = vmatpush1.bf16.msra.mxu0 %v6433_v62  ;;  %2816 = vmatpush1.bf16.msra.mxu1 %v6435_v49 }
 0x8c9   :  { %2776 = vmatprep.subr.bf16.mxu0 %v6437_v54  ;;  %2817 = vmatprep.subr.bf16.mxu1 %v6439_v21 }
 0x8cc   :  { %2777 = vmatpush1.bf16.msra.mxu0 %v6445_v28  ;;  %2818 = vmatpush1.bf16.msra.mxu1 %v6447_v50 }
 0x8cd   :  { %2778 = vmatprep.subr.bf16.mxu0 %v6449_v11  ;;  %2819 = vmatprep.subr.bf16.mxu1 %v6451_v41 }
 0x8d0   :  { %2779 = vmatpush1.bf16.msra.mxu0 %v6457_v36  ;;  %2820 = vmatpush1.bf16.msra.mxu1 %v6459_v34 }
 0x8d1   :  { %2780 = vmatprep.subr.bf16.mxu0 %v6461_v2  ;;  %2821 = vmatprep.subr.bf16.mxu1 %v6463_v15 }
 0x8d4   :  { %2781 = vmatpush1.bf16.msra.mxu0 %v6469_v27  ;;  %2822 = vmatpush1.bf16.msra.mxu1 %v6471_v18 }
 0x8d5   :  { %2782 = vmatprep.subr.bf16.mxu0 %v6473_v0  ;;  %2823 = vmatprep.subr.bf16.mxu1 %v6475_v22 }
 0x8d8   :  { %2783 = vmatpush1.bf16.msra.mxu0 %v6481_v47  ;;  %2824 = vmatpush1.bf16.msra.mxu1 %v6483_v30 }
 0x8d9   :  { %2784 = vmatprep.subr.bf16.mxu0 %v6485_v45  ;;  %2825 = vmatprep.subr.bf16.mxu1 %v6487_v14  ;;  %v8974_v14 = vld [vmem:[#allocation52_spill] sm:$0xff] }
 0x8da   :  { %v8975_v45 = vld [vmem:[#allocation60_spill] sm:$0xff] }
 0x8dc   :  { %2785 = vmatpush1.bf16.msra.mxu0 %v6493_v48  ;;  %2826 = vmatpush1.bf16.msra.mxu1 %v6495_v61 }
 0x8dd   :  { %2786 = vmatprep.subr.bf16.mxu0 %v6497_v43  ;;  %2827 = vmatprep.subr.bf16.mxu1 %v6499_v6  ;;  %v8964_v6 = vld [vmem:[#allocation82_spill] sm:$0xff] }
 0x8e0   :  { %2787 = vmatpush1.bf16.msra.mxu0 %v6505_v44  ;;  %2828 = vmatpush1.bf16.msra.mxu1 %v6507_v10  ;;  %v8965_v44 = vld [vmem:[#allocation83_spill] sm:$0xff]  ;;  %v8966_v10 = vld [vmem:[#allocation84_spill] sm:$0xff] }
 0x8e1   :  { %2788 = vmatprep.subr.bf16.mxu0 %v6509_v31  ;;  %2829 = vmatprep.subr.bf16.mxu1 %v6511_v8  ;;  %v8967_v31 = vld [vmem:[#allocation85_spill] sm:$0xff]  ;;  %v8968_v8 = vld [vmem:[#allocation86_spill] sm:$0xff] }
 0x8e4   :  { %2789 = vmatpush1.bf16.msra.mxu0 %v6517_v53  ;;  %2830 = vmatpush1.bf16.msra.mxu1 %v6519_v3  ;;  %v8969_v53 = vld [vmem:[#allocation87_spill] sm:$0xff]  ;;  %v8970_v3 = vld [vmem:[#allocation88_spill] sm:$0xff] }
 0x8e5   :  { %2790 = vmatprep.subr.bf16.mxu0 %v6521_v4  ;;  %2831 = vmatprep.subr.bf16.mxu1 %v6523_v13  ;;  %v8971_v4 = vld [vmem:[#allocation89_spill] sm:$0xff]  ;;  %v8972_v13 = vld [vmem:[#allocation90_spill] sm:$0xff] }
 0x8e8   :  { %2791 = vmatpush1.bf16.msra.mxu0 %v6529_v33  ;;  %2832 = vmatpush1.bf16.msra.mxu1 %v8963_v55  ;;  %v8973_v33 = vld [vmem:[#allocation91_spill] sm:$0xff] }
 0x8e9   :  { %2792 = vmatprep.subr.bf16.mxu0 %v8964_v6  ;;  %2833 = vmatprep.subr.bf16.mxu1 %v8965_v44 }
 0x8ec   :  { %2793 = vmatpush1.bf16.msra.mxu0 %v8966_v10  ;;  %2834 = vmatpush1.bf16.msra.mxu1 %v8967_v31 }
 0x8ed   :  { %2794 = vmatprep.subr.bf16.mxu0 %v8968_v8  ;;  %2835 = vmatprep.subr.bf16.mxu1 %v8969_v53  ;;  %v2514_v8 = vunpack.c.l.bf16 %v8974_v14  ;;  %v2516_v53 = vunpack.c.l.bf16 %v8975_v45 }
 0x8f0   :  { %2795 = vmatpush1.bf16.msra.mxu0 %v8970_v3  ;;  %2836 = vmatpush1.bf16.msra.mxu1 %v8971_v4  ;;  %v2515_v3 = vunpack.c.h.bf16 %v8974_v14  ;;  %v2517_v4 = vunpack.c.h.bf16 %v8975_v45  ;;  %v8976_v45 = vld [vmem:[#allocation32_spill] sm:$0xff] }
 0x8f1   :  { %2846 = vmatprep.subr.bf16.mxu0 %v8972_v13  ;;  %2887 = vmatprep.subr.bf16.mxu1 %v8973_v33 }
 0x946   :  { %v2556_v55 = vpop.f32.mrb[32].mxu0  ;;  %v2597_v6 = vpop.f32.mrb[60].mxu1 }
 0x947   :  { %v2558_v43 = vpop.f32.mrb[33].mxu0  ;;  %v2599_v44 = vpop.f32.mrb[61].mxu1  ;;  %v2686_v30 = vadd.f32 %v2556_v55, %v2514_v8  ;;  %v2688_v13 = vadd.f32 %v2597_v6, %v2516_v53  ;;  %v2518_v8 = vunpack.c.l.bf16 %v8976_v45  ;;  %v8977_v53 = vld [vmem:[#allocation48_spill] sm:$0xff] }
 0x948   :  { %v2560_v61 = vpop.f32.mrb[34].mxu0  ;;  %v2601_v10 = vpop.f32.mrb[62].mxu1  ;;  %v2687_v47 = vadd.f32 %v2558_v43, %v2515_v3  ;;  %v2689_v33 = vadd.f32 %v2599_v44, %v2517_v4  ;;  %v2520_v6 = vunpack.c.l.bf16 %v8977_v53 }
 0x949   :  { %v2561_v48 = vpop.f32.mrb[35].mxu0  ;;  %v2602_v31 = vpop.f32.mrb[63].mxu1  ;;  %v4632_v22 = vmul.f32 -1.442695, %v2686_v30  ;;  %v4634_v0 = vmul.f32 -1.442695, %v2688_v13  ;;  %v2519_v13 = vunpack.c.h.bf16 %v8976_v45 }
 0x94a   :  { %v4633_v18 = vmul.f32 -1.442695, %v2687_v47  ;;  %v4635_v27 = vmul.f32 -1.442695, %v2689_v33  ;;  %v2521_v33 = vunpack.c.h.bf16 %v8977_v53 }
 0x94b   :  { %4933 = vpow2.f32 %v4632_v22 }
 0x94c   :  { %4935 = vpow2.f32 %v4634_v0 }
 0x94d   :  { %4937 = vpow2.f32 %v4633_v18 }
 0x94e   :  { %4939 = vpow2.f32 %v4635_v27 }
 0x955   :  { %v4934_v48 = vpop.eup %4933 }
 0x956   :  { %v4936_v31 = vpop.eup %4935  ;;  %v2700_v15 = vadd.f32 1.0, %v4934_v48 }
 0x957   :  { %v4938_v10 = vpop.eup %4937  ;;  %v2712_v14 = vadd.f32 1.0, %v4936_v31 }
 0x958   :  { %v4940_v61 = vpop.eup %4939  ;;  %v2701_v2 = vadd.f32 1.0, %v4938_v10  ;;  %4941 = vrcp.f32 %v2700_v15 }
 0x959   :  { %v2713_v44 = vadd.f32 1.0, %v4940_v61  ;;  %4943 = vrcp.f32 %v2712_v14 }
 0x95a   :  { %4945 = vrcp.f32 %v2701_v2 }
 0x95b   :  { %4947 = vrcp.f32 %v2713_v44 }
 0x962   :  { %v4942_v15 = vpop.eup %4941 }
 0x963   :  { %v4944_v14 = vpop.eup %4943 }
 0x964   :  { %v4946_v2 = vpop.eup %4945 }
 0x965   :  { %v4948_v45 = vpop.eup %4947 }
 0x986   :  { %v2638_v47 = vpop.f32.mrb[36].mxu0  ;;  %v2679_v27 = vpop.f32.mrb[64].mxu1 }
 0x987   :  { %v2690_v22 = vadd.f32 %v2638_v47, %v2518_v8  ;;  %v2692_v4 = vadd.f32 %v2679_v27, %v2520_v6  ;;  %v2640_v43 = vpop.f32.mrb[37].mxu0  ;;  %v2681_v0 = vpop.f32.mrb[65].mxu1  ;;  %v2732_v6 = vmul.f32 0.0, %v4944_v14  ;;  %v8978_v14 = vld [vmem:[#allocation92_spill] sm:$0xff] }
 0x988   :  { %v2691_v3 = vadd.f32 %v2640_v43, %v2519_v13  ;;  %v2693_v30 = vadd.f32 %v2681_v0, %v2521_v33  ;;  %v2642_v18 = vpop.f32.mrb[38].mxu0  ;;  %v2683_v55 = vpop.f32.mrb[66].mxu1  ;;  %v2733_v33 = vmul.f32 0.0, %v4948_v45  ;;  %v8980_v45 = vld [vmem:[#allocation94_spill] sm:$0xff] }
 0x989   :  { %4949 = vtanh.f32 %v2690_v22  ;;  %v4636_v48 = vmul.f32 -1.442695, %v2692_v4  ;;  %v2643_v31 = vpop.f32.mrb[39].mxu0  ;;  %v2684_v10 = vpop.f32.mrb[67].mxu1 }
 0x98a   :  { %4951 = vtanh.f32 %v2691_v3  ;;  %v4637_v61 = vmul.f32 -1.442695, %v2693_v30 }
 0x98b   :  { %4953 = vpow2.f32 %v4636_v48 }
 0x98c   :  { %4955 = vpow2.f32 %v4637_v61 }
 0x993   :  { %v4950_v8 = vpop.eup %4949 }
 0x994   :  { %v4952_v53 = vpop.eup %4951  ;;  %v2734_v44 = vmul.f32 %v4950_v8, %v4942_v15  ;;  %v8981_v8 = vld [vmem:[#allocation95_spill] sm:$0xff] }
 0x995   :  { %v4954_v13 = vpop.eup %4953  ;;  %v2735_v47 = vmul.f32 %v4952_v53, %v4946_v2  ;;  %v8979_v2 = vld [vmem:[#allocation93_spill] sm:$0xff]  ;;  %v8982_v53 = vld [vmem:[#allocation96_spill] sm:$0xff] }
 0x996   :  { %v4956_v27 = vpop.eup %4955  ;;  %v6831_v22 = vadd.f32 %v2734_v44, %v2732_v6  ;;  %v2726_v4 = vadd.f32 1.0, %v4954_v13  ;;  %v8983_v6 = vld [vmem:[#allocation97_spill] sm:$0xff]  ;;  %v8984_v44 = vld [vmem:[#allocation98_spill] sm:$0xff]  ;;  %v8985_v13 = vld [vmem:[#allocation99_spill] sm:$0xff] }
 0x997   :  { %v6833_v43 = vadd.f32 %v2735_v47, %v2733_v33  ;;  %v2727_v0 = vadd.f32 1.0, %v4956_v27  ;;  %v8986_v33 = vld [vmem:[#allocation100_spill] sm:$0xff]  ;;  %v8987_v47 = vld [vmem:[#allocation101_spill] sm:$0xff]  ;;  %v8988_v27 = vld [vmem:[#allocation102_spill] sm:$0xff] }
 0x998   :  { %4957 = vtanh.f32 %v6831_v22 }
 0x999   :  { %4959 = vrcp.f32 %v2726_v4  ;;  %v8989_v4 = vld [vmem:[#allocation103_spill] sm:$0xff] }
 0x99a   :  { %4961 = vtanh.f32 %v6833_v43 }
 0x99b   :  { %4963 = vrcp.f32 %v2727_v0  ;;  %v8990_v0 = vld [vmem:[#allocation104_spill] sm:$0xff] }
 0x9a2   :  { %v4958_v3 = vpop.eup %4957 }
 0x9a3   :  { %v4960_v30 = vpop.eup %4959 }
 0x9a4   :  { %v4962_v18 = vpop.eup %4961  ;;  %v2740_v55 = vmul.f32 %v4960_v30, %v4958_v3  ;;  %v8991_v3 = vld [vmem:[#allocation105_spill] sm:$0xff]  ;;  %v8992_v30 = vld [vmem:[#allocation106_spill] sm:$0xff] }
 0x9a5   :  { %v4964_v48 = vpop.eup %4963 }
 0x9a6   :  { %v2741_v31 = vmul.f32 %v4964_v48, %v4962_v18  ;;  %v6837_v15 = vpack.c.bf16 %v2740_v55, %v2740_v55  ;;  %v8993_v18 = vld [vmem:[#allocation107_spill] sm:$0xff]  ;;  %v8995_v48 = vld [vmem:[#allocation109_spill] sm:$0xff] }
 0x9a8   :  { %v2743_v10 = vpack.c.bf16 %v2741_v31, %v2741_v31  ;;  %v4730_v61 = vpack.c.bf16 %v2741_v31, %v2740_v55  ;;  %v8994_v55 = vld [vmem:[#allocation108_spill] sm:$0xff]  ;;  %v8996_v31 = vld [vmem:[#allocation110_spill] sm:$0xff] }
 0x9aa   :  { %2796 = vmatprep.mubr.bf16.mxu0 %v2743_v10  ;;  %2837 = vmatprep.mubr.bf16.mxu1 %v2743_v10  ;;  %2750 = vst [vmem:[%s8375_s12] sm:$0xff] %v4730_v61  ;;  %v8998_v61 = vld [vmem:[#allocation112_spill] sm:$0xff] }
 0x9ab   :  { %2797 = vmatmul.mubr.bf16.vlgmr.msra.gmra.mrb[40].mxu0 %v6837_v15  ;;  %2838 = vmatmul.mubr.bf16.vlgmr.msra.gmra.mrb[68].mxu1 %v6837_v15 }
 0x9ac   :  { %2847 = vmatpush1.bf16.msra.mxu0 %v8978_v14  ;;  %2888 = vmatpush1.bf16.msra.mxu1 %v8979_v2  ;;  %v8999_v14 = vld [vmem:[#allocation113_spill] sm:$0xff]  ;;  %v9000_v2 = vld [vmem:[#allocation114_spill] sm:$0xff] }
 0x9ad   :  { %2878 = vmatprep.mubr.bf16.mxu0 %v2743_v10  ;;  %2919 = vmatprep.mubr.bf16.mxu1 %v2743_v10  ;;  %v8997_v10 = vld [vmem:[#allocation111_spill] sm:$0xff] }
 0x9ae   :  { %2848 = vmatprep.subr.bf16.mxu0 %v8980_v45  ;;  %2889 = vmatprep.subr.bf16.mxu1 %v8981_v8  ;;  %v9001_v45 = vld [vmem:[#allocation115_spill] sm:$0xff]  ;;  %v9002_v8 = vld [vmem:[#allocation116_spill] sm:$0xff] }
 0x9b0   :  { %2849 = vmatpush1.bf16.msra.mxu0 %v8982_v53  ;;  %2890 = vmatpush1.bf16.msra.mxu1 %v8983_v6 }
 0x9b1   :  { %2850 = vmatprep.subr.bf16.mxu0 %v8984_v44  ;;  %2891 = vmatprep.subr.bf16.mxu1 %v8985_v13 }
 0x9b4   :  { %2851 = vmatpush1.bf16.msra.mxu0 %v8986_v33  ;;  %2892 = vmatpush1.bf16.msra.mxu1 %v8987_v47 }
 0x9b5   :  { %2852 = vmatprep.subr.bf16.mxu0 %v8988_v27  ;;  %2893 = vmatprep.subr.bf16.mxu1 %v8989_v4 }
 0x9b8   :  { %2853 = vmatpush1.bf16.msra.mxu0 %v8990_v0  ;;  %2894 = vmatpush1.bf16.msra.mxu1 %v8991_v3 }
 0x9b9   :  { %2854 = vmatprep.subr.bf16.mxu0 %v8992_v30  ;;  %2895 = vmatprep.subr.bf16.mxu1 %v8993_v18  ;;  %v9003_v30 = vld [vmem:[#allocation117_spill] sm:$0xff]  ;;  %v9004_v18 = vld [vmem:[#allocation118_spill] sm:$0xff] }
 0x9bc   :  { %2855 = vmatpush1.bf16.msra.mxu0 %v8994_v55  ;;  %2896 = vmatpush1.bf16.msra.mxu1 %v8995_v48  ;;  %v9005_v55 = vld [vmem:[#allocation119_spill] sm:$0xff]  ;;  %v9006_v48 = vld [vmem:[#allocation120_spill] sm:$0xff] }
 0x9bd   :  { %2856 = vmatprep.subr.bf16.mxu0 %v8996_v31  ;;  %2897 = vmatprep.subr.bf16.mxu1 %v8997_v10  ;;  %v9007_v31 = vld [vmem:[#allocation121_spill] sm:$0xff]  ;;  %v9008_v10 = vld [vmem:[#allocation122_spill] sm:$0xff] }
 0x9c0   :  { %2857 = vmatpush1.bf16.msra.mxu0 %v8998_v61  ;;  %2898 = vmatpush1.bf16.msra.mxu1 %v8999_v14  ;;  %v9009_v61 = vld [vmem:[#allocation123_spill] sm:$0xff]  ;;  %v9010_v14 = vld [vmem:[#allocation124_spill] sm:$0xff] }
 0x9c1   :  { %2858 = vmatprep.subr.bf16.mxu0 %v9000_v2  ;;  %2899 = vmatprep.subr.bf16.mxu1 %v9001_v45  ;;  %v9011_v2 = vld [vmem:[#allocation125_spill] sm:$0xff]  ;;  %v9012_v45 = vld [vmem:[#allocation126_spill] sm:$0xff] }
 0x9c4   :  { %2859 = vmatpush1.bf16.msra.mxu0 %v9002_v8  ;;  %2900 = vmatpush1.bf16.msra.mxu1 %v9003_v30  ;;  %v9013_v8 = vld [vmem:[#allocation127_spill] sm:$0xff]  ;;  %v9014_v30 = vld [vmem:[#allocation128_spill] sm:$0xff] }
 0x9c5   :  { %2860 = vmatprep.subr.bf16.mxu0 %v9004_v18  ;;  %2901 = vmatprep.subr.bf16.mxu1 %v9005_v55  ;;  %v9015_v18 = vld [vmem:[#allocation129_spill] sm:$0xff]  ;;  %v9016_v55 = vld [vmem:[#allocation130_spill] sm:$0xff] }
 0x9c8   :  { %2861 = vmatpush1.bf16.msra.mxu0 %v9006_v48  ;;  %2902 = vmatpush1.bf16.msra.mxu1 %v9007_v31  ;;  %v9017_v48 = vld [vmem:[#allocation131_spill] sm:$0xff]  ;;  %v9018_v31 = vld [vmem:[#allocation132_spill] sm:$0xff] }
 0x9c9   :  { %2862 = vmatprep.subr.bf16.mxu0 %v9008_v10  ;;  %2903 = vmatprep.subr.bf16.mxu1 %v9009_v61  ;;  %v9019_v10 = vld [vmem:[#allocation133_spill] sm:$0xff]  ;;  %v9020_v61 = vld [vmem:[#allocation134_spill] sm:$0xff] }
 0x9cc   :  { %2863 = vmatpush1.bf16.msra.mxu0 %v9010_v14  ;;  %2904 = vmatpush1.bf16.msra.mxu1 %v9011_v2  ;;  %v9021_v14 = vld [vmem:[#allocation135_spill] sm:$0xff]  ;;  %v9022_v2 = vld [vmem:[#allocation136_spill] sm:$0xff] }
 0x9cd   :  { %2864 = vmatprep.subr.bf16.mxu0 %v9012_v45  ;;  %2905 = vmatprep.subr.bf16.mxu1 %v9013_v8  ;;  %v9023_v45 = vld [vmem:[#allocation137_spill] sm:$0xff]  ;;  %v9024_v8 = vld [vmem:[#allocation138_spill] sm:$0xff] }
 0x9d0   :  { %2865 = vmatpush1.bf16.msra.mxu0 %v9014_v30  ;;  %2906 = vmatpush1.bf16.msra.mxu1 %v9015_v18  ;;  %v9025_v30 = vld [vmem:[#allocation139_spill] sm:$0xff]  ;;  %v9026_v18 = vld [vmem:[#allocation140_spill] sm:$0xff] }
 0x9d1   :  { %2866 = vmatprep.subr.bf16.mxu0 %v9016_v55  ;;  %2907 = vmatprep.subr.bf16.mxu1 %v9017_v48  ;;  %v9027_v55 = vld [vmem:[#allocation141_spill] sm:$0xff]  ;;  %v9028_v48 = vld [vmem:[#allocation142_spill] sm:$0xff] }
 0x9d4   :  { %2867 = vmatpush1.bf16.msra.mxu0 %v9018_v31  ;;  %2908 = vmatpush1.bf16.msra.mxu1 %v9019_v10  ;;  %v9029_v31 = vld [vmem:[#allocation143_spill] sm:$0xff] }
 0x9d5   :  { %2868 = vmatprep.subr.bf16.mxu0 %v9020_v61  ;;  %2909 = vmatprep.subr.bf16.mxu1 %v9021_v14  ;;  %v9030_v61 = vld [vmem:[#allocation144_spill] sm:$0xff]  ;;  %v9031_v14 = vld [vmem:[#allocation145_spill] sm:$0xff] }
 0x9d8   :  { %2869 = vmatpush1.bf16.msra.mxu0 %v9022_v2  ;;  %2910 = vmatpush1.bf16.msra.mxu1 %v9023_v45 }
 0x9d9   :  { %2870 = vmatprep.subr.bf16.mxu0 %v9024_v8  ;;  %2911 = vmatprep.subr.bf16.mxu1 %v9025_v30 }
 0x9dc   :  { %2871 = vmatpush1.bf16.msra.mxu0 %v9026_v18  ;;  %2912 = vmatpush1.bf16.msra.mxu1 %v9027_v55 }
 0x9dd   :  { %2872 = vmatprep.subr.bf16.mxu0 %v9028_v48  ;;  %2913 = vmatprep.subr.bf16.mxu1 %v9029_v31 }
 0x9e0   :  { %2873 = vmatpush1.bf16.msra.mxu0 %v6725_v37  ;;  %2914 = vmatpush1.bf16.msra.mxu1 %v9030_v61 }
 0x9e1   :  { %2874 = vmatprep.subr.bf16.mxu0 %v9031_v14  ;;  %2915 = vmatprep.subr.bf16.mxu1 %v6731_v35 }
 0x9e4   :  { %2875 = vmatpush1.bf16.msra.mxu0 %v6737_v39  ;;  %2916 = vmatpush1.bf16.msra.mxu1 %v6739_v63 }
 0x9e5   :  { %2876 = vmatprep.subr.bf16.mxu0 %v6741_v32  ;;  %2917 = vmatprep.subr.bf16.mxu1 %v6743_v59 }
 0x9e8   :  { %2877 = vmatpush1.bf16.msra.mxu0 %v6749_v19  ;;  %2918 = vmatpush1.bf16.msra.mxu1 %v6751_v60 }
 0x9e9   :  { %3007 = vmatprep.subr.bf16.mxu0 %v6367_v17  ;;  %3048 = vmatprep.subr.bf16.mxu1 %v6369_v57  ;;  %v9032_v17 = vld [vmem:[#allocation33_spill] sm:$0xff]  ;;  %v9033_v57 = vld [vmem:[#allocation35_spill] sm:$0xff] }
 0x9eb   :  { %2879 = vmatmul.mubr.bf16.vlgmr.msra.gmra.mrb[44].mxu0 %v6837_v15  ;;  %2920 = vmatmul.mubr.bf16.vlgmr.msra.gmra.mrb[72].mxu1 %v6837_v15  ;;  %v9064_v15 = vld [vmem:[#allocation90_spill] sm:$0xff] }
 0x9ec   :  { %3008 = vmatpush1.bf16.msra.mxu0 %v6371_v51  ;;  %3049 = vmatpush1.bf16.msra.mxu1 %v6375_v52  ;;  %v9034_v51 = vld [vmem:[#allocation37_spill] sm:$0xff]  ;;  %v9035_v52 = vld [vmem:[#allocation39_spill] sm:$0xff] }
 0x9ed   :  { %3009 = vmatprep.subr.bf16.mxu0 %v6377_v58  ;;  %3050 = vmatprep.subr.bf16.mxu1 %v6379_v56  ;;  %v9036_v58 = vld [vmem:[#allocation41_spill] sm:$0xff]  ;;  %v9037_v56 = vld [vmem:[#allocation43_spill] sm:$0xff] }
 0x9f0   :  { %3010 = vmatpush1.bf16.msra.mxu0 %v6385_v26  ;;  %3051 = vmatpush1.bf16.msra.mxu1 %v6387_v1  ;;  %v9038_v26 = vld [vmem:[#allocation45_spill] sm:$0xff]  ;;  %v9039_v1 = vld [vmem:[#allocation47_spill] sm:$0xff] }
 0x9f1   :  { %3011 = vmatprep.subr.bf16.mxu0 %v6389_v12  ;;  %3052 = vmatprep.subr.bf16.mxu1 %v6391_v29  ;;  %v9040_v12 = vld [vmem:[#allocation49_spill] sm:$0xff]  ;;  %v9041_v29 = vld [vmem:[#allocation51_spill] sm:$0xff] }
 0x9f4   :  { %3012 = vmatpush1.bf16.msra.mxu0 %v6397_v23  ;;  %3053 = vmatpush1.bf16.msra.mxu1 %v6399_v38  ;;  %v9043_v23 = vld [vmem:[#allocation69_spill] sm:$0xff]  ;;  %v9044_v38 = vld [vmem:[#allocation70_spill] sm:$0xff] }
 0x9f5   :  { %3013 = vmatprep.subr.bf16.mxu0 %v6401_v40  ;;  %3054 = vmatprep.subr.bf16.mxu1 %v6403_v7  ;;  %v9045_v40 = vld [vmem:[#allocation71_spill] sm:$0xff]  ;;  %v9046_v7 = vld [vmem:[#allocation72_spill] sm:$0xff] }
 0x9f8   :  { %3014 = vmatpush1.bf16.msra.mxu0 %v6409_v46  ;;  %3055 = vmatpush1.bf16.msra.mxu1 %v6411_v5  ;;  %v9047_v46 = vld [vmem:[#allocation73_spill] sm:$0xff]  ;;  %v9048_v5 = vld [vmem:[#allocation74_spill] sm:$0xff] }
 0x9f9   :  { %3015 = vmatprep.subr.bf16.mxu0 %v6413_v42  ;;  %3056 = vmatprep.subr.bf16.mxu1 %v6415_v20  ;;  %v9049_v42 = vld [vmem:[#allocation75_spill] sm:$0xff]  ;;  %v9050_v20 = vld [vmem:[#allocation76_spill] sm:$0xff] }
 0x9fc   :  { %3016 = vmatpush1.bf16.msra.mxu0 %v6421_v9  ;;  %3057 = vmatpush1.bf16.msra.mxu1 %v6423_v16  ;;  %v9051_v9 = vld [vmem:[#allocation77_spill] sm:$0xff]  ;;  %v9052_v16 = vld [vmem:[#allocation78_spill] sm:$0xff] }
 0x9fd   :  { %3017 = vmatprep.subr.bf16.mxu0 %v6425_v24  ;;  %3058 = vmatprep.subr.bf16.mxu1 %v6427_v25  ;;  %v9053_v24 = vld [vmem:[#allocation79_spill] sm:$0xff]  ;;  %v9054_v25 = vld [vmem:[#allocation80_spill] sm:$0xff] }
 0xa00   :  { %3018 = vmatpush1.bf16.msra.mxu0 %v6433_v62  ;;  %3059 = vmatpush1.bf16.msra.mxu1 %v6435_v49  ;;  %v9055_v62 = vld [vmem:[#allocation81_spill] sm:$0xff]  ;;  %v9056_v49 = vld [vmem:[#allocation82_spill] sm:$0xff] }
 0xa01   :  { %3019 = vmatprep.subr.bf16.mxu0 %v6437_v54  ;;  %3060 = vmatprep.subr.bf16.mxu1 %v6439_v21  ;;  %v9057_v54 = vld [vmem:[#allocation83_spill] sm:$0xff]  ;;  %v9058_v21 = vld [vmem:[#allocation84_spill] sm:$0xff] }
 0xa04   :  { %3020 = vmatpush1.bf16.msra.mxu0 %v6445_v28  ;;  %3061 = vmatpush1.bf16.msra.mxu1 %v6447_v50  ;;  %v9059_v28 = vld [vmem:[#allocation85_spill] sm:$0xff]  ;;  %v9060_v50 = vld [vmem:[#allocation86_spill] sm:$0xff] }
 0xa05   :  { %3021 = vmatprep.subr.bf16.mxu0 %v6449_v11  ;;  %3062 = vmatprep.subr.bf16.mxu1 %v6451_v41  ;;  %v9061_v11 = vld [vmem:[#allocation87_spill] sm:$0xff]  ;;  %v9062_v41 = vld [vmem:[#allocation88_spill] sm:$0xff] }
 0xa08   :  { %3022 = vmatpush1.bf16.msra.mxu0 %v6457_v36  ;;  %3063 = vmatpush1.bf16.msra.mxu1 %v6459_v34  ;;  %v9042_v34 = vld [vmem:[#allocation68_spill] sm:$0xff]  ;;  %v9063_v36 = vld [vmem:[#allocation89_spill] sm:$0xff] }
 0xa09   :  { %3023 = vmatprep.subr.bf16.mxu0 %v9032_v17  ;;  %3064 = vmatprep.subr.bf16.mxu1 %v9033_v57  ;;  %v9065_v17 = vld [vmem:[#allocation91_spill] sm:$0xff] }
 0xa0c   :  { %3024 = vmatpush1.bf16.msra.mxu0 %v9034_v51  ;;  %3065 = vmatpush1.bf16.msra.mxu1 %v9035_v52 }
 0xa0d   :  { %3025 = vmatprep.subr.bf16.mxu0 %v9036_v58  ;;  %3066 = vmatprep.subr.bf16.mxu1 %v9037_v56 }
 0xa10   :  { %3026 = vmatpush1.bf16.msra.mxu0 %v9038_v26  ;;  %3067 = vmatpush1.bf16.msra.mxu1 %v9039_v1 }
 0xa11   :  { %3027 = vmatprep.subr.bf16.mxu0 %v9040_v12  ;;  %3068 = vmatprep.subr.bf16.mxu1 %v9041_v29  ;;  %v9066_v29 = vld [vmem:[#allocation53_spill] sm:$0xff] }
 0xa14   :  { %3028 = vmatpush1.bf16.msra.mxu0 %v9042_v34  ;;  %3069 = vmatpush1.bf16.msra.mxu1 %v9043_v23  ;;  %v2756_v34 = vunpack.c.l.bf16 %v9066_v29  ;;  %v9067_v23 = vld [vmem:[#allocation61_spill] sm:$0xff] }
 0xa15   :  { %3029 = vmatprep.subr.bf16.mxu0 %v9044_v38  ;;  %3070 = vmatprep.subr.bf16.mxu1 %v9045_v40  ;;  %v2758_v38 = vunpack.c.l.bf16 %v9067_v23  ;;  %v2757_v40 = vunpack.c.h.bf16 %v9066_v29 }
 0xa18   :  { %3030 = vmatpush1.bf16.msra.mxu0 %v9046_v7  ;;  %3071 = vmatpush1.bf16.msra.mxu1 %v9047_v46  ;;  %v2759_v7 = vunpack.c.h.bf16 %v9067_v23 }
 0xa19   :  { %3031 = vmatprep.subr.bf16.mxu0 %v9048_v5  ;;  %3072 = vmatprep.subr.bf16.mxu1 %v9049_v42 }
 0xa1c   :  { %3032 = vmatpush1.bf16.msra.mxu0 %v9050_v20  ;;  %3073 = vmatpush1.bf16.msra.mxu1 %v9051_v9 }
 0xa1d   :  { %3033 = vmatprep.subr.bf16.mxu0 %v9052_v16  ;;  %3074 = vmatprep.subr.bf16.mxu1 %v9053_v24 }
 0xa20   :  { %3034 = vmatpush1.bf16.msra.mxu0 %v9054_v25  ;;  %3075 = vmatpush1.bf16.msra.mxu1 %v9055_v62 }
 0xa21   :  { %3035 = vmatprep.subr.bf16.mxu0 %v9056_v49  ;;  %3076 = vmatprep.subr.bf16.mxu1 %v9057_v54 }
 0xa24   :  { %3036 = vmatpush1.bf16.msra.mxu0 %v9058_v21  ;;  %3077 = vmatpush1.bf16.msra.mxu1 %v9059_v28 }
 0xa25   :  { %3037 = vmatprep.subr.bf16.mxu0 %v9060_v50  ;;  %3078 = vmatprep.subr.bf16.mxu1 %v9061_v11 }
 0xa28   :  { %3038 = vmatpush1.bf16.msra.mxu0 %v9062_v41  ;;  %3079 = vmatpush1.bf16.msra.mxu1 %v9063_v36  ;;  %v9068_v41 = vld [vmem:[#allocation34_spill] sm:$0xff] }
 0xa29   :  { %3089 = vmatprep.subr.bf16.mxu0 %v9064_v15  ;;  %3130 = vmatprep.subr.bf16.mxu1 %v9065_v17  ;;  %v2760_v36 = vunpack.c.l.bf16 %v9068_v41  ;;  %v9069_v15 = vld [vmem:[#allocation50_spill] sm:$0xff] }
 0xa2a   :  { %v2762_v17 = vunpack.c.l.bf16 %v9069_v15 }
 0xa7e   :  { %v2798_v57 = vpop.f32.mrb[40].mxu0  ;;  %v2839_v51 = vpop.f32.mrb[68].mxu1 }
 0xa7f   :  { %v2800_v52 = vpop.f32.mrb[41].mxu0  ;;  %v2841_v58 = vpop.f32.mrb[69].mxu1  ;;  %v2928_v46 = vadd.f32 %v2798_v57, %v2756_v34  ;;  %v2930_v5 = vadd.f32 %v2839_v51, %v2758_v38  ;;  %v2761_v51 = vunpack.c.h.bf16 %v9068_v41 }
 0xa80   :  { %v2802_v56 = vpop.f32.mrb[42].mxu0  ;;  %v2843_v26 = vpop.f32.mrb[70].mxu1  ;;  %v2929_v42 = vadd.f32 %v2800_v52, %v2757_v40  ;;  %v2931_v20 = vadd.f32 %v2841_v58, %v2759_v7  ;;  %v2763_v52 = vunpack.c.h.bf16 %v9069_v15 }
 0xa81   :  { %v2803_v1 = vpop.f32.mrb[43].mxu0  ;;  %v2844_v12 = vpop.f32.mrb[71].mxu1  ;;  %v4639_v9 = vmul.f32 -1.442695, %v2928_v46  ;;  %v4641_v16 = vmul.f32 -1.442695, %v2930_v5 }
 0xa82   :  { %v4640_v24 = vmul.f32 -1.442695, %v2929_v42  ;;  %v4642_v25 = vmul.f32 -1.442695, %v2931_v20 }
 0xa83   :  { %4965 = vpow2.f32 %v4639_v9 }
 0xa84   :  { %4967 = vpow2.f32 %v4641_v16 }
 0xa85   :  { %4969 = vpow2.f32 %v4640_v24 }
 0xa86   :  { %4971 = vpow2.f32 %v4642_v25 }
 0xa8d   :  { %v4966_v62 = vpop.eup %4965 }
 0xa8e   :  { %v4968_v49 = vpop.eup %4967  ;;  %v2942_v28 = vadd.f32 1.0, %v4966_v62 }
 0xa8f   :  { %v4970_v54 = vpop.eup %4969  ;;  %v2954_v50 = vadd.f32 1.0, %v4968_v49 }
 0xa90   :  { %v4972_v21 = vpop.eup %4971  ;;  %v2943_v11 = vadd.f32 1.0, %v4970_v54  ;;  %4973 = vrcp.f32 %v2942_v28 }
 0xa91   :  { %v2955_v57 = vadd.f32 1.0, %v4972_v21  ;;  %4975 = vrcp.f32 %v2954_v50 }
 0xa92   :  { %4977 = vrcp.f32 %v2943_v11 }
 0xa93   :  { %4979 = vrcp.f32 %v2955_v57 }
 0xa9a   :  { %v4974_v20 = vpop.eup %4973 }
 0xa9b   :  { %v4976_v9 = vpop.eup %4975 }
 0xa9c   :  { %v4978_v16 = vpop.eup %4977  ;;  %v2974_v49 = vmul.f32 %v4976_v9, %v6831_v22  ;;  %v9087_v9 = vld [vmem:[#allocation123_spill] sm:$0xff] }
 0xa9d   :  { %v4980_v24 = vpop.eup %4979 }
 0xa9e   :  { %v2975_v28 = vmul.f32 %v4980_v24, %v6833_v43  ;;  %v9089_v24 = vld [vmem:[#allocation125_spill] sm:$0xff] }
 0xabe   :  { %v2880_v58 = vpop.f32.mrb[44].mxu0  ;;  %v2921_v56 = vpop.f32.mrb[72].mxu1 }
 0xabf   :  { %v2932_v26 = vadd.f32 %v2880_v58, %v2760_v36  ;;  %v2934_v1 = vadd.f32 %v2921_v56, %v2762_v17  ;;  %v2882_v12 = vpop.f32.mrb[45].mxu0  ;;  %v2923_v29 = vpop.f32.mrb[73].mxu1 }
 0xac0   :  { %v2933_v34 = vadd.f32 %v2882_v12, %v2761_v51  ;;  %v2935_v23 = vadd.f32 %v2923_v29, %v2763_v52  ;;  %v2884_v38 = vpop.f32.mrb[46].mxu0  ;;  %v2925_v40 = vpop.f32.mrb[74].mxu1  ;;  %v6997_v12 = vld [vmem:[#allocation4 + $0x20] sm:$0xff]  ;;  %v7000_v29 = vld [vmem:[#allocation4 + $0x30] sm:$0xff] }
 0xac1   :  { %4981 = vtanh.f32 %v2932_v26  ;;  %v4643_v7 = vmul.f32 -1.442695, %v2934_v1  ;;  %v2885_v46 = vpop.f32.mrb[47].mxu0  ;;  %v2926_v5 = vpop.f32.mrb[75].mxu1  ;;  %v9070_v38 = vld [vmem:[#allocation106_spill] sm:$0xff]  ;;  %v9081_v40 = vld [vmem:[#allocation117_spill] sm:$0xff] }
 0xac2   :  { %4983 = vtanh.f32 %v2933_v34  ;;  %v4644_v42 = vmul.f32 -1.442695, %v2935_v23  ;;  %v7003_v34 = vld [vmem:[#allocation4 + $0x68] sm:$0xff]  ;;  %v7006_v23 = vld [vmem:[#allocation4 + $0x78] sm:$0xff]  ;;  %v9084_v5 = vld [vmem:[#allocation120_spill] sm:$0xff] }
 0xac3   :  { %4985 = vpow2.f32 %v4643_v7  ;;  %v9082_v7 = vld [vmem:[#allocation118_spill] sm:$0xff]  ;;  %v9083_v46 = vld [vmem:[#allocation119_spill] sm:$0xff] }
 0xac4   :  { %4987 = vpow2.f32 %v4644_v42  ;;  %v9085_v42 = vld [vmem:[#allocation121_spill] sm:$0xff] }
 0xacb   :  { %v4982_v25 = vpop.eup %4981 }
 0xacc   :  { %v4984_v62 = vpop.eup %4983  ;;  %v2976_v54 = vmul.f32 %v4982_v25, %v4974_v20  ;;  %v9086_v20 = vld [vmem:[#allocation122_spill] sm:$0xff] }
 0xacd   :  { %v4986_v21 = vpop.eup %4985  ;;  %v2977_v50 = vmul.f32 %v4984_v62, %v4978_v16  ;;  %v9088_v16 = vld [vmem:[#allocation124_spill] sm:$0xff]  ;;  %v9090_v25 = vld [vmem:[#allocation126_spill] sm:$0xff]  ;;  %v9091_v62 = vld [vmem:[#allocation127_spill] sm:$0xff] }
 0xace   :  { %v4988_v11 = vpop.eup %4987  ;;  %v6984_v41 = vadd.f32 %v2976_v54, %v2974_v49  ;;  %v2968_v36 = vadd.f32 1.0, %v4986_v21  ;;  %v9092_v49 = vld [vmem:[#allocation128_spill] sm:$0xff]  ;;  %v9093_v54 = vld [vmem:[#allocation129_spill] sm:$0xff]  ;;  %v9094_v21 = vld [vmem:[#allocation130_spill] sm:$0xff] }
 0xacf   :  { %v6986_v15 = vadd.f32 %v2977_v50, %v2975_v28  ;;  %v2969_v17 = vadd.f32 1.0, %v4988_v11  ;;  %v9095_v28 = vld [vmem:[#allocation131_spill] sm:$0xff]  ;;  %v9096_v50 = vld [vmem:[#allocation132_spill] sm:$0xff]  ;;  %v9097_v11 = vld [vmem:[#allocation134_spill] sm:$0xff] }
 0xad0   :  { %4989 = vtanh.f32 %v6984_v41 }
 0xad1   :  { %4991 = vrcp.f32 %v2968_v36  ;;  %v9098_v36 = vld [vmem:[#allocation135_spill] sm:$0xff] }
 0xad2   :  { %4993 = vtanh.f32 %v6986_v15 }
 0xad3   :  { %4995 = vrcp.f32 %v2969_v17  ;;  %v7126_v17 = vld [vmem:[#allocation4 + $0x110] sm:$0xff] }
 0xad4   :  { %9107 = vst [vmem:[#allocation96_spill] sm:$0xff] %v7126_v17 }
 0xada   :  { %v4990_v57 = vpop.eup %4989 }
 0xadb   :  { %v4992_v22 = vpop.eup %4991 }
 0xadc   :  { %v4994_v51 = vpop.eup %4993  ;;  %v2982_v52 = vmul.f32 %v4992_v22, %v4990_v57  ;;  %v7129_v57 = vld [vmem:[#allocation4 + $0x148] sm:$0xff]  ;;  %v7132_v22 = vld [vmem:[#allocation4 + $0x158] sm:$0xff] }
 0xadd   :  { %v4996_v58 = vpop.eup %4995  ;;  %9108 = vst [vmem:[#allocation97_spill] sm:$0xff] %v7129_v57  ;;  %9109 = vst [vmem:[#allocation98_spill] sm:$0xff] %v7132_v22 }
 0xade   :  { %v2983_v43 = vmul.f32 %v4996_v58, %v4994_v51  ;;  %v6990_v1 = vpack.c.bf16 %v2982_v52, %v2982_v52  ;;  %v7135_v51 = vld [vmem:[#allocation4 + $0x140] sm:$0xff]  ;;  %v7141_v58 = vld [vmem:[#allocation4 + $0x188] sm:$0xff] }
 0xadf   :  { %9110 = vst [vmem:[#allocation99_spill] sm:$0xff] %v7135_v51  ;;  %9112 = vst [vmem:[#allocation101_spill] sm:$0xff] %v7141_v58 }
 0xae0   :  { %v2985_v56 = vpack.c.bf16 %v2983_v43, %v2983_v43  ;;  %v4731_v26 = vpack.c.bf16 %v2983_v43, %v2982_v52  ;;  %v7138_v52 = vld [vmem:[#allocation4 + $0x150] sm:$0xff]  ;;  %v7144_v43 = vld [vmem:[#allocation4 + $0x198] sm:$0xff] }
 0xae1   :  { %9111 = vst [vmem:[#allocation100_spill] sm:$0xff] %v7138_v52  ;;  %9113 = vst [vmem:[#allocation102_spill] sm:$0xff] %v7144_v43 }
 0xae2   :  { %3039 = vmatprep.mubr.bf16.mxu0 %v2985_v56  ;;  %3080 = vmatprep.mubr.bf16.mxu1 %v2985_v56  ;;  %4646 = vst [vmem:[%s8375_s12 + $0x8] sm:$0xff] %v4731_v26  ;;  %v7150_v26 = vld [vmem:[#allocation4 + $0x190] sm:$0xff] }
 0xae3   :  { %3040 = vmatmul.mubr.bf16.vlgmr.msra.gmra.mrb[48].mxu0 %v6990_v1  ;;  %3081 = vmatmul.mubr.bf16.vlgmr.msra.gmra.mrb[76].mxu1 %v6990_v1  ;;  %9115 = vst [vmem:[#allocation104_spill] sm:$0xff] %v7150_v26 }
 0xae4   :  { %3090 = vmatpush1.bf16.msra.mxu0 %v6997_v12  ;;  %3131 = vmatpush1.bf16.msra.mxu1 %v7000_v29 }
 0xae5   :  { %3121 = vmatprep.mubr.bf16.mxu0 %v2985_v56  ;;  %3162 = vmatprep.mubr.bf16.mxu1 %v2985_v56  ;;  %v7147_v56 = vld [vmem:[#allocation4 + $0x180] sm:$0xff] }
 0xae6   :  { %3091 = vmatprep.subr.bf16.mxu0 %v7003_v34  ;;  %3132 = vmatprep.subr.bf16.mxu1 %v7006_v23  ;;  %9114 = vst [vmem:[#allocation103_spill] sm:$0xff] %v7147_v56 }
 0xae8   :  { %3092 = vmatpush1.bf16.msra.mxu0 %v8982_v53  ;;  %3133 = vmatpush1.bf16.msra.mxu1 %v8983_v6  ;;  %v9071_v53 = vld [vmem:[#allocation107_spill] sm:$0xff]  ;;  %v9072_v6 = vld [vmem:[#allocation108_spill] sm:$0xff] }
 0xae9   :  { %3093 = vmatprep.subr.bf16.mxu0 %v8984_v44  ;;  %3134 = vmatprep.subr.bf16.mxu1 %v8985_v13  ;;  %v9073_v44 = vld [vmem:[#allocation109_spill] sm:$0xff]  ;;  %v9074_v13 = vld [vmem:[#allocation110_spill] sm:$0xff] }
 0xaec   :  { %3094 = vmatpush1.bf16.msra.mxu0 %v8986_v33  ;;  %3135 = vmatpush1.bf16.msra.mxu1 %v8987_v47  ;;  %v9075_v33 = vld [vmem:[#allocation111_spill] sm:$0xff]  ;;  %v9076_v47 = vld [vmem:[#allocation112_spill] sm:$0xff] }
 0xaed   :  { %3095 = vmatprep.subr.bf16.mxu0 %v8988_v27  ;;  %3136 = vmatprep.subr.bf16.mxu1 %v8989_v4  ;;  %v9077_v27 = vld [vmem:[#allocation113_spill] sm:$0xff]  ;;  %v9078_v4 = vld [vmem:[#allocation114_spill] sm:$0xff] }
 0xaf0   :  { %3096 = vmatpush1.bf16.msra.mxu0 %v8990_v0  ;;  %3137 = vmatpush1.bf16.msra.mxu1 %v8991_v3  ;;  %v9079_v0 = vld [vmem:[#allocation115_spill] sm:$0xff]  ;;  %v9080_v3 = vld [vmem:[#allocation116_spill] sm:$0xff] }
 0xaf1   :  { %3097 = vmatprep.subr.bf16.mxu0 %v9070_v38  ;;  %3138 = vmatprep.subr.bf16.mxu1 %v9071_v53  ;;  %v7156_v38 = vld [vmem:[#allocation4 + $0x1d8] sm:$0xff]  ;;  %v7159_v53 = vld [vmem:[#allocation4 + $0x1c0] sm:$0xff] }
 0xaf2   :  { %9117 = vst [vmem:[#allocation133_spill] sm:$0xff] %v7156_v38  ;;  %9118 = vst [vmem:[#allocation136_spill] sm:$0xff] %v7159_v53 }
 0xaf4   :  { %3098 = vmatpush1.bf16.msra.mxu0 %v9072_v6  ;;  %3139 = vmatpush1.bf16.msra.mxu1 %v9073_v44  ;;  %v7162_v6 = vld [vmem:[#allocation4 + $0x1d0] sm:$0xff]  ;;  %v7165_v44 = vld [vmem:[#allocation4 + $0x208] sm:$0xff] }
 0xaf5   :  { %3099 = vmatprep.subr.bf16.mxu0 %v9074_v13  ;;  %3140 = vmatprep.subr.bf16.mxu1 %v9075_v33  ;;  %9119 = vst [vmem:[#allocation137_spill] sm:$0xff] %v7162_v6  ;;  %9120 = vst [vmem:[#allocation138_spill] sm:$0xff] %v7165_v44  ;;  %v7168_v13 = vld [vmem:[#allocation4 + $0x218] sm:$0xff]  ;;  %v7171_v33 = vld [vmem:[#allocation4 + $0x200] sm:$0xff] }
 0xaf6   :  { %9121 = vst [vmem:[#allocation139_spill] sm:$0xff] %v7168_v13  ;;  %9122 = vst [vmem:[#allocation140_spill] sm:$0xff] %v7171_v33 }
 0xaf8   :  { %3100 = vmatpush1.bf16.msra.mxu0 %v9076_v47  ;;  %3141 = vmatpush1.bf16.msra.mxu1 %v9077_v27  ;;  %v7174_v47 = vld [vmem:[#allocation4 + $0x210] sm:$0xff]  ;;  %v7177_v27 = vld [vmem:[#allocation4 + $0x248] sm:$0xff] }
 0xaf9   :  { %3101 = vmatprep.subr.bf16.mxu0 %v9078_v4  ;;  %3142 = vmatprep.subr.bf16.mxu1 %v9079_v0  ;;  %9123 = vst [vmem:[#allocation141_spill] sm:$0xff] %v7174_v47  ;;  %9124 = vst [vmem:[#allocation142_spill] sm:$0xff] %v7177_v27  ;;  %v7180_v4 = vld [vmem:[#allocation4 + $0x258] sm:$0xff]  ;;  %v7183_v0 = vld [vmem:[#allocation4 + $0x240] sm:$0xff] }
 0xafa   :  { %9125 = vst [vmem:[#allocation143_spill] sm:$0xff] %v7180_v4  ;;  %9126 = vst [vmem:[#allocation144_spill] sm:$0xff] %v7183_v0 }
 0xafc   :  { %3102 = vmatpush1.bf16.msra.mxu0 %v9080_v3  ;;  %3143 = vmatpush1.bf16.msra.mxu1 %v9081_v40  ;;  %v7186_v3 = vld [vmem:[#allocation4 + $0x250] sm:$0xff]  ;;  %v7189_v40 = vld [vmem:[#allocation4 + $0x288] sm:$0xff] }
 0xafd   :  { %3103 = vmatprep.subr.bf16.mxu0 %v9082_v7  ;;  %3144 = vmatprep.subr.bf16.mxu1 %v9083_v46  ;;  %9127 = vst [vmem:[#allocation145_spill] sm:$0xff] %v7186_v3  ;;  %9128 = vst [vmem:[#allocation33_spill] sm:$0xff] %v7189_v40  ;;  %v7192_v7 = vld [vmem:[#allocation4 + $0x298] sm:$0xff]  ;;  %v7195_v46 = vld [vmem:[#allocation4 + $0x280] sm:$0xff] }
 0xafe   :  { %9129 = vst [vmem:[#allocation35_spill] sm:$0xff] %v7192_v7  ;;  %9130 = vst [vmem:[#allocation37_spill] sm:$0xff] %v7195_v46 }
 0xb00   :  { %3104 = vmatpush1.bf16.msra.mxu0 %v9084_v5  ;;  %3145 = vmatpush1.bf16.msra.mxu1 %v9085_v42  ;;  %v7198_v5 = vld [vmem:[#allocation4 + $0x290] sm:$0xff]  ;;  %v7201_v42 = vld [vmem:[#allocation4 + $0x2c8] sm:$0xff] }
 0xb01   :  { %3105 = vmatprep.subr.bf16.mxu0 %v9086_v20  ;;  %3146 = vmatprep.subr.bf16.mxu1 %v9087_v9  ;;  %9131 = vst [vmem:[#allocation39_spill] sm:$0xff] %v7198_v5  ;;  %9132 = vst [vmem:[#allocation41_spill] sm:$0xff] %v7201_v42  ;;  %v7204_v20 = vld [vmem:[#allocation4 + $0x2d8] sm:$0xff]  ;;  %v7207_v9 = vld [vmem:[#allocation4 + $0x2c0] sm:$0xff] }
 0xb02   :  { %9133 = vst [vmem:[#allocation43_spill] sm:$0xff] %v7204_v20  ;;  %9134 = vst [vmem:[#allocation45_spill] sm:$0xff] %v7207_v9 }
 0xb04   :  { %3106 = vmatpush1.bf16.msra.mxu0 %v9088_v16  ;;  %3147 = vmatpush1.bf16.msra.mxu1 %v9089_v24  ;;  %v7210_v16 = vld [vmem:[#allocation4 + $0x2d0] sm:$0xff]  ;;  %v7213_v24 = vld [vmem:[#allocation4 + $0x308] sm:$0xff] }
 0xb05   :  { %3107 = vmatprep.subr.bf16.mxu0 %v9090_v25  ;;  %3148 = vmatprep.subr.bf16.mxu1 %v9091_v62  ;;  %9135 = vst [vmem:[#allocation47_spill] sm:$0xff] %v7210_v16  ;;  %9136 = vst [vmem:[#allocation49_spill] sm:$0xff] %v7213_v24  ;;  %v7216_v25 = vld [vmem:[#allocation4 + $0x318] sm:$0xff]  ;;  %v7219_v62 = vld [vmem:[#allocation4 + $0x300] sm:$0xff] }
 0xb06   :  { %9137 = vst [vmem:[#allocation51_spill] sm:$0xff] %v7216_v25  ;;  %9138 = vst [vmem:[#allocation68_spill] sm:$0xff] %v7219_v62 }
 0xb08   :  { %3108 = vmatpush1.bf16.msra.mxu0 %v9092_v49  ;;  %3149 = vmatpush1.bf16.msra.mxu1 %v9093_v54  ;;  %v7222_v49 = vld [vmem:[#allocation4 + $0x310] sm:$0xff]  ;;  %v7225_v54 = vld [vmem:[#allocation4 + $0x348] sm:$0xff] }
 0xb09   :  { %3109 = vmatprep.subr.bf16.mxu0 %v9094_v21  ;;  %3150 = vmatprep.subr.bf16.mxu1 %v9095_v28  ;;  %9139 = vst [vmem:[#allocation69_spill] sm:$0xff] %v7222_v49  ;;  %9140 = vst [vmem:[#allocation70_spill] sm:$0xff] %v7225_v54  ;;  %v7228_v21 = vld [vmem:[#allocation4 + $0x358] sm:$0xff]  ;;  %v7231_v28 = vld [vmem:[#allocation4 + $0x340] sm:$0xff] }
 0xb0a   :  { %9141 = vst [vmem:[#allocation71_spill] sm:$0xff] %v7228_v21  ;;  %9142 = vst [vmem:[#allocation72_spill] sm:$0xff] %v7231_v28 }
 0xb0c   :  { %3110 = vmatpush1.bf16.msra.mxu0 %v9096_v50  ;;  %3151 = vmatpush1.bf16.msra.mxu1 %v9019_v10  ;;  %v7108_v10 = vld [vmem:[#allocation4 + $0xd8] sm:$0xff]  ;;  %v7234_v50 = vld [vmem:[#allocation4 + $0x350] sm:$0xff] }
 0xb0d   :  { %3111 = vmatprep.subr.bf16.mxu0 %v9097_v11  ;;  %3152 = vmatprep.subr.bf16.mxu1 %v9098_v36  ;;  %9101 = vst [vmem:[#allocation32_spill] sm:$0xff] %v7108_v10  ;;  %9143 = vst [vmem:[#allocation73_spill] sm:$0xff] %v7234_v50  ;;  %v7237_v11 = vld [vmem:[#allocation4 + $0x388] sm:$0xff]  ;;  %v7240_v36 = vld [vmem:[#allocation4 + $0x398] sm:$0xff] }
 0xb0e   :  { %9144 = vst [vmem:[#allocation74_spill] sm:$0xff] %v7237_v11  ;;  %9145 = vst [vmem:[#allocation75_spill] sm:$0xff] %v7240_v36 }
 0xb10   :  { %3112 = vmatpush1.bf16.msra.mxu0 %v9022_v2  ;;  %3153 = vmatpush1.bf16.msra.mxu1 %v9023_v45  ;;  %v7117_v2 = vld [vmem:[#allocation4 + $0x108] sm:$0xff]  ;;  %v7120_v45 = vld [vmem:[#allocation4 + $0x118] sm:$0xff] }
 0xb11   :  { %3113 = vmatprep.subr.bf16.mxu0 %v9024_v8  ;;  %3154 = vmatprep.subr.bf16.mxu1 %v9025_v30  ;;  %v7067_v30 = vld [vmem:[#allocation4 + $0x8] sm:$0xff]  ;;  %9104 = vst [vmem:[#allocation93_spill] sm:$0xff] %v7117_v2  ;;  %9105 = vst [vmem:[#allocation94_spill] sm:$0xff] %v7120_v45  ;;  %v7123_v8 = vld [vmem:[#allocation4 + $0x100] sm:$0xff] }
 0xb12   :  { %9106 = vst [vmem:[#allocation95_spill] sm:$0xff] %v7123_v8 }
 0xb14   :  { %3114 = vmatpush1.bf16.msra.mxu0 %v9026_v18  ;;  %3155 = vmatpush1.bf16.msra.mxu1 %v9027_v55  ;;  %v7096_v18 = vld [vmem:[#allocation4 + $0x98] sm:$0xff]  ;;  %v7099_v55 = vld [vmem:[#allocation4 + $0x80] sm:$0xff] }
 0xb15   :  { %3115 = vmatprep.subr.bf16.mxu0 %v9028_v48  ;;  %3156 = vmatprep.subr.bf16.mxu1 %v9029_v31  ;;  %v7102_v48 = vld [vmem:[#allocation4 + $0x90] sm:$0xff]  ;;  %v7105_v31 = vld [vmem:[#allocation4 + $0xc8] sm:$0xff] }
 0xb16   :  { %9099 = vst [vmem:[#allocation52_spill] sm:$0xff] %v7102_v48  ;;  %9100 = vst [vmem:[#allocation60_spill] sm:$0xff] %v7105_v31 }
 0xb18   :  { %3116 = vmatpush1.bf16.msra.mxu0 %v6725_v37  ;;  %3157 = vmatpush1.bf16.msra.mxu1 %v9030_v61  ;;  %v7070_v37 = vld [vmem:[#allocation4 + $0x18] sm:$0xff]  ;;  %v7111_v61 = vld [vmem:[#allocation4 + $0xc0] sm:$0xff] }
 0xb19   :  { %3117 = vmatprep.subr.bf16.mxu0 %v9031_v14  ;;  %3158 = vmatprep.subr.bf16.mxu1 %v6731_v35  ;;  %v7075_v35 = vld [vmem:[#allocation4] sm:$0xff]  ;;  %9102 = vst [vmem:[#allocation48_spill] sm:$0xff] %v7111_v61  ;;  %v7114_v14 = vld [vmem:[#allocation4 + $0xd0] sm:$0xff] }
 0xb1a   :  { %9103 = vst [vmem:[#allocation92_spill] sm:$0xff] %v7114_v14 }
 0xb1c   :  { %3118 = vmatpush1.bf16.msra.mxu0 %v6737_v39  ;;  %3159 = vmatpush1.bf16.msra.mxu1 %v6739_v63  ;;  %v7087_v39 = vld [vmem:[#allocation4 + $0x40] sm:$0xff]  ;;  %v7090_v63 = vld [vmem:[#allocation4 + $0x50] sm:$0xff] }
 0xb1d   :  { %3119 = vmatprep.subr.bf16.mxu0 %v6741_v32  ;;  %3160 = vmatprep.subr.bf16.mxu1 %v6743_v59  ;;  %v7078_v32 = vld [vmem:[#allocation4 + $0x10] sm:$0xff]  ;;  %v7084_v59 = vld [vmem:[#allocation4 + $0x58] sm:$0xff] }
 0xb20   :  { %3120 = vmatpush1.bf16.msra.mxu0 %v6749_v19  ;;  %3161 = vmatpush1.bf16.msra.mxu1 %v6751_v60  ;;  %v7081_v19 = vld [vmem:[#allocation4 + $0x48] sm:$0xff] }
 0xb21   :  { %3250 = vmatprep.subr.bf16.mxu0 %v7067_v30  ;;  %3291 = vmatprep.subr.bf16.mxu1 %v7070_v37  ;;  %v7093_v60 = vld [vmem:[#allocation4 + $0x88] sm:$0xff] }
 0xb23   :  { %3122 = vmatmul.mubr.bf16.vlgmr.msra.gmra.mrb[52].mxu0 %v6990_v1  ;;  %3163 = vmatmul.mubr.bf16.vlgmr.msra.gmra.mrb[80].mxu1 %v6990_v1  ;;  %v7153_v1 = vld [vmem:[#allocation4 + $0x1c8] sm:$0xff] }
 0xb24   :  { %3251 = vmatpush1.bf16.msra.mxu0 %v7075_v35  ;;  %3292 = vmatpush1.bf16.msra.mxu1 %v7078_v32  ;;  %9116 = vst [vmem:[#allocation105_spill] sm:$0xff] %v7153_v1 }
 0xb25   :  { %3252 = vmatprep.subr.bf16.mxu0 %v7081_v19  ;;  %3293 = vmatprep.subr.bf16.mxu1 %v7084_v59 }
 0xb28   :  { %3253 = vmatpush1.bf16.msra.mxu0 %v7087_v39  ;;  %3294 = vmatpush1.bf16.msra.mxu1 %v7090_v63 }
 0xb29   :  { %3254 = vmatprep.subr.bf16.mxu0 %v7093_v60  ;;  %3295 = vmatprep.subr.bf16.mxu1 %v7096_v18 }
 0xb2c   :  { %3255 = vmatpush1.bf16.msra.mxu0 %v7099_v55  ;;  %3296 = vmatpush1.bf16.msra.mxu1 %v7102_v48 }
 0xb2d   :  { %3256 = vmatprep.subr.bf16.mxu0 %v7105_v31  ;;  %3297 = vmatprep.subr.bf16.mxu1 %v7108_v10 }
 0xb30   :  { %3257 = vmatpush1.bf16.msra.mxu0 %v7111_v61  ;;  %3298 = vmatpush1.bf16.msra.mxu1 %v7114_v14 }
 0xb31   :  { %3258 = vmatprep.subr.bf16.mxu0 %v7117_v2  ;;  %3299 = vmatprep.subr.bf16.mxu1 %v7120_v45 }
 0xb34   :  { %3259 = vmatpush1.bf16.msra.mxu0 %v7123_v8  ;;  %3300 = vmatpush1.bf16.msra.mxu1 %v7126_v17 }
 0xb35   :  { %3260 = vmatprep.subr.bf16.mxu0 %v7129_v57  ;;  %3301 = vmatprep.subr.bf16.mxu1 %v7132_v22 }
 0xb38   :  { %3261 = vmatpush1.bf16.msra.mxu0 %v7135_v51  ;;  %3302 = vmatpush1.bf16.msra.mxu1 %v7138_v52 }
 0xb39   :  { %3262 = vmatprep.subr.bf16.mxu0 %v7141_v58  ;;  %3303 = vmatprep.subr.bf16.mxu1 %v7144_v43 }
 0xb3c   :  { %3263 = vmatpush1.bf16.msra.mxu0 %v7147_v56  ;;  %3304 = vmatpush1.bf16.msra.mxu1 %v7150_v26 }
 0xb3d   :  { %3264 = vmatprep.subr.bf16.mxu0 %v7153_v1  ;;  %3305 = vmatprep.subr.bf16.mxu1 %v7156_v38 }
 0xb40   :  { %3265 = vmatpush1.bf16.msra.mxu0 %v7159_v53  ;;  %3306 = vmatpush1.bf16.msra.mxu1 %v7162_v6 }
 0xb41   :  { %3266 = vmatprep.subr.bf16.mxu0 %v7165_v44  ;;  %3307 = vmatprep.subr.bf16.mxu1 %v7168_v13 }
 0xb44   :  { %3267 = vmatpush1.bf16.msra.mxu0 %v7171_v33  ;;  %3308 = vmatpush1.bf16.msra.mxu1 %v7174_v47 }
 0xb45   :  { %3268 = vmatprep.subr.bf16.mxu0 %v7177_v27  ;;  %3309 = vmatprep.subr.bf16.mxu1 %v7180_v4 }
 0xb48   :  { %3269 = vmatpush1.bf16.msra.mxu0 %v7183_v0  ;;  %3310 = vmatpush1.bf16.msra.mxu1 %v7186_v3 }
 0xb49   :  { %3270 = vmatprep.subr.bf16.mxu0 %v7189_v40  ;;  %3311 = vmatprep.subr.bf16.mxu1 %v7192_v7 }
 0xb4c   :  { %3271 = vmatpush1.bf16.msra.mxu0 %v7195_v46  ;;  %3312 = vmatpush1.bf16.msra.mxu1 %v7198_v5 }
 0xb4d   :  { %3272 = vmatprep.subr.bf16.mxu0 %v7201_v42  ;;  %3313 = vmatprep.subr.bf16.mxu1 %v7204_v20  ;;  %v9155_v42 = vld [vmem:[#allocation62_spill] sm:$0xff] }
 0xb50   :  { %3273 = vmatpush1.bf16.msra.mxu0 %v7207_v9  ;;  %3314 = vmatpush1.bf16.msra.mxu1 %v7210_v16  ;;  %v9154_v9 = vld [vmem:[#allocation54_spill] sm:$0xff] }
 0xb51   :  { %3274 = vmatprep.subr.bf16.mxu0 %v7213_v24  ;;  %3315 = vmatprep.subr.bf16.mxu1 %v7216_v25  ;;  %v2999_v20 = vunpack.c.l.bf16 %v9154_v9  ;;  %v3000_v5 = vunpack.c.h.bf16 %v9154_v9 }
 0xb54   :  { %3275 = vmatpush1.bf16.msra.mxu0 %v7219_v62  ;;  %3316 = vmatpush1.bf16.msra.mxu1 %v7222_v49 }
 0xb55   :  { %3276 = vmatprep.subr.bf16.mxu0 %v7225_v54  ;;  %3317 = vmatprep.subr.bf16.mxu1 %v7228_v21  ;;  %v7243_v54 = vld [vmem:[#allocation4 + $0x380] sm:$0xff]  ;;  %v7246_v21 = vld [vmem:[#allocation4 + $0x390] sm:$0xff] }
 0xb56   :  { %9146 = vst [vmem:[#allocation76_spill] sm:$0xff] %v7243_v54  ;;  %9147 = vst [vmem:[#allocation77_spill] sm:$0xff] %v7246_v21 }
 0xb58   :  { %3277 = vmatpush1.bf16.msra.mxu0 %v7231_v28  ;;  %3318 = vmatpush1.bf16.msra.mxu1 %v7234_v50  ;;  %v7249_v28 = vld [vmem:[#allocation4 + $0x3c8] sm:$0xff]  ;;  %v7252_v50 = vld [vmem:[#allocation4 + $0x3d8] sm:$0xff] }
 0xb59   :  { %3278 = vmatprep.subr.bf16.mxu0 %v7237_v11  ;;  %3319 = vmatprep.subr.bf16.mxu1 %v7240_v36  ;;  %9148 = vst [vmem:[#allocation78_spill] sm:$0xff] %v7249_v28  ;;  %9149 = vst [vmem:[#allocation79_spill] sm:$0xff] %v7252_v50  ;;  %v7255_v11 = vld [vmem:[#allocation4 + $0x3c0] sm:$0xff]  ;;  %v7258_v36 = vld [vmem:[#allocation4 + $0x3d0] sm:$0xff] }
 0xb5a   :  { %9150 = vst [vmem:[#allocation80_spill] sm:$0xff] %v7255_v11  ;;  %9151 = vst [vmem:[#allocation81_spill] sm:$0xff] %v7258_v36 }
 0xb5c   :  { %3279 = vmatpush1.bf16.msra.mxu0 %v7243_v54  ;;  %3320 = vmatpush1.bf16.msra.mxu1 %v7246_v21  ;;  %v7261_v54 = vld [vmem:[#allocation4 + $0x28] sm:$0xff]  ;;  %v7264_v21 = vld [vmem:[#allocation4 + $0x38] sm:$0xff] }
 0xb5d   :  { %3280 = vmatprep.subr.bf16.mxu0 %v7249_v28  ;;  %3321 = vmatprep.subr.bf16.mxu1 %v7252_v50  ;;  %9152 = vst [vmem:[#allocation82_spill] sm:$0xff] %v7261_v54  ;;  %9153 = vst [vmem:[#allocation83_spill] sm:$0xff] %v7264_v21 }
 0xb60   :  { %3281 = vmatpush1.bf16.msra.mxu0 %v7255_v11  ;;  %3322 = vmatpush1.bf16.msra.mxu1 %v7258_v36  ;;  %v3001_v36 = vunpack.c.l.bf16 %v9155_v42 }
 0xb61   :  { %3332 = vmatprep.subr.bf16.mxu0 %v7261_v54  ;;  %3373 = vmatprep.subr.bf16.mxu1 %v7264_v21  ;;  %v3002_v54 = vunpack.c.h.bf16 %v9155_v42  ;;  %v9156_v42 = vld [vmem:[#allocation36_spill] sm:$0xff] }
 0xbb6   :  { %v3041_v28 = vpop.f32.mrb[48].mxu0  ;;  %v3082_v49 = vpop.f32.mrb[76].mxu1 }
 0xbb7   :  { %v3043_v62 = vpop.f32.mrb[49].mxu0  ;;  %v3084_v50 = vpop.f32.mrb[77].mxu1  ;;  %v3171_v46 = vadd.f32 %v3041_v28, %v2999_v20  ;;  %v3173_v7 = vadd.f32 %v3082_v49, %v3001_v36  ;;  %v3003_v20 = vunpack.c.l.bf16 %v9156_v42  ;;  %v9157_v49 = vld [vmem:[#allocation26_spill] sm:$0xff] }
 0xbb8   :  { %v3045_v25 = vpop.f32.mrb[50].mxu0  ;;  %v3086_v24 = vpop.f32.mrb[78].mxu1  ;;  %v3172_v40 = vadd.f32 %v3043_v62, %v3000_v5  ;;  %v3174_v21 = vadd.f32 %v3084_v50, %v3002_v54  ;;  %v3005_v5 = vunpack.c.l.bf16 %v9157_v49 }
 0xbb9   :  { %v3046_v16 = vpop.f32.mrb[51].mxu0  ;;  %v3087_v11 = vpop.f32.mrb[79].mxu1  ;;  %v4647_v3 = vmul.f32 -1.442695, %v3171_v46  ;;  %v4649_v0 = vmul.f32 -1.442695, %v3173_v7  ;;  %v3004_v7 = vunpack.c.h.bf16 %v9156_v42 }
 0xbba   :  { %v4648_v4 = vmul.f32 -1.442695, %v3172_v40  ;;  %v4650_v27 = vmul.f32 -1.442695, %v3174_v21  ;;  %v3006_v40 = vunpack.c.h.bf16 %v9157_v49 }
 0xbbb   :  { %4997 = vpow2.f32 %v4647_v3 }
 0xbbc   :  { %4999 = vpow2.f32 %v4649_v0 }
 0xbbd   :  { %5001 = vpow2.f32 %v4648_v4 }
 0xbbe   :  { %5003 = vpow2.f32 %v4650_v27 }
 0xbc5   :  { %v4998_v16 = vpop.eup %4997 }
 0xbc6   :  { %v5000_v24 = vpop.eup %4999  ;;  %v3185_v47 = vadd.f32 1.0, %v4998_v16 }
 0xbc7   :  { %v5002_v25 = vpop.eup %5001  ;;  %v3197_v9 = vadd.f32 1.0, %v5000_v24 }
 0xbc8   :  { %v5004_v11 = vpop.eup %5003  ;;  %v3186_v33 = vadd.f32 1.0, %v5002_v25  ;;  %5005 = vrcp.f32 %v3185_v47 }
 0xbc9   :  { %v3198_v62 = vadd.f32 1.0, %v5004_v11  ;;  %5007 = vrcp.f32 %v3197_v9 }
 0xbca   :  { %5009 = vrcp.f32 %v3186_v33 }
 0xbcb   :  { %5011 = vrcp.f32 %v3198_v62 }
 0xbd2   :  { %v5006_v47 = vpop.eup %5005 }
 0xbd3   :  { %v5008_v9 = vpop.eup %5007 }
 0xbd4   :  { %v5010_v33 = vpop.eup %5009 }
 0xbd5   :  { %v5012_v42 = vpop.eup %5011 }
 0xbf6   :  { %v3123_v4 = vpop.f32.mrb[52].mxu0  ;;  %v3164_v27 = vpop.f32.mrb[80].mxu1 }
 0xbf7   :  { %v3175_v0 = vadd.f32 %v3123_v4, %v3003_v20  ;;  %v3177_v3 = vadd.f32 %v3164_v27, %v3005_v5  ;;  %v3125_v46 = vpop.f32.mrb[53].mxu0  ;;  %v3166_v54 = vpop.f32.mrb[81].mxu1  ;;  %v3217_v5 = vmul.f32 %v5008_v9, %v6984_v41  ;;  %v7300_v9 = vld [vmem:[#allocation4 + $0xa8] sm:$0xff] }
 0xbf8   :  { %v3176_v21 = vadd.f32 %v3125_v46, %v3004_v7  ;;  %v3178_v28 = vadd.f32 %v3166_v54, %v3006_v40  ;;  %v3127_v50 = vpop.f32.mrb[54].mxu0  ;;  %v3168_v36 = vpop.f32.mrb[82].mxu1  ;;  %v3218_v40 = vmul.f32 %v5012_v42, %v6986_v15  ;;  %v7306_v42 = vld [vmem:[#allocation4 + $0xa0] sm:$0xff] }
 0xbf9   :  { %5013 = vtanh.f32 %v3175_v0  ;;  %v4651_v16 = vmul.f32 -1.442695, %v3177_v3  ;;  %v3128_v24 = vpop.f32.mrb[55].mxu0  ;;  %v3169_v25 = vpop.f32.mrb[83].mxu1 }
 0xbfa   :  { %5015 = vtanh.f32 %v3176_v21  ;;  %v4652_v11 = vmul.f32 -1.442695, %v3178_v28 }
 0xbfb   :  { %5017 = vpow2.f32 %v4651_v16 }
 0xbfc   :  { %5019 = vpow2.f32 %v4652_v11  ;;  %v7294_v11 = vld [vmem:[#allocation4 + $0x60] sm:$0xff] }
 0xc03   :  { %v5014_v20 = vpop.eup %5013 }
 0xc04   :  { %v5016_v49 = vpop.eup %5015  ;;  %v3219_v62 = vmul.f32 %v5014_v20, %v5006_v47  ;;  %v7297_v47 = vld [vmem:[#allocation4 + $0x70] sm:$0xff] }
 0xc05   :  { %v5018_v7 = vpop.eup %5017  ;;  %v3220_v4 = vmul.f32 %v5016_v49, %v5010_v33  ;;  %v7303_v33 = vld [vmem:[#allocation4 + $0xb8] sm:$0xff]  ;;  %v7309_v20 = vld [vmem:[#allocation4 + $0xb0] sm:$0xff]  ;;  %v7312_v49 = vld [vmem:[#allocation4 + $0xe8] sm:$0xff] }
 0xc06   :  { %v5020_v27 = vpop.eup %5019  ;;  %v7277_v0 = vadd.f32 %v3219_v62, %v3217_v5  ;;  %v3211_v3 = vadd.f32 1.0, %v5018_v7  ;;  %v7315_v5 = vld [vmem:[#allocation4 + $0xf8] sm:$0xff]  ;;  %v7318_v62 = vld [vmem:[#allocation4 + $0xe0] sm:$0xff]  ;;  %v7321_v7 = vld [vmem:[#allocation4 + $0xf0] sm:$0xff] }
 0xc07   :  { %v7279_v46 = vadd.f32 %v3220_v4, %v3218_v40  ;;  %v3212_v54 = vadd.f32 1.0, %v5020_v27  ;;  %v7324_v40 = vld [vmem:[#allocation4 + $0x128] sm:$0xff]  ;;  %v7327_v4 = vld [vmem:[#allocation4 + $0x138] sm:$0xff]  ;;  %v7330_v27 = vld [vmem:[#allocation4 + $0x120] sm:$0xff] }
 0xc08   :  { %5021 = vtanh.f32 %v7277_v0 }
 0xc09   :  { %5023 = vrcp.f32 %v3211_v3  ;;  %v7333_v3 = vld [vmem:[#allocation4 + $0x130] sm:$0xff] }
 0xc0a   :  { %5025 = vtanh.f32 %v7279_v46 }
 0xc0b   :  { %5027 = vrcp.f32 %v3212_v54  ;;  %v7336_v54 = vld [vmem:[#allocation4 + $0x168] sm:$0xff] }
 0xc12   :  { %v5022_v21 = vpop.eup %5021 }
 0xc13   :  { %v5024_v41 = vpop.eup %5023 }
 0xc14   :  { %v5026_v28 = vpop.eup %5025  ;;  %v3225_v50 = vmul.f32 %v5024_v41, %v5022_v21  ;;  %v7339_v21 = vld [vmem:[#allocation4 + $0x178] sm:$0xff]  ;;  %v7342_v41 = vld [vmem:[#allocation4 + $0x160] sm:$0xff] }
 0xc15   :  { %v5028_v36 = vpop.eup %5027 }
 0xc16   :  { %v3226_v15 = vmul.f32 %v5028_v36, %v5026_v28  ;;  %v7283_v25 = vpack.c.bf16 %v3225_v50, %v3225_v50  ;;  %v7345_v28 = vld [vmem:[#allocation4 + $0x170] sm:$0xff]  ;;  %v7351_v36 = vld [vmem:[#allocation4 + $0x1b8] sm:$0xff] }
 0xc17   :  { %9158 = vst [vmem:[#allocation84_spill] sm:$0xff] %v7345_v28  ;;  %9160 = vst [vmem:[#allocation86_spill] sm:$0xff] %v7351_v36 }
 0xc18   :  { %v3228_v16 = vpack.c.bf16 %v3226_v15, %v3226_v15  ;;  %v4732_v24 = vpack.c.bf16 %v3226_v15, %v3225_v50  ;;  %v7348_v50 = vld [vmem:[#allocation4 + $0x1a8] sm:$0xff]  ;;  %v7354_v15 = vld [vmem:[#allocation4 + $0x1a0] sm:$0xff] }
 0xc19   :  { %9159 = vst [vmem:[#allocation85_spill] sm:$0xff] %v7348_v50  ;;  %9161 = vst [vmem:[#allocation87_spill] sm:$0xff] %v7354_v15 }
 0xc1a   :  { %3282 = vmatprep.mubr.bf16.mxu0 %v3228_v16  ;;  %3323 = vmatprep.mubr.bf16.mxu1 %v3228_v16  ;;  %4654 = vst [vmem:[%s8375_s12 + $0x10] sm:$0xff] %v4732_v24  ;;  %v7360_v24 = vld [vmem:[#allocation4 + $0x1e8] sm:$0xff] }
 0xc1b   :  { %3283 = vmatmul.mubr.bf16.vlgmr.msra.gmra.mrb[56].mxu0 %v7283_v25  ;;  %3324 = vmatmul.mubr.bf16.vlgmr.msra.gmra.mrb[84].mxu1 %v7283_v25  ;;  %9163 = vst [vmem:[#allocation89_spill] sm:$0xff] %v7360_v24 }
 0xc1c   :  { %3333 = vmatpush1.bf16.msra.mxu0 %v6997_v12  ;;  %3374 = vmatpush1.bf16.msra.mxu1 %v7000_v29 }
 0xc1d   :  { %3364 = vmatprep.mubr.bf16.mxu0 %v3228_v16  ;;  %3405 = vmatprep.mubr.bf16.mxu1 %v3228_v16  ;;  %v7357_v16 = vld [vmem:[#allocation4 + $0x1b0] sm:$0xff] }
 0xc1e   :  { %3334 = vmatprep.subr.bf16.mxu0 %v7003_v34  ;;  %3375 = vmatprep.subr.bf16.mxu1 %v7006_v23  ;;  %9162 = vst [vmem:[#allocation88_spill] sm:$0xff] %v7357_v16 }
 0xc20   :  { %3335 = vmatpush1.bf16.msra.mxu0 %v7294_v11  ;;  %3376 = vmatpush1.bf16.msra.mxu1 %v7297_v47 }
 0xc21   :  { %3336 = vmatprep.subr.bf16.mxu0 %v7300_v9  ;;  %3377 = vmatprep.subr.bf16.mxu1 %v7303_v33 }
 0xc24   :  { %3337 = vmatpush1.bf16.msra.mxu0 %v7306_v42  ;;  %3378 = vmatpush1.bf16.msra.mxu1 %v7309_v20 }
 0xc25   :  { %3338 = vmatprep.subr.bf16.mxu0 %v7312_v49  ;;  %3379 = vmatprep.subr.bf16.mxu1 %v7315_v5 }
 0xc28   :  { %3339 = vmatpush1.bf16.msra.mxu0 %v7318_v62  ;;  %3380 = vmatpush1.bf16.msra.mxu1 %v7321_v7 }
 0xc29   :  { %3340 = vmatprep.subr.bf16.mxu0 %v7324_v40  ;;  %3381 = vmatprep.subr.bf16.mxu1 %v7327_v4 }
 0xc2c   :  { %3341 = vmatpush1.bf16.msra.mxu0 %v7330_v27  ;;  %3382 = vmatpush1.bf16.msra.mxu1 %v7333_v3 }
 0xc2d   :  { %3342 = vmatprep.subr.bf16.mxu0 %v7336_v54  ;;  %3383 = vmatprep.subr.bf16.mxu1 %v7339_v21 }
 0xc30   :  { %3343 = vmatpush1.bf16.msra.mxu0 %v7342_v41  ;;  %3384 = vmatpush1.bf16.msra.mxu1 %v7345_v28  ;;  %v7363_v28 = vld [vmem:[#allocation4 + $0x1f8] sm:$0xff] }
 0xc31   :  { %3344 = vmatprep.subr.bf16.mxu0 %v7348_v50  ;;  %3385 = vmatprep.subr.bf16.mxu1 %v7351_v36  ;;  %9164 = vst [vmem:[#allocation90_spill] sm:$0xff] %v7363_v28  ;;  %v7366_v50 = vld [vmem:[#allocation4 + $0x1e0] sm:$0xff]  ;;  %v7369_v36 = vld [vmem:[#allocation4 + $0x1f0] sm:$0xff] }
 0xc32   :  { %9165 = vst [vmem:[#allocation91_spill] sm:$0xff] %v7366_v50  ;;  %9166 = vst [vmem:[#allocation53_spill] sm:$0xff] %v7369_v36 }
 0xc34   :  { %3345 = vmatpush1.bf16.msra.mxu0 %v7354_v15  ;;  %3386 = vmatpush1.bf16.msra.mxu1 %v7357_v16  ;;  %v7372_v15 = vld [vmem:[#allocation4 + $0x228] sm:$0xff]  ;;  %v7375_v16 = vld [vmem:[#allocation4 + $0x238] sm:$0xff] }
 0xc35   :  { %3346 = vmatprep.subr.bf16.mxu0 %v7360_v24  ;;  %3387 = vmatprep.subr.bf16.mxu1 %v7363_v28  ;;  %9167 = vst [vmem:[#allocation61_spill] sm:$0xff] %v7372_v15  ;;  %9168 = vst [vmem:[#allocation34_spill] sm:$0xff] %v7375_v16  ;;  %v7378_v24 = vld [vmem:[#allocation4 + $0x220] sm:$0xff]  ;;  %v7381_v28 = vld [vmem:[#allocation4 + $0x230] sm:$0xff] }
 0xc36   :  { %9169 = vst [vmem:[#allocation50_spill] sm:$0xff] %v7378_v24  ;;  %9170 = vst [vmem:[#allocation106_spill] sm:$0xff] %v7381_v28 }
 0xc38   :  { %3347 = vmatpush1.bf16.msra.mxu0 %v7366_v50  ;;  %3388 = vmatpush1.bf16.msra.mxu1 %v7369_v36  ;;  %v7384_v50 = vld [vmem:[#allocation4 + $0x268] sm:$0xff]  ;;  %v7387_v36 = vld [vmem:[#allocation4 + $0x278] sm:$0xff] }
 0xc39   :  { %3348 = vmatprep.subr.bf16.mxu0 %v7372_v15  ;;  %3389 = vmatprep.subr.bf16.mxu1 %v7375_v16  ;;  %9171 = vst [vmem:[#allocation107_spill] sm:$0xff] %v7384_v50  ;;  %9172 = vst [vmem:[#allocation108_spill] sm:$0xff] %v7387_v36  ;;  %v7390_v15 = vld [vmem:[#allocation4 + $0x260] sm:$0xff]  ;;  %v7393_v16 = vld [vmem:[#allocation4 + $0x270] sm:$0xff] }
 0xc3a   :  { %9173 = vst [vmem:[#allocation109_spill] sm:$0xff] %v7390_v15  ;;  %9174 = vst [vmem:[#allocation110_spill] sm:$0xff] %v7393_v16 }
 0xc3c   :  { %3349 = vmatpush1.bf16.msra.mxu0 %v7378_v24  ;;  %3390 = vmatpush1.bf16.msra.mxu1 %v7381_v28  ;;  %v7396_v24 = vld [vmem:[#allocation4 + $0x2a8] sm:$0xff]  ;;  %v7399_v28 = vld [vmem:[#allocation4 + $0x2b8] sm:$0xff] }
 0xc3d   :  { %3350 = vmatprep.subr.bf16.mxu0 %v7384_v50  ;;  %3391 = vmatprep.subr.bf16.mxu1 %v7387_v36  ;;  %9175 = vst [vmem:[#allocation111_spill] sm:$0xff] %v7396_v24  ;;  %9176 = vst [vmem:[#allocation112_spill] sm:$0xff] %v7399_v28  ;;  %v7402_v50 = vld [vmem:[#allocation4 + $0x2a0] sm:$0xff]  ;;  %v7405_v36 = vld [vmem:[#allocation4 + $0x2b0] sm:$0xff] }
 0xc3e   :  { %9177 = vst [vmem:[#allocation113_spill] sm:$0xff] %v7402_v50  ;;  %9178 = vst [vmem:[#allocation114_spill] sm:$0xff] %v7405_v36 }
 0xc40   :  { %3351 = vmatpush1.bf16.msra.mxu0 %v7390_v15  ;;  %3392 = vmatpush1.bf16.msra.mxu1 %v7393_v16  ;;  %v7408_v15 = vld [vmem:[#allocation4 + $0x2e8] sm:$0xff]  ;;  %v7411_v16 = vld [vmem:[#allocation4 + $0x2f8] sm:$0xff] }
 0xc41   :  { %3352 = vmatprep.subr.bf16.mxu0 %v7396_v24  ;;  %3393 = vmatprep.subr.bf16.mxu1 %v7399_v28  ;;  %9179 = vst [vmem:[#allocation115_spill] sm:$0xff] %v7408_v15  ;;  %9180 = vst [vmem:[#allocation116_spill] sm:$0xff] %v7411_v16  ;;  %v7414_v24 = vld [vmem:[#allocation4 + $0x2e0] sm:$0xff]  ;;  %v7417_v28 = vld [vmem:[#allocation4 + $0x2f0] sm:$0xff] }
 0xc42   :  { %9181 = vst [vmem:[#allocation117_spill] sm:$0xff] %v7414_v24  ;;  %9182 = vst [vmem:[#allocation118_spill] sm:$0xff] %v7417_v28 }
 0xc44   :  { %3353 = vmatpush1.bf16.msra.mxu0 %v7402_v50  ;;  %3394 = vmatpush1.bf16.msra.mxu1 %v7405_v36  ;;  %v7420_v50 = vld [vmem:[#allocation4 + $0x328] sm:$0xff]  ;;  %v7423_v36 = vld [vmem:[#allocation4 + $0x338] sm:$0xff] }
 0xc45   :  { %3354 = vmatprep.subr.bf16.mxu0 %v7408_v15  ;;  %3395 = vmatprep.subr.bf16.mxu1 %v7411_v16  ;;  %9183 = vst [vmem:[#allocation119_spill] sm:$0xff] %v7420_v50  ;;  %9184 = vst [vmem:[#allocation120_spill] sm:$0xff] %v7423_v36  ;;  %v7426_v15 = vld [vmem:[#allocation4 + $0x320] sm:$0xff]  ;;  %v7429_v16 = vld [vmem:[#allocation4 + $0x330] sm:$0xff] }
 0xc46   :  { %9185 = vst [vmem:[#allocation121_spill] sm:$0xff] %v7426_v15  ;;  %9186 = vst [vmem:[#allocation122_spill] sm:$0xff] %v7429_v16 }
 0xc48   :  { %3355 = vmatpush1.bf16.msra.mxu0 %v7414_v24  ;;  %3396 = vmatpush1.bf16.msra.mxu1 %v7417_v28  ;;  %v7432_v24 = vld [vmem:[#allocation4 + $0x368] sm:$0xff]  ;;  %v7435_v28 = vld [vmem:[#allocation4 + $0x378] sm:$0xff] }
 0xc49   :  { %3356 = vmatprep.subr.bf16.mxu0 %v7420_v50  ;;  %3397 = vmatprep.subr.bf16.mxu1 %v7423_v36  ;;  %9187 = vst [vmem:[#allocation123_spill] sm:$0xff] %v7432_v24  ;;  %9188 = vst [vmem:[#allocation124_spill] sm:$0xff] %v7435_v28  ;;  %v7438_v50 = vld [vmem:[#allocation4 + $0x360] sm:$0xff]  ;;  %v7441_v36 = vld [vmem:[#allocation4 + $0x370] sm:$0xff] }
 0xc4a   :  { %9189 = vst [vmem:[#allocation125_spill] sm:$0xff] %v7438_v50  ;;  %9190 = vst [vmem:[#allocation126_spill] sm:$0xff] %v7441_v36 }
 0xc4c   :  { %3357 = vmatpush1.bf16.msra.mxu0 %v7426_v15  ;;  %3398 = vmatpush1.bf16.msra.mxu1 %v7429_v16  ;;  %v7444_v15 = vld [vmem:[#allocation4 + $0x3a8] sm:$0xff]  ;;  %v7447_v16 = vld [vmem:[#allocation4 + $0x3b8] sm:$0xff] }
 0xc4d   :  { %3358 = vmatprep.subr.bf16.mxu0 %v7432_v24  ;;  %3399 = vmatprep.subr.bf16.mxu1 %v7435_v28  ;;  %9191 = vst [vmem:[#allocation127_spill] sm:$0xff] %v7444_v15  ;;  %9192 = vst [vmem:[#allocation128_spill] sm:$0xff] %v7447_v16  ;;  %v7450_v24 = vld [vmem:[#allocation4 + $0x3a0] sm:$0xff]  ;;  %v7453_v28 = vld [vmem:[#allocation4 + $0x3b0] sm:$0xff] }
 0xc4e   :  { %9193 = vst [vmem:[#allocation129_spill] sm:$0xff] %v7450_v24  ;;  %9194 = vst [vmem:[#allocation130_spill] sm:$0xff] %v7453_v28 }
 0xc50   :  { %3359 = vmatpush1.bf16.msra.mxu0 %v7438_v50  ;;  %3400 = vmatpush1.bf16.msra.mxu1 %v7441_v36  ;;  %v7456_v50 = vld [vmem:[#allocation4 + $0x3e8] sm:$0xff]  ;;  %v7459_v36 = vld [vmem:[#allocation4 + $0x3f8] sm:$0xff] }
 0xc51   :  { %3360 = vmatprep.subr.bf16.mxu0 %v7444_v15  ;;  %3401 = vmatprep.subr.bf16.mxu1 %v7447_v16  ;;  %9195 = vst [vmem:[#allocation131_spill] sm:$0xff] %v7456_v50  ;;  %9196 = vst [vmem:[#allocation132_spill] sm:$0xff] %v7459_v36  ;;  %v7462_v15 = vld [vmem:[#allocation4 + $0x3e0] sm:$0xff]  ;;  %v7465_v16 = vld [vmem:[#allocation4 + $0x3f0] sm:$0xff] }
 0xc52   :  { %9197 = vst [vmem:[#allocation134_spill] sm:$0xff] %v7462_v15  ;;  %9198 = vst [vmem:[#allocation135_spill] sm:$0xff] %v7465_v16 }
 0xc54   :  { %3361 = vmatpush1.bf16.msra.mxu0 %v7450_v24  ;;  %3402 = vmatpush1.bf16.msra.mxu1 %v7453_v28 }
 0xc55   :  { %3362 = vmatprep.subr.bf16.mxu0 %v7456_v50  ;;  %3403 = vmatprep.subr.bf16.mxu1 %v7459_v36 }
 0xc58   :  { %3363 = vmatpush1.bf16.msra.mxu0 %v7462_v15  ;;  %3404 = vmatpush1.bf16.msra.mxu1 %v7465_v16 }
 0xc59   :  { %3493 = vmatprep.subr.bf16.mxu0 %v7067_v30  ;;  %3534 = vmatprep.subr.bf16.mxu1 %v7070_v37 }
 0xc5b   :  { %3365 = vmatmul.mubr.bf16.vlgmr.msra.gmra.mrb[60].mxu0 %v7283_v25  ;;  %3406 = vmatmul.mubr.bf16.vlgmr.msra.gmra.mrb[88].mxu1 %v7283_v25  ;;  %v9199_v25 = vld [vmem:[#allocation140_spill] sm:$0xff] }
 0xc5c   :  { %3494 = vmatpush1.bf16.msra.mxu0 %v7075_v35  ;;  %3535 = vmatpush1.bf16.msra.mxu1 %v7078_v32 }
 0xc5d   :  { %3495 = vmatprep.subr.bf16.mxu0 %v7081_v19  ;;  %3536 = vmatprep.subr.bf16.mxu1 %v7084_v59 }
 0xc60   :  { %3496 = vmatpush1.bf16.msra.mxu0 %v7087_v39  ;;  %3537 = vmatpush1.bf16.msra.mxu1 %v7090_v63 }
 0xc61   :  { %3497 = vmatprep.subr.bf16.mxu0 %v7093_v60  ;;  %3538 = vmatprep.subr.bf16.mxu1 %v7096_v18 }
 0xc64   :  { %3498 = vmatpush1.bf16.msra.mxu0 %v7099_v55  ;;  %3539 = vmatpush1.bf16.msra.mxu1 %v7102_v48 }
 0xc65   :  { %3499 = vmatprep.subr.bf16.mxu0 %v7105_v31  ;;  %3540 = vmatprep.subr.bf16.mxu1 %v7108_v10 }
 0xc68   :  { %3500 = vmatpush1.bf16.msra.mxu0 %v7111_v61  ;;  %3541 = vmatpush1.bf16.msra.mxu1 %v7114_v14 }
 0xc69   :  { %3501 = vmatprep.subr.bf16.mxu0 %v7117_v2  ;;  %3542 = vmatprep.subr.bf16.mxu1 %v7120_v45 }
 0xc6c   :  { %3502 = vmatpush1.bf16.msra.mxu0 %v7123_v8  ;;  %3543 = vmatpush1.bf16.msra.mxu1 %v7126_v17  ;;  %v9232_v17 = vld [vmem:[#allocation63_spill] sm:$0xff] }
 0xc6d   :  { %3503 = vmatprep.subr.bf16.mxu0 %v7129_v57  ;;  %3544 = vmatprep.subr.bf16.mxu1 %v7132_v22  ;;  %v9231_v57 = vld [vmem:[#allocation55_spill] sm:$0xff] }
 0xc70   :  { %3504 = vmatpush1.bf16.msra.mxu0 %v7135_v51  ;;  %3545 = vmatpush1.bf16.msra.mxu1 %v7138_v52 }
 0xc71   :  { %3505 = vmatprep.subr.bf16.mxu0 %v7141_v58  ;;  %3546 = vmatprep.subr.bf16.mxu1 %v7144_v43  ;;  %v9200_v58 = vld [vmem:[#allocation141_spill] sm:$0xff]  ;;  %v9201_v43 = vld [vmem:[#allocation142_spill] sm:$0xff] }
 0xc74   :  { %3506 = vmatpush1.bf16.msra.mxu0 %v7147_v56  ;;  %3547 = vmatpush1.bf16.msra.mxu1 %v7150_v26  ;;  %v9202_v56 = vld [vmem:[#allocation143_spill] sm:$0xff]  ;;  %v9203_v26 = vld [vmem:[#allocation144_spill] sm:$0xff] }
 0xc75   :  { %3507 = vmatprep.subr.bf16.mxu0 %v7153_v1  ;;  %3548 = vmatprep.subr.bf16.mxu1 %v7156_v38  ;;  %v9204_v1 = vld [vmem:[#allocation145_spill] sm:$0xff] }
 0xc76   :  { %v9205_v38 = vld [vmem:[#allocation33_spill] sm:$0xff] }
 0xc78   :  { %3508 = vmatpush1.bf16.msra.mxu0 %v7159_v53  ;;  %3549 = vmatpush1.bf16.msra.mxu1 %v7162_v6  ;;  %v9206_v53 = vld [vmem:[#allocation35_spill] sm:$0xff]  ;;  %v9207_v6 = vld [vmem:[#allocation37_spill] sm:$0xff] }
 0xc79   :  { %3509 = vmatprep.subr.bf16.mxu0 %v7165_v44  ;;  %3550 = vmatprep.subr.bf16.mxu1 %v7168_v13  ;;  %v9208_v44 = vld [vmem:[#allocation39_spill] sm:$0xff]  ;;  %v9209_v13 = vld [vmem:[#allocation41_spill] sm:$0xff] }
 0xc7c   :  { %3510 = vmatpush1.bf16.msra.mxu0 %v9199_v25  ;;  %3551 = vmatpush1.bf16.msra.mxu1 %v9200_v58  ;;  %v9210_v25 = vld [vmem:[#allocation43_spill] sm:$0xff]  ;;  %v9211_v58 = vld [vmem:[#allocation45_spill] sm:$0xff] }
 0xc7d   :  { %3511 = vmatprep.subr.bf16.mxu0 %v9201_v43  ;;  %3552 = vmatprep.subr.bf16.mxu1 %v9202_v56  ;;  %v9212_v43 = vld [vmem:[#allocation47_spill] sm:$0xff]  ;;  %v9213_v56 = vld [vmem:[#allocation49_spill] sm:$0xff] }
 0xc80   :  { %3512 = vmatpush1.bf16.msra.mxu0 %v9203_v26  ;;  %3553 = vmatpush1.bf16.msra.mxu1 %v9204_v1  ;;  %v9214_v26 = vld [vmem:[#allocation51_spill] sm:$0xff]  ;;  %v9215_v1 = vld [vmem:[#allocation68_spill] sm:$0xff] }
 0xc81   :  { %3513 = vmatprep.subr.bf16.mxu0 %v9205_v38  ;;  %3554 = vmatprep.subr.bf16.mxu1 %v9206_v53  ;;  %v9216_v38 = vld [vmem:[#allocation69_spill] sm:$0xff]  ;;  %v9217_v53 = vld [vmem:[#allocation70_spill] sm:$0xff] }
 0xc84   :  { %3514 = vmatpush1.bf16.msra.mxu0 %v9207_v6  ;;  %3555 = vmatpush1.bf16.msra.mxu1 %v9208_v44  ;;  %v9218_v6 = vld [vmem:[#allocation71_spill] sm:$0xff]  ;;  %v9219_v44 = vld [vmem:[#allocation72_spill] sm:$0xff] }
 0xc85   :  { %3515 = vmatprep.subr.bf16.mxu0 %v9209_v13  ;;  %3556 = vmatprep.subr.bf16.mxu1 %v9210_v25  ;;  %v9220_v13 = vld [vmem:[#allocation73_spill] sm:$0xff]  ;;  %v9221_v25 = vld [vmem:[#allocation74_spill] sm:$0xff] }
 0xc88   :  { %3516 = vmatpush1.bf16.msra.mxu0 %v9211_v58  ;;  %3557 = vmatpush1.bf16.msra.mxu1 %v9212_v43  ;;  %v9222_v58 = vld [vmem:[#allocation75_spill] sm:$0xff]  ;;  %v9223_v43 = vld [vmem:[#allocation76_spill] sm:$0xff] }
 0xc89   :  { %3517 = vmatprep.subr.bf16.mxu0 %v9213_v56  ;;  %3558 = vmatprep.subr.bf16.mxu1 %v9214_v26  ;;  %v9224_v56 = vld [vmem:[#allocation77_spill] sm:$0xff]  ;;  %v9225_v26 = vld [vmem:[#allocation78_spill] sm:$0xff] }
 0xc8c   :  { %3518 = vmatpush1.bf16.msra.mxu0 %v9215_v1  ;;  %3559 = vmatpush1.bf16.msra.mxu1 %v9216_v38  ;;  %v9226_v1 = vld [vmem:[#allocation79_spill] sm:$0xff]  ;;  %v9227_v38 = vld [vmem:[#allocation80_spill] sm:$0xff] }
 0xc8d   :  { %3519 = vmatprep.subr.bf16.mxu0 %v9217_v53  ;;  %3560 = vmatprep.subr.bf16.mxu1 %v9218_v6  ;;  %v9228_v53 = vld [vmem:[#allocation81_spill] sm:$0xff]  ;;  %v9229_v6 = vld [vmem:[#allocation82_spill] sm:$0xff] }
 0xc90   :  { %3520 = vmatpush1.bf16.msra.mxu0 %v9219_v44  ;;  %3561 = vmatpush1.bf16.msra.mxu1 %v9220_v13  ;;  %v9230_v44 = vld [vmem:[#allocation83_spill] sm:$0xff] }
 0xc91   :  { %3521 = vmatprep.subr.bf16.mxu0 %v9221_v25  ;;  %3562 = vmatprep.subr.bf16.mxu1 %v9222_v58 }
 0xc94   :  { %3522 = vmatpush1.bf16.msra.mxu0 %v9223_v43  ;;  %3563 = vmatpush1.bf16.msra.mxu1 %v9224_v56 }
 0xc95   :  { %3523 = vmatprep.subr.bf16.mxu0 %v9225_v26  ;;  %3564 = vmatprep.subr.bf16.mxu1 %v9226_v1  ;;  %v3242_v26 = vunpack.c.l.bf16 %v9231_v57  ;;  %v3244_v1 = vunpack.c.l.bf16 %v9232_v17 }
 0xc98   :  { %3524 = vmatpush1.bf16.msra.mxu0 %v9227_v38  ;;  %3565 = vmatpush1.bf16.msra.mxu1 %v9228_v53  ;;  %v3243_v38 = vunpack.c.h.bf16 %v9231_v57  ;;  %v3245_v53 = vunpack.c.h.bf16 %v9232_v17  ;;  %v9233_v17 = vld [vmem:[#allocation38_spill] sm:$0xff] }
 0xc99   :  { %3575 = vmatprep.subr.bf16.mxu0 %v9229_v6  ;;  %3616 = vmatprep.subr.bf16.mxu1 %v9230_v44 }
 0xcee   :  { %v3284_v13 = vpop.f32.mrb[56].mxu0  ;;  %v3325_v25 = vpop.f32.mrb[84].mxu1 }
 0xcef   :  { %v3286_v52 = vpop.f32.mrb[57].mxu0  ;;  %v3327_v58 = vpop.f32.mrb[85].mxu1  ;;  %v3414_v8 = vadd.f32 %v3284_v13, %v3242_v26  ;;  %v3416_v6 = vadd.f32 %v3325_v25, %v3244_v1  ;;  %v3246_v26 = vunpack.c.l.bf16 %v9233_v17  ;;  %v9234_v1 = vld [vmem:[#allocation27_spill] sm:$0xff] }
 0xcf0   :  { %v3288_v51 = vpop.f32.mrb[58].mxu0  ;;  %v3329_v43 = vpop.f32.mrb[86].mxu1  ;;  %v3415_v45 = vadd.f32 %v3286_v52, %v3243_v38  ;;  %v3417_v44 = vadd.f32 %v3327_v58, %v3245_v53  ;;  %v3248_v52 = vunpack.c.l.bf16 %v9234_v1 }
 0xcf1   :  { %v3289_v22 = vpop.f32.mrb[59].mxu0  ;;  %v3330_v56 = vpop.f32.mrb[87].mxu1  ;;  %v4655_v2 = vmul.f32 -1.442695, %v3414_v8  ;;  %v4657_v14 = vmul.f32 -1.442695, %v3416_v6  ;;  %v3247_v8 = vunpack.c.h.bf16 %v9233_v17 }
 0xcf2   :  { %v4656_v61 = vmul.f32 -1.442695, %v3415_v45  ;;  %v4658_v10 = vmul.f32 -1.442695, %v3417_v44  ;;  %v3249_v45 = vunpack.c.h.bf16 %v9234_v1 }
 0xcf3   :  { %5029 = vpow2.f32 %v4655_v2 }
 0xcf4   :  { %5031 = vpow2.f32 %v4657_v14 }
 0xcf5   :  { %5033 = vpow2.f32 %v4656_v61 }
 0xcf6   :  { %5035 = vpow2.f32 %v4658_v10 }
 0xcfd   :  { %v5030_v22 = vpop.eup %5029 }
 0xcfe   :  { %v5032_v51 = vpop.eup %5031  ;;  %v3428_v31 = vadd.f32 1.0, %v5030_v22 }
 0xcff   :  { %v5034_v43 = vpop.eup %5033  ;;  %v3440_v57 = vadd.f32 1.0, %v5032_v51 }
 0xd00   :  { %v5036_v56 = vpop.eup %5035  ;;  %v3429_v48 = vadd.f32 1.0, %v5034_v43  ;;  %5037 = vrcp.f32 %v3428_v31 }
 0xd01   :  { %v3441_v58 = vadd.f32 1.0, %v5036_v56  ;;  %5039 = vrcp.f32 %v3440_v57 }
 0xd02   :  { %5041 = vrcp.f32 %v3429_v48 }
 0xd03   :  { %5043 = vrcp.f32 %v3441_v58 }
 0xd0a   :  { %v5038_v31 = vpop.eup %5037 }
 0xd0b   :  { %v5040_v57 = vpop.eup %5039 }
 0xd0c   :  { %v5042_v48 = vpop.eup %5041 }
 0xd0d   :  { %v5044_v17 = vpop.eup %5043 }
 0xd2e   :  { %v3366_v61 = vpop.f32.mrb[60].mxu0  ;;  %v3407_v10 = vpop.f32.mrb[88].mxu1 }
 0xd2f   :  { %v3418_v14 = vadd.f32 %v3366_v61, %v3246_v26  ;;  %v3420_v2 = vadd.f32 %v3407_v10, %v3248_v52  ;;  %v3368_v38 = vpop.f32.mrb[61].mxu0  ;;  %v3409_v53 = vpop.f32.mrb[89].mxu1  ;;  %v3460_v52 = vmul.f32 %v5040_v57, %v7277_v0  ;;  %v9241_v57 = vld [vmem:[#allocation90_spill] sm:$0xff] }
 0xd30   :  { %v3419_v6 = vadd.f32 %v3368_v38, %v3247_v8  ;;  %v3421_v44 = vadd.f32 %v3409_v53, %v3249_v45  ;;  %v3370_v13 = vpop.f32.mrb[62].mxu0  ;;  %v3411_v25 = vpop.f32.mrb[90].mxu1  ;;  %v3461_v45 = vmul.f32 %v5044_v17, %v7279_v46  ;;  %v9243_v17 = vld [vmem:[#allocation53_spill] sm:$0xff] }
 0xd31   :  { %5045 = vtanh.f32 %v3418_v14  ;;  %v4659_v22 = vmul.f32 -1.442695, %v3420_v2  ;;  %v3371_v51 = vpop.f32.mrb[63].mxu0  ;;  %v3412_v43 = vpop.f32.mrb[91].mxu1 }
 0xd32   :  { %5047 = vtanh.f32 %v3419_v6  ;;  %v4660_v56 = vmul.f32 -1.442695, %v3421_v44 }
 0xd33   :  { %5049 = vpow2.f32 %v4659_v22 }
 0xd34   :  { %5051 = vpow2.f32 %v4660_v56  ;;  %v9239_v56 = vld [vmem:[#allocation88_spill] sm:$0xff] }
 0xd3b   :  { %v5046_v26 = vpop.eup %5045 }
 0xd3c   :  { %v5048_v1 = vpop.eup %5047  ;;  %v3462_v58 = vmul.f32 %v5046_v26, %v5038_v31  ;;  %v9240_v31 = vld [vmem:[#allocation89_spill] sm:$0xff] }
 0xd3d   :  { %v5050_v8 = vpop.eup %5049  ;;  %v3463_v61 = vmul.f32 %v5048_v1, %v5042_v48  ;;  %v9242_v48 = vld [vmem:[#allocation91_spill] sm:$0xff]  ;;  %v9244_v26 = vld [vmem:[#allocation61_spill] sm:$0xff]  ;;  %v9245_v1 = vld [vmem:[#allocation34_spill] sm:$0xff] }
 0xd3e   :  { %v5052_v10 = vpop.eup %5051  ;;  %v7546_v14 = vadd.f32 %v3462_v58, %v3460_v52  ;;  %v3454_v2 = vadd.f32 1.0, %v5050_v8  ;;  %v9246_v52 = vld [vmem:[#allocation50_spill] sm:$0xff]  ;;  %v9248_v8 = vld [vmem:[#allocation107_spill] sm:$0xff] }
 0xd3f   :  { %v7548_v38 = vadd.f32 %v3463_v61, %v3461_v45  ;;  %v3455_v53 = vadd.f32 1.0, %v5052_v10  ;;  %v9247_v58 = vld [vmem:[#allocation106_spill] sm:$0xff]  ;;  %v9249_v45 = vld [vmem:[#allocation108_spill] sm:$0xff]  ;;  %v9250_v61 = vld [vmem:[#allocation109_spill] sm:$0xff] }
 0xd40   :  { %5053 = vtanh.f32 %v7546_v14  ;;  %v9251_v10 = vld [vmem:[#allocation110_spill] sm:$0xff] }
 0xd41   :  { %5055 = vrcp.f32 %v3454_v2  ;;  %v9252_v2 = vld [vmem:[#allocation111_spill] sm:$0xff] }
 0xd42   :  { %5057 = vtanh.f32 %v7548_v38 }
 0xd43   :  { %5059 = vrcp.f32 %v3455_v53  ;;  %v9253_v53 = vld [vmem:[#allocation112_spill] sm:$0xff] }
 0xd4a   :  { %v5054_v6 = vpop.eup %5053 }
 0xd4b   :  { %v5056_v0 = vpop.eup %5055 }
 0xd4c   :  { %v5058_v44 = vpop.eup %5057  ;;  %v3468_v13 = vmul.f32 %v5056_v0, %v5054_v6  ;;  %v9254_v6 = vld [vmem:[#allocation113_spill] sm:$0xff]  ;;  %v9255_v0 = vld [vmem:[#allocation114_spill] sm:$0xff] }
 0xd4d   :  { %v5060_v25 = vpop.eup %5059 }
 0xd4e   :  { %v3469_v46 = vmul.f32 %v5060_v25, %v5058_v44  ;;  %v7552_v43 = vpack.c.bf16 %v3468_v13, %v3468_v13  ;;  %v9256_v44 = vld [vmem:[#allocation115_spill] sm:$0xff]  ;;  %v9258_v25 = vld [vmem:[#allocation117_spill] sm:$0xff] }
 0xd50   :  { %v3471_v22 = vpack.c.bf16 %v3469_v46, %v3469_v46  ;;  %v4733_v51 = vpack.c.bf16 %v3469_v46, %v3468_v13  ;;  %v9257_v13 = vld [vmem:[#allocation116_spill] sm:$0xff]  ;;  %v9259_v46 = vld [vmem:[#allocation118_spill] sm:$0xff] }
 0xd52   :  { %3525 = vmatprep.mubr.bf16.mxu0 %v3471_v22  ;;  %3566 = vmatprep.mubr.bf16.mxu1 %v3471_v22  ;;  %4662 = vst [vmem:[%s8375_s12 + $0x18] sm:$0xff] %v4733_v51  ;;  %v9261_v51 = vld [vmem:[#allocation120_spill] sm:$0xff] }
 0xd53   :  { %3526 = vmatmul.mubr.bf16.vlgmr.msra.gmra.mrb[64].mxu0 %v7552_v43  ;;  %3567 = vmatmul.mubr.bf16.vlgmr.msra.gmra.mrb[92].mxu1 %v7552_v43 }
 0xd54   :  { %3576 = vmatpush1.bf16.msra.mxu0 %v6997_v12  ;;  %3617 = vmatpush1.bf16.msra.mxu1 %v7000_v29  ;;  %v9235_v12 = vld [vmem:[#allocation84_spill] sm:$0xff]  ;;  %v9236_v29 = vld [vmem:[#allocation85_spill] sm:$0xff] }
 0xd55   :  { %3607 = vmatprep.mubr.bf16.mxu0 %v3471_v22  ;;  %3648 = vmatprep.mubr.bf16.mxu1 %v3471_v22  ;;  %v9260_v22 = vld [vmem:[#allocation119_spill] sm:$0xff] }
 0xd56   :  { %3577 = vmatprep.subr.bf16.mxu0 %v7003_v34  ;;  %3618 = vmatprep.subr.bf16.mxu1 %v7006_v23  ;;  %v9237_v34 = vld [vmem:[#allocation86_spill] sm:$0xff]  ;;  %v9238_v23 = vld [vmem:[#allocation87_spill] sm:$0xff] }
 0xd58   :  { %3578 = vmatpush1.bf16.msra.mxu0 %v7294_v11  ;;  %3619 = vmatpush1.bf16.msra.mxu1 %v7297_v47 }
 0xd59   :  { %3579 = vmatprep.subr.bf16.mxu0 %v7300_v9  ;;  %3620 = vmatprep.subr.bf16.mxu1 %v7303_v33 }
 0xd5c   :  { %3580 = vmatpush1.bf16.msra.mxu0 %v7306_v42  ;;  %3621 = vmatpush1.bf16.msra.mxu1 %v7309_v20 }
 0xd5d   :  { %3581 = vmatprep.subr.bf16.mxu0 %v7312_v49  ;;  %3622 = vmatprep.subr.bf16.mxu1 %v7315_v5 }
 0xd60   :  { %3582 = vmatpush1.bf16.msra.mxu0 %v7318_v62  ;;  %3623 = vmatpush1.bf16.msra.mxu1 %v7321_v7 }
 0xd61   :  { %3583 = vmatprep.subr.bf16.mxu0 %v7324_v40  ;;  %3624 = vmatprep.subr.bf16.mxu1 %v7327_v4 }
 0xd64   :  { %3584 = vmatpush1.bf16.msra.mxu0 %v7330_v27  ;;  %3625 = vmatpush1.bf16.msra.mxu1 %v7333_v3 }
 0xd65   :  { %3585 = vmatprep.subr.bf16.mxu0 %v7336_v54  ;;  %3626 = vmatprep.subr.bf16.mxu1 %v7339_v21 }
 0xd68   :  { %3586 = vmatpush1.bf16.msra.mxu0 %v7342_v41  ;;  %3627 = vmatpush1.bf16.msra.mxu1 %v9235_v12 }
 0xd69   :  { %3587 = vmatprep.subr.bf16.mxu0 %v9236_v29  ;;  %3628 = vmatprep.subr.bf16.mxu1 %v9237_v34 }
 0xd6c   :  { %3588 = vmatpush1.bf16.msra.mxu0 %v9238_v23  ;;  %3629 = vmatpush1.bf16.msra.mxu1 %v9239_v56 }
 0xd6d   :  { %3589 = vmatprep.subr.bf16.mxu0 %v9240_v31  ;;  %3630 = vmatprep.subr.bf16.mxu1 %v9241_v57 }
 0xd70   :  { %3590 = vmatpush1.bf16.msra.mxu0 %v9242_v48  ;;  %3631 = vmatpush1.bf16.msra.mxu1 %v9243_v17 }
 0xd71   :  { %3591 = vmatprep.subr.bf16.mxu0 %v9244_v26  ;;  %3632 = vmatprep.subr.bf16.mxu1 %v9245_v1 }
 0xd74   :  { %3592 = vmatpush1.bf16.msra.mxu0 %v9246_v52  ;;  %3633 = vmatpush1.bf16.msra.mxu1 %v9247_v58 }
 0xd75   :  { %3593 = vmatprep.subr.bf16.mxu0 %v9248_v8  ;;  %3634 = vmatprep.subr.bf16.mxu1 %v9249_v45 }
 0xd78   :  { %3594 = vmatpush1.bf16.msra.mxu0 %v9250_v61  ;;  %3635 = vmatpush1.bf16.msra.mxu1 %v9251_v10  ;;  %v9262_v10 = vld [vmem:[#allocation121_spill] sm:$0xff] }
 0xd79   :  { %3595 = vmatprep.subr.bf16.mxu0 %v9252_v2  ;;  %3636 = vmatprep.subr.bf16.mxu1 %v9253_v53  ;;  %v9263_v2 = vld [vmem:[#allocation122_spill] sm:$0xff]  ;;  %v9264_v53 = vld [vmem:[#allocation123_spill] sm:$0xff] }
 0xd7c   :  { %3596 = vmatpush1.bf16.msra.mxu0 %v9254_v6  ;;  %3637 = vmatpush1.bf16.msra.mxu1 %v9255_v0  ;;  %v9265_v6 = vld [vmem:[#allocation124_spill] sm:$0xff]  ;;  %v9266_v0 = vld [vmem:[#allocation125_spill] sm:$0xff] }
 0xd7d   :  { %3597 = vmatprep.subr.bf16.mxu0 %v9256_v44  ;;  %3638 = vmatprep.subr.bf16.mxu1 %v9257_v13  ;;  %v9267_v44 = vld [vmem:[#allocation126_spill] sm:$0xff]  ;;  %v9268_v13 = vld [vmem:[#allocation127_spill] sm:$0xff] }
 0xd80   :  { %3598 = vmatpush1.bf16.msra.mxu0 %v9258_v25  ;;  %3639 = vmatpush1.bf16.msra.mxu1 %v9259_v46  ;;  %v9269_v25 = vld [vmem:[#allocation128_spill] sm:$0xff] }
 0xd81   :  { %3599 = vmatprep.subr.bf16.mxu0 %v9260_v22  ;;  %3640 = vmatprep.subr.bf16.mxu1 %v9261_v51 }
 0xd84   :  { %3600 = vmatpush1.bf16.msra.mxu0 %v9262_v10  ;;  %3641 = vmatpush1.bf16.msra.mxu1 %v9263_v2 }
 0xd85   :  { %3601 = vmatprep.subr.bf16.mxu0 %v9264_v53  ;;  %3642 = vmatprep.subr.bf16.mxu1 %v9265_v6 }
 0xd88   :  { %3602 = vmatpush1.bf16.msra.mxu0 %v9266_v0  ;;  %3643 = vmatpush1.bf16.msra.mxu1 %v9267_v44 }
 0xd89   :  { %3603 = vmatprep.subr.bf16.mxu0 %v9268_v13  ;;  %3644 = vmatprep.subr.bf16.mxu1 %v9269_v25 }
 0xd8c   :  { %3604 = vmatpush1.bf16.msra.mxu0 %v7450_v24  ;;  %3645 = vmatpush1.bf16.msra.mxu1 %v7453_v28 }
 0xd8d   :  { %3605 = vmatprep.subr.bf16.mxu0 %v7456_v50  ;;  %3646 = vmatprep.subr.bf16.mxu1 %v7459_v36  ;;  %v9325_v36 = vld [vmem:[#allocation56_spill] sm:$0xff] }
 0xd8e   :  { %v9326_v50 = vld [vmem:[#allocation64_spill] sm:$0xff] }
 0xd90   :  { %3606 = vmatpush1.bf16.msra.mxu0 %v7462_v15  ;;  %3647 = vmatpush1.bf16.msra.mxu1 %v7465_v16 }
 0xd91   :  { %3736 = vmatprep.subr.bf16.mxu0 %v7067_v30  ;;  %3777 = vmatprep.subr.bf16.mxu1 %v7070_v37  ;;  %v9270_v30 = vld [vmem:[#allocation52_spill] sm:$0xff] }
 0xd92   :  { %v9271_v37 = vld [vmem:[#allocation60_spill] sm:$0xff] }
 0xd93   :  { %3608 = vmatmul.mubr.bf16.vlgmr.msra.gmra.mrb[68].mxu0 %v7552_v43  ;;  %3649 = vmatmul.mubr.bf16.vlgmr.msra.gmra.mrb[96].mxu1 %v7552_v43  ;;  %v9281_v43 = vld [vmem:[#allocation99_spill] sm:$0xff] }
 0xd94   :  { %3737 = vmatpush1.bf16.msra.mxu0 %v7075_v35  ;;  %3778 = vmatpush1.bf16.msra.mxu1 %v7078_v32  ;;  %v9272_v35 = vld [vmem:[#allocation32_spill] sm:$0xff] }
 0xd95   :  { %3738 = vmatprep.subr.bf16.mxu0 %v7081_v19  ;;  %3779 = vmatprep.subr.bf16.mxu1 %v7084_v59  ;;  %v9273_v32 = vld [vmem:[#allocation48_spill] sm:$0xff]  ;;  %v9275_v59 = vld [vmem:[#allocation93_spill] sm:$0xff] }
 0xd96   :  { %v9274_v19 = vld [vmem:[#allocation92_spill] sm:$0xff] }
 0xd98   :  { %3739 = vmatpush1.bf16.msra.mxu0 %v7087_v39  ;;  %3780 = vmatpush1.bf16.msra.mxu1 %v7090_v63  ;;  %v9276_v39 = vld [vmem:[#allocation94_spill] sm:$0xff]  ;;  %v9277_v63 = vld [vmem:[#allocation95_spill] sm:$0xff] }
 0xd99   :  { %3740 = vmatprep.subr.bf16.mxu0 %v7093_v60  ;;  %3781 = vmatprep.subr.bf16.mxu1 %v7096_v18  ;;  %v9278_v60 = vld [vmem:[#allocation96_spill] sm:$0xff]  ;;  %v9279_v18 = vld [vmem:[#allocation97_spill] sm:$0xff] }
 0xd9c   :  { %3741 = vmatpush1.bf16.msra.mxu0 %v7099_v55  ;;  %3782 = vmatpush1.bf16.msra.mxu1 %v9270_v30  ;;  %v9280_v55 = vld [vmem:[#allocation98_spill] sm:$0xff]  ;;  %v9282_v30 = vld [vmem:[#allocation100_spill] sm:$0xff] }
 0xd9d   :  { %3742 = vmatprep.subr.bf16.mxu0 %v9271_v37  ;;  %3783 = vmatprep.subr.bf16.mxu1 %v9272_v35  ;;  %v9283_v37 = vld [vmem:[#allocation101_spill] sm:$0xff]  ;;  %v9284_v35 = vld [vmem:[#allocation102_spill] sm:$0xff] }
 0xda0   :  { %3743 = vmatpush1.bf16.msra.mxu0 %v9273_v32  ;;  %3784 = vmatpush1.bf16.msra.mxu1 %v9274_v19  ;;  %v9285_v32 = vld [vmem:[#allocation103_spill] sm:$0xff]  ;;  %v9286_v19 = vld [vmem:[#allocation104_spill] sm:$0xff] }
 0xda1   :  { %3744 = vmatprep.subr.bf16.mxu0 %v9275_v59  ;;  %3785 = vmatprep.subr.bf16.mxu1 %v9276_v39  ;;  %v9287_v59 = vld [vmem:[#allocation105_spill] sm:$0xff] }
 0xda2   :  { %v9288_v39 = vld [vmem:[#allocation133_spill] sm:$0xff] }
 0xda4   :  { %3745 = vmatpush1.bf16.msra.mxu0 %v9277_v63  ;;  %3786 = vmatpush1.bf16.msra.mxu1 %v9278_v60  ;;  %v9289_v63 = vld [vmem:[#allocation136_spill] sm:$0xff]  ;;  %v9290_v60 = vld [vmem:[#allocation137_spill] sm:$0xff] }
 0xda5   :  { %3746 = vmatprep.subr.bf16.mxu0 %v9279_v18  ;;  %3787 = vmatprep.subr.bf16.mxu1 %v9280_v55  ;;  %v9291_v18 = vld [vmem:[#allocation138_spill] sm:$0xff]  ;;  %v9292_v55 = vld [vmem:[#allocation139_spill] sm:$0xff] }
 0xda8   :  { %3747 = vmatpush1.bf16.msra.mxu0 %v9281_v43  ;;  %3788 = vmatpush1.bf16.msra.mxu1 %v9282_v30  ;;  %v9293_v43 = vld [vmem:[#allocation140_spill] sm:$0xff]  ;;  %v9294_v30 = vld [vmem:[#allocation141_spill] sm:$0xff] }
 0xda9   :  { %3748 = vmatprep.subr.bf16.mxu0 %v9283_v37  ;;  %3789 = vmatprep.subr.bf16.mxu1 %v9284_v35  ;;  %v9295_v37 = vld [vmem:[#allocation142_spill] sm:$0xff]  ;;  %v9296_v35 = vld [vmem:[#allocation143_spill] sm:$0xff] }
 0xdac   :  { %3749 = vmatpush1.bf16.msra.mxu0 %v9285_v32  ;;  %3790 = vmatpush1.bf16.msra.mxu1 %v9286_v19  ;;  %v9297_v32 = vld [vmem:[#allocation144_spill] sm:$0xff]  ;;  %v9298_v19 = vld [vmem:[#allocation145_spill] sm:$0xff] }
 0xdad   :  { %3750 = vmatprep.subr.bf16.mxu0 %v9287_v59  ;;  %3791 = vmatprep.subr.bf16.mxu1 %v9288_v39  ;;  %v9299_v59 = vld [vmem:[#allocation33_spill] sm:$0xff]  ;;  %v9300_v39 = vld [vmem:[#allocation35_spill] sm:$0xff] }
 0xdb0   :  { %3751 = vmatpush1.bf16.msra.mxu0 %v9289_v63  ;;  %3792 = vmatpush1.bf16.msra.mxu1 %v9290_v60  ;;  %v9301_v63 = vld [vmem:[#allocation37_spill] sm:$0xff]  ;;  %v9302_v60 = vld [vmem:[#allocation39_spill] sm:$0xff] }
 0xdb1   :  { %3752 = vmatprep.subr.bf16.mxu0 %v9291_v18  ;;  %3793 = vmatprep.subr.bf16.mxu1 %v9292_v55  ;;  %v9303_v18 = vld [vmem:[#allocation41_spill] sm:$0xff]  ;;  %v9304_v55 = vld [vmem:[#allocation43_spill] sm:$0xff] }
 0xdb4   :  { %3753 = vmatpush1.bf16.msra.mxu0 %v9293_v43  ;;  %3794 = vmatpush1.bf16.msra.mxu1 %v9294_v30  ;;  %v9305_v43 = vld [vmem:[#allocation45_spill] sm:$0xff]  ;;  %v9306_v30 = vld [vmem:[#allocation47_spill] sm:$0xff] }
 0xdb5   :  { %3754 = vmatprep.subr.bf16.mxu0 %v9295_v37  ;;  %3795 = vmatprep.subr.bf16.mxu1 %v9296_v35  ;;  %v9307_v37 = vld [vmem:[#allocation49_spill] sm:$0xff]  ;;  %v9308_v35 = vld [vmem:[#allocation51_spill] sm:$0xff] }
 0xdb8   :  { %3755 = vmatpush1.bf16.msra.mxu0 %v9297_v32  ;;  %3796 = vmatpush1.bf16.msra.mxu1 %v9298_v19  ;;  %v9309_v32 = vld [vmem:[#allocation68_spill] sm:$0xff]  ;;  %v9310_v19 = vld [vmem:[#allocation69_spill] sm:$0xff] }
 0xdb9   :  { %3756 = vmatprep.subr.bf16.mxu0 %v9299_v59  ;;  %3797 = vmatprep.subr.bf16.mxu1 %v9300_v39  ;;  %v9311_v59 = vld [vmem:[#allocation70_spill] sm:$0xff]  ;;  %v9312_v39 = vld [vmem:[#allocation71_spill] sm:$0xff] }
 0xdbc   :  { %3757 = vmatpush1.bf16.msra.mxu0 %v9301_v63  ;;  %3798 = vmatpush1.bf16.msra.mxu1 %v9302_v60  ;;  %v9313_v63 = vld [vmem:[#allocation72_spill] sm:$0xff]  ;;  %v9314_v60 = vld [vmem:[#allocation73_spill] sm:$0xff] }
 0xdbd   :  { %3758 = vmatprep.subr.bf16.mxu0 %v9303_v18  ;;  %3799 = vmatprep.subr.bf16.mxu1 %v9304_v55  ;;  %v9315_v18 = vld [vmem:[#allocation74_spill] sm:$0xff]  ;;  %v9316_v55 = vld [vmem:[#allocation75_spill] sm:$0xff] }
 0xdc0   :  { %3759 = vmatpush1.bf16.msra.mxu0 %v9305_v43  ;;  %3800 = vmatpush1.bf16.msra.mxu1 %v9306_v30  ;;  %v9317_v43 = vld [vmem:[#allocation76_spill] sm:$0xff]  ;;  %v9318_v30 = vld [vmem:[#allocation77_spill] sm:$0xff] }
 0xdc1   :  { %3760 = vmatprep.subr.bf16.mxu0 %v9307_v37  ;;  %3801 = vmatprep.subr.bf16.mxu1 %v9308_v35  ;;  %v9319_v37 = vld [vmem:[#allocation78_spill] sm:$0xff]  ;;  %v9320_v35 = vld [vmem:[#allocation79_spill] sm:$0xff] }
 0xdc4   :  { %3761 = vmatpush1.bf16.msra.mxu0 %v9309_v32  ;;  %3802 = vmatpush1.bf16.msra.mxu1 %v9310_v19  ;;  %v9321_v32 = vld [vmem:[#allocation80_spill] sm:$0xff]  ;;  %v9322_v19 = vld [vmem:[#allocation81_spill] sm:$0xff] }
 0xdc5   :  { %3762 = vmatprep.subr.bf16.mxu0 %v9311_v59  ;;  %3803 = vmatprep.subr.bf16.mxu1 %v9312_v39  ;;  %v9323_v59 = vld [vmem:[#allocation82_spill] sm:$0xff]  ;;  %v9324_v39 = vld [vmem:[#allocation83_spill] sm:$0xff] }
 0xdc8   :  { %3763 = vmatpush1.bf16.msra.mxu0 %v9313_v63  ;;  %3804 = vmatpush1.bf16.msra.mxu1 %v9314_v60 }
 0xdc9   :  { %3764 = vmatprep.subr.bf16.mxu0 %v9315_v18  ;;  %3805 = vmatprep.subr.bf16.mxu1 %v9316_v55 }
 0xdcc   :  { %3765 = vmatpush1.bf16.msra.mxu0 %v9317_v43  ;;  %3806 = vmatpush1.bf16.msra.mxu1 %v9318_v30 }
 0xdcd   :  { %3766 = vmatprep.subr.bf16.mxu0 %v9319_v37  ;;  %3807 = vmatprep.subr.bf16.mxu1 %v9320_v35  ;;  %v3485_v37 = vunpack.c.l.bf16 %v9325_v36  ;;  %v3487_v35 = vunpack.c.l.bf16 %v9326_v50 }
 0xdd0   :  { %3767 = vmatpush1.bf16.msra.mxu0 %v9321_v32  ;;  %3808 = vmatpush1.bf16.msra.mxu1 %v9322_v19  ;;  %v3486_v32 = vunpack.c.h.bf16 %v9325_v36  ;;  %v3488_v19 = vunpack.c.h.bf16 %v9326_v50  ;;  %v9327_v50 = vld [vmem:[#allocation40_spill] sm:$0xff] }
 0xdd1   :  { %3818 = vmatprep.subr.bf16.mxu0 %v9323_v59  ;;  %3859 = vmatprep.subr.bf16.mxu1 %v9324_v39 }
 0xe26   :  { %v3527_v63 = vpop.f32.mrb[64].mxu0  ;;  %v3568_v60 = vpop.f32.mrb[92].mxu1 }
 0xe27   :  { %v3529_v18 = vpop.f32.mrb[65].mxu0  ;;  %v3570_v55 = vpop.f32.mrb[93].mxu1  ;;  %v3657_v28 = vadd.f32 %v3527_v63, %v3485_v37  ;;  %v3659_v59 = vadd.f32 %v3568_v60, %v3487_v35  ;;  %v3489_v63 = vunpack.c.l.bf16 %v9327_v50  ;;  %v9328_v60 = vld [vmem:[#allocation28_spill] sm:$0xff] }
 0xe28   :  { %v3531_v16 = vpop.f32.mrb[66].mxu0  ;;  %v3572_v43 = vpop.f32.mrb[94].mxu1  ;;  %v3658_v24 = vadd.f32 %v3529_v18, %v3486_v32  ;;  %v3660_v39 = vadd.f32 %v3570_v55, %v3488_v19  ;;  %v3491_v18 = vunpack.c.l.bf16 %v9328_v60 }
 0xe29   :  { %v3532_v15 = vpop.f32.mrb[67].mxu0  ;;  %v3573_v30 = vpop.f32.mrb[95].mxu1  ;;  %v4663_v25 = vmul.f32 -1.442695, %v3657_v28  ;;  %v4665_v13 = vmul.f32 -1.442695, %v3659_v59  ;;  %v3490_v28 = vunpack.c.h.bf16 %v9327_v50 }
 0xe2a   :  { %v4664_v44 = vmul.f32 -1.442695, %v3658_v24  ;;  %v4666_v0 = vmul.f32 -1.442695, %v3660_v39  ;;  %v3492_v24 = vunpack.c.h.bf16 %v9328_v60 }
 0xe2b   :  { %5061 = vpow2.f32 %v4663_v25 }
 0xe2c   :  { %5063 = vpow2.f32 %v4665_v13 }
 0xe2d   :  { %5065 = vpow2.f32 %v4664_v44 }
 0xe2e   :  { %5067 = vpow2.f32 %v4666_v0 }
 0xe35   :  { %v5062_v15 = vpop.eup %5061 }
 0xe36   :  { %v5064_v16 = vpop.eup %5063  ;;  %v3671_v6 = vadd.f32 1.0, %v5062_v15 }
 0xe37   :  { %v5066_v43 = vpop.eup %5065  ;;  %v3683_v36 = vadd.f32 1.0, %v5064_v16 }
 0xe38   :  { %v5068_v30 = vpop.eup %5067  ;;  %v3672_v53 = vadd.f32 1.0, %v5066_v43  ;;  %5069 = vrcp.f32 %v3671_v6 }
 0xe39   :  { %v3684_v55 = vadd.f32 1.0, %v5068_v30  ;;  %5071 = vrcp.f32 %v3683_v36 }
 0xe3a   :  { %5073 = vrcp.f32 %v3672_v53 }
 0xe3b   :  { %5075 = vrcp.f32 %v3684_v55 }
 0xe42   :  { %v5070_v6 = vpop.eup %5069 }
 0xe43   :  { %v5072_v36 = vpop.eup %5071 }
 0xe44   :  { %v5074_v53 = vpop.eup %5073 }
 0xe45   :  { %v5076_v50 = vpop.eup %5075 }
 0xe66   :  { %v3609_v44 = vpop.f32.mrb[68].mxu0  ;;  %v3650_v0 = vpop.f32.mrb[96].mxu1 }
 0xe67   :  { %v3661_v13 = vadd.f32 %v3609_v44, %v3489_v63  ;;  %v3663_v25 = vadd.f32 %v3650_v0, %v3491_v18  ;;  %v3611_v37 = vpop.f32.mrb[69].mxu0  ;;  %v3652_v35 = vpop.f32.mrb[97].mxu1  ;;  %v3703_v18 = vmul.f32 %v5072_v36, %v7546_v14  ;;  %v7718_v36 = vld [vmem:[#allocation4 + $0x68] sm:$0xff] }
 0xe68   :  { %v3662_v32 = vadd.f32 %v3611_v37, %v3490_v28  ;;  %v3664_v19 = vadd.f32 %v3652_v35, %v3492_v24  ;;  %v3613_v59 = vpop.f32.mrb[70].mxu0  ;;  %v3654_v39 = vpop.f32.mrb[98].mxu1  ;;  %v3704_v24 = vmul.f32 %v5076_v50, %v7548_v38  ;;  %v7838_v50 = vld [vmem:[#allocation4 + $0x100] sm:$0xff] }
 0xe69   :  { %5077 = vtanh.f32 %v3661_v13  ;;  %v4667_v15 = vmul.f32 -1.442695, %v3663_v25  ;;  %v3614_v16 = vpop.f32.mrb[71].mxu0  ;;  %v3655_v43 = vpop.f32.mrb[99].mxu1 }
 0xe6a   :  { %5079 = vtanh.f32 %v3662_v32  ;;  %v4668_v30 = vmul.f32 -1.442695, %v3664_v19 }
 0xe6b   :  { %5081 = vpow2.f32 %v4667_v15 }
 0xe6c   :  { %5083 = vpow2.f32 %v4668_v30  ;;  %v7712_v30 = vld [vmem:[#allocation4 + $0x20] sm:$0xff] }
 0xe73   :  { %v5078_v63 = vpop.eup %5077 }
 0xe74   :  { %v5080_v60 = vpop.eup %5079  ;;  %v3705_v55 = vmul.f32 %v5078_v63, %v5070_v6  ;;  %v7715_v6 = vld [vmem:[#allocation4 + $0x30] sm:$0xff] }
 0xe75   :  { %v5082_v28 = vpop.eup %5081  ;;  %v3706_v44 = vmul.f32 %v5080_v60, %v5074_v53  ;;  %v7721_v53 = vld [vmem:[#allocation4 + $0x78] sm:$0xff]  ;;  %v7841_v63 = vld [vmem:[#allocation4 + $0x110] sm:$0xff]  ;;  %v7844_v60 = vld [vmem:[#allocation4 + $0x148] sm:$0xff] }
 0xe76   :  { %v5084_v0 = vpop.eup %5083  ;;  %v7699_v13 = vadd.f32 %v3705_v55, %v3703_v18  ;;  %v3697_v25 = vadd.f32 1.0, %v5082_v28  ;;  %v7847_v18 = vld [vmem:[#allocation4 + $0x158] sm:$0xff]  ;;  %v7850_v55 = vld [vmem:[#allocation4 + $0x140] sm:$0xff]  ;;  %v7853_v28 = vld [vmem:[#allocation4 + $0x150] sm:$0xff] }
 0xe77   :  { %v7701_v37 = vadd.f32 %v3706_v44, %v3704_v24  ;;  %v3698_v35 = vadd.f32 1.0, %v5084_v0  ;;  %v7856_v24 = vld [vmem:[#allocation4 + $0x188] sm:$0xff]  ;;  %v7859_v44 = vld [vmem:[#allocation4 + $0x198] sm:$0xff]  ;;  %v7862_v0 = vld [vmem:[#allocation4 + $0x180] sm:$0xff] }
 0xe78   :  { %5085 = vtanh.f32 %v7699_v13 }
 0xe79   :  { %5087 = vrcp.f32 %v3697_v25  ;;  %v7865_v25 = vld [vmem:[#allocation4 + $0x190] sm:$0xff] }
 0xe7a   :  { %5089 = vtanh.f32 %v7701_v37 }
 0xe7b   :  { %5091 = vrcp.f32 %v3698_v35  ;;  %v7868_v35 = vld [vmem:[#allocation4 + $0x1c8] sm:$0xff] }
 0xe82   :  { %v5086_v32 = vpop.eup %5085 }
 0xe83   :  { %v5088_v14 = vpop.eup %5087 }
 0xe84   :  { %v5090_v19 = vpop.eup %5089  ;;  %v3711_v59 = vmul.f32 %v5088_v14, %v5086_v32  ;;  %v7871_v32 = vld [vmem:[#allocation4 + $0x1d8] sm:$0xff]  ;;  %v7874_v14 = vld [vmem:[#allocation4 + $0x1c0] sm:$0xff] }
 0xe85   :  { %v5092_v39 = vpop.eup %5091 }
 0xe86   :  { %v3712_v38 = vmul.f32 %v5092_v39, %v5090_v19  ;;  %v7705_v43 = vpack.c.bf16 %v3711_v59, %v3711_v59  ;;  %v7877_v19 = vld [vmem:[#allocation4 + $0x1d0] sm:$0xff]  ;;  %v7883_v39 = vld [vmem:[#allocation4 + $0x218] sm:$0xff] }
 0xe88   :  { %v3714_v15 = vpack.c.bf16 %v3712_v38, %v3712_v38  ;;  %v4734_v16 = vpack.c.bf16 %v3712_v38, %v3711_v59  ;;  %v7880_v59 = vld [vmem:[#allocation4 + $0x208] sm:$0xff]  ;;  %v7886_v38 = vld [vmem:[#allocation4 + $0x200] sm:$0xff] }
 0xe89   :  { %9349 = vst [vmem:[#allocation54_spill] sm:$0xff] %v7886_v38 }
 0xe8a   :  { %3768 = vmatprep.mubr.bf16.mxu0 %v3714_v15  ;;  %3809 = vmatprep.mubr.bf16.mxu1 %v3714_v15  ;;  %4670 = vst [vmem:[%s8375_s12 + $0x20] sm:$0xff] %v4734_v16  ;;  %v7892_v16 = vld [vmem:[#allocation4 + $0x248] sm:$0xff] }
 0xe8b   :  { %3769 = vmatmul.mubr.bf16.vlgmr.msra.gmra.mrb[72].mxu0 %v7705_v43  ;;  %3810 = vmatmul.mubr.bf16.vlgmr.msra.gmra.mrb[100].mxu1 %v7705_v43  ;;  %9351 = vst [vmem:[#allocation36_spill] sm:$0xff] %v7892_v16 }
 0xe8c   :  { %3819 = vmatpush1.bf16.msra.mxu0 %v7712_v30  ;;  %3860 = vmatpush1.bf16.msra.mxu1 %v7715_v6 }
 0xe8d   :  { %3850 = vmatprep.mubr.bf16.mxu0 %v3714_v15  ;;  %3891 = vmatprep.mubr.bf16.mxu1 %v3714_v15  ;;  %v7889_v15 = vld [vmem:[#allocation4 + $0x210] sm:$0xff] }
 0xe8e   :  { %3820 = vmatprep.subr.bf16.mxu0 %v7718_v36  ;;  %3861 = vmatprep.subr.bf16.mxu1 %v7721_v53  ;;  %9350 = vst [vmem:[#allocation62_spill] sm:$0xff] %v7889_v15 }
 0xe90   :  { %3821 = vmatpush1.bf16.msra.mxu0 %v7294_v11  ;;  %3862 = vmatpush1.bf16.msra.mxu1 %v7297_v47  ;;  %v9329_v11 = vld [vmem:[#allocation110_spill] sm:$0xff]  ;;  %v9330_v47 = vld [vmem:[#allocation111_spill] sm:$0xff] }
 0xe91   :  { %3822 = vmatprep.subr.bf16.mxu0 %v7300_v9  ;;  %3863 = vmatprep.subr.bf16.mxu1 %v7303_v33  ;;  %v9331_v9 = vld [vmem:[#allocation112_spill] sm:$0xff]  ;;  %v9332_v33 = vld [vmem:[#allocation113_spill] sm:$0xff] }
 0xe94   :  { %3823 = vmatpush1.bf16.msra.mxu0 %v7306_v42  ;;  %3864 = vmatpush1.bf16.msra.mxu1 %v7309_v20  ;;  %v9333_v42 = vld [vmem:[#allocation114_spill] sm:$0xff]  ;;  %v9334_v20 = vld [vmem:[#allocation115_spill] sm:$0xff] }
 0xe95   :  { %3824 = vmatprep.subr.bf16.mxu0 %v7312_v49  ;;  %3865 = vmatprep.subr.bf16.mxu1 %v7315_v5  ;;  %v9335_v49 = vld [vmem:[#allocation116_spill] sm:$0xff]  ;;  %v9336_v5 = vld [vmem:[#allocation117_spill] sm:$0xff] }
 0xe98   :  { %3825 = vmatpush1.bf16.msra.mxu0 %v7318_v62  ;;  %3866 = vmatpush1.bf16.msra.mxu1 %v7321_v7  ;;  %v9337_v62 = vld [vmem:[#allocation123_spill] sm:$0xff]  ;;  %v9338_v7 = vld [vmem:[#allocation124_spill] sm:$0xff] }
 0xe99   :  { %3826 = vmatprep.subr.bf16.mxu0 %v7324_v40  ;;  %3867 = vmatprep.subr.bf16.mxu1 %v7327_v4  ;;  %v9339_v40 = vld [vmem:[#allocation125_spill] sm:$0xff]  ;;  %v9340_v4 = vld [vmem:[#allocation126_spill] sm:$0xff] }
 0xe9c   :  { %3827 = vmatpush1.bf16.msra.mxu0 %v7330_v27  ;;  %3868 = vmatpush1.bf16.msra.mxu1 %v7333_v3  ;;  %v9341_v27 = vld [vmem:[#allocation127_spill] sm:$0xff]  ;;  %v9342_v3 = vld [vmem:[#allocation128_spill] sm:$0xff] }
 0xe9d   :  { %3828 = vmatprep.subr.bf16.mxu0 %v7336_v54  ;;  %3869 = vmatprep.subr.bf16.mxu1 %v7339_v21  ;;  %v9343_v54 = vld [vmem:[#allocation129_spill] sm:$0xff]  ;;  %v9344_v21 = vld [vmem:[#allocation130_spill] sm:$0xff] }
 0xea0   :  { %3829 = vmatpush1.bf16.msra.mxu0 %v7342_v41  ;;  %3870 = vmatpush1.bf16.msra.mxu1 %v9235_v12  ;;  %v9345_v41 = vld [vmem:[#allocation131_spill] sm:$0xff]  ;;  %v9346_v12 = vld [vmem:[#allocation132_spill] sm:$0xff] }
 0xea1   :  { %3830 = vmatprep.subr.bf16.mxu0 %v9236_v29  ;;  %3871 = vmatprep.subr.bf16.mxu1 %v9237_v34  ;;  %v9347_v29 = vld [vmem:[#allocation134_spill] sm:$0xff]  ;;  %v9348_v34 = vld [vmem:[#allocation135_spill] sm:$0xff] }
 0xea4   :  { %3831 = vmatpush1.bf16.msra.mxu0 %v9238_v23  ;;  %3872 = vmatpush1.bf16.msra.mxu1 %v9239_v56  ;;  %v7782_v23 = vld [vmem:[#allocation4 + $0x8] sm:$0xff]  ;;  %v7785_v56 = vld [vmem:[#allocation4 + $0x18] sm:$0xff] }
 0xea5   :  { %3832 = vmatprep.subr.bf16.mxu0 %v9240_v31  ;;  %3873 = vmatprep.subr.bf16.mxu1 %v9241_v57  ;;  %v7790_v31 = vld [vmem:[#allocation4] sm:$0xff]  ;;  %v7793_v57 = vld [vmem:[#allocation4 + $0x10] sm:$0xff] }
 0xea8   :  { %3833 = vmatpush1.bf16.msra.mxu0 %v9242_v48  ;;  %3874 = vmatpush1.bf16.msra.mxu1 %v9243_v17  ;;  %v7796_v48 = vld [vmem:[#allocation4 + $0x48] sm:$0xff]  ;;  %v7799_v17 = vld [vmem:[#allocation4 + $0x58] sm:$0xff] }
 0xea9   :  { %3834 = vmatprep.subr.bf16.mxu0 %v9244_v26  ;;  %3875 = vmatprep.subr.bf16.mxu1 %v9245_v1  ;;  %v7802_v26 = vld [vmem:[#allocation4 + $0x40] sm:$0xff]  ;;  %v7805_v1 = vld [vmem:[#allocation4 + $0x50] sm:$0xff] }
 0xeac   :  { %3835 = vmatpush1.bf16.msra.mxu0 %v9246_v52  ;;  %3876 = vmatpush1.bf16.msra.mxu1 %v9247_v58  ;;  %v7808_v52 = vld [vmem:[#allocation4 + $0x88] sm:$0xff]  ;;  %v7811_v58 = vld [vmem:[#allocation4 + $0x98] sm:$0xff] }
 0xead   :  { %3836 = vmatprep.subr.bf16.mxu0 %v9248_v8  ;;  %3877 = vmatprep.subr.bf16.mxu1 %v9249_v45  ;;  %v7814_v8 = vld [vmem:[#allocation4 + $0x80] sm:$0xff]  ;;  %v7817_v45 = vld [vmem:[#allocation4 + $0x90] sm:$0xff] }
 0xeb0   :  { %3837 = vmatpush1.bf16.msra.mxu0 %v9250_v61  ;;  %3878 = vmatpush1.bf16.msra.mxu1 %v9329_v11  ;;  %v7820_v61 = vld [vmem:[#allocation4 + $0xc8] sm:$0xff]  ;;  %v7898_v11 = vld [vmem:[#allocation4 + $0x240] sm:$0xff] }
 0xeb1   :  { %3838 = vmatprep.subr.bf16.mxu0 %v9330_v47  ;;  %3879 = vmatprep.subr.bf16.mxu1 %v9331_v9  ;;  %9353 = vst [vmem:[#allocation55_spill] sm:$0xff] %v7898_v11  ;;  %v7901_v47 = vld [vmem:[#allocation4 + $0x250] sm:$0xff]  ;;  %v7904_v9 = vld [vmem:[#allocation4 + $0x288] sm:$0xff] }
 0xeb2   :  { %9354 = vst [vmem:[#allocation63_spill] sm:$0xff] %v7901_v47  ;;  %9355 = vst [vmem:[#allocation38_spill] sm:$0xff] %v7904_v9 }
 0xeb4   :  { %3839 = vmatpush1.bf16.msra.mxu0 %v9332_v33  ;;  %3880 = vmatpush1.bf16.msra.mxu1 %v9333_v42  ;;  %v7907_v33 = vld [vmem:[#allocation4 + $0x298] sm:$0xff]  ;;  %v7910_v42 = vld [vmem:[#allocation4 + $0x280] sm:$0xff] }
 0xeb5   :  { %3840 = vmatprep.subr.bf16.mxu0 %v9334_v20  ;;  %3881 = vmatprep.subr.bf16.mxu1 %v9335_v49  ;;  %9356 = vst [vmem:[#allocation27_spill] sm:$0xff] %v7907_v33  ;;  %9357 = vst [vmem:[#allocation84_spill] sm:$0xff] %v7910_v42  ;;  %v7913_v20 = vld [vmem:[#allocation4 + $0x290] sm:$0xff]  ;;  %v7916_v49 = vld [vmem:[#allocation4 + $0x2c8] sm:$0xff] }
 0xeb6   :  { %9358 = vst [vmem:[#allocation85_spill] sm:$0xff] %v7913_v20  ;;  %9359 = vst [vmem:[#allocation86_spill] sm:$0xff] %v7916_v49 }
 0xeb8   :  { %3841 = vmatpush1.bf16.msra.mxu0 %v9336_v5  ;;  %3882 = vmatpush1.bf16.msra.mxu1 %v9259_v46  ;;  %v7829_v46 = vld [vmem:[#allocation4 + $0xd0] sm:$0xff]  ;;  %v7919_v5 = vld [vmem:[#allocation4 + $0x2d8] sm:$0xff] }
 0xeb9   :  { %3842 = vmatprep.subr.bf16.mxu0 %v9260_v22  ;;  %3883 = vmatprep.subr.bf16.mxu1 %v9261_v51  ;;  %v7832_v22 = vld [vmem:[#allocation4 + $0x108] sm:$0xff]  ;;  %v7835_v51 = vld [vmem:[#allocation4 + $0x118] sm:$0xff]  ;;  %9360 = vst [vmem:[#allocation87_spill] sm:$0xff] %v7919_v5 }
 0xebc   :  { %3843 = vmatpush1.bf16.msra.mxu0 %v9262_v10  ;;  %3884 = vmatpush1.bf16.msra.mxu1 %v9263_v2  ;;  %v7823_v10 = vld [vmem:[#allocation4 + $0xd8] sm:$0xff]  ;;  %v7826_v2 = vld [vmem:[#allocation4 + $0xc0] sm:$0xff] }
 0xebd   :  { %3844 = vmatprep.subr.bf16.mxu0 %v9337_v62  ;;  %3885 = vmatprep.subr.bf16.mxu1 %v9338_v7  ;;  %v7922_v62 = vld [vmem:[#allocation4 + $0x2c0] sm:$0xff]  ;;  %v7925_v7 = vld [vmem:[#allocation4 + $0x2d0] sm:$0xff] }
 0xebe   :  { %9361 = vst [vmem:[#allocation88_spill] sm:$0xff] %v7922_v62  ;;  %9362 = vst [vmem:[#allocation89_spill] sm:$0xff] %v7925_v7 }
 0xec0   :  { %3845 = vmatpush1.bf16.msra.mxu0 %v9339_v40  ;;  %3886 = vmatpush1.bf16.msra.mxu1 %v9340_v4  ;;  %v7928_v40 = vld [vmem:[#allocation4 + $0x308] sm:$0xff]  ;;  %v7931_v4 = vld [vmem:[#allocation4 + $0x318] sm:$0xff] }
 0xec1   :  { %3846 = vmatprep.subr.bf16.mxu0 %v9341_v27  ;;  %3887 = vmatprep.subr.bf16.mxu1 %v9342_v3  ;;  %9363 = vst [vmem:[#allocation90_spill] sm:$0xff] %v7928_v40  ;;  %9364 = vst [vmem:[#allocation91_spill] sm:$0xff] %v7931_v4  ;;  %v7934_v27 = vld [vmem:[#allocation4 + $0x300] sm:$0xff]  ;;  %v7937_v3 = vld [vmem:[#allocation4 + $0x310] sm:$0xff] }
 0xec2   :  { %9365 = vst [vmem:[#allocation53_spill] sm:$0xff] %v7934_v27  ;;  %9366 = vst [vmem:[#allocation61_spill] sm:$0xff] %v7937_v3 }
 0xec4   :  { %3847 = vmatpush1.bf16.msra.mxu0 %v9343_v54  ;;  %3888 = vmatpush1.bf16.msra.mxu1 %v9344_v21  ;;  %v7940_v54 = vld [vmem:[#allocation4 + $0x348] sm:$0xff]  ;;  %v7943_v21 = vld [vmem:[#allocation4 + $0x358] sm:$0xff] }
 0xec5   :  { %3848 = vmatprep.subr.bf16.mxu0 %v9345_v41  ;;  %3889 = vmatprep.subr.bf16.mxu1 %v9346_v12  ;;  %9367 = vst [vmem:[#allocation34_spill] sm:$0xff] %v7940_v54  ;;  %9368 = vst [vmem:[#allocation50_spill] sm:$0xff] %v7943_v21  ;;  %v7946_v41 = vld [vmem:[#allocation4 + $0x340] sm:$0xff]  ;;  %v7949_v12 = vld [vmem:[#allocation4 + $0x350] sm:$0xff] }
 0xec6   :  { %9369 = vst [vmem:[#allocation106_spill] sm:$0xff] %v7946_v41  ;;  %9370 = vst [vmem:[#allocation107_spill] sm:$0xff] %v7949_v12 }
 0xec8   :  { %3849 = vmatpush1.bf16.msra.mxu0 %v9347_v29  ;;  %3890 = vmatpush1.bf16.msra.mxu1 %v9348_v34  ;;  %v7952_v29 = vld [vmem:[#allocation4 + $0x388] sm:$0xff]  ;;  %v7955_v34 = vld [vmem:[#allocation4 + $0x398] sm:$0xff] }
 0xec9   :  { %3979 = vmatprep.subr.bf16.mxu0 %v7782_v23  ;;  %4020 = vmatprep.subr.bf16.mxu1 %v7785_v56  ;;  %9371 = vst [vmem:[#allocation108_spill] sm:$0xff] %v7952_v29  ;;  %9372 = vst [vmem:[#allocation109_spill] sm:$0xff] %v7955_v34 }
 0xecb   :  { %3851 = vmatmul.mubr.bf16.vlgmr.msra.gmra.mrb[76].mxu0 %v7705_v43  ;;  %3892 = vmatmul.mubr.bf16.vlgmr.msra.gmra.mrb[104].mxu1 %v7705_v43  ;;  %v7895_v43 = vld [vmem:[#allocation4 + $0x258] sm:$0xff] }
 0xecc   :  { %3980 = vmatpush1.bf16.msra.mxu0 %v7790_v31  ;;  %4021 = vmatpush1.bf16.msra.mxu1 %v7793_v57  ;;  %9352 = vst [vmem:[#allocation26_spill] sm:$0xff] %v7895_v43 }
 0xecd   :  { %3981 = vmatprep.subr.bf16.mxu0 %v7796_v48  ;;  %4022 = vmatprep.subr.bf16.mxu1 %v7799_v17 }
 0xed0   :  { %3982 = vmatpush1.bf16.msra.mxu0 %v7802_v26  ;;  %4023 = vmatpush1.bf16.msra.mxu1 %v7805_v1 }
 0xed1   :  { %3983 = vmatprep.subr.bf16.mxu0 %v7808_v52  ;;  %4024 = vmatprep.subr.bf16.mxu1 %v7811_v58 }
 0xed4   :  { %3984 = vmatpush1.bf16.msra.mxu0 %v7814_v8  ;;  %4025 = vmatpush1.bf16.msra.mxu1 %v7817_v45 }
 0xed5   :  { %3985 = vmatprep.subr.bf16.mxu0 %v7820_v61  ;;  %4026 = vmatprep.subr.bf16.mxu1 %v7823_v10 }
 0xed8   :  { %3986 = vmatpush1.bf16.msra.mxu0 %v7826_v2  ;;  %4027 = vmatpush1.bf16.msra.mxu1 %v7829_v46 }
 0xed9   :  { %3987 = vmatprep.subr.bf16.mxu0 %v7832_v22  ;;  %4028 = vmatprep.subr.bf16.mxu1 %v7835_v51 }
 0xedc   :  { %3988 = vmatpush1.bf16.msra.mxu0 %v7838_v50  ;;  %4029 = vmatpush1.bf16.msra.mxu1 %v7841_v63 }
 0xedd   :  { %3989 = vmatprep.subr.bf16.mxu0 %v7844_v60  ;;  %4030 = vmatprep.subr.bf16.mxu1 %v7847_v18 }
 0xee0   :  { %3990 = vmatpush1.bf16.msra.mxu0 %v7850_v55  ;;  %4031 = vmatpush1.bf16.msra.mxu1 %v7853_v28 }
 0xee1   :  { %3991 = vmatprep.subr.bf16.mxu0 %v7856_v24  ;;  %4032 = vmatprep.subr.bf16.mxu1 %v7859_v44 }
 0xee4   :  { %3992 = vmatpush1.bf16.msra.mxu0 %v7862_v0  ;;  %4033 = vmatpush1.bf16.msra.mxu1 %v7865_v25 }
 0xee5   :  { %3993 = vmatprep.subr.bf16.mxu0 %v7868_v35  ;;  %4034 = vmatprep.subr.bf16.mxu1 %v7871_v32 }
 0xee8   :  { %3994 = vmatpush1.bf16.msra.mxu0 %v7874_v14  ;;  %4035 = vmatpush1.bf16.msra.mxu1 %v7877_v19 }
 0xee9   :  { %3995 = vmatprep.subr.bf16.mxu0 %v7880_v59  ;;  %4036 = vmatprep.subr.bf16.mxu1 %v7883_v39 }
 0xeec   :  { %3996 = vmatpush1.bf16.msra.mxu0 %v7886_v38  ;;  %4037 = vmatpush1.bf16.msra.mxu1 %v7889_v15 }
 0xeed   :  { %3997 = vmatprep.subr.bf16.mxu0 %v7892_v16  ;;  %4038 = vmatprep.subr.bf16.mxu1 %v7895_v43 }
 0xef0   :  { %3998 = vmatpush1.bf16.msra.mxu0 %v7898_v11  ;;  %4039 = vmatpush1.bf16.msra.mxu1 %v7901_v47 }
 0xef1   :  { %3999 = vmatprep.subr.bf16.mxu0 %v7904_v9  ;;  %4040 = vmatprep.subr.bf16.mxu1 %v7907_v33 }
 0xef4   :  { %4000 = vmatpush1.bf16.msra.mxu0 %v7910_v42  ;;  %4041 = vmatpush1.bf16.msra.mxu1 %v7913_v20 }
 0xef5   :  { %4001 = vmatprep.subr.bf16.mxu0 %v7916_v49  ;;  %4042 = vmatprep.subr.bf16.mxu1 %v7919_v5  ;;  %v9382_v49 = vld [vmem:[#allocation65_spill] sm:$0xff] }
 0xef8   :  { %4002 = vmatpush1.bf16.msra.mxu0 %v7922_v62  ;;  %4043 = vmatpush1.bf16.msra.mxu1 %v7925_v7  ;;  %v9381_v62 = vld [vmem:[#allocation57_spill] sm:$0xff] }
 0xef9   :  { %4003 = vmatprep.subr.bf16.mxu0 %v7928_v40  ;;  %4044 = vmatprep.subr.bf16.mxu1 %v7931_v4  ;;  %v3728_v5 = vunpack.c.l.bf16 %v9381_v62  ;;  %v3729_v20 = vunpack.c.h.bf16 %v9381_v62 }
 0xefc   :  { %4004 = vmatpush1.bf16.msra.mxu0 %v7934_v27  ;;  %4045 = vmatpush1.bf16.msra.mxu1 %v7937_v3 }
 0xefd   :  { %4005 = vmatprep.subr.bf16.mxu0 %v7940_v54  ;;  %4046 = vmatprep.subr.bf16.mxu1 %v7943_v21  ;;  %v7958_v54 = vld [vmem:[#allocation4 + $0x380] sm:$0xff]  ;;  %v7961_v21 = vld [vmem:[#allocation4 + $0x390] sm:$0xff] }
 0xefe   :  { %9373 = vst [vmem:[#allocation118_spill] sm:$0xff] %v7958_v54  ;;  %9374 = vst [vmem:[#allocation119_spill] sm:$0xff] %v7961_v21 }
 0xf00   :  { %4006 = vmatpush1.bf16.msra.mxu0 %v7946_v41  ;;  %4047 = vmatpush1.bf16.msra.mxu1 %v7949_v12  ;;  %v7964_v41 = vld [vmem:[#allocation4 + $0x3c8] sm:$0xff]  ;;  %v7967_v12 = vld [vmem:[#allocation4 + $0x3d8] sm:$0xff] }
 0xf01   :  { %4007 = vmatprep.subr.bf16.mxu0 %v7952_v29  ;;  %4048 = vmatprep.subr.bf16.mxu1 %v7955_v34  ;;  %9375 = vst [vmem:[#allocation120_spill] sm:$0xff] %v7964_v41  ;;  %9376 = vst [vmem:[#allocation121_spill] sm:$0xff] %v7967_v12  ;;  %v7970_v29 = vld [vmem:[#allocation4 + $0x3c0] sm:$0xff]  ;;  %v7973_v34 = vld [vmem:[#allocation4 + $0x3d0] sm:$0xff] }
 0xf02   :  { %9377 = vst [vmem:[#allocation122_spill] sm:$0xff] %v7970_v29  ;;  %9378 = vst [vmem:[#allocation52_spill] sm:$0xff] %v7973_v34 }
 0xf04   :  { %4008 = vmatpush1.bf16.msra.mxu0 %v7958_v54  ;;  %4049 = vmatpush1.bf16.msra.mxu1 %v7961_v21  ;;  %v7976_v54 = vld [vmem:[#allocation4 + $0x28] sm:$0xff]  ;;  %v7979_v21 = vld [vmem:[#allocation4 + $0x38] sm:$0xff] }
 0xf05   :  { %4009 = vmatprep.subr.bf16.mxu0 %v7964_v41  ;;  %4050 = vmatprep.subr.bf16.mxu1 %v7967_v12  ;;  %9379 = vst [vmem:[#allocation60_spill] sm:$0xff] %v7976_v54  ;;  %9380 = vst [vmem:[#allocation32_spill] sm:$0xff] %v7979_v21 }
 0xf08   :  { %4010 = vmatpush1.bf16.msra.mxu0 %v7970_v29  ;;  %4051 = vmatpush1.bf16.msra.mxu1 %v7973_v34  ;;  %v3730_v34 = vunpack.c.l.bf16 %v9382_v49 }
 0xf09   :  { %4061 = vmatprep.subr.bf16.mxu0 %v7976_v54  ;;  %4102 = vmatprep.subr.bf16.mxu1 %v7979_v21  ;;  %v3731_v54 = vunpack.c.h.bf16 %v9382_v49  ;;  %v9383_v49 = vld [vmem:[#allocation42_spill] sm:$0xff] }
 0xf5e   :  { %v3770_v41 = vpop.f32.mrb[72].mxu0  ;;  %v3811_v3 = vpop.f32.mrb[100].mxu1 }
 0xf5f   :  { %v3772_v27 = vpop.f32.mrb[73].mxu0  ;;  %v3813_v12 = vpop.f32.mrb[101].mxu1  ;;  %v3900_v42 = vadd.f32 %v3770_v41, %v3728_v5  ;;  %v3902_v33 = vadd.f32 %v3811_v3, %v3730_v34  ;;  %v3732_v5 = vunpack.c.l.bf16 %v9383_v49  ;;  %v9384_v3 = vld [vmem:[#allocation29_spill] sm:$0xff] }
 0xf60   :  { %v3774_v4 = vpop.f32.mrb[74].mxu0  ;;  %v3815_v40 = vpop.f32.mrb[102].mxu1  ;;  %v3901_v9 = vadd.f32 %v3772_v27, %v3729_v20  ;;  %v3903_v21 = vadd.f32 %v3813_v12, %v3731_v54  ;;  %v3734_v20 = vunpack.c.l.bf16 %v9384_v3 }
 0xf61   :  { %v3775_v7 = vpop.f32.mrb[75].mxu0  ;;  %v3816_v29 = vpop.f32.mrb[103].mxu1  ;;  %v4671_v47 = vmul.f32 -1.442695, %v3900_v42  ;;  %v4673_v11 = vmul.f32 -1.442695, %v3902_v33  ;;  %v3733_v33 = vunpack.c.h.bf16 %v9383_v49 }
 0xf62   :  { %v4672_v43 = vmul.f32 -1.442695, %v3901_v9  ;;  %v4674_v16 = vmul.f32 -1.442695, %v3903_v21  ;;  %v3735_v9 = vunpack.c.h.bf16 %v9384_v3 }
 0xf63   :  { %5093 = vpow2.f32 %v4671_v47 }
 0xf64   :  { %5095 = vpow2.f32 %v4673_v11 }
 0xf65   :  { %5097 = vpow2.f32 %v4672_v43 }
 0xf66   :  { %5099 = vpow2.f32 %v4674_v16 }
 0xf6d   :  { %v5094_v7 = vpop.eup %5093 }
 0xf6e   :  { %v5096_v40 = vpop.eup %5095  ;;  %v3914_v15 = vadd.f32 1.0, %v5094_v7 }
 0xf6f   :  { %v5098_v4 = vpop.eup %5097  ;;  %v3926_v62 = vadd.f32 1.0, %v5096_v40 }
 0xf70   :  { %v5100_v29 = vpop.eup %5099  ;;  %v3915_v38 = vadd.f32 1.0, %v5098_v4  ;;  %5101 = vrcp.f32 %v3914_v15 }
 0xf71   :  { %v3927_v27 = vadd.f32 1.0, %v5100_v29  ;;  %5103 = vrcp.f32 %v3926_v62 }
 0xf72   :  { %5105 = vrcp.f32 %v3915_v38 }
 0xf73   :  { %5107 = vrcp.f32 %v3927_v27 }
 0xf7a   :  { %v5102_v15 = vpop.eup %5101 }
 0xf7b   :  { %v5104_v62 = vpop.eup %5103 }
 0xf7c   :  { %v5106_v38 = vpop.eup %5105 }
 0xf7d   :  { %v5108_v49 = vpop.eup %5107 }
 0xf9e   :  { %v3852_v43 = vpop.f32.mrb[76].mxu0  ;;  %v3893_v16 = vpop.f32.mrb[104].mxu1 }
 0xf9f   :  { %v3904_v11 = vadd.f32 %v3852_v43, %v3732_v5  ;;  %v3906_v47 = vadd.f32 %v3893_v16, %v3734_v20  ;;  %v3854_v42 = vpop.f32.mrb[77].mxu0  ;;  %v3895_v54 = vpop.f32.mrb[105].mxu1  ;;  %v3946_v20 = vmul.f32 %v5104_v62, %v7699_v13  ;;  %v8015_v62 = vld [vmem:[#allocation4 + $0xa8] sm:$0xff] }
 0xfa0   :  { %v3905_v21 = vadd.f32 %v3854_v42, %v3733_v33  ;;  %v3907_v41 = vadd.f32 %v3895_v54, %v3735_v9  ;;  %v3856_v12 = vpop.f32.mrb[78].mxu0  ;;  %v3897_v34 = vpop.f32.mrb[106].mxu1  ;;  %v3947_v9 = vmul.f32 %v5108_v49, %v7701_v37  ;;  %v8021_v49 = vld [vmem:[#allocation4 + $0xa0] sm:$0xff] }
 0xfa1   :  { %5109 = vtanh.f32 %v3904_v11  ;;  %v4675_v7 = vmul.f32 -1.442695, %v3906_v47  ;;  %v3857_v40 = vpop.f32.mrb[79].mxu0  ;;  %v3898_v4 = vpop.f32.mrb[107].mxu1 }
 0xfa2   :  { %5111 = vtanh.f32 %v3905_v21  ;;  %v4676_v29 = vmul.f32 -1.442695, %v3907_v41 }
 0xfa3   :  { %5113 = vpow2.f32 %v4675_v7 }
 0xfa4   :  { %5115 = vpow2.f32 %v4676_v29  ;;  %v8009_v29 = vld [vmem:[#allocation4 + $0x60] sm:$0xff] }
 0xfab   :  { %v5110_v5 = vpop.eup %5109 }
 0xfac   :  { %v5112_v3 = vpop.eup %5111  ;;  %v3948_v27 = vmul.f32 %v5110_v5, %v5102_v15  ;;  %v8012_v15 = vld [vmem:[#allocation4 + $0x70] sm:$0xff] }
 0xfad   :  { %v5114_v33 = vpop.eup %5113  ;;  %v3949_v43 = vmul.f32 %v5112_v3, %v5106_v38  ;;  %v8018_v38 = vld [vmem:[#allocation4 + $0xb8] sm:$0xff]  ;;  %v8024_v5 = vld [vmem:[#allocation4 + $0xb0] sm:$0xff]  ;;  %v8027_v3 = vld [vmem:[#allocation4 + $0xe8] sm:$0xff] }
 0xfae   :  { %v5116_v16 = vpop.eup %5115  ;;  %v7992_v11 = vadd.f32 %v3948_v27, %v3946_v20  ;;  %v3940_v47 = vadd.f32 1.0, %v5114_v33  ;;  %v8030_v20 = vld [vmem:[#allocation4 + $0xf8] sm:$0xff]  ;;  %v8033_v27 = vld [vmem:[#allocation4 + $0xe0] sm:$0xff]  ;;  %v8036_v33 = vld [vmem:[#allocation4 + $0xf0] sm:$0xff] }
 0xfaf   :  { %v7994_v42 = vadd.f32 %v3949_v43, %v3947_v9  ;;  %v3941_v54 = vadd.f32 1.0, %v5116_v16  ;;  %v8039_v9 = vld [vmem:[#allocation4 + $0x128] sm:$0xff]  ;;  %v8042_v43 = vld [vmem:[#allocation4 + $0x138] sm:$0xff]  ;;  %v8045_v16 = vld [vmem:[#allocation4 + $0x120] sm:$0xff] }
 0xfb0   :  { %5117 = vtanh.f32 %v7992_v11 }
 0xfb1   :  { %5119 = vrcp.f32 %v3940_v47  ;;  %v8048_v47 = vld [vmem:[#allocation4 + $0x130] sm:$0xff] }
 0xfb2   :  { %5121 = vtanh.f32 %v7994_v42 }
 0xfb3   :  { %5123 = vrcp.f32 %v3941_v54  ;;  %v8051_v54 = vld [vmem:[#allocation4 + $0x168] sm:$0xff] }
 0xfba   :  { %v5118_v21 = vpop.eup %5117 }
 0xfbb   :  { %v5120_v13 = vpop.eup %5119 }
 0xfbc   :  { %v5122_v41 = vpop.eup %5121  ;;  %v3954_v12 = vmul.f32 %v5120_v13, %v5118_v21  ;;  %v8054_v21 = vld [vmem:[#allocation4 + $0x178] sm:$0xff]  ;;  %v8057_v13 = vld [vmem:[#allocation4 + $0x160] sm:$0xff] }
 0xfbd   :  { %v5124_v34 = vpop.eup %5123 }
 0xfbe   :  { %v3955_v37 = vmul.f32 %v5124_v34, %v5122_v41  ;;  %v7998_v4 = vpack.c.bf16 %v3954_v12, %v3954_v12  ;;  %v8060_v41 = vld [vmem:[#allocation4 + $0x170] sm:$0xff]  ;;  %v8066_v34 = vld [vmem:[#allocation4 + $0x1b8] sm:$0xff] }
 0xfbf   :  { %9385 = vst [vmem:[#allocation48_spill] sm:$0xff] %v8060_v41  ;;  %9387 = vst [vmem:[#allocation93_spill] sm:$0xff] %v8066_v34 }
 0xfc0   :  { %v3957_v7 = vpack.c.bf16 %v3955_v37, %v3955_v37  ;;  %v4735_v40 = vpack.c.bf16 %v3955_v37, %v3954_v12  ;;  %v8063_v12 = vld [vmem:[#allocation4 + $0x1a8] sm:$0xff]  ;;  %v8069_v37 = vld [vmem:[#allocation4 + $0x1a0] sm:$0xff] }
 0xfc1   :  { %9386 = vst [vmem:[#allocation92_spill] sm:$0xff] %v8063_v12  ;;  %9388 = vst [vmem:[#allocation94_spill] sm:$0xff] %v8069_v37 }
 0xfc2   :  { %4011 = vmatprep.mubr.bf16.mxu0 %v3957_v7  ;;  %4052 = vmatprep.mubr.bf16.mxu1 %v3957_v7  ;;  %4678 = vst [vmem:[%s8375_s12 + $0x28] sm:$0xff] %v4735_v40  ;;  %v8075_v40 = vld [vmem:[#allocation4 + $0x1e8] sm:$0xff] }
 0xfc3   :  { %4012 = vmatmul.mubr.bf16.vlgmr.msra.gmra.mrb[80].mxu0 %v7998_v4  ;;  %4053 = vmatmul.mubr.bf16.vlgmr.msra.gmra.mrb[108].mxu1 %v7998_v4  ;;  %9390 = vst [vmem:[#allocation96_spill] sm:$0xff] %v8075_v40 }
 0xfc4   :  { %4062 = vmatpush1.bf16.msra.mxu0 %v7712_v30  ;;  %4103 = vmatpush1.bf16.msra.mxu1 %v7715_v6 }
 0xfc5   :  { %4093 = vmatprep.mubr.bf16.mxu0 %v3957_v7  ;;  %4134 = vmatprep.mubr.bf16.mxu1 %v3957_v7  ;;  %v8072_v7 = vld [vmem:[#allocation4 + $0x1b0] sm:$0xff] }
 0xfc6   :  { %4063 = vmatprep.subr.bf16.mxu0 %v7718_v36  ;;  %4104 = vmatprep.subr.bf16.mxu1 %v7721_v53  ;;  %9389 = vst [vmem:[#allocation95_spill] sm:$0xff] %v8072_v7 }
 0xfc8   :  { %4064 = vmatpush1.bf16.msra.mxu0 %v8009_v29  ;;  %4105 = vmatpush1.bf16.msra.mxu1 %v8012_v15 }
 0xfc9   :  { %4065 = vmatprep.subr.bf16.mxu0 %v8015_v62  ;;  %4106 = vmatprep.subr.bf16.mxu1 %v8018_v38 }
 0xfcc   :  { %4066 = vmatpush1.bf16.msra.mxu0 %v8021_v49  ;;  %4107 = vmatpush1.bf16.msra.mxu1 %v8024_v5 }
 0xfcd   :  { %4067 = vmatprep.subr.bf16.mxu0 %v8027_v3  ;;  %4108 = vmatprep.subr.bf16.mxu1 %v8030_v20 }
 0xfd0   :  { %4068 = vmatpush1.bf16.msra.mxu0 %v8033_v27  ;;  %4109 = vmatpush1.bf16.msra.mxu1 %v8036_v33 }
 0xfd1   :  { %4069 = vmatprep.subr.bf16.mxu0 %v8039_v9  ;;  %4110 = vmatprep.subr.bf16.mxu1 %v8042_v43 }
 0xfd4   :  { %4070 = vmatpush1.bf16.msra.mxu0 %v8045_v16  ;;  %4111 = vmatpush1.bf16.msra.mxu1 %v8048_v47 }
 0xfd5   :  { %4071 = vmatprep.subr.bf16.mxu0 %v8051_v54  ;;  %4112 = vmatprep.subr.bf16.mxu1 %v8054_v21 }
 0xfd8   :  { %4072 = vmatpush1.bf16.msra.mxu0 %v8057_v13  ;;  %4113 = vmatpush1.bf16.msra.mxu1 %v8060_v41  ;;  %v8078_v41 = vld [vmem:[#allocation4 + $0x1f8] sm:$0xff] }
 0xfd9   :  { %4073 = vmatprep.subr.bf16.mxu0 %v8063_v12  ;;  %4114 = vmatprep.subr.bf16.mxu1 %v8066_v34  ;;  %9391 = vst [vmem:[#allocation97_spill] sm:$0xff] %v8078_v41  ;;  %v8081_v12 = vld [vmem:[#allocation4 + $0x1e0] sm:$0xff]  ;;  %v8084_v34 = vld [vmem:[#allocation4 + $0x1f0] sm:$0xff] }
 0xfda   :  { %9392 = vst [vmem:[#allocation98_spill] sm:$0xff] %v8081_v12  ;;  %9393 = vst [vmem:[#allocation99_spill] sm:$0xff] %v8084_v34 }
 0xfdc   :  { %4074 = vmatpush1.bf16.msra.mxu0 %v8069_v37  ;;  %4115 = vmatpush1.bf16.msra.mxu1 %v8072_v7  ;;  %v8087_v37 = vld [vmem:[#allocation4 + $0x228] sm:$0xff]  ;;  %v8090_v7 = vld [vmem:[#allocation4 + $0x238] sm:$0xff] }
 0xfdd   :  { %4075 = vmatprep.subr.bf16.mxu0 %v8075_v40  ;;  %4116 = vmatprep.subr.bf16.mxu1 %v8078_v41  ;;  %9394 = vst [vmem:[#allocation100_spill] sm:$0xff] %v8087_v37  ;;  %9395 = vst [vmem:[#allocation101_spill] sm:$0xff] %v8090_v7  ;;  %v8093_v40 = vld [vmem:[#allocation4 + $0x220] sm:$0xff]  ;;  %v8096_v41 = vld [vmem:[#allocation4 + $0x230] sm:$0xff] }
 0xfde   :  { %9396 = vst [vmem:[#allocation102_spill] sm:$0xff] %v8093_v40  ;;  %9397 = vst [vmem:[#allocation103_spill] sm:$0xff] %v8096_v41 }
 0xfe0   :  { %4076 = vmatpush1.bf16.msra.mxu0 %v8081_v12  ;;  %4117 = vmatpush1.bf16.msra.mxu1 %v8084_v34  ;;  %v8099_v12 = vld [vmem:[#allocation4 + $0x268] sm:$0xff]  ;;  %v8102_v34 = vld [vmem:[#allocation4 + $0x278] sm:$0xff] }
 0xfe1   :  { %4077 = vmatprep.subr.bf16.mxu0 %v8087_v37  ;;  %4118 = vmatprep.subr.bf16.mxu1 %v8090_v7  ;;  %9398 = vst [vmem:[#allocation104_spill] sm:$0xff] %v8099_v12  ;;  %9399 = vst [vmem:[#allocation105_spill] sm:$0xff] %v8102_v34  ;;  %v8105_v37 = vld [vmem:[#allocation4 + $0x260] sm:$0xff]  ;;  %v8108_v7 = vld [vmem:[#allocation4 + $0x270] sm:$0xff] }
 0xfe2   :  { %9400 = vst [vmem:[#allocation133_spill] sm:$0xff] %v8105_v37  ;;  %9401 = vst [vmem:[#allocation136_spill] sm:$0xff] %v8108_v7 }
 0xfe4   :  { %4078 = vmatpush1.bf16.msra.mxu0 %v8093_v40  ;;  %4119 = vmatpush1.bf16.msra.mxu1 %v8096_v41  ;;  %v8111_v40 = vld [vmem:[#allocation4 + $0x2a8] sm:$0xff]  ;;  %v8114_v41 = vld [vmem:[#allocation4 + $0x2b8] sm:$0xff] }
 0xfe5   :  { %4079 = vmatprep.subr.bf16.mxu0 %v8099_v12  ;;  %4120 = vmatprep.subr.bf16.mxu1 %v8102_v34  ;;  %9402 = vst [vmem:[#allocation137_spill] sm:$0xff] %v8111_v40  ;;  %9403 = vst [vmem:[#allocation138_spill] sm:$0xff] %v8114_v41  ;;  %v8117_v12 = vld [vmem:[#allocation4 + $0x2a0] sm:$0xff]  ;;  %v8120_v34 = vld [vmem:[#allocation4 + $0x2b0] sm:$0xff] }
 0xfe6   :  { %9404 = vst [vmem:[#allocation139_spill] sm:$0xff] %v8117_v12  ;;  %9405 = vst [vmem:[#allocation140_spill] sm:$0xff] %v8120_v34 }
 0xfe8   :  { %4080 = vmatpush1.bf16.msra.mxu0 %v8105_v37  ;;  %4121 = vmatpush1.bf16.msra.mxu1 %v8108_v7  ;;  %v8123_v37 = vld [vmem:[#allocation4 + $0x2e8] sm:$0xff]  ;;  %v8126_v7 = vld [vmem:[#allocation4 + $0x2f8] sm:$0xff] }
 0xfe9   :  { %4081 = vmatprep.subr.bf16.mxu0 %v8111_v40  ;;  %4122 = vmatprep.subr.bf16.mxu1 %v8114_v41  ;;  %9406 = vst [vmem:[#allocation141_spill] sm:$0xff] %v8123_v37  ;;  %9407 = vst [vmem:[#allocation142_spill] sm:$0xff] %v8126_v7  ;;  %v8129_v40 = vld [vmem:[#allocation4 + $0x2e0] sm:$0xff]  ;;  %v8132_v41 = vld [vmem:[#allocation4 + $0x2f0] sm:$0xff] }
 0xfea   :  { %9408 = vst [vmem:[#allocation143_spill] sm:$0xff] %v8129_v40  ;;  %9409 = vst [vmem:[#allocation144_spill] sm:$0xff] %v8132_v41 }
 0xfec   :  { %4082 = vmatpush1.bf16.msra.mxu0 %v8117_v12  ;;  %4123 = vmatpush1.bf16.msra.mxu1 %v8120_v34  ;;  %v8135_v12 = vld [vmem:[#allocation4 + $0x328] sm:$0xff]  ;;  %v8138_v34 = vld [vmem:[#allocation4 + $0x338] sm:$0xff] }
 0xfed   :  { %4083 = vmatprep.subr.bf16.mxu0 %v8123_v37  ;;  %4124 = vmatprep.subr.bf16.mxu1 %v8126_v7  ;;  %9410 = vst [vmem:[#allocation145_spill] sm:$0xff] %v8135_v12  ;;  %9411 = vst [vmem:[#allocation33_spill] sm:$0xff] %v8138_v34  ;;  %v8141_v37 = vld [vmem:[#allocation4 + $0x320] sm:$0xff]  ;;  %v8144_v7 = vld [vmem:[#allocation4 + $0x330] sm:$0xff] }
 0xfee   :  { %9412 = vst [vmem:[#allocation35_spill] sm:$0xff] %v8141_v37  ;;  %9413 = vst [vmem:[#allocation37_spill] sm:$0xff] %v8144_v7 }
 0xff0   :  { %4084 = vmatpush1.bf16.msra.mxu0 %v8129_v40  ;;  %4125 = vmatpush1.bf16.msra.mxu1 %v8132_v41  ;;  %v8147_v40 = vld [vmem:[#allocation4 + $0x368] sm:$0xff]  ;;  %v8150_v41 = vld [vmem:[#allocation4 + $0x378] sm:$0xff] }
 0xff1   :  { %4085 = vmatprep.subr.bf16.mxu0 %v8135_v12  ;;  %4126 = vmatprep.subr.bf16.mxu1 %v8138_v34  ;;  %9414 = vst [vmem:[#allocation39_spill] sm:$0xff] %v8147_v40  ;;  %9415 = vst [vmem:[#allocation41_spill] sm:$0xff] %v8150_v41  ;;  %v8153_v12 = vld [vmem:[#allocation4 + $0x360] sm:$0xff]  ;;  %v8156_v34 = vld [vmem:[#allocation4 + $0x370] sm:$0xff] }
 0xff2   :  { %9416 = vst [vmem:[#allocation43_spill] sm:$0xff] %v8153_v12  ;;  %9417 = vst [vmem:[#allocation45_spill] sm:$0xff] %v8156_v34 }
 0xff4   :  { %4086 = vmatpush1.bf16.msra.mxu0 %v8141_v37  ;;  %4127 = vmatpush1.bf16.msra.mxu1 %v8144_v7  ;;  %v8159_v37 = vld [vmem:[#allocation4 + $0x3a8] sm:$0xff]  ;;  %v8162_v7 = vld [vmem:[#allocation4 + $0x3b8] sm:$0xff] }
 0xff5   :  { %4087 = vmatprep.subr.bf16.mxu0 %v8147_v40  ;;  %4128 = vmatprep.subr.bf16.mxu1 %v8150_v41  ;;  %9418 = vst [vmem:[#allocation47_spill] sm:$0xff] %v8159_v37  ;;  %9419 = vst [vmem:[#allocation49_spill] sm:$0xff] %v8162_v7  ;;  %v8165_v40 = vld [vmem:[#allocation4 + $0x3a0] sm:$0xff]  ;;  %v8168_v41 = vld [vmem:[#allocation4 + $0x3b0] sm:$0xff] }
 0xff8   :  { %4088 = vmatpush1.bf16.msra.mxu0 %v8153_v12  ;;  %4129 = vmatpush1.bf16.msra.mxu1 %v8156_v34  ;;  %v8171_v12 = vld [vmem:[#allocation4 + $0x3e8] sm:$0xff]  ;;  %v8174_v34 = vld [vmem:[#allocation4 + $0x3f8] sm:$0xff] }
 0xff9   :  { %4089 = vmatprep.subr.bf16.mxu0 %v8159_v37  ;;  %4130 = vmatprep.subr.bf16.mxu1 %v8162_v7  ;;  %v8177_v37 = vld [vmem:[#allocation4 + $0x3e0] sm:$0xff]  ;;  %v8180_v7 = vld [vmem:[#allocation4 + $0x3f0] sm:$0xff] }
 0xffc   :  { %4090 = vmatpush1.bf16.msra.mxu0 %v8165_v40  ;;  %4131 = vmatpush1.bf16.msra.mxu1 %v8168_v41 }
 0xffd   :  { %4091 = vmatprep.subr.bf16.mxu0 %v8171_v12  ;;  %4132 = vmatprep.subr.bf16.mxu1 %v8174_v34 }
0x1000   :  { %4092 = vmatpush1.bf16.msra.mxu0 %v8177_v37  ;;  %4133 = vmatpush1.bf16.msra.mxu1 %v8180_v7 }
0x1001   :  { %4222 = vmatprep.subr.bf16.mxu0 %v7782_v23  ;;  %4263 = vmatprep.subr.bf16.mxu1 %v7785_v56  ;;  %v9420_v23 = vld [vmem:[#allocation54_spill] sm:$0xff] }
0x1002   :  { %v9421_v56 = vld [vmem:[#allocation62_spill] sm:$0xff] }
0x1003   :  { %4094 = vmatmul.mubr.bf16.vlgmr.msra.gmra.mrb[84].mxu0 %v7998_v4  ;;  %4135 = vmatmul.mubr.bf16.vlgmr.msra.gmra.mrb[112].mxu1 %v7998_v4 }
0x1004   :  { %4223 = vmatpush1.bf16.msra.mxu0 %v7790_v31  ;;  %4264 = vmatpush1.bf16.msra.mxu1 %v7793_v57  ;;  %v9422_v31 = vld [vmem:[#allocation36_spill] sm:$0xff]  ;;  %v9423_v57 = vld [vmem:[#allocation26_spill] sm:$0xff] }
0x1005   :  { %4224 = vmatprep.subr.bf16.mxu0 %v7796_v48  ;;  %4265 = vmatprep.subr.bf16.mxu1 %v7799_v17  ;;  %v9424_v48 = vld [vmem:[#allocation55_spill] sm:$0xff] }
0x1006   :  { %v9425_v17 = vld [vmem:[#allocation63_spill] sm:$0xff] }
0x1008   :  { %4225 = vmatpush1.bf16.msra.mxu0 %v7802_v26  ;;  %4266 = vmatpush1.bf16.msra.mxu1 %v7805_v1  ;;  %v9426_v26 = vld [vmem:[#allocation38_spill] sm:$0xff]  ;;  %v9427_v1 = vld [vmem:[#allocation27_spill] sm:$0xff] }
0x1009   :  { %4226 = vmatprep.subr.bf16.mxu0 %v7808_v52  ;;  %4267 = vmatprep.subr.bf16.mxu1 %v7811_v58  ;;  %v9428_v52 = vld [vmem:[#allocation84_spill] sm:$0xff]  ;;  %v9429_v58 = vld [vmem:[#allocation85_spill] sm:$0xff] }
0x100c   :  { %4227 = vmatpush1.bf16.msra.mxu0 %v7814_v8  ;;  %4268 = vmatpush1.bf16.msra.mxu1 %v7817_v45  ;;  %v9430_v8 = vld [vmem:[#allocation86_spill] sm:$0xff]  ;;  %v9431_v45 = vld [vmem:[#allocation87_spill] sm:$0xff] }
0x100d   :  { %4228 = vmatprep.subr.bf16.mxu0 %v7820_v61  ;;  %4269 = vmatprep.subr.bf16.mxu1 %v7823_v10  ;;  %v9432_v61 = vld [vmem:[#allocation88_spill] sm:$0xff]  ;;  %v9433_v10 = vld [vmem:[#allocation89_spill] sm:$0xff] }
0x1010   :  { %4229 = vmatpush1.bf16.msra.mxu0 %v7826_v2  ;;  %4270 = vmatpush1.bf16.msra.mxu1 %v7829_v46  ;;  %v9434_v2 = vld [vmem:[#allocation90_spill] sm:$0xff]  ;;  %v9435_v46 = vld [vmem:[#allocation91_spill] sm:$0xff] }
0x1011   :  { %4230 = vmatprep.subr.bf16.mxu0 %v7832_v22  ;;  %4271 = vmatprep.subr.bf16.mxu1 %v7835_v51  ;;  %v9436_v22 = vld [vmem:[#allocation53_spill] sm:$0xff] }
0x1012   :  { %v9437_v51 = vld [vmem:[#allocation61_spill] sm:$0xff] }
0x1014   :  { %4231 = vmatpush1.bf16.msra.mxu0 %v7838_v50  ;;  %4272 = vmatpush1.bf16.msra.mxu1 %v7841_v63  ;;  %v9438_v50 = vld [vmem:[#allocation34_spill] sm:$0xff] }
0x1015   :  { %4232 = vmatprep.subr.bf16.mxu0 %v7844_v60  ;;  %4273 = vmatprep.subr.bf16.mxu1 %v7847_v18  ;;  %v9439_v63 = vld [vmem:[#allocation50_spill] sm:$0xff]  ;;  %v9441_v18 = vld [vmem:[#allocation107_spill] sm:$0xff] }
0x1016   :  { %v9440_v60 = vld [vmem:[#allocation106_spill] sm:$0xff] }
0x1018   :  { %4233 = vmatpush1.bf16.msra.mxu0 %v7850_v55  ;;  %4274 = vmatpush1.bf16.msra.mxu1 %v7853_v28  ;;  %v9442_v55 = vld [vmem:[#allocation108_spill] sm:$0xff]  ;;  %v9443_v28 = vld [vmem:[#allocation109_spill] sm:$0xff] }
0x1019   :  { %4234 = vmatprep.subr.bf16.mxu0 %v7856_v24  ;;  %4275 = vmatprep.subr.bf16.mxu1 %v7859_v44  ;;  %v9444_v24 = vld [vmem:[#allocation118_spill] sm:$0xff]  ;;  %v9445_v44 = vld [vmem:[#allocation119_spill] sm:$0xff] }
0x101c   :  { %4235 = vmatpush1.bf16.msra.mxu0 %v7862_v0  ;;  %4276 = vmatpush1.bf16.msra.mxu1 %v7865_v25  ;;  %v9446_v0 = vld [vmem:[#allocation120_spill] sm:$0xff]  ;;  %v9447_v25 = vld [vmem:[#allocation121_spill] sm:$0xff] }
0x101d   :  { %4236 = vmatprep.subr.bf16.mxu0 %v7868_v35  ;;  %4277 = vmatprep.subr.bf16.mxu1 %v7871_v32  ;;  %v9448_v35 = vld [vmem:[#allocation122_spill] sm:$0xff]  ;;  %v9449_v32 = vld [vmem:[#allocation52_spill] sm:$0xff] }
0x1020   :  { %4237 = vmatpush1.bf16.msra.mxu0 %v7874_v14  ;;  %4278 = vmatpush1.bf16.msra.mxu1 %v7877_v19  ;;  %v9450_v14 = vld [vmem:[#allocation60_spill] sm:$0xff] }
0x1021   :  { %4238 = vmatprep.subr.bf16.mxu0 %v7880_v59  ;;  %4279 = vmatprep.subr.bf16.mxu1 %v7883_v39  ;;  %v9451_v19 = vld [vmem:[#allocation32_spill] sm:$0xff] }
0x1024   :  { %4239 = vmatpush1.bf16.msra.mxu0 %v9420_v23  ;;  %4280 = vmatpush1.bf16.msra.mxu1 %v9421_v56 }
0x1025   :  { %4240 = vmatprep.subr.bf16.mxu0 %v9422_v31  ;;  %4281 = vmatprep.subr.bf16.mxu1 %v9423_v57 }
0x1028   :  { %4241 = vmatpush1.bf16.msra.mxu0 %v9424_v48  ;;  %4282 = vmatpush1.bf16.msra.mxu1 %v9425_v17  ;;  %v9452_v17 = vld [vmem:[#allocation58_spill] sm:$0xff] }
0x1029   :  { %4242 = vmatprep.subr.bf16.mxu0 %v9426_v26  ;;  %4283 = vmatprep.subr.bf16.mxu1 %v9427_v1  ;;  %v3971_v26 = vunpack.c.l.bf16 %v9452_v17  ;;  %v9453_v1 = vld [vmem:[#allocation66_spill] sm:$0xff] }
0x102c   :  { %4243 = vmatpush1.bf16.msra.mxu0 %v9428_v52  ;;  %4284 = vmatpush1.bf16.msra.mxu1 %v9429_v58  ;;  %v3973_v52 = vunpack.c.l.bf16 %v9453_v1  ;;  %v3972_v58 = vunpack.c.h.bf16 %v9452_v17 }
0x102d   :  { %4244 = vmatprep.subr.bf16.mxu0 %v9430_v8  ;;  %4285 = vmatprep.subr.bf16.mxu1 %v9431_v45  ;;  %v3974_v8 = vunpack.c.h.bf16 %v9453_v1 }
0x1030   :  { %4245 = vmatpush1.bf16.msra.mxu0 %v9432_v61  ;;  %4286 = vmatpush1.bf16.msra.mxu1 %v9433_v10 }
0x1031   :  { %4246 = vmatprep.subr.bf16.mxu0 %v9434_v2  ;;  %4287 = vmatprep.subr.bf16.mxu1 %v9435_v46 }
0x1034   :  { %4247 = vmatpush1.bf16.msra.mxu0 %v9436_v22  ;;  %4288 = vmatpush1.bf16.msra.mxu1 %v9437_v51 }
0x1035   :  { %4248 = vmatprep.subr.bf16.mxu0 %v9438_v50  ;;  %4289 = vmatprep.subr.bf16.mxu1 %v9439_v63 }
0x1038   :  { %4249 = vmatpush1.bf16.msra.mxu0 %v9440_v60  ;;  %4290 = vmatpush1.bf16.msra.mxu1 %v9441_v18 }
0x1039   :  { %4250 = vmatprep.subr.bf16.mxu0 %v9442_v55  ;;  %4291 = vmatprep.subr.bf16.mxu1 %v9443_v28 }
0x103c   :  { %4251 = vmatpush1.bf16.msra.mxu0 %v9444_v24  ;;  %4292 = vmatpush1.bf16.msra.mxu1 %v9445_v44 }
0x103d   :  { %4252 = vmatprep.subr.bf16.mxu0 %v9446_v0  ;;  %4293 = vmatprep.subr.bf16.mxu1 %v9447_v25  ;;  %v9454_v0 = vld [vmem:[#allocation44_spill] sm:$0xff] }
0x103e   :  { %v3975_v25 = vunpack.c.l.bf16 %v9454_v0 }
0x1040   :  { %4253 = vmatpush1.bf16.msra.mxu0 %v9448_v35  ;;  %4294 = vmatpush1.bf16.msra.mxu1 %v9449_v32  ;;  %v9455_v35 = vld [vmem:[#allocation30_spill] sm:$0xff] }
0x1041   :  { %4304 = vmatprep.subr.bf16.mxu0 %v9450_v14  ;;  %4345 = vmatprep.subr.bf16.mxu1 %v9451_v19  ;;  %v3977_v32 = vunpack.c.l.bf16 %v9455_v35  ;;  %v3976_v19 = vunpack.c.h.bf16 %v9454_v0 }
0x1096   :  { %v4013_v59 = vpop.f32.mrb[80].mxu0  ;;  %v4054_v39 = vpop.f32.mrb[108].mxu1 }
0x1097   :  { %v4015_v4 = vpop.f32.mrb[81].mxu0  ;;  %v4056_v23 = vpop.f32.mrb[109].mxu1  ;;  %v4143_v45 = vadd.f32 %v4013_v59, %v3971_v26  ;;  %v4145_v61 = vadd.f32 %v4054_v39, %v3973_v52  ;;  %v3978_v59 = vunpack.c.h.bf16 %v9455_v35 }
0x1098   :  { %v4017_v56 = vpop.f32.mrb[82].mxu0  ;;  %v4058_v31 = vpop.f32.mrb[110].mxu1  ;;  %v4144_v10 = vadd.f32 %v4015_v4, %v3972_v58  ;;  %v4146_v2 = vadd.f32 %v4056_v23, %v3974_v8 }
0x1099   :  { %v4018_v57 = vpop.f32.mrb[83].mxu0  ;;  %v4059_v48 = vpop.f32.mrb[111].mxu1  ;;  %v4679_v46 = vmul.f32 -1.442695, %v4143_v45  ;;  %v4681_v22 = vmul.f32 -1.442695, %v4145_v61 }
0x109a   :  { %v4680_v51 = vmul.f32 -1.442695, %v4144_v10  ;;  %v4682_v50 = vmul.f32 -1.442695, %v4146_v2 }
0x109b   :  { %5125 = vpow2.f32 %v4679_v46 }
0x109c   :  { %5127 = vpow2.f32 %v4681_v22 }
0x109d   :  { %5129 = vpow2.f32 %v4680_v51 }
0x109e   :  { %5131 = vpow2.f32 %v4682_v50 }
0x10a5   :  { %v5126_v63 = vpop.eup %5125 }
0x10a6   :  { %v5128_v60 = vpop.eup %5127  ;;  %v4157_v28 = vadd.f32 1.0, %v5126_v63 }
0x10a7   :  { %v5130_v18 = vpop.eup %5129  ;;  %v4169_v24 = vadd.f32 1.0, %v5128_v60 }
0x10a8   :  { %v5132_v55 = vpop.eup %5131  ;;  %v4158_v44 = vadd.f32 1.0, %v5130_v18  ;;  %5133 = vrcp.f32 %v4157_v28 }
0x10a9   :  { %v4170_v14 = vadd.f32 1.0, %v5132_v55  ;;  %5135 = vrcp.f32 %v4169_v24 }
0x10aa   :  { %5137 = vrcp.f32 %v4158_v44 }
0x10ab   :  { %5139 = vrcp.f32 %v4170_v14 }
0x10b2   :  { %v5134_v61 = vpop.eup %5133 }
0x10b3   :  { %v5136_v10 = vpop.eup %5135 }
0x10b4   :  { %v5138_v2 = vpop.eup %5137  ;;  %v4189_v50 = vmul.f32 %v5136_v10, %v7992_v11  ;;  %v9490_v10 = vld [vmem:[#allocation49_spill] sm:$0xff] }
0x10b5   :  { %v5140_v46 = vpop.eup %5139 }
0x10b6   :  { %v4190_v18 = vmul.f32 %v5140_v46, %v7994_v42 }
0x10d6   :  { %v4095_v39 = vpop.f32.mrb[84].mxu0  ;;  %v4136_v4 = vpop.f32.mrb[112].mxu1 }
0x10d7   :  { %v4147_v23 = vadd.f32 %v4095_v39, %v3975_v25  ;;  %v4149_v56 = vadd.f32 %v4136_v4, %v3977_v32  ;;  %v4097_v31 = vpop.f32.mrb[85].mxu0  ;;  %v4138_v57 = vpop.f32.mrb[113].mxu1 }
0x10d8   :  { %v4148_v48 = vadd.f32 %v4097_v31, %v3976_v19  ;;  %v4150_v17 = vadd.f32 %v4138_v57, %v3978_v59  ;;  %v4099_v26 = vpop.f32.mrb[86].mxu0  ;;  %v4140_v1 = vpop.f32.mrb[114].mxu1  ;;  %v9479_v31 = vld [vmem:[#allocation143_spill] sm:$0xff]  ;;  %v9480_v57 = vld [vmem:[#allocation144_spill] sm:$0xff] }
0x10d9   :  { %5141 = vtanh.f32 %v4147_v23  ;;  %v4683_v52 = vmul.f32 -1.442695, %v4149_v56  ;;  %v4100_v58 = vpop.f32.mrb[87].mxu0  ;;  %v4141_v8 = vpop.f32.mrb[115].mxu1  ;;  %v9477_v23 = vld [vmem:[#allocation141_spill] sm:$0xff]  ;;  %v9478_v56 = vld [vmem:[#allocation142_spill] sm:$0xff] }
0x10da   :  { %5143 = vtanh.f32 %v4148_v48  ;;  %v4684_v45 = vmul.f32 -1.442695, %v4150_v17  ;;  %v9481_v48 = vld [vmem:[#allocation145_spill] sm:$0xff]  ;;  %v9483_v26 = vld [vmem:[#allocation35_spill] sm:$0xff] }
0x10db   :  { %5145 = vpow2.f32 %v4683_v52  ;;  %v9482_v17 = vld [vmem:[#allocation33_spill] sm:$0xff]  ;;  %v9485_v52 = vld [vmem:[#allocation39_spill] sm:$0xff] }
0x10dc   :  { %5147 = vpow2.f32 %v4684_v45  ;;  %v9484_v1 = vld [vmem:[#allocation37_spill] sm:$0xff]  ;;  %v9487_v8 = vld [vmem:[#allocation43_spill] sm:$0xff] }
0x10dd   :  { %v9486_v58 = vld [vmem:[#allocation41_spill] sm:$0xff] }
0x10de   :  { %v9488_v45 = vld [vmem:[#allocation45_spill] sm:$0xff] }
0x10e3   :  { %v5142_v22 = vpop.eup %5141 }
0x10e4   :  { %v5144_v51 = vpop.eup %5143  ;;  %v4191_v63 = vmul.f32 %v5142_v22, %v5134_v61  ;;  %v9489_v61 = vld [vmem:[#allocation47_spill] sm:$0xff] }
0x10e5   :  { %v5146_v60 = vpop.eup %5145  ;;  %v4192_v55 = vmul.f32 %v5144_v51, %v5138_v2 }
0x10e6   :  { %v5148_v28 = vpop.eup %5147  ;;  %v8261_v24 = vadd.f32 %v4191_v63, %v4189_v50  ;;  %v4183_v44 = vadd.f32 1.0, %v5146_v60  ;;  %v9491_v60 = vld [vmem:[#allocation59_spill] sm:$0xff] }
0x10e7   :  { %v8263_v0 = vadd.f32 %v4192_v55, %v4190_v18  ;;  %v4184_v25 = vadd.f32 1.0, %v5148_v28  ;;  %v9492_v18 = vld [vmem:[#allocation67_spill] sm:$0xff] }
0x10e8   :  { %5149 = vtanh.f32 %v8261_v24 }
0x10e9   :  { %5151 = vrcp.f32 %v4183_v44 }
0x10ea   :  { %5153 = vtanh.f32 %v8263_v0 }
0x10eb   :  { %5155 = vrcp.f32 %v4184_v25 }
0x10f2   :  { %v5150_v35 = vpop.eup %5149 }
0x10f3   :  { %v5152_v11 = vpop.eup %5151 }
0x10f4   :  { %v5154_v32 = vpop.eup %5153  ;;  %v4197_v14 = vmul.f32 %v5152_v11, %v5150_v35 }
0x10f5   :  { %v5156_v19 = vpop.eup %5155 }
0x10f6   :  { %v4198_v42 = vmul.f32 %v5156_v19, %v5154_v32  ;;  %v8267_v4 = vpack.c.bf16 %v4197_v14, %v4197_v14 }
0x10f8   :  { %v4200_v59 = vpack.c.bf16 %v4198_v42, %v4198_v42  ;;  %v4736_v39 = vpack.c.bf16 %v4198_v42, %v4197_v14 }
0x10fa   :  { %4254 = vmatprep.mubr.bf16.mxu0 %v4200_v59  ;;  %4295 = vmatprep.mubr.bf16.mxu1 %v4200_v59  ;;  %4686 = vst [vmem:[%s8375_s12 + $0x30] sm:$0xff] %v4736_v39 }
0x10fb   :  { %4255 = vmatmul.mubr.bf16.vlgmr.msra.gmra.mrb[88].mxu0 %v8267_v4  ;;  %4296 = vmatmul.mubr.bf16.vlgmr.msra.gmra.mrb[116].mxu1 %v8267_v4 }
0x10fc   :  { %4305 = vmatpush1.bf16.msra.mxu0 %v7712_v30  ;;  %4346 = vmatpush1.bf16.msra.mxu1 %v7715_v6  ;;  %v9456_v30 = vld [vmem:[#allocation48_spill] sm:$0xff] }
0x10fd   :  { %4336 = vmatprep.mubr.bf16.mxu0 %v4200_v59  ;;  %4377 = vmatprep.mubr.bf16.mxu1 %v4200_v59  ;;  %v9457_v6 = vld [vmem:[#allocation92_spill] sm:$0xff] }
0x10fe   :  { %4306 = vmatprep.subr.bf16.mxu0 %v7718_v36  ;;  %4347 = vmatprep.subr.bf16.mxu1 %v7721_v53  ;;  %v9458_v36 = vld [vmem:[#allocation93_spill] sm:$0xff]  ;;  %v9459_v53 = vld [vmem:[#allocation94_spill] sm:$0xff] }
0x1100   :  { %4307 = vmatpush1.bf16.msra.mxu0 %v8009_v29  ;;  %4348 = vmatpush1.bf16.msra.mxu1 %v8012_v15  ;;  %v9460_v29 = vld [vmem:[#allocation95_spill] sm:$0xff]  ;;  %v9461_v15 = vld [vmem:[#allocation96_spill] sm:$0xff] }
0x1101   :  { %4308 = vmatprep.subr.bf16.mxu0 %v8015_v62  ;;  %4349 = vmatprep.subr.bf16.mxu1 %v8018_v38  ;;  %v9462_v62 = vld [vmem:[#allocation97_spill] sm:$0xff]  ;;  %v9463_v38 = vld [vmem:[#allocation98_spill] sm:$0xff] }
0x1104   :  { %4309 = vmatpush1.bf16.msra.mxu0 %v8021_v49  ;;  %4350 = vmatpush1.bf16.msra.mxu1 %v8024_v5  ;;  %v9464_v49 = vld [vmem:[#allocation99_spill] sm:$0xff]  ;;  %v9465_v5 = vld [vmem:[#allocation100_spill] sm:$0xff] }
0x1105   :  { %4310 = vmatprep.subr.bf16.mxu0 %v8027_v3  ;;  %4351 = vmatprep.subr.bf16.mxu1 %v8030_v20  ;;  %v9466_v3 = vld [vmem:[#allocation101_spill] sm:$0xff]  ;;  %v9467_v20 = vld [vmem:[#allocation102_spill] sm:$0xff] }
0x1108   :  { %4311 = vmatpush1.bf16.msra.mxu0 %v8033_v27  ;;  %4352 = vmatpush1.bf16.msra.mxu1 %v8036_v33  ;;  %v9468_v27 = vld [vmem:[#allocation103_spill] sm:$0xff]  ;;  %v9469_v33 = vld [vmem:[#allocation104_spill] sm:$0xff] }
0x1109   :  { %4312 = vmatprep.subr.bf16.mxu0 %v8039_v9  ;;  %4353 = vmatprep.subr.bf16.mxu1 %v8042_v43  ;;  %v9470_v9 = vld [vmem:[#allocation105_spill] sm:$0xff] }
0x110a   :  { %v9471_v43 = vld [vmem:[#allocation133_spill] sm:$0xff] }
0x110c   :  { %4313 = vmatpush1.bf16.msra.mxu0 %v8045_v16  ;;  %4354 = vmatpush1.bf16.msra.mxu1 %v8048_v47  ;;  %v9472_v16 = vld [vmem:[#allocation136_spill] sm:$0xff]  ;;  %v9473_v47 = vld [vmem:[#allocation137_spill] sm:$0xff] }
0x110d   :  { %4314 = vmatprep.subr.bf16.mxu0 %v8051_v54  ;;  %4355 = vmatprep.subr.bf16.mxu1 %v8054_v21  ;;  %v9474_v54 = vld [vmem:[#allocation138_spill] sm:$0xff]  ;;  %v9475_v21 = vld [vmem:[#allocation139_spill] sm:$0xff] }
0x1110   :  { %4315 = vmatpush1.bf16.msra.mxu0 %v8057_v13  ;;  %4356 = vmatpush1.bf16.msra.mxu1 %v9456_v30  ;;  %v9476_v13 = vld [vmem:[#allocation140_spill] sm:$0xff] }
0x1111   :  { %4316 = vmatprep.subr.bf16.mxu0 %v9457_v6  ;;  %4357 = vmatprep.subr.bf16.mxu1 %v9458_v36  ;;  %v9493_v36 = vld [vmem:[#allocation46_spill] sm:$0xff] }
0x1114   :  { %4317 = vmatpush1.bf16.msra.mxu0 %v9459_v53  ;;  %4358 = vmatpush1.bf16.msra.mxu1 %v9460_v29  ;;  %v4218_v53 = vunpack.c.l.bf16 %v9493_v36  ;;  %v9494_v29 = vld [vmem:[#allocation31_spill] sm:$0xff] }
0x1115   :  { %4318 = vmatprep.subr.bf16.mxu0 %v9461_v15  ;;  %4359 = vmatprep.subr.bf16.mxu1 %v9462_v62  ;;  %v4220_v15 = vunpack.c.l.bf16 %v9494_v29 }
0x1118   :  { %4319 = vmatpush1.bf16.msra.mxu0 %v9463_v38  ;;  %4360 = vmatpush1.bf16.msra.mxu1 %v9464_v49  ;;  %v4219_v38 = vunpack.c.h.bf16 %v9493_v36  ;;  %v4221_v49 = vunpack.c.h.bf16 %v9494_v29 }
0x1119   :  { %4320 = vmatprep.subr.bf16.mxu0 %v9465_v5  ;;  %4361 = vmatprep.subr.bf16.mxu1 %v9466_v3 }
0x111c   :  { %4321 = vmatpush1.bf16.msra.mxu0 %v9467_v20  ;;  %4362 = vmatpush1.bf16.msra.mxu1 %v9468_v27 }
0x111d   :  { %4322 = vmatprep.subr.bf16.mxu0 %v9469_v33  ;;  %4363 = vmatprep.subr.bf16.mxu1 %v9470_v9 }
0x1120   :  { %4323 = vmatpush1.bf16.msra.mxu0 %v9471_v43  ;;  %4364 = vmatpush1.bf16.msra.mxu1 %v9472_v16 }
0x1121   :  { %4324 = vmatprep.subr.bf16.mxu0 %v9473_v47  ;;  %4365 = vmatprep.subr.bf16.mxu1 %v9474_v54 }
0x1124   :  { %4325 = vmatpush1.bf16.msra.mxu0 %v9475_v21  ;;  %4366 = vmatpush1.bf16.msra.mxu1 %v9476_v13 }
0x1125   :  { %4326 = vmatprep.subr.bf16.mxu0 %v9477_v23  ;;  %4367 = vmatprep.subr.bf16.mxu1 %v9478_v56 }
0x1128   :  { %4327 = vmatpush1.bf16.msra.mxu0 %v9479_v31  ;;  %4368 = vmatpush1.bf16.msra.mxu1 %v9480_v57 }
0x1129   :  { %4328 = vmatprep.subr.bf16.mxu0 %v9481_v48  ;;  %4369 = vmatprep.subr.bf16.mxu1 %v9482_v17 }
0x112c   :  { %4329 = vmatpush1.bf16.msra.mxu0 %v9483_v26  ;;  %4370 = vmatpush1.bf16.msra.mxu1 %v9484_v1 }
0x112d   :  { %4330 = vmatprep.subr.bf16.mxu0 %v9485_v52  ;;  %4371 = vmatprep.subr.bf16.mxu1 %v9486_v58 }
0x1130   :  { %4331 = vmatpush1.bf16.msra.mxu0 %v9487_v8  ;;  %4372 = vmatpush1.bf16.msra.mxu1 %v9488_v45 }
0x1131   :  { %4332 = vmatprep.subr.bf16.mxu0 %v9489_v61  ;;  %4373 = vmatprep.subr.bf16.mxu1 %v9490_v10 }
0x1134   :  { %4333 = vmatpush1.bf16.msra.mxu0 %v8165_v40  ;;  %4374 = vmatpush1.bf16.msra.mxu1 %v8168_v41 }
0x1135   :  { %4334 = vmatprep.subr.bf16.mxu0 %v8171_v12  ;;  %4375 = vmatprep.subr.bf16.mxu1 %v8174_v34  ;;  %v4214_v12 = vunpack.c.l.bf16 %v9491_v60  ;;  %v4216_v34 = vunpack.c.l.bf16 %v9492_v18 }
0x1138   :  { %4335 = vmatpush1.bf16.msra.mxu0 %v8177_v37  ;;  %4376 = vmatpush1.bf16.msra.mxu1 %v8180_v7  ;;  %v4215_v37 = vunpack.c.h.bf16 %v9491_v60  ;;  %v4217_v7 = vunpack.c.h.bf16 %v9492_v18 }
0x113b   :  { %4337 = vmatmul.mubr.bf16.vlgmr.msra.gmra.mrb[92].mxu0 %v8267_v4  ;;  %4378 = vmatmul.mubr.bf16.vlgmr.msra.gmra.mrb[120].mxu1 %v8267_v4 }
0x11ce   :  { %v4256_v2 = vpop.f32.mrb[88].mxu0  ;;  %v4297_v46 = vpop.f32.mrb[116].mxu1 }
0x11cf   :  { %v4258_v22 = vpop.f32.mrb[89].mxu0  ;;  %v4299_v51 = vpop.f32.mrb[117].mxu1  ;;  %v4386_v55 = vadd.f32 %v4256_v2, %v4214_v12  ;;  %v4388_v28 = vadd.f32 %v4297_v46, %v4216_v34 }
0x11d0   :  { %v4260_v50 = vpop.f32.mrb[90].mxu0  ;;  %v4301_v40 = vpop.f32.mrb[118].mxu1  ;;  %v4387_v44 = vadd.f32 %v4258_v22, %v4215_v37  ;;  %v4389_v25 = vadd.f32 %v4299_v51, %v4217_v7 }
0x11d1   :  { %v4261_v63 = vpop.f32.mrb[91].mxu0  ;;  %v4302_v41 = vpop.f32.mrb[119].mxu1  ;;  %v4687_v35 = vmul.f32 -1.442695, %v4386_v55  ;;  %v4689_v11 = vmul.f32 -1.442695, %v4388_v28 }
0x11d2   :  { %v4688_v32 = vmul.f32 -1.442695, %v4387_v44  ;;  %v4690_v14 = vmul.f32 -1.442695, %v4389_v25 }
0x11d3   :  { %5157 = vpow2.f32 %v4687_v35 }
0x11d4   :  { %5159 = vpow2.f32 %v4689_v11 }
0x11d5   :  { %5161 = vpow2.f32 %v4688_v32 }
0x11d6   :  { %5163 = vpow2.f32 %v4690_v14 }
0x11dd   :  { %v5158_v19 = vpop.eup %5157 }
0x11de   :  { %v5160_v42 = vpop.eup %5159  ;;  %v4400_v4 = vadd.f32 1.0, %v5158_v19 }
0x11df   :  { %v5162_v59 = vpop.eup %5161  ;;  %v4412_v30 = vadd.f32 1.0, %v5160_v42 }
0x11e0   :  { %v5164_v39 = vpop.eup %5163  ;;  %v4401_v6 = vadd.f32 1.0, %v5162_v59  ;;  %5165 = vrcp.f32 %v4400_v4 }
0x11e1   :  { %v4413_v62 = vadd.f32 1.0, %v5164_v39  ;;  %5167 = vrcp.f32 %v4412_v30 }
0x11e2   :  { %5169 = vrcp.f32 %v4401_v6 }
0x11e3   :  { %5171 = vrcp.f32 %v4413_v62 }
0x11ea   :  { %v5166_v31 = vpop.eup %5165 }
0x11eb   :  { %v5168_v57 = vpop.eup %5167 }
0x11ec   :  { %v5170_v48 = vpop.eup %5169  ;;  %v4432_v52 = vmul.f32 %v5168_v57, %v8261_v24 }
0x11ed   :  { %v5172_v17 = vpop.eup %5171 }
0x11ee   :  { %v4433_v45 = vmul.f32 %v5172_v17, %v8263_v0 }
0x120e   :  { %v4338_v5 = vpop.f32.mrb[92].mxu0  ;;  %v4379_v3 = vpop.f32.mrb[120].mxu1 }
0x120f   :  { %v4390_v20 = vadd.f32 %v4338_v5, %v4218_v53  ;;  %v4392_v27 = vadd.f32 %v4379_v3, %v4220_v15  ;;  %v4340_v33 = vpop.f32.mrb[93].mxu0  ;;  %v4381_v9 = vpop.f32.mrb[121].mxu1 }
0x1210   :  { %v4391_v43 = vadd.f32 %v4340_v33, %v4219_v38  ;;  %v4393_v16 = vadd.f32 %v4381_v9, %v4221_v49  ;;  %v4342_v47 = vpop.f32.mrb[94].mxu0  ;;  %v4383_v54 = vpop.f32.mrb[122].mxu1 }
0x1211   :  { %5173 = vtanh.f32 %v4390_v20  ;;  %v4691_v21 = vmul.f32 -1.442695, %v4392_v27  ;;  %v4343_v13 = vpop.f32.mrb[95].mxu0  ;;  %v4384_v23 = vpop.f32.mrb[123].mxu1 }
0x1212   :  { %5175 = vtanh.f32 %v4391_v43  ;;  %v4692_v56 = vmul.f32 -1.442695, %v4393_v16 }
0x1213   :  { %5177 = vpow2.f32 %v4691_v21 }
0x1214   :  { %5179 = vpow2.f32 %v4692_v56 }
0x121b   :  { %v5174_v26 = vpop.eup %5173 }
0x121c   :  { %v5176_v1 = vpop.eup %5175  ;;  %v4434_v58 = vmul.f32 %v5174_v26, %v5166_v31 }
0x121d   :  { %v5178_v8 = vpop.eup %5177  ;;  %v4435_v61 = vmul.f32 %v5176_v1, %v5170_v48 }
0x121e   :  { %v5180_v10 = vpop.eup %5179  ;;  %v4436_v2 = vadd.f32 %v4434_v58, %v4432_v52  ;;  %v4426_v46 = vadd.f32 1.0, %v5178_v8 }
0x121f   :  { %v4437_v22 = vadd.f32 %v4435_v61, %v4433_v45  ;;  %v4427_v51 = vadd.f32 1.0, %v5180_v10 }
0x1220   :  { %5181 = vtanh.f32 %v4436_v2 }
0x1221   :  { %5183 = vrcp.f32 %v4426_v46 }
0x1222   :  { %5185 = vtanh.f32 %v4437_v22 }
0x1223   :  { %5187 = vrcp.f32 %v4427_v51 }
0x122a   :  { %v5182_v50 = vpop.eup %5181 }
0x122b   :  { %v5184_v40 = vpop.eup %5183 }
0x122c   :  { %v5186_v63 = vpop.eup %5185  ;;  %v4440_v24 = vmul.f32 %v5184_v40, %v5182_v50 }
0x122d   :  { %v5188_v41 = vpop.eup %5187 }
0x122e   :  { %v4441_v60 = vmul.f32 %v5188_v41, %v5186_v63  ;;  %4452 = vst [vmem:[#allocation13] sm:$0xff] %v4440_v24 }
0x1230   :  { %v4737_v0 = vpack.c.bf16 %v4441_v60, %v4440_v24  ;;  %4453 = vst [vmem:[#allocation13 + $0x8] sm:$0xff] %v4441_v60 }
0x1231   :  { %5522 = shalt.err (!%p5519_p0)
}
0x1232   :  { %s5523_s4 = scalar_lea.hbm %s8376_s13, 256 }
0x1233   :  { %p5524_p1 = scmp.ne.s32.totalorder %s8376_s13, %s5523_s4  ;;  %p5527_p2 = scmp.lt.u32.totalorder %s5523_s4, %s8376_s13 }
0x1235   :  { %p5529_p3 = pnand %p5527_p2, %p5524_p1 }
0x1237   :  { %5532 = shalt.err (!%p5529_p3)
}
0x1238   :  { %4465 = dma.vmem_to_hbm [thread:$0]  %s4463_s25, 256, %s8376_s13, [#allocation9]   ;;  %4694 = vst [vmem:[%s8375_s12 + $0x38] sm:$0xff] %v4737_v0 }
0x1239   :  { %5543 = dma.done.wait [#allocation9], 256  }
0x123a   :  { %5544 = vsyncadd [#allocation9], 4294967040 }
0x123b   :  { %4471 = vsyncpa [#allocation8], 1 }
0x123c   :  { %4472 = vsyncpa [#allocation11], 1 }
0x123d   :  { %4473 = vsyncpa [#allocation9], 1 }
0x123e   :  { %4474 = vsyncmov [#allocation5] }
0x1241   :  { %s4475_s24 = vpop.sfrf %4474 }
0x1242   :  { %p4695_p4 = scmp.ne.s32.totalorder %s4475_s24, 0 }
0x1244   :  { %4479 = shalt.err (%p4695_p4)  }
0x1245   :  { %4481 = vsyncmov [#allocation5 + $0x1] }
0x1248   :  { %s4482_s11 = vpop.sfrf %4481 }
0x1249   :  { %p4696_p5 = scmp.ne.s32.totalorder %s4482_s11, 0 }
0x124b   :  { %4486 = shalt.err (%p4696_p5)  }
0x124c   :  { %4488 = vsyncmov [#allocation5 + $0x2] }
0x124f   :  { %s4489_s10 = vpop.sfrf %4488 }
0x1250   :  { %p4697_p6 = scmp.ne.s32.totalorder %s4489_s10, 0 }
0x1252   :  { %4493 = shalt.err (%p4697_p6)  }

</bundles_post_ra>
